<compile_context>
chip_gen: v6e
topology: v6e:2x2x1
jax: 0.10.0
libtpu: 0.0.40
codegen_flags: <defaults>
</compile_context>

<pallas_src>
import jax
import jax.numpy as jnp
from jax.experimental import pallas as pl
from jax.experimental.pallas import tpu as pltpu


def _softplus(x):
    # numerically stable softplus: max(x, 0) + log1p(exp(-|x|))
    return jnp.maximum(x, 0.0) + jnp.log1p(jnp.exp(-jnp.abs(x)))


def _sigmoid_fast(x):
    # sigmoid via the EUP approximate reciprocal (separate VLIW slot -> cheap).
    return pl.reciprocal(1.0 + jnp.exp(-x), approx=True)


def _vae_kernel(
    # batch-tiled inputs
    x_ref, label_ref, eps1_ref, eps2_ref,
    # encoder weights (VMEM-resident: constant index_map)
    ew1x_ref, ew1l_ref, eb1_ref, ew2_ref, eb2_ref, ehw_ref, ehb_ref,
    # decoder weights
    dw1z_ref, dw1l_ref, db1_ref, dw2_ref, db2_ref, dhw_ref, dhb_ref,
    # packed, lane-dense outputs
    enc_out_ref,   # [block_b, 2*z_dim]  = mu || logvar
    dec_out_ref,   # [block_b, 3*x_dim]  = x_reconst || mu_de || logvar_de
):
    x_dim = x_ref.shape[1]
    z_dim = eps1_ref.shape[1]

    def mm(a, w_ref):
        # matmul operands in the weight dtype (bf16 by default), f32 accumulate.
        w = w_ref[...]
        return jnp.dot(a.astype(w.dtype), w, preferred_element_type=jnp.float32)

    x = x_ref[...]
    lab = label_ref[...]

    # ---- Encoder: Linear([x,label]) -> softplus -> Linear -> softplus ----
    h = _softplus(mm(x, ew1x_ref) + mm(lab, ew1l_ref) + eb1_ref[...])
    h = _softplus(mm(h, ew2_ref) + eb2_ref[...])

    # fused mu||logvar head: one MXU pass, 2*z_dim output lanes
    head_e = mm(h, ehw_ref) + ehb_ref[...]
    mu = head_e[:, :z_dim]
    logvar = _softplus(head_e[:, z_dim:])

    # reparameterization
    z = mu + eps1_ref[...] * jnp.exp(logvar * 0.5)

    # ---- Decoder: Linear([z,label]) -> softplus -> Linear -> softplus ----
    d = _softplus(mm(z, dw1z_ref) + mm(lab, dw1l_ref) + db1_ref[...])
    d = _softplus(mm(d, dw2_ref) + db2_ref[...])

    # fused mu_de||logvar_de head
    head_d = mm(d, dhw_ref) + dhb_ref[...]
    mu_de = _sigmoid_fast(head_d[:, :x_dim])
    logvar_de = head_d[:, x_dim:]
    x_reconst = mu_de + eps2_ref[...] * jnp.exp(logvar_de * 0.5)

    enc_out_ref[...] = jnp.concatenate([mu, logvar], axis=-1)
    dec_out_ref[...] = jnp.concatenate([x_reconst, mu_de, logvar_de], axis=-1)


def _default_block_b(B, bytes_per_row, weight_bytes,
                     max_block=256, vmem_budget=24 * 1024 * 1024):
    """Largest power-of-two-ish divisor of B <= max_block whose double-buffered
    batch tiles + resident weights fit a conservative VMEM budget (safe on
    v7x's 64 MiB VMEM / 32 MiB scoped default). Also tries to guarantee >= 2
    grid steps so v7x's two TensorCores are both used."""
    bb = max_block
    while bb > 8 and B % bb != 0:
        bb //= 2
    if B % bb != 0:
        bb = B
    # shrink until footprint fits
    while (bb > 8 and bb % 2 == 0 and B % (bb // 2) == 0
           and 2 * bb * bytes_per_row + weight_bytes > vmem_budget):
        bb //= 2
    # try to get at least 2 grid steps (pipelining + v7x megacore)
    if B // bb < 2 and bb % 2 == 0 and bb // 2 >= 8 and B % (bb // 2) == 0:
        bb //= 2
    return bb


def vae_forward(x, label, eps1, eps2, params, *, block_b=None,
                matmul_dtype=jnp.bfloat16):
    """Fused VAE123 forward on TPU via Pallas.

    x:     [B, x_dim] f32        label: [B, n_lab] f32 (one-hot)
    eps1:  [B, z_dim] f32 noise  eps2:  [B, x_dim] f32 noise
    Returns (x_reconst, mu_de, logvar_de, mu, logvar).
    """
    B, x_dim = x.shape
    n_lab = label.shape[1]
    z_dim = eps1.shape[1]
    h_dim = params["ew1"].shape[1]
    assert eps2.shape == (B, x_dim)
    wdt = matmul_dtype

    # ---- weight preprocessing (once, in plain JAX) ----
    ew1x = params["ew1"][:x_dim].astype(wdt)           # [x_dim, h]
    ew1l = params["ew1"][x_dim:].astype(wdt)           # [n_lab, h]
    ew2 = params["ew2"].astype(wdt)                    # [h, h]
    ehw = jnp.concatenate([params["ewmu"], params["ewlv"]], axis=1).astype(wdt)  # [h, 2z]
    ehb = jnp.concatenate([params["ebmu"], params["eblv"]], axis=1)              # [1, 2z] f32
    dw1z = params["dw1"][:z_dim].astype(wdt)           # [z, h]
    dw1l = params["dw1"][z_dim:].astype(wdt)           # [n_lab, h]
    dw2 = params["dw2"].astype(wdt)                    # [h, h]
    dhw = jnp.concatenate([params["dwmu"], params["dwlv"]], axis=1).astype(wdt)  # [h, 2x]
    dhb = jnp.concatenate([params["dbmu"], params["dblv"]], axis=1)              # [1, 2x] f32
    eb1, eb2, db1, db2 = params["eb1"], params["eb2"], params["db1"], params["db2"]

    weight_args = [ew1x, ew1l, eb1, ew2, eb2, ehw, ehb,
                   dw1z, dw1l, db1, dw2, db2, dhw, dhb]
    weight_bytes = sum(int(w.size) * w.dtype.itemsize for w in weight_args)

    # ---- batch tile selection ----
    if block_b is None:
        bytes_per_row = 4 * (x_dim + n_lab + z_dim + x_dim        # input tiles (f32)
                             + 2 * z_dim + 3 * x_dim)             # output tiles (f32)
        block_b = _default_block_b(B, bytes_per_row, weight_bytes)
    assert B % block_b == 0, "batch must be divisible by block_b"
    assert block_b == B or block_b % 8 == 0, "block_b must be a multiple of 8"
    grid = (B // block_b,)

    def batch_spec(feat):
        return pl.BlockSpec((block_b, feat), lambda i: (i, 0))

    def full_spec(arr):
        # constant index_map -> weights stay VMEM-resident, DMA'd once.
        return pl.BlockSpec(arr.shape, lambda i: (0, 0))

    in_specs = ([batch_spec(x_dim), batch_spec(n_lab),
                 batch_spec(z_dim), batch_spec(x_dim)]
                + [full_spec(w) for w in weight_args])
    out_specs = [batch_spec(2 * z_dim), batch_spec(3 * x_dim)]
    out_shapes = (jax.ShapeDtypeStruct((B, 2 * z_dim), jnp.float32),
                  jax.ShapeDtypeStruct((B, 3 * x_dim), jnp.float32))

    flops = 2 * B * ((x_dim + n_lab) * h_dim + h_dim * h_dim + h_dim * 2 * z_dim
                     + (z_dim + n_lab) * h_dim + h_dim * h_dim + h_dim * 2 * x_dim)
    transcendentals = B * (6 * h_dim + 3 * z_dim + 3 * x_dim)
    bytes_accessed = (int(x.size + label.size + eps1.size + eps2.size) * 4
                      + weight_bytes
                      + B * (2 * z_dim + 3 * x_dim) * 4)

    enc_out, dec_out = pl.pallas_call(
        _vae_kernel,
        out_shape=out_shapes,
        grid_spec=pltpu.PrefetchScalarGridSpec(
            num_scalar_prefetch=0,
            grid=grid,
            in_specs=in_specs,
            out_specs=out_specs,
        ),
        compiler_params=pltpu.CompilerParams(
            dimension_semantics=("parallel",),
        ),
        cost_estimate=pl.CostEstimate(
            flops=flops,
            transcendentals=transcendentals,
            bytes_accessed=bytes_accessed,
        ),
    )(x, label, eps1, eps2, *weight_args)

    mu = enc_out[:, :z_dim]
    logvar = enc_out[:, z_dim:]
    x_reconst = dec_out[:, :x_dim]
    mu_de = dec_out[:, x_dim:2 * x_dim]
    logvar_de = dec_out[:, 2 * x_dim:]
    return x_reconst, mu_de, logvar_de, mu, logvar


def init_params(key, x_dim, h_dim, z_dim, n_classes=10):
    """Deterministic synthetic parameters, PyTorch-Linear-like init.
    Weights stored [in, out]; biases [1, out]."""
    ks = jax.random.split(key, 16)

    def lin(kw, kb, fan_in, fan_out):
        bound = 1.0 / jnp.sqrt(fan_in)
        w = jax.random.uniform(kw, (fan_in, fan_out), jnp.float32, -bound, bound)
        b = jax.random.uniform(kb, (1, fan_out), jnp.float32, -bound, bound)
        return w, b

    p = {}
    p["ew1"], p["eb1"] = lin(ks[0], ks[1], x_dim + n_classes, h_dim)
    p["ew2"], p["eb2"] = lin(ks[2], ks[3], h_dim, h_dim)
    p["ewmu"], p["ebmu"] = lin(ks[4], ks[5], h_dim, z_dim)
    p["ewlv"], p["eblv"] = lin(ks[6], ks[7], h_dim, z_dim)
    p["dw1"], p["db1"] = lin(ks[8], ks[9], z_dim + n_classes, h_dim)
    p["dw2"], p["db2"] = lin(ks[10], ks[11], h_dim, h_dim)
    p["dwmu"], p["dbmu"] = lin(ks[12], ks[13], h_dim, x_dim)
    p["dwlv"], p["dblv"] = lin(ks[14], ks[15], h_dim, x_dim)
    return p


def vae_reference(x, label, eps1, eps2, p, matmul_dtype=jnp.bfloat16):
    """Plain-JAX reference mirroring VAE123.forward (same matmul dtype)."""
    wdt = matmul_dtype

    def mm(a, w):
        return jnp.dot(a.astype(wdt), w.astype(wdt),
                       preferred_element_type=jnp.float32)

    xc = jnp.concatenate([x, label], axis=-1)
    h = _softplus(mm(xc, p["ew1"]) + p["eb1"])
    h = _softplus(mm(h, p["ew2"]) + p["eb2"])
    mu = mm(h, p["ewmu"]) + p["ebmu"]
    logvar = _softplus(mm(h, p["ewlv"]) + p["eblv"])
    z = mu + eps1 * jnp.exp(logvar / 2)

    zc = jnp.concatenate([z, label], axis=-1)
    d = _softplus(mm(zc, p["dw1"]) + p["db1"])
    d = _softplus(mm(d, p["dw2"]) + p["db2"])
    mu_de = jax.nn.sigmoid(mm(d, p["dwmu"]) + p["dbmu"])
    logvar_de = mm(d, p["dwlv"]) + p["dblv"]
    x_reconst = mu_de + eps2 * jnp.exp(logvar_de / 2)
    return x_reconst, mu_de, logvar_de, mu, logvar


if __name__ == "__main__":
    # Small shapes consistent with the module (flat features + 10-class one-hot
    # labels); batch chosen so the default block_b=256 gives a 2-step grid.
    B, X_DIM, H_DIM, Z_DIM, N_CLASSES = 512, 64, 128, 16, 10

    key = jax.random.PRNGKey(0)
    k_x, k_lab, k_e1, k_e2, k_p = jax.random.split(key, 5)

    x = jax.random.normal(k_x, (B, X_DIM), dtype=jnp.float32)
    label = jax.nn.one_hot(
        jax.random.randint(k_lab, (B,), 0, N_CLASSES), N_CLASSES, dtype=jnp.float32)
    eps1 = jax.random.normal(k_e1, (B, Z_DIM), dtype=jnp.float32)   # encoder noise
    eps2 = jax.random.normal(k_e2, (B, X_DIM), dtype=jnp.float32)   # decoder noise
    params = init_params(k_p, X_DIM, H_DIM, Z_DIM, N_CLASSES)

    outs = vae_forward(x, label, eps1, eps2, params)
    jax.block_until_ready(outs)

    refs = vae_reference(x, label, eps1, eps2, params)
    names = ["x_reconst", "mu_de", "logvar_de", "mu", "logvar"]
    for name, got, want in zip(names, outs, refs):
        # bf16 matmuls + approximate-reciprocal sigmoid -> loose-ish tolerance
        assert bool(jnp.allclose(got, want, atol=5e-3, rtol=5e-3)), f"mismatch: {name}"

    print("KERNEL_OK")
</pallas_src>

<mosaic_0001>
module attributes {stable_mosaic.version = 11 : i64} {
  func.func @_vae_kernel(%arg0: i32, %arg1: memref<256x64xf32, #tpu.memory_space<vmem>>, %arg2: memref<256x10xf32, #tpu.memory_space<vmem>>, %arg3: memref<256x16xf32, #tpu.memory_space<vmem>>, %arg4: memref<256x64xf32, #tpu.memory_space<vmem>>, %arg5: memref<64x128xbf16, #tpu.memory_space<vmem>>, %arg6: memref<10x128xbf16, #tpu.memory_space<vmem>>, %arg7: memref<1x128xf32, #tpu.memory_space<vmem>>, %arg8: memref<128x128xbf16, #tpu.memory_space<vmem>>, %arg9: memref<1x128xf32, #tpu.memory_space<vmem>>, %arg10: memref<128x32xbf16, #tpu.memory_space<vmem>>, %arg11: memref<1x32xf32, #tpu.memory_space<vmem>>, %arg12: memref<16x128xbf16, #tpu.memory_space<vmem>>, %arg13: memref<10x128xbf16, #tpu.memory_space<vmem>>, %arg14: memref<1x128xf32, #tpu.memory_space<vmem>>, %arg15: memref<128x128xbf16, #tpu.memory_space<vmem>>, %arg16: memref<1x128xf32, #tpu.memory_space<vmem>>, %arg17: memref<128x128xbf16, #tpu.memory_space<vmem>>, %arg18: memref<1x128xf32, #tpu.memory_space<vmem>>, %arg19: memref<256x32xf32, #tpu.memory_space<vmem>>, %arg20: memref<256x192xf32, #tpu.memory_space<vmem>>) attributes {dimension_semantics = [#tpu.dimension_semantics<parallel>], iteration_bounds = array<i64: 2>, scalar_prefetch = 0 : i64, scratch_operands = 0 : i64, tpu.core_type = #tpu.core_type<tc>, window_params = [{transform_indices = @transform_0, window_bounds = array<i64: 256, 64>}, {transform_indices = @transform_1, window_bounds = array<i64: 256, 10>}, {transform_indices = @transform_2, window_bounds = array<i64: 256, 16>}, {transform_indices = @transform_3, window_bounds = array<i64: 256, 64>}, {pipeline_mode = #tpu.pipeline_mode<synchronous>, transform_indices = @transform_4, window_bounds = array<i64: 64, 128>}, {pipeline_mode = #tpu.pipeline_mode<synchronous>, transform_indices = @transform_5, window_bounds = array<i64: 10, 128>}, {pipeline_mode = #tpu.pipeline_mode<synchronous>, transform_indices = @transform_6, window_bounds = array<i64: 1, 128>}, {pipeline_mode = #tpu.pipeline_mode<synchronous>, transform_indices = @transform_7, window_bounds = array<i64: 128, 128>}, {pipeline_mode = #tpu.pipeline_mode<synchronous>, transform_indices = @transform_8, window_bounds = array<i64: 1, 128>}, {pipeline_mode = #tpu.pipeline_mode<synchronous>, transform_indices = @transform_9, window_bounds = array<i64: 128, 32>}, {pipeline_mode = #tpu.pipeline_mode<synchronous>, transform_indices = @transform_10, window_bounds = array<i64: 1, 32>}, {pipeline_mode = #tpu.pipeline_mode<synchronous>, transform_indices = @transform_11, window_bounds = array<i64: 16, 128>}, {pipeline_mode = #tpu.pipeline_mode<synchronous>, transform_indices = @transform_12, window_bounds = array<i64: 10, 128>}, {pipeline_mode = #tpu.pipeline_mode<synchronous>, transform_indices = @transform_13, window_bounds = array<i64: 1, 128>}, {pipeline_mode = #tpu.pipeline_mode<synchronous>, transform_indices = @transform_14, window_bounds = array<i64: 128, 128>}, {pipeline_mode = #tpu.pipeline_mode<synchronous>, transform_indices = @transform_15, window_bounds = array<i64: 1, 128>}, {pipeline_mode = #tpu.pipeline_mode<synchronous>, transform_indices = @transform_16, window_bounds = array<i64: 128, 128>}, {pipeline_mode = #tpu.pipeline_mode<synchronous>, transform_indices = @transform_17, window_bounds = array<i64: 1, 128>}, {transform_indices = @transform_18, window_bounds = array<i64: 256, 32>}, {transform_indices = @transform_19, window_bounds = array<i64: 256, 192>}]} {
    %c0 = arith.constant 0 : index
    %c0_0 = arith.constant 0 : index
    %0 = vector.load %arg1[%c0, %c0_0] : memref<256x64xf32, #tpu.memory_space<vmem>>, vector<256x64xf32>
    %c0_1 = arith.constant 0 : index
    %c0_2 = arith.constant 0 : index
    %1 = vector.load %arg2[%c0_1, %c0_2] : memref<256x10xf32, #tpu.memory_space<vmem>>, vector<256x10xf32>
    %c0_3 = arith.constant 0 : index
    %c0_4 = arith.constant 0 : index
    %2 = vector.load %arg5[%c0_3, %c0_4] : memref<64x128xbf16, #tpu.memory_space<vmem>>, vector<64x128xbf16>
    %3 = arith.truncf %0 : vector<256x64xf32> to vector<256x64xbf16>
    %cst = arith.constant dense<0.000000e+00> : vector<256x128xf32>
    %4 = tpu.matmul %3, %2, %cst {dimension_numbers = #tpu.dot_dimension_numbers<[1], [0], [0], [1], [0, 0, 1, 1], [], []>} : vector<256x64xbf16>, vector<64x128xbf16>, vector<256x128xf32> -> vector<256x128xf32>
    %c0_5 = arith.constant 0 : index
    %c0_6 = arith.constant 0 : index
    %5 = vector.load %arg6[%c0_5, %c0_6] : memref<10x128xbf16, #tpu.memory_space<vmem>>, vector<10x128xbf16>
    %6 = arith.truncf %1 : vector<256x10xf32> to vector<256x10xbf16>
    %cst_7 = arith.constant dense<0.000000e+00> : vector<256x128xf32>
    %7 = tpu.matmul %6, %5, %cst_7 {dimension_numbers = #tpu.dot_dimension_numbers<[1], [0], [0], [1], [0, 0, 1, 1], [], []>} : vector<256x10xbf16>, vector<10x128xbf16>, vector<256x128xf32> -> vector<256x128xf32>
    %8 = arith.addf %4, %7 : vector<256x128xf32>
    %c0_8 = arith.constant 0 : index
    %c0_9 = arith.constant 0 : index
    %9 = vector.load %arg7[%c0_8, %c0_9] : memref<1x128xf32, #tpu.memory_space<vmem>>, vector<1x128xf32>
    %10 = vector.broadcast %9 : vector<1x128xf32> to vector<256x128xf32>
    %11 = arith.addf %8, %10 : vector<256x128xf32>
    %cst_10 = arith.constant 0.000000e+00 : f32
    %12 = vector.broadcast %cst_10 : f32 to vector<256x128xf32>
    %13 = arith.maximumf %11, %12 : vector<256x128xf32>
    %14 = math.absf %11 : vector<256x128xf32>
    %cst_11 = arith.constant 0.000000e+00 : f32
    %15 = vector.broadcast %cst_11 : f32 to vector<256x128xf32>
    %16 = arith.subf %15, %14 : vector<256x128xf32>
    %17 = math.exp %16 : vector<256x128xf32>
    %18 = math.log1p %17 : vector<256x128xf32>
    %19 = arith.addf %13, %18 : vector<256x128xf32>
    %c0_12 = arith.constant 0 : index
    %c0_13 = arith.constant 0 : index
    %20 = vector.load %arg8[%c0_12, %c0_13] : memref<128x128xbf16, #tpu.memory_space<vmem>>, vector<128x128xbf16>
    %21 = arith.truncf %19 : vector<256x128xf32> to vector<256x128xbf16>
    %cst_14 = arith.constant dense<0.000000e+00> : vector<256x128xf32>
    %22 = tpu.matmul %21, %20, %cst_14 {dimension_numbers = #tpu.dot_dimension_numbers<[1], [0], [0], [1], [0, 0, 1, 1], [], []>} : vector<256x128xbf16>, vector<128x128xbf16>, vector<256x128xf32> -> vector<256x128xf32>
    %c0_15 = arith.constant 0 : index
    %c0_16 = arith.constant 0 : index
    %23 = vector.load %arg9[%c0_15, %c0_16] : memref<1x128xf32, #tpu.memory_space<vmem>>, vector<1x128xf32>
    %24 = vector.broadcast %23 : vector<1x128xf32> to vector<256x128xf32>
    %25 = arith.addf %22, %24 : vector<256x128xf32>
    %cst_17 = arith.constant 0.000000e+00 : f32
    %26 = vector.broadcast %cst_17 : f32 to vector<256x128xf32>
    %27 = arith.maximumf %25, %26 : vector<256x128xf32>
    %28 = math.absf %25 : vector<256x128xf32>
    %cst_18 = arith.constant 0.000000e+00 : f32
    %29 = vector.broadcast %cst_18 : f32 to vector<256x128xf32>
    %30 = arith.subf %29, %28 : vector<256x128xf32>
    %31 = math.exp %30 : vector<256x128xf32>
    %32 = math.log1p %31 : vector<256x128xf32>
    %33 = arith.addf %27, %32 : vector<256x128xf32>
    %c0_19 = arith.constant 0 : index
    %c0_20 = arith.constant 0 : index
    %34 = vector.load %arg10[%c0_19, %c0_20] : memref<128x32xbf16, #tpu.memory_space<vmem>>, vector<128x32xbf16>
    %35 = arith.truncf %33 : vector<256x128xf32> to vector<256x128xbf16>
    %cst_21 = arith.constant dense<0.000000e+00> : vector<256x32xf32>
    %36 = tpu.matmul %35, %34, %cst_21 {dimension_numbers = #tpu.dot_dimension_numbers<[1], [0], [0], [1], [0, 0, 1, 1], [], []>} : vector<256x128xbf16>, vector<128x32xbf16>, vector<256x32xf32> -> vector<256x32xf32>
    %c0_22 = arith.constant 0 : index
    %c0_23 = arith.constant 0 : index
    %37 = vector.load %arg11[%c0_22, %c0_23] : memref<1x32xf32, #tpu.memory_space<vmem>>, vector<1x32xf32>
    %38 = vector.broadcast %37 : vector<1x32xf32> to vector<256x32xf32>
    %39 = arith.addf %36, %38 : vector<256x32xf32>
    %40 = vector.extract_strided_slice %39 {offsets = [0, 0], sizes = [256, 16], strides = [1, 1]} : vector<256x32xf32> to vector<256x16xf32>
    %41 = vector.extract_strided_slice %39 {offsets = [0, 16], sizes = [256, 16], strides = [1, 1]} : vector<256x32xf32> to vector<256x16xf32>
    %cst_24 = arith.constant 0.000000e+00 : f32
    %42 = vector.broadcast %cst_24 : f32 to vector<256x16xf32>
    %43 = arith.maximumf %41, %42 : vector<256x16xf32>
    %44 = math.absf %41 : vector<256x16xf32>
    %cst_25 = arith.constant 0.000000e+00 : f32
    %45 = vector.broadcast %cst_25 : f32 to vector<256x16xf32>
    %46 = arith.subf %45, %44 : vector<256x16xf32>
    %47 = math.exp %46 : vector<256x16xf32>
    %48 = math.log1p %47 : vector<256x16xf32>
    %49 = arith.addf %43, %48 : vector<256x16xf32>
    %c0_26 = arith.constant 0 : index
    %c0_27 = arith.constant 0 : index
    %50 = vector.load %arg3[%c0_26, %c0_27] : memref<256x16xf32, #tpu.memory_space<vmem>>, vector<256x16xf32>
    %cst_28 = arith.constant 5.000000e-01 : f32
    %51 = vector.broadcast %cst_28 : f32 to vector<256x16xf32>
    %52 = arith.mulf %49, %51 : vector<256x16xf32>
    %53 = math.exp %52 : vector<256x16xf32>
    %54 = arith.mulf %50, %53 : vector<256x16xf32>
    %55 = arith.addf %40, %54 : vector<256x16xf32>
    %c0_29 = arith.constant 0 : index
    %c0_30 = arith.constant 0 : index
    %56 = vector.load %arg12[%c0_29, %c0_30] : memref<16x128xbf16, #tpu.memory_space<vmem>>, vector<16x128xbf16>
    %57 = arith.truncf %55 : vector<256x16xf32> to vector<256x16xbf16>
    %cst_31 = arith.constant dense<0.000000e+00> : vector<256x128xf32>
    %58 = tpu.matmul %57, %56, %cst_31 {dimension_numbers = #tpu.dot_dimension_numbers<[1], [0], [0], [1], [0, 0, 1, 1], [], []>} : vector<256x16xbf16>, vector<16x128xbf16>, vector<256x128xf32> -> vector<256x128xf32>
    %c0_32 = arith.constant 0 : index
    %c0_33 = arith.constant 0 : index
    %59 = vector.load %arg13[%c0_32, %c0_33] : memref<10x128xbf16, #tpu.memory_space<vmem>>, vector<10x128xbf16>
    %60 = arith.truncf %1 : vector<256x10xf32> to vector<256x10xbf16>
    %cst_34 = arith.constant dense<0.000000e+00> : vector<256x128xf32>
    %61 = tpu.matmul %60, %59, %cst_34 {dimension_numbers = #tpu.dot_dimension_numbers<[1], [0], [0], [1], [0, 0, 1, 1], [], []>} : vector<256x10xbf16>, vector<10x128xbf16>, vector<256x128xf32> -> vector<256x128xf32>
    %62 = arith.addf %58, %61 : vector<256x128xf32>
    %c0_35 = arith.constant 0 : index
    %c0_36 = arith.constant 0 : index
    %63 = vector.load %arg14[%c0_35, %c0_36] : memref<1x128xf32, #tpu.memory_space<vmem>>, vector<1x128xf32>
    %64 = vector.broadcast %63 : vector<1x128xf32> to vector<256x128xf32>
    %65 = arith.addf %62, %64 : vector<256x128xf32>
    %cst_37 = arith.constant 0.000000e+00 : f32
    %66 = vector.broadcast %cst_37 : f32 to vector<256x128xf32>
    %67 = arith.maximumf %65, %66 : vector<256x128xf32>
    %68 = math.absf %65 : vector<256x128xf32>
    %cst_38 = arith.constant 0.000000e+00 : f32
    %69 = vector.broadcast %cst_38 : f32 to vector<256x128xf32>
    %70 = arith.subf %69, %68 : vector<256x128xf32>
    %71 = math.exp %70 : vector<256x128xf32>
    %72 = math.log1p %71 : vector<256x128xf32>
    %73 = arith.addf %67, %72 : vector<256x128xf32>
    %c0_39 = arith.constant 0 : index
    %c0_40 = arith.constant 0 : index
    %74 = vector.load %arg15[%c0_39, %c0_40] : memref<128x128xbf16, #tpu.memory_space<vmem>>, vector<128x128xbf16>
    %75 = arith.truncf %73 : vector<256x128xf32> to vector<256x128xbf16>
    %cst_41 = arith.constant dense<0.000000e+00> : vector<256x128xf32>
    %76 = tpu.matmul %75, %74, %cst_41 {dimension_numbers = #tpu.dot_dimension_numbers<[1], [0], [0], [1], [0, 0, 1, 1], [], []>} : vector<256x128xbf16>, vector<128x128xbf16>, vector<256x128xf32> -> vector<256x128xf32>
    %c0_42 = arith.constant 0 : index
    %c0_43 = arith.constant 0 : index
    %77 = vector.load %arg16[%c0_42, %c0_43] : memref<1x128xf32, #tpu.memory_space<vmem>>, vector<1x128xf32>
    %78 = vector.broadcast %77 : vector<1x128xf32> to vector<256x128xf32>
    %79 = arith.addf %76, %78 : vector<256x128xf32>
    %cst_44 = arith.constant 0.000000e+00 : f32
    %80 = vector.broadcast %cst_44 : f32 to vector<256x128xf32>
    %81 = arith.maximumf %79, %80 : vector<256x128xf32>
    %82 = math.absf %79 : vector<256x128xf32>
    %cst_45 = arith.constant 0.000000e+00 : f32
    %83 = vector.broadcast %cst_45 : f32 to vector<256x128xf32>
    %84 = arith.subf %83, %82 : vector<256x128xf32>
    %85 = math.exp %84 : vector<256x128xf32>
    %86 = math.log1p %85 : vector<256x128xf32>
    %87 = arith.addf %81, %86 : vector<256x128xf32>
    %c0_46 = arith.constant 0 : index
    %c0_47 = arith.constant 0 : index
    %88 = vector.load %arg17[%c0_46, %c0_47] : memref<128x128xbf16, #tpu.memory_space<vmem>>, vector<128x128xbf16>
    %89 = arith.truncf %87 : vector<256x128xf32> to vector<256x128xbf16>
    %cst_48 = arith.constant dense<0.000000e+00> : vector<256x128xf32>
    %90 = tpu.matmul %89, %88, %cst_48 {dimension_numbers = #tpu.dot_dimension_numbers<[1], [0], [0], [1], [0, 0, 1, 1], [], []>} : vector<256x128xbf16>, vector<128x128xbf16>, vector<256x128xf32> -> vector<256x128xf32>
    %c0_49 = arith.constant 0 : index
    %c0_50 = arith.constant 0 : index
    %91 = vector.load %arg18[%c0_49, %c0_50] : memref<1x128xf32, #tpu.memory_space<vmem>>, vector<1x128xf32>
    %92 = vector.broadcast %91 : vector<1x128xf32> to vector<256x128xf32>
    %93 = arith.addf %90, %92 : vector<256x128xf32>
    %94 = vector.extract_strided_slice %93 {offsets = [0, 0], sizes = [256, 64], strides = [1, 1]} : vector<256x128xf32> to vector<256x64xf32>
    %cst_51 = arith.constant 0.000000e+00 : f32
    %95 = vector.broadcast %cst_51 : f32 to vector<256x64xf32>
    %96 = arith.subf %95, %94 : vector<256x64xf32>
    %97 = math.exp %96 : vector<256x64xf32>
    %cst_52 = arith.constant 1.000000e+00 : f32
    %98 = vector.broadcast %cst_52 : f32 to vector<256x64xf32>
    %99 = arith.addf %98, %97 : vector<256x64xf32>
    %100 = tpu.reciprocal %99 {approx = true} : vector<256x64xf32> -> vector<256x64xf32>
    %101 = vector.extract_strided_slice %93 {offsets = [0, 64], sizes = [256, 64], strides = [1, 1]} : vector<256x128xf32> to vector<256x64xf32>
    %c0_53 = arith.constant 0 : index
    %c0_54 = arith.constant 0 : index
    %102 = vector.load %arg4[%c0_53, %c0_54] : memref<256x64xf32, #tpu.memory_space<vmem>>, vector<256x64xf32>
    %cst_55 = arith.constant 5.000000e-01 : f32
    %103 = vector.broadcast %cst_55 : f32 to vector<256x64xf32>
    %104 = arith.mulf %101, %103 : vector<256x64xf32>
    %105 = math.exp %104 : vector<256x64xf32>
    %106 = arith.mulf %102, %105 : vector<256x64xf32>
    %107 = arith.addf %100, %106 : vector<256x64xf32>
    %108 = tpu.concatenate %40, %49 in 1 : vector<256x16xf32>, vector<256x16xf32> -> vector<256x32xf32>
    %c0_56 = arith.constant 0 : index
    %c0_57 = arith.constant 0 : index
    %109 = vector.load %arg19[%c0_56, %c0_57] : memref<256x32xf32, #tpu.memory_space<vmem>>, vector<256x32xf32>
    tpu.vector_store %arg19[%c0_56, %c0_57], %108 {strides = array<i32>} : memref<256x32xf32, #tpu.memory_space<vmem>>, vector<256x32xf32>,
    %110 = tpu.concatenate %107, %100, %101 in 1 : vector<256x64xf32>, vector<256x64xf32>, vector<256x64xf32> -> vector<256x192xf32>
    %c0_58 = arith.constant 0 : index
    %c0_59 = arith.constant 0 : index
    %111 = vector.load %arg20[%c0_58, %c0_59] : memref<256x192xf32, #tpu.memory_space<vmem>>, vector<256x192xf32>
    tpu.vector_store %arg20[%c0_58, %c0_59], %110 {strides = array<i32>} : memref<256x192xf32, #tpu.memory_space<vmem>>, vector<256x192xf32>,
    return
  }
  func.func @transform_0(%arg0: i32) -> (i32, i32) {
    %c0_i32 = arith.constant 0 : i32
    %c0_i32_0 = arith.constant 0 : i32
    return %arg0, %c0_i32 : i32, i32
  }
  func.func @transform_1(%arg0: i32) -> (i32, i32) {
    %c0_i32 = arith.constant 0 : i32
    %c0_i32_0 = arith.constant 0 : i32
    return %arg0, %c0_i32 : i32, i32
  }
  func.func @transform_2(%arg0: i32) -> (i32, i32) {
    %c0_i32 = arith.constant 0 : i32
    %c0_i32_0 = arith.constant 0 : i32
    return %arg0, %c0_i32 : i32, i32
  }
  func.func @transform_3(%arg0: i32) -> (i32, i32) {
    %c0_i32 = arith.constant 0 : i32
    %c0_i32_0 = arith.constant 0 : i32
    return %arg0, %c0_i32 : i32, i32
  }
  func.func @transform_4(%arg0: i32) -> (i32, i32) {
    %c0_i32 = arith.constant 0 : i32
    %c0_i32_0 = arith.constant 0 : i32
    %c0_i32_1 = arith.constant 0 : i32
    return %c0_i32, %c0_i32_0 : i32, i32
  }
  func.func @transform_5(%arg0: i32) -> (i32, i32) {
    %c0_i32 = arith.constant 0 : i32
    %c0_i32_0 = arith.constant 0 : i32
    %c0_i32_1 = arith.constant 0 : i32
    return %c0_i32, %c0_i32_0 : i32, i32
  }
  func.func @transform_6(%arg0: i32) -> (i32, i32) {
    %c0_i32 = arith.constant 0 : i32
    %c0_i32_0 = arith.constant 0 : i32
    %c0_i32_1 = arith.constant 0 : i32
    return %c0_i32, %c0_i32_0 : i32, i32
  }
  func.func @transform_7(%arg0: i32) -> (i32, i32) {
    %c0_i32 = arith.constant 0 : i32
    %c0_i32_0 = arith.constant 0 : i32
    %c0_i32_1 = arith.constant 0 : i32
    return %c0_i32, %c0_i32_0 : i32, i32
  }
  func.func @transform_8(%arg0: i32) -> (i32, i32) {
    %c0_i32 = arith.constant 0 : i32
    %c0_i32_0 = arith.constant 0 : i32
    %c0_i32_1 = arith.constant 0 : i32
    return %c0_i32, %c0_i32_0 : i32, i32
  }
  func.func @transform_9(%arg0: i32) -> (i32, i32) {
    %c0_i32 = arith.constant 0 : i32
    %c0_i32_0 = arith.constant 0 : i32
    %c0_i32_1 = arith.constant 0 : i32
    return %c0_i32, %c0_i32_0 : i32, i32
  }
  func.func @transform_10(%arg0: i32) -> (i32, i32) {
    %c0_i32 = arith.constant 0 : i32
    %c0_i32_0 = arith.constant 0 : i32
    %c0_i32_1 = arith.constant 0 : i32
    return %c0_i32, %c0_i32_0 : i32, i32
  }
  func.func @transform_11(%arg0: i32) -> (i32, i32) {
    %c0_i32 = arith.constant 0 : i32
    %c0_i32_0 = arith.constant 0 : i32
    %c0_i32_1 = arith.constant 0 : i32
    return %c0_i32, %c0_i32_0 : i32, i32
  }
  func.func @transform_12(%arg0: i32) -> (i32, i32) {
    %c0_i32 = arith.constant 0 : i32
    %c0_i32_0 = arith.constant 0 : i32
    %c0_i32_1 = arith.constant 0 : i32
    return %c0_i32, %c0_i32_0 : i32, i32
  }
  func.func @transform_13(%arg0: i32) -> (i32, i32) {
    %c0_i32 = arith.constant 0 : i32
    %c0_i32_0 = arith.constant 0 : i32
    %c0_i32_1 = arith.constant 0 : i32
    return %c0_i32, %c0_i32_0 : i32, i32
  }
  func.func @transform_14(%arg0: i32) -> (i32, i32) {
    %c0_i32 = arith.constant 0 : i32
    %c0_i32_0 = arith.constant 0 : i32
    %c0_i32_1 = arith.constant 0 : i32
    return %c0_i32, %c0_i32_0 : i32, i32
  }
  func.func @transform_15(%arg0: i32) -> (i32, i32) {
    %c0_i32 = arith.constant 0 : i32
    %c0_i32_0 = arith.constant 0 : i32
    %c0_i32_1 = arith.constant 0 : i32
    return %c0_i32, %c0_i32_0 : i32, i32
  }
  func.func @transform_16(%arg0: i32) -> (i32, i32) {
    %c0_i32 = arith.constant 0 : i32
    %c0_i32_0 = arith.constant 0 : i32
    %c0_i32_1 = arith.constant 0 : i32
    return %c0_i32, %c0_i32_0 : i32, i32
  }
  func.func @transform_17(%arg0: i32) -> (i32, i32) {
    %c0_i32 = arith.constant 0 : i32
    %c0_i32_0 = arith.constant 0 : i32
    %c0_i32_1 = arith.constant 0 : i32
    return %c0_i32, %c0_i32_0 : i32, i32
  }
  func.func @transform_18(%arg0: i32) -> (i32, i32) {
    %c0_i32 = arith.constant 0 : i32
    %c0_i32_0 = arith.constant 0 : i32
    return %arg0, %c0_i32 : i32, i32
  }
  func.func @transform_19(%arg0: i32) -> (i32, i32) {
    %c0_i32 = arith.constant 0 : i32
    %c0_i32_0 = arith.constant 0 : i32
    return %arg0, %c0_i32 : i32, i32
  }
}

</mosaic_0001>

<bundles_post_ra>
// kernel: tpu_custom_call.1
= control target key start
LH: loop header
LB: loop body
LE: loop exit
PB: predicated region body
PF: predicated region fallthrough
CT: control target
= control target key end

     0   :  { %s12435_s0 = inlined_call_operand.vmem [shape: f32[512,64], index: 0, kind: input, shape index: {}]   ;;  %s12436_s1 = inlined_call_operand.vmem [shape: f32[512,10], index: 1, kind: input, shape index: {}]   ;;  %s12437_s2 = inlined_call_operand.vmem [shape: f32[512,16], index: 2, kind: input, shape index: {}]   ;;  %s12438_s3 = inlined_call_operand.vmem [shape: f32[512,64], index: 3, kind: input, shape index: {}]   ;;  %s12439_s4 = inlined_call_operand.vmem [shape: bf16[64,128], index: 4, kind: input, shape index: {}]   ;;  %s12440_s5 = inlined_call_operand.vmem [shape: bf16[10,128], index: 5, kind: input, shape index: {}]   ;;  %s12441_s6 = inlined_call_operand.vmem [shape: f32[1,128], index: 6, kind: input, shape index: {}]   ;;  %s12442_s7 = inlined_call_operand.vmem [shape: bf16[128,128], index: 7, kind: input, shape index: {}]   ;;  %s12443_s8 = inlined_call_operand.vmem [shape: f32[1,128], index: 8, kind: input, shape index: {}]   ;;  %s12444_s9 = inlined_call_operand.vmem [shape: bf16[128,32], index: 9, kind: input, shape index: {}]   ;;  %s12445_s10 = inlined_call_operand.vmem [shape: f32[1,32], index: 10, kind: input, shape index: {}]   ;;  %s12446_s11 = inlined_call_operand.vmem [shape: bf16[16,128], index: 11, kind: input, shape index: {}]   ;;  %s12447_s12 = inlined_call_operand.vmem [shape: bf16[10,128], index: 12, kind: input, shape index: {}]   ;;  %s12448_s13 = inlined_call_operand.vmem [shape: f32[1,128], index: 13, kind: input, shape index: {}]   ;;  %s12449_s14 = inlined_call_operand.vmem [shape: bf16[128,128], index: 14, kind: input, shape index: {}]   ;;  %s12450_s15 = inlined_call_operand.vmem [shape: f32[1,128], index: 15, kind: input, shape index: {}]   ;;  %s12451_s16 = inlined_call_operand.vmem [shape: bf16[128,128], index: 16, kind: input, shape index: {}]   ;;  %s12452_s17 = inlined_call_operand.vmem [shape: f32[1,128], index: 17, kind: input, shape index: {}]   ;;  %s12453_s18 = inlined_call_operand.vmem [shape: f32[512,32], index: 18, kind: output, shape index: {0}]   ;;  %s12454_s19 = inlined_call_operand.vmem [shape: f32[512,192], index: 19, kind: output, shape index: {1}]  }
   0x1   :  { %12514 = sst [smem:[#allocation34_spill]] %s12435_s0  ;;  %s8157_s0 = smov 0  }
   0x2   :  { %12515 = sst [smem:[#allocation35_spill]] %s12436_s1 }
   0x3   :  { %12516 = sst [smem:[#allocation36_spill]] %s12437_s2 }
   0x4   :  { %12517 = sst [smem:[#allocation37_spill]] %s12438_s3 }
   0x5 LB: > { %s6468_s30 = sadd.s32 4294967295, %s8053_s0   ;;  %p6472_p0 = scmp.ge.s32.totalorder %s8053_s0, 1  ;;  %s8053_s0 = sphi %s8157_s0, %s30_s0  }
   0x6   : > { %p574_p1 = scmp.lt.s32.totalorder %s8053_s0, 3 }
   0x8   : > { %p575_p2 = pnand %p6472_p0, %p574_p1 }
   0xa   : > { %578 = sbr.rel (%p575_p2) target bundleno = 2123 (0x84b), region = 92 }
   0xf   : > { %v7111_v0 = vld [vmem:[%s12439_s4 + $0x18] sm:$0xff]   ;;  %vm849_vm0 = vcmask 1044480   ;;  %v7112_v1 = vld [vmem:[%s12439_s4 + $0x10] sm:$0xff]   ;;  %s6473_s2 = sshll.u32 %s6468_s30, 5  ;;  %v7113_v2 = vld [vmem:[%s12440_s5] sm:$0x1f]  }
  0x10   : > { %6799 = vmatprep.subr.bf16.mxu1 %v7111_v0  ;;  %p652_p3 = scmp.lt.s32.totalorder %s6473_s2, 63  ;;  %7099 = vmatprep.subr.msk.bf16.mxu0 %vm849_vm0, %v7113_v2  ;;  %v851_v3 = vsel %vm849_vm0, %v7113_v2, 0  ;;  %v7114_v4 = vld [vmem:[%s12439_s4 + $0x8] sm:$0xff]   ;;  %v7116_v5 = vld [vmem:[%s12442_s7 + $0x38] sm:$0xff]   ;;  %v7115_v6 = vld [vmem:[%s12439_s4] sm:$0xff]   ;;  %s12518_s1 = sld [smem:[#allocation35_spill]] }
  0x11   : > { %6800 = vmatpush3.bf16.msra.mxu1 %v7111_v0  ;;  %6766 = vmatpush3.bf16.msra.mxu0 %v851_v3  ;;  %vm800_vm1 = vcmask 80896   ;;  %s12519_s25 = sld [smem:[#allocation34_spill]]  ;;  %vm1038_vm2 = vcmask 523264   ;;  %s8055_s24 = smov 112  }
  0x12   : > { %6801 = vmatprep.subr.bf16.mxu1 %v7112_v1  ;;  %s12948_s2 = smov (!%p652_p3, %s6473_s2), 63  ;;  %6839 = vmatprep.subr.bf16.mxu0 %v7116_v5  ;;  %s8056_s20 = smov 64  }
  0x13   : > { %s8185_s28 = sshll.u32 %s12948_s2, 3  ;;  %s6597_s21 = sshll.u32 %s12948_s2, 4 }
  0x14   : > { %s9743_s29 = scalar_lea.vmem %s12453_s18, %s8185_s28  ;;  %s11893_s23 = scalar_lea.vmem %s12454_s19, %s6597_s21 }
  0x15   : > { %6802 = vmatpush3.bf16.msra.mxu1 %v7112_v1 }
  0x16   : > { %6803 = vmatprep.subr.bf16.mxu1 %v7114_v4  ;;  %s8194_s22 = scalar_lea.vmem %s12518_s1, %s8185_s28 }
  0x17   : > { %v721_v7 = vld [vmem:[%s8194_s22] sm:$0xff]  ;;  %v722_v8 = vld [vmem:[%s8194_s22 + $0x8] sm:$0xff]  ;;  %v723_v9 = vld [vmem:[%s8194_s22 + $0x10] sm:$0xff]  ;;  %s8203_s3 = scalar_lea.vmem %s12519_s25, %s8185_s28  ;;  %s12946_s25 = sld [smem:[#allocation37_spill]] }
  0x18   : > { %v8205_v10 = vpack.c.bf16 %v722_v8, %v721_v7  ;;  %v724_v11 = vld [vmem:[%s8194_s22 + $0x18] sm:$0xff]  ;;  %v689_v12 = vld [vmem:[%s8203_s3] sm:$0xff]  ;;  %v690_v13 = vld [vmem:[%s8203_s3 + $0x8] sm:$0xff] }
  0x19   : > { %6804 = vmatpush3.bf16.msra.mxu1 %v7114_v4  ;;  %v8210_v14 = vpack.c.bf16 %v724_v11, %v723_v9  ;;  %v761_v15 = vpack.c.bf16 %v690_v13, %v689_v12  ;;  %v691_v16 = vld [vmem:[%s8203_s3 + $0x10] sm:$0xff]  ;;  %v692_v17 = vld [vmem:[%s8203_s3 + $0x18] sm:$0xff]  ;;  %v725_v18 = vld [vmem:[%s8194_s22 + $0x20] sm:$0xff] }
  0x1a   : > { %12520 = vst [vmem:[#allocation2_spill] sm:$0xff] %v8205_v10  ;;  %6767 = vmatprep.mubr.msk.bf16.mxu0 %vm800_vm1, %v8205_v10  ;;  %6805 = vmatprep.subr.bf16.mxu1 %v7115_v6  ;;  %v726_v19 = vld [vmem:[%s8194_s22 + $0x28] sm:$0xff]  ;;  %v693_v21 = vld [vmem:[%s8203_s3 + $0x20] sm:$0xff]  ;;  %v762_v23 = vpack.c.bf16 %v692_v17, %v691_v16  ;;  %v727_v24 = vld [vmem:[%s8194_s22 + $0x30] sm:$0xff] }
  0x1b   : > { %12521 = vst [vmem:[#allocation3_spill] sm:$0xff] %v8210_v14  ;;  %6768 = vmatmul.mubr.msk.bf16.vlgmr.msra.gmra.mxu0 %vm800_vm1, %v8210_v14  ;;  %6807 = vmatprep.mubr.msk.bf16.mxu1 %vm1038_vm2, %v761_v15  ;;  %v8221_v20 = vpack.c.bf16 %v726_v19, %v725_v18  ;;  %v694_v22 = vld [vmem:[%s8203_s3 + $0x28] sm:$0xff]  ;;  %v728_v25 = vld [vmem:[%s8194_s22 + $0x38] sm:$0xff]  ;;  %v729_v27 = vld [vmem:[%s8194_s22 + $0x40] sm:$0xff] }
  0x1c   : > { %6840 = vmatpush3.bf16.msra.mxu0 %v7116_v5  ;;  %v763_v26 = vpack.c.bf16 %v694_v22, %v693_v21  ;;  %v730_v28 = vld [vmem:[%s8194_s22 + $0x48] sm:$0xff]  ;;  %v8231_v29 = vpack.c.bf16 %v728_v25, %v727_v24  ;;  %v695_v31 = vld [vmem:[%s8203_s3 + $0x30] sm:$0xff]  ;;  %v696_v32 = vld [vmem:[%s8203_s3 + $0x38] sm:$0xff] }
  0x1d   : > { %12522 = vst [vmem:[#allocation4_spill] sm:$0xff] %v8221_v20  ;;  %6806 = vmatpush3.bf16.msra.mxu1 %v7115_v6  ;;  %6771 = vmatprep.mubr.msk.bf16.mxu0 %vm800_vm1, %v8221_v20  ;;  %v8234_v30 = vpack.c.bf16 %v730_v28, %v729_v27  ;;  %v697_v33 = vld [vmem:[%s8203_s3 + $0x40] sm:$0xff]  ;;  %v698_v34 = vld [vmem:[%s8203_s3 + $0x48] sm:$0xff]  ;;  %v764_v35 = vpack.c.bf16 %v696_v32, %v695_v31  ;;  %v731_v36 = vld [vmem:[%s8194_s22 + $0x50] sm:$0xff] }
  0x1e   : > { %12523 = vst [vmem:[#allocation5_spill] sm:$0xff] %v8231_v29  ;;  %v732_v37 = vld [vmem:[%s8194_s22 + $0x58] sm:$0xff]  ;;  %v765_v38 = vpack.c.bf16 %v698_v34, %v697_v33  ;;  %v733_v39 = vld [vmem:[%s8194_s22 + $0x60] sm:$0xff]  ;;  %v734_v40 = vld [vmem:[%s8194_s22 + $0x68] sm:$0xff] }
  0x1f   : > { %12524 = vst [vmem:[#allocation6_spill] sm:$0xff] %v8234_v30  ;;  %v8249_v41 = vpack.c.bf16 %v732_v37, %v731_v36  ;;  %v8252_v42 = vpack.c.bf16 %v734_v40, %v733_v39  ;;  %v699_v43 = vld [vmem:[%s8203_s3 + $0x50] sm:$0xff]  ;;  %v700_v44 = vld [vmem:[%s8203_s3 + $0x58] sm:$0xff]  ;;  %v701_v45 = vld [vmem:[%s8203_s3 + $0x60] sm:$0xff] }
  0x20   : > { %6808 = vmatmul.mubr.msk.bf16.vlgmr.msra.gmra.mxu1 %vm1038_vm2, %v762_v23  ;;  %v702_v46 = vld [vmem:[%s8203_s3 + $0x68] sm:$0xff]  ;;  %v735_v47 = vld [vmem:[%s8194_s22 + $0x70] sm:$0xff]  ;;  %v736_v48 = vld [vmem:[%s8194_s22 + $0x78] sm:$0xff]  ;;  %v766_v50 = vpack.c.bf16 %v700_v44, %v699_v43 }
  0x21   : > { %6811 = vmatprep.mubr.msk.bf16.mxu1 %vm1038_vm2, %v763_v26  ;;  %12525 = vst [vmem:[#allocation7_spill] sm:$0xff] %v8249_v41  ;;  %12526 = vst [vmem:[#allocation8_spill] sm:$0xff] %v8252_v42  ;;  %v737_v49 = vld [vmem:[%s8194_s22 + $0x80] sm:$0xff]  ;;  %v738_v51 = vld [vmem:[%s8194_s22 + $0x88] sm:$0xff]  ;;  %v767_v52 = vpack.c.bf16 %v702_v46, %v701_v45  ;;  %v8267_v53 = vpack.c.bf16 %v736_v48, %v735_v47 }
  0x22   : > { %v703_v54 = vld [vmem:[%s8203_s3 + $0x70] sm:$0xff]  ;;  %v704_v55 = vld [vmem:[%s8203_s3 + $0x78] sm:$0xff]  ;;  %v8272_v56 = vpack.c.bf16 %v738_v51, %v737_v49  ;;  %v705_v57 = vld [vmem:[%s8203_s3 + $0x80] sm:$0xff] }
  0x23   : > { %6772 = vmatmul.mubr.msk.bf16.gmra.mxu0 %vm800_vm1, %v8231_v29  ;;  %12527 = vst [vmem:[#allocation9_spill] sm:$0xff] %v8267_v53  ;;  %v706_v58 = vld [vmem:[%s8203_s3 + $0x88] sm:$0xff]  ;;  %v739_v59 = vld [vmem:[%s8194_s22 + $0x90] sm:$0xff]  ;;  %v740_v60 = vld [vmem:[%s8194_s22 + $0x98] sm:$0xff]  ;;  %v768_v63 = vpack.c.bf16 %v704_v55, %v703_v54 }
  0x24   : > { %6775 = vmatprep.mubr.msk.bf16.mxu0 %vm800_vm1, %v8234_v30  ;;  %12528 = vst [vmem:[#allocation10_spill] sm:$0xff] %v8272_v56  ;;  %v741_v61 = vld [vmem:[%s8194_s22 + $0xa0] sm:$0xff]  ;;  %v742_v62 = vld [vmem:[%s8194_s22 + $0xa8] sm:$0xff]  ;;  %v769_v0 = vpack.c.bf16 %v706_v58, %v705_v57  ;;  %v8285_v1 = vpack.c.bf16 %v740_v60, %v739_v59  ;;  %v707_v2 = vld [vmem:[%s8203_s3 + $0x90] sm:$0xff] }
  0x25   : > { %v708_v3 = vld [vmem:[%s8203_s3 + $0x98] sm:$0xff]  ;;  %v8290_v4 = vpack.c.bf16 %v742_v62, %v741_v61  ;;  %v709_v5 = vld [vmem:[%s8203_s3 + $0xa0] sm:$0xff]  ;;  %v710_v6 = vld [vmem:[%s8203_s3 + $0xa8] sm:$0xff] }
  0x26   : > { %12529 = vst [vmem:[#allocation11_spill] sm:$0xff] %v8285_v1  ;;  %v743_v7 = vld [vmem:[%s8194_s22 + $0xb0] sm:$0xff]  ;;  %v744_v8 = vld [vmem:[%s8194_s22 + $0xb8] sm:$0xff]  ;;  %v745_v9 = vld [vmem:[%s8194_s22 + $0xc0] sm:$0xff]  ;;  %v770_v12 = vpack.c.bf16 %v708_v3, %v707_v2  ;;  %v771_v13 = vpack.c.bf16 %v710_v6, %v709_v5 }
  0x27   : > { %12530 = vst [vmem:[#allocation12_spill] sm:$0xff] %v8290_v4  ;;  %v746_v11 = vld [vmem:[%s8194_s22 + $0xc8] sm:$0xff]  ;;  %v8303_v15 = vpack.c.bf16 %v744_v8, %v743_v7  ;;  %v711_v17 = vld [vmem:[%s8203_s3 + $0xb0] sm:$0xff]  ;;  %v712_v18 = vld [vmem:[%s8203_s3 + $0xb8] sm:$0xff] }
  0x28   : > { %6812 = vmatmul.mubr.msk.bf16.gmra.mxu1 %vm1038_vm2, %v764_v35  ;;  %v8306_v16 = vpack.c.bf16 %v746_v11, %v745_v9  ;;  %v713_v19 = vld [vmem:[%s8203_s3 + $0xc0] sm:$0xff]  ;;  %v714_v21 = vld [vmem:[%s8203_s3 + $0xc8] sm:$0xff]  ;;  %v772_v22 = vpack.c.bf16 %v712_v18, %v711_v17  ;;  %v747_v23 = vld [vmem:[%s8194_s22 + $0xd0] sm:$0xff] }
  0x29   : > { %6815 = vmatprep.mubr.msk.bf16.mxu1 %vm1038_vm2, %v765_v38  ;;  %12531 = vst [vmem:[#allocation13_spill] sm:$0xff] %v8303_v15  ;;  %v748_v24 = vld [vmem:[%s8194_s22 + $0xd8] sm:$0xff]  ;;  %v773_v25 = vpack.c.bf16 %v714_v21, %v713_v19  ;;  %v749_v26 = vld [vmem:[%s8194_s22 + $0xe0] sm:$0xff]  ;;  %v750_v27 = vld [vmem:[%s8194_s22 + $0xe8] sm:$0xff] }
  0x2a   : > { %12532 = vst [vmem:[#allocation14_spill] sm:$0xff] %v8306_v16  ;;  %v8321_v28 = vpack.c.bf16 %v748_v24, %v747_v23  ;;  %v8324_v31 = vpack.c.bf16 %v750_v27, %v749_v26  ;;  %v715_v32 = vld [vmem:[%s8203_s3 + $0xd0] sm:$0xff]  ;;  %v716_v33 = vld [vmem:[%s8203_s3 + $0xd8] sm:$0xff]  ;;  %v717_v34 = vld [vmem:[%s8203_s3 + $0xe0] sm:$0xff] }
  0x2b   : > { %6776 = vmatmul.mubr.msk.bf16.gmra.mxu0 %vm800_vm1, %v8249_v41  ;;  %v718_v35 = vld [vmem:[%s8203_s3 + $0xe8] sm:$0xff]  ;;  %v774_v36 = vpack.c.bf16 %v716_v33, %v715_v32  ;;  %v751_v37 = vld [vmem:[%s8194_s22 + $0xf0] sm:$0xff]  ;;  %v752_v38 = vld [vmem:[%s8194_s22 + $0xf8] sm:$0xff] }
  0x2c   : > { %6779 = vmatprep.mubr.msk.bf16.mxu0 %vm800_vm1, %v8252_v42  ;;  %12533 = vst [vmem:[#allocation15_spill] sm:$0xff] %v8321_v28  ;;  %12534 = vst [vmem:[#allocation16_spill] sm:$0xff] %v8324_v31  ;;  %v775_v39 = vpack.c.bf16 %v718_v35, %v717_v34  ;;  %v8337_v40 = vpack.c.bf16 %v752_v38, %v751_v37  ;;  %v719_v43 = vld [vmem:[%s8203_s3 + $0xf0] sm:$0xff]  ;;  %v720_v44 = vld [vmem:[%s8203_s3 + $0xf8] sm:$0xff]  ;;  %s12181_s3 = scalar_lea.vmem %s12946_s25, %s8185_s28 }
  0x2d   : > { %v776_v45 = vpack.c.bf16 %v720_v44, %v719_v43  ;;  %v7117_v46 = vld [vmem:[%s12442_s7 + $0x30] sm:$0xff]   ;;  %v7118_v47 = vld [vmem:[%s12442_s7 + $0x28] sm:$0xff]   ;;  %v7119_v48 = vld [vmem:[%s12442_s7 + $0x20] sm:$0xff]  }
  0x2e   : > { %12535 = vst [vmem:[#allocation17_spill] sm:$0xff] %v8337_v40  ;;  %6841 = vmatprep.subr.bf16.mxu0 %v7117_v46  ;;  %v7120_v49 = vld [vmem:[%s12442_s7 + $0x18] sm:$0xff]   ;;  %v7122_v51 = vld [vmem:[%s12442_s7 + $0x8] sm:$0xff]   ;;  %v8370_v59 = vld [vmem:[%s12441_s6] ss:$0 sm:$0xff] }
  0x2f   : > { %6842 = vmatpush3.bf16.msra.mxu0 %v7117_v46 }
  0x30   : > { %6816 = vmatmul.mubr.msk.bf16.gmra.mxu1 %vm1038_vm2, %v766_v50  ;;  %6843 = vmatprep.subr.bf16.mxu0 %v7118_v47  ;;  %v7121_v50 = vld [vmem:[%s12442_s7 + $0x10] sm:$0xff]  }
  0x31   : > { %6819 = vmatprep.mubr.msk.bf16.mxu1 %vm1038_vm2, %v767_v52  ;;  %v7123_v52 = vld [vmem:[%s12442_s7] sm:$0xff]  }
  0x33   : > { %6780 = vmatmul.mubr.msk.bf16.gmra.mxu0 %vm800_vm1, %v8267_v53 }
  0x34   : > { %6783 = vmatprep.mubr.msk.bf16.mxu0 %vm800_vm1, %v8272_v56  ;;  %6844 = vmatpush3.bf16.msra.mxu0 %v7118_v47 }
  0x35   : > { %6845 = vmatprep.subr.bf16.mxu0 %v7119_v48 }
  0x38   : > { %6820 = vmatmul.mubr.msk.bf16.gmra.mxu1 %vm1038_vm2, %v768_v63  ;;  %6846 = vmatpush3.bf16.msra.mxu0 %v7119_v48 }
  0x39   : > { %6823 = vmatprep.mubr.msk.bf16.mxu1 %vm1038_vm2, %v769_v0  ;;  %6847 = vmatprep.subr.bf16.mxu0 %v7120_v49 }
  0x3b   : > { %6784 = vmatmul.mubr.msk.bf16.gmra.mxu0 %vm800_vm1, %v8285_v1 }
  0x3c   : > { %6787 = vmatprep.mubr.msk.bf16.mxu0 %vm800_vm1, %v8290_v4  ;;  %6848 = vmatpush3.bf16.msra.mxu0 %v7120_v49 }
  0x3d   : > { %6849 = vmatprep.subr.bf16.mxu0 %v7121_v50 }
  0x40   : > { %6824 = vmatmul.mubr.msk.bf16.gmra.mxu1 %vm1038_vm2, %v770_v12  ;;  %6850 = vmatpush3.bf16.msra.mxu0 %v7121_v50 }
  0x41   : > { %6827 = vmatprep.mubr.msk.bf16.mxu1 %vm1038_vm2, %v771_v13  ;;  %6851 = vmatprep.subr.bf16.mxu0 %v7122_v51 }
  0x43   : > { %6788 = vmatmul.mubr.msk.bf16.gmra.mxu0 %vm800_vm1, %v8303_v15 }
  0x44   : > { %6791 = vmatprep.mubr.msk.bf16.mxu0 %vm800_vm1, %v8306_v16  ;;  %6852 = vmatpush3.bf16.msra.mxu0 %v7122_v51 }
  0x45   : > { %6853 = vmatprep.subr.bf16.mxu0 %v7123_v52 }
  0x48   : > { %6828 = vmatmul.mubr.msk.bf16.gmra.mxu1 %vm1038_vm2, %v772_v22  ;;  %6854 = vmatpush3.bf16.msra.mxu0 %v7123_v52 }
  0x49   : > { %6831 = vmatprep.mubr.msk.bf16.mxu1 %vm1038_vm2, %v773_v25 }
  0x4b   : > { %6792 = vmatmul.mubr.msk.bf16.gmra.mxu0 %vm800_vm1, %v8321_v28 }
  0x4c   : > { %6795 = vmatprep.mubr.msk.bf16.mxu0 %vm800_vm1, %v8324_v31 }
  0x50   : > { %6832 = vmatmul.mubr.msk.bf16.gmra.mxu1 %vm1038_vm2, %v774_v36 }
  0x51   : > { %6835 = vmatprep.mubr.msk.bf16.mxu1 %vm1038_vm2, %v775_v39 }
  0x53   : > { %6796 = vmatmul.mubr.msk.bf16.gmra.mxu0 %vm800_vm1, %v8337_v40 }
  0x58   : > { %6836 = vmatmul.mubr.msk.bf16.gmra.mxu1 %vm1038_vm2, %v776_v45 }
  0xdb   : > { %v6769_v54 = vpop.f32.mrf.mxu0 }
  0xdd   : > { %v887_v55 = vpop.f32.mrf.mxu0 }
  0xdf   : > { %v6770_v57 = vpop.f32.mrf.mxu0 }
  0xe0   : > { %v6809_v58 = vpop.f32.mrf.mxu1 }
  0xe1   : > { %v890_v60 = vpop.f32.mrf.mxu0  ;;  %v1130_v61 = vadd.f32 %v6809_v58, %v6769_v54 }
  0xe2   : > { %v1121_v62 = vpop.f32.mrf.mxu1 }
  0xe3   : > { %v8373_v63 = vadd.f32 %v8370_v59, %v1130_v61  ;;  %v6773_v0 = vpop.f32.mrf.mxu0  ;;  %v1122_v7 = vadd.f32 %v1121_v62, %v887_v55 }
  0xe4   : > { %v6810_v2 = vpop.f32.mrf.mxu1 }
  0xe5   : > { %v1321_v3 = vand.u32 2147483647, %v8373_v63  ;;  %v903_v5 = vpop.f32.mrf.mxu0  ;;  %v1133_v6 = vadd.f32 %v6810_v2, %v6770_v57  ;;  %v8381_v22 = vadd.f32 %v8370_v59, %v1122_v7 }
  0xe6   : > { %v1124_v8 = vpop.f32.mrf.mxu1 }
  0xe7   : > { %v1353_v9 = vsub.f32 0.0, %v1321_v3  ;;  %v8377_v11 = vadd.f32 %v8370_v59, %v1133_v6  ;;  %v6774_v12 = vpop.f32.mrf.mxu0  ;;  %v1125_v13 = vadd.f32 %v1124_v8, %v890_v60  ;;  %v1319_v37 = vand.u32 2147483647, %v8381_v22 }
  0xe8   : > { %v6813_v17 = vpop.f32.mrf.mxu1 }
  0xe9   : > { %v1387_v18 = vmul.f32 1.442695, %v1353_v9  ;;  %v1322_v19 = vand.u32 2147483647, %v8377_v11  ;;  %v906_v21 = vpop.f32.mrf.mxu0  ;;  %v1146_v23 = vadd.f32 %v6813_v17, %v6773_v0  ;;  %v8384_v32 = vadd.f32 %v8370_v59, %v1125_v13 }
  0xea   : > { %v1137_v24 = vpop.f32.mrf.mxu1  ;;  %v1351_v50 = vsub.f32 0.0, %v1319_v37 }
  0xeb   : > { %v1354_v25 = vsub.f32 0.0, %v1322_v19  ;;  %v6777_v26 = vpop.f32.mrf.mxu0  ;;  %v1138_v27 = vadd.f32 %v1137_v24, %v903_v5  ;;  %7150 = vpow2.f32 %v1387_v18  ;;  %v8387_v35 = vadd.f32 %v8370_v59, %v1146_v23 }
  0xec   : > { %v6814_v33 = vpop.f32.mrf.mxu1  ;;  %v1320_v45 = vand.u32 2147483647, %v8384_v32  ;;  %v1383_v3 = vmul.f32 1.442695, %v1351_v50 }
  0xed   : > { %v1389_v34 = vmul.f32 1.442695, %v1354_v25  ;;  %v919_v36 = vpop.f32.mrf.mxu0  ;;  %v8391_v38 = vadd.f32 %v8370_v59, %v1138_v27  ;;  %v1149_v43 = vadd.f32 %v6814_v33, %v6774_v12  ;;  %v1325_v48 = vand.u32 2147483647, %v8387_v35 }
  0xee   : > { %v1140_v39 = vpop.f32.mrf.mxu1  ;;  %v1352_v58 = vsub.f32 0.0, %v1320_v45 }
  0xef   : > { %7152 = vpow2.f32 %v1389_v34  ;;  %v6778_v44 = vpop.f32.mrf.mxu0  ;;  %v1141_v46 = vadd.f32 %v1140_v39, %v906_v21  ;;  %v1323_v51 = vand.u32 2147483647, %v8391_v38  ;;  %v8397_v55 = vadd.f32 %v8370_v59, %v1149_v43 }
  0xf0   : > { %v6817_v47 = vpop.f32.mrf.mxu1  ;;  %v1357_v0 = vsub.f32 0.0, %v1325_v48  ;;  %v1385_v18 = vmul.f32 1.442695, %v1352_v58  ;;  %7154 = vpow2.f32 %v1383_v3 }
  0xf1   : > { %v922_v49 = vpop.f32.mrf.mxu0  ;;  %v1162_v52 = vadd.f32 %v6817_v47, %v6777_v26  ;;  %v8400_v60 = vadd.f32 %v8370_v59, %v1141_v46  ;;  %v1355_v5 = vsub.f32 0.0, %v1323_v51  ;;  %v1326_v9 = vand.u32 2147483647, %v8397_v55 }
  0xf2   : > { %v1153_v54 = vpop.f32.mrf.mxu1  ;;  %v1395_v26 = vmul.f32 1.442695, %v1357_v0  ;;  %7156 = vpow2.f32 %v1385_v18 }
  0xf3   : > { %v6781_v57 = vpop.f32.mrf.mxu0  ;;  %v1154_v61 = vadd.f32 %v1153_v54, %v919_v36  ;;  %v8403_v6 = vadd.f32 %v8370_v59, %v1162_v52  ;;  %v1324_v19 = vand.u32 2147483647, %v8400_v60  ;;  %v1391_v37 = vmul.f32 1.442695, %v1355_v5 }
  0xf4   : > { %v6818_v62 = vpop.f32.mrf.mxu1  ;;  %v1358_v46 = vsub.f32 0.0, %v1326_v9  ;;  %7158 = vpow2.f32 %v1395_v26 }
  0xf5   : > { %v935_v2 = vpop.f32.mrf.mxu0  ;;  %v1165_v7 = vadd.f32 %v6818_v62, %v6778_v44  ;;  %v8409_v21 = vadd.f32 %v8370_v59, %v1154_v61  ;;  %v1329_v39 = vand.u32 2147483647, %v8403_v6  ;;  %v1356_v50 = vsub.f32 0.0, %v1324_v19 }
  0xf6   : > { %v1156_v8 = vpop.f32.mrf.mxu1  ;;  %7160 = vpow2.f32 %v1391_v37 }
  0xf7   : > { %v1157_v12 = vadd.f32 %v1156_v8, %v922_v49  ;;  %v6782_v13 = vpop.f32.mrf.mxu0  ;;  %v8414_v27 = vadd.f32 %v8370_v59, %v1165_v7  ;;  %v1327_v51 = vand.u32 2147483647, %v8409_v21  ;;  %v1361_v7 = vsub.f32 0.0, %v1329_v39 }
  0xf8   : > { %v6821_v23 = vpop.f32.mrf.mxu1  ;;  %v8416_v34 = vpop.eup %7150 }
  0xf9   : > { %v938_v33 = vpop.f32.mrf.mxu0  ;;  %v8423_v47 = vadd.f32 %v8370_v59, %v1157_v12  ;;  %v1178_v52 = vadd.f32 %v6821_v23, %v6781_v57  ;;  %v1465_v58 = vadd.f32 1.0, %v8416_v34  ;;  %v1330_v62 = vand.u32 2147483647, %v8414_v27 }
  0xfa   : > { %v1169_v43 = vpop.f32.mrf.mxu1  ;;  %v1468_v3 = vmul.f32 -0.5, %v8416_v34  ;;  %v1397_v12 = vmul.f32 1.442695, %v1358_v46  ;;  %v1393_v23 = vmul.f32 1.442695, %v1356_v50  ;;  %v1359_v26 = vsub.f32 0.0, %v1327_v51 }
  0xfb   : > { %v6785_v48 = vpop.f32.mrf.mxu0  ;;  %v1328_v18 = vand.u32 2147483647, %v8423_v47  ;;  %v8437_v61 = vadd.f32 %v8370_v59, %v1178_v52  ;;  %v1170_v44 = vadd.f32 %v1169_v43, %v935_v2  ;;  %7162 = vlog2.f32 %v1465_v58  ;;  %v7124_v50 = vld [vmem:[%s12444_s9 + $0x38] sm:$0xff]   ;;  %v7125_v2 = vld [vmem:[%s12444_s9 + $0x30] sm:$0xff]  }
  0xfc   : > { %v8425_v49 = vpop.eup %7152  ;;  %v6822_v54 = vpop.f32.mrf.mxu1  ;;  %v1362_v5 = vsub.f32 0.0, %v1330_v62  ;;  %v1469_v46 = vadd.f32 1.0, %v1468_v3  ;;  %v1403_v24 = vmul.f32 1.442695, %v1361_v7  ;;  %v1471_v62 = vand.u32 2147483647, %v8416_v34  ;;  %6887 = vmatprep.subr.bf16.mxu1 %v7124_v50 }
  0xfd   : > { %v951_v0 = vpop.f32.mrf.mxu0  ;;  %v1474_v9 = vadd.f32 1.0, %v8425_v49  ;;  %v1477_v37 = vmul.f32 -0.5, %v8425_v49  ;;  %v1181_v57 = vadd.f32 %v6822_v54, %v6782_v13  ;;  %v1360_v43 = vsub.f32 0.0, %v1328_v18  ;;  %6888 = vmatpush3.bf16.msra.mxu1 %v7124_v50 }
  0xfe   : > { %v1172_v8 = vpop.f32.mrf.mxu1  ;;  %v8448_v51 = vadd.f32 %v8370_v59, %v1170_v44  ;;  %v1399_v13 = vmul.f32 1.442695, %v1359_v26  ;;  %v1405_v7 = vmul.f32 1.442695, %v1362_v5  ;;  %6889 = vmatprep.subr.bf16.mxu1 %v7125_v2  ;;  %v8462_v18 = vmul.f32 %v8416_v34, %v1469_v46 }
  0xff   : > { %v6786_v19 = vpop.f32.mrf.mxu0  ;;  %v1173_v25 = vadd.f32 %v1172_v8, %v938_v33  ;;  %7164 = vlog2.f32 %v1474_v9  ;;  %v1333_v33 = vand.u32 2147483647, %v8437_v61  ;;  %v1478_v3 = vadd.f32 1.0, %v1477_v37 }
 0x100   : > { %v6825_v45 = vpop.f32.mrf.mxu1  ;;  %7166 = vpow2.f32 %v1397_v12  ;;  %v8459_v12 = vpop.eup %7154  ;;  %v1401_v5 = vmul.f32 1.442695, %v1360_v43  ;;  %vm8489_vm3 = vcmp.lt.f32.partialorder %v1471_v62, 0.0004427343 }
 0x101   : > { %v954_v36 = vpop.f32.mrf.mxu0  ;;  %v1194_v52 = vadd.f32 %v6825_v45, %v6785_v48  ;;  %7168 = vpow2.f32 %v1393_v23  ;;  %v8454_v45 = vadd.f32 %v8370_v59, %v1181_v57  ;;  %v8457_v48 = vadd.f32 %v8370_v59, %v1173_v25  ;;  %v8469_v37 = vpop.eup %7156  ;;  %6890 = vmatpush3.bf16.msra.mxu1 %v7125_v2 }
 0x102   : > { %v1185_v17 = vpop.f32.mrf.mxu1  ;;  %7170 = vpow2.f32 %v1403_v24  ;;  %v1480_v57 = vand.u32 2147483647, %v8425_v49  ;;  %v1365_v23 = vsub.f32 0.0, %v1333_v33  ;;  %v8472_v50 = vmul.f32 %v8425_v49, %v1478_v3 }
 0x103   : > { %v6789_v58 = vpop.f32.mrf.mxu0  ;;  %v1186_v8 = vadd.f32 %v1185_v17, %v951_v0  ;;  %v1331_v17 = vand.u32 2147483647, %v8448_v51  ;;  %v8466_v24 = vadd.f32 %v8370_v59, %v1194_v52  ;;  %7172 = vpow2.f32 %v1399_v13  ;;  %v8478_v52 = vpop.eup %7158 }
 0x104   : > { %v6826_v54 = vpop.f32.mrf.mxu1  ;;  %7174 = vpow2.f32 %v1405_v7  ;;  %v1332_v33 = vand.u32 2147483647, %v8457_v48  ;;  %v8483_v49 = vpop.eup %7160  ;;  %v8487_v34 = vadd.f32 1.0, %v8459_v12  ;;  %v1411_v13 = vmul.f32 1.442695, %v1365_v23 }
 0x105   : > { %v967_v39 = vpop.f32.mrf.mxu0  ;;  %12536 = vst [vmem:[#allocation18_spill] sm:$0xff] %v8466_v24  ;;  %v1197_v25 = vadd.f32 %v6826_v54, %v6786_v19  ;;  %v8476_v46 = vadd.f32 %v8370_v59, %v1186_v8  ;;  %v1334_v19 = vand.u32 2147483647, %v8454_v45  ;;  %7176 = vpow2.f32 %v1401_v5 }
 0x106   : > { %v1188_v9 = vpop.f32.mrf.mxu1  ;;  %v1363_v3 = vsub.f32 0.0, %v1331_v17  ;;  %v1337_v7 = vand.u32 2147483647, %v8466_v24  ;;  %vm8503_vm4 = vcmp.lt.f32.partialorder %v1480_v57, 0.0004427343  ;;  %7178 = vpow2.f32 %v1411_v13 }
 0x107   : > { %v6790_v0 = vpop.f32.mrf.mxu0  ;;  %v1189_v54 = vadd.f32 %v1188_v9, %v954_v36  ;;  %v8496_v9 = vadd.f32 %v8370_v59, %v1197_v25  ;;  %v1335_v31 = vand.u32 2147483647, %v8476_v46  ;;  %v1366_v40 = vsub.f32 0.0, %v1334_v19 }
 0x108   : > { %v6829_v26 = vpop.f32.mrf.mxu1  ;;  %v7163_v15 = vpop.eup %7162  ;;  %v1364_v36 = vsub.f32 0.0, %v1332_v33  ;;  %v1407_v56 = vmul.f32 1.442695, %v1363_v3  ;;  %v1369_v53 = vsub.f32 0.0, %v1337_v7 }
 0x109   : > { %v970_v43 = vpop.f32.mrf.mxu0  ;;  %v8501_v28 = vadd.f32 %v8370_v59, %v1189_v54  ;;  %v1210_v62 = vadd.f32 %v6829_v26, %v6789_v58  ;;  %v1338_v57 = vand.u32 2147483647, %v8496_v9  ;;  %v1467_v19 = vmul.f32 0.6931472, %v7163_v15 }
 0x10a   : > { %v1201_v44 = vpop.f32.mrf.mxu1  ;;  %v1367_v33 = vsub.f32 0.0, %v1335_v31  ;;  %v1413_v17 = vmul.f32 1.442695, %v1366_v40  ;;  %v1409_v26 = vmul.f32 1.442695, %v1364_v36  ;;  %7180 = vpow2.f32 %v1407_v56 }
 0x10b   : > { %v6793_v8 = vpop.f32.mrf.mxu0  ;;  %v1202_v4 = vadd.f32 %v1201_v44, %v967_v39  ;;  %v8509_v42 = vadd.f32 %v8370_v59, %v1210_v62  ;;  %v1336_v3 = vand.u32 2147483647, %v8501_v28  ;;  %v1419_v20 = vmul.f32 1.442695, %v1369_v53 }
 0x10c   : > { %v6830_v5 = vpop.f32.mrf.mxu1  ;;  %v7165_v58 = vpop.eup %7164  ;;  %v1370_v31 = vsub.f32 0.0, %v1338_v57  ;;  %v1473_v40 = vsel %vm8489_vm3, %v8462_v18, %v1467_v19  ;;  %v1415_v13 = vmul.f32 1.442695, %v1367_v33  ;;  %7182 = vpow2.f32 %v1413_v17 }
 0x10d   : > { %v983_v16 = vpop.f32.mrf.mxu0  ;;  %v1213_v25 = vadd.f32 %v6830_v5, %v6790_v0  ;;  %12541 = vst [vmem:[#allocation19_spill] sm:$0xff] %v8509_v42  ;;  %v8514_v41 = vadd.f32 %v8370_v59, %v1202_v4  ;;  %v8519_v0 = vpop.eup %7166  ;;  %v1341_v4 = vand.u32 2147483647, %v8509_v42  ;;  %v1368_v36 = vsub.f32 0.0, %v1336_v3 }
 0x10e   : > { %v1204_v1 = vpop.f32.mrf.mxu1  ;;  %v8522_v62 = vpop.eup %7168  ;;  %7184 = vpow2.f32 %v1409_v26  ;;  %v1421_v33 = vmul.f32 1.442695, %v1370_v31 }
 0x10f   : > { %v6794_v54 = vpop.f32.mrf.mxu0  ;;  %12542 = vst [vmem:[#allocation20_spill] sm:$0xff] %v8514_v41  ;;  %v8517_v39 = vadd.f32 %v8370_v59, %v1213_v25  ;;  %v1205_v7 = vadd.f32 %v1204_v1, %v970_v43  ;;  %v8525_v29 = vpop.eup %7170  ;;  %v1476_v25 = vmul.f32 0.6931472, %v7165_v58  ;;  %v1339_v15 = vand.u32 2147483647, %v8514_v41 }
 0x110   : > { %v6833_v44 = vpop.f32.mrf.mxu1  ;;  %v8529_v24 = vpop.eup %7172  ;;  %7186 = vpow2.f32 %v1419_v20 }
 0x111   : > { %12543 = vst [vmem:[#allocation21_spill] sm:$0xff] %v8517_v39  ;;  %v986_v5 = vpop.f32.mrf.mxu0  ;;  %v1342_v14 = vand.u32 2147483647, %v8517_v39  ;;  %v1226_v1 = vadd.f32 %v6833_v44, %v6793_v8  ;;  %v8535_v58 = vadd.f32 %v8370_v59, %v1205_v7  ;;  %v8537_v56 = vpop.eup %7174  ;;  %v1373_v8 = vsub.f32 0.0, %v1341_v4 }
 0x112   : > { %v1217_v30 = vpop.f32.mrf.mxu1  ;;  %v1482_v44 = vsel %vm8503_vm4, %v8472_v50, %v1476_v25  ;;  %v1371_v18 = vsub.f32 0.0, %v1339_v15  ;;  %v8546_v19 = vpop.eup %7176  ;;  %7188 = vpow2.f32 %v1415_v13  ;;  %v1417_v50 = vmul.f32 1.442695, %v1368_v36 }
 0x113   : > { %v1218_v43 = vadd.f32 %v1217_v30, %v983_v16  ;;  %12544 = vst [vmem:[#allocation22_spill] sm:$0xff] %v8535_v58  ;;  %v6797_v53 = vpop.f32.mrf.mxu0  ;;  %v8544_v2 = vadd.f32 %v8370_v59, %v1226_v1  ;;  %v1374_v3 = vsub.f32 0.0, %v1342_v14  ;;  %v1340_v23 = vand.u32 2147483647, %v8535_v58 }
 0x114   : > { %v6834_v10 = vpop.f32.mrf.mxu1  ;;  %v12548_v4 = vmax.f32 %v8377_v11, 0.0  ;;  %v1427_v20 = vmul.f32 1.442695, %v1373_v8  ;;  %7190 = vlog2.f32 %v8487_v34 }
 0x115   : > { %v1229_v30 = vadd.f32 %v6834_v10, %v6794_v54  ;;  %12545 = vst [vmem:[#allocation23_spill] sm:$0xff] %v8544_v2  ;;  %v8549_v17 = vadd.f32 %v8370_v59, %v1218_v43  ;;  %v12547_v10 = vmax.f32 %v8373_v63, 0.0  ;;  %v999_v26 = vpop.f32.mrf.mxu0  ;;  %v1423_v63 = vmul.f32 1.442695, %v1371_v18 }
 0x116   : > { %v1220_v16 = vpop.f32.mrf.mxu1  ;;  %v8558_v25 = vadd.f32 %v1482_v44, %v12548_v4  ;;  %v1345_v43 = vand.u32 2147483647, %v8544_v2  ;;  %7192 = vpow2.f32 %v1421_v33  ;;  %v1372_v8 = vsub.f32 0.0, %v1340_v23  ;;  %v8576_v33 = vpop.eup %7178 }
 0x117   : > { %12546 = vst [vmem:[#allocation24_spill] sm:$0xff] %v8549_v17  ;;  %v8553_v54 = vadd.f32 %v1473_v40, %v12547_v10  ;;  %v8561_v14 = vadd.f32 %v8370_v59, %v1229_v30  ;;  %v1221_v15 = vadd.f32 %v1220_v16, %v986_v5  ;;  %v1429_v40 = vmul.f32 1.442695, %v1374_v3  ;;  %v6798_v30 = vpop.f32.mrf.mxu0  ;;  %v8580_v23 = vpop.eup %7180 }
 0x118   : > { %v6837_v7 = vpop.f32.mrf.mxu1  ;;  %v1343_v13 = vand.u32 2147483647, %v8549_v17  ;;  %7194 = vpow2.f32 %v1417_v50  ;;  %v1456_v5 = vadd.f32 1.0, %v8469_v37  ;;  %v1377_v10 = vsub.f32 0.0, %v1345_v43 }
 0x119   : > { %12549 = vst [vmem:[#allocation25_spill] sm:$0xff] %v8561_v14  ;;  %v8568_v11 = vadd.f32 %v8370_v59, %v1221_v15  ;;  %7196 = vpow2.f32 %v1427_v20  ;;  %v1346_v18 = vand.u32 2147483647, %v8561_v14  ;;  %v1242_v15 = vadd.f32 %v6837_v7, %v6797_v53  ;;  %v1002_v1 = vpop.f32.mrf.mxu0 }
 0x11a   : > { %v1233_v31 = vpop.f32.mrf.mxu1  ;;  %7198 = vpow2.f32 %v1423_v63  ;;  %v1375_v4 = vsub.f32 0.0, %v1343_v13  ;;  %v1425_v57 = vmul.f32 1.442695, %v1372_v8  ;;  %v1450_v63 = vmul.f32 -0.5, %v8459_v12 }
 0x11b   : > { %12550 = vst [vmem:[#allocation26_spill] sm:$0xff] %v8568_v11  ;;  %v1344_v50 = vand.u32 2147483647, %v8568_v11  ;;  %7200 = vpow2.f32 %v1429_v40  ;;  %v1234_v36 = vadd.f32 %v1233_v31, %v999_v26  ;;  %v1378_v14 = vsub.f32 0.0, %v1346_v18  ;;  %v8590_v40 = vpop.eup %7182 }
 0x11c   : > { %v6838_v16 = vpop.f32.mrf.mxu1  ;;  %7202 = vlog2.f32 %v1456_v5  ;;  %v8585_v43 = vadd.f32 %v8370_v59, %v1242_v15  ;;  %v1435_v53 = vmul.f32 1.442695, %v1377_v10  ;;  %v1483_v31 = vadd.f32 1.0, %v8483_v49  ;;  %v8596_v13 = vpop.eup %7184 }
 0x11d   : > { %v1245_v34 = vadd.f32 %v6838_v16, %v6798_v30  ;;  %v8588_v3 = vadd.f32 %v8370_v59, %v1234_v36  ;;  %v1376_v7 = vsub.f32 0.0, %v1344_v50  ;;  %v1431_v8 = vmul.f32 1.442695, %v1375_v4  ;;  %v8600_v18 = vpop.eup %7186 }
 0x11e   : > { %v1236_v44 = vpop.f32.mrf.mxu1  ;;  %12551 = vst [vmem:[#allocation27_spill] sm:$0xff] %v8585_v43  ;;  %v1453_v5 = vand.u32 2147483647, %v8459_v12  ;;  %v1349_v30 = vand.u32 2147483647, %v8585_v43  ;;  %7204 = vpow2.f32 %v1425_v57  ;;  %v1459_v36 = vmul.f32 -0.5, %v8469_v37 }
 0x11f   : > { %12552 = vst [vmem:[#allocation28_spill] sm:$0xff] %v8588_v3  ;;  %v8593_v26 = vadd.f32 %v8370_v59, %v1245_v34  ;;  %v1237_v16 = vadd.f32 %v1236_v44, %v1002_v1  ;;  %v1347_v10 = vand.u32 2147483647, %v8588_v3  ;;  %v8605_v50 = vpop.eup %7188  ;;  %v1437_v15 = vmul.f32 1.442695, %v1378_v14 }
 0x120   : > { %v1381_v20 = vsub.f32 0.0, %v1349_v30  ;;  %7206 = vlog2.f32 %v1483_v31  ;;  %v1486_v4 = vmul.f32 -0.5, %v8483_v49  ;;  %v1433_v1 = vmul.f32 1.442695, %v1376_v7 }
 0x121   : > { %12553 = vst [vmem:[#allocation29_spill] sm:$0xff] %v8593_v26  ;;  %v1350_v34 = vand.u32 2147483647, %v8593_v26  ;;  %7208 = vpow2.f32 %v1435_v53  ;;  %v1379_v44 = vsub.f32 0.0, %v1347_v10  ;;  %v7191_v2 = vpop.eup %7190  ;;  %v1451_v57 = vadd.f32 1.0, %v1450_v63 }
 0x122   : > { %7210 = vpow2.f32 %v1431_v8  ;;  %v1443_v39 = vmul.f32 1.442695, %v1381_v20  ;;  %v8610_v3 = vadd.f32 %v8370_v59, %v1237_v16  ;;  %v1460_v42 = vadd.f32 1.0, %v1459_v36 }
 0x123   : > { %v8612_v26 = vpop.eup %7192  ;;  %v1462_v14 = vand.u32 2147483647, %v8469_v37  ;;  %v1382_v31 = vsub.f32 0.0, %v1350_v34  ;;  %v1492_v30 = vadd.f32 1.0, %v8522_v62  ;;  %7212 = vpow2.f32 %v1437_v15 }
 0x124   : > { %12554 = vst [vmem:[#allocation30_spill] sm:$0xff] %v8610_v3  ;;  %vm8618_vm5 = vcmp.lt.f32.partialorder %v1453_v5, 0.0004427343  ;;  %v1439_v63 = vmul.f32 1.442695, %v1379_v44  ;;  %v1487_v20 = vadd.f32 1.0, %v1486_v4  ;;  %7214 = vpow2.f32 %v1433_v1 }
 0x125   : > { %v8616_v53 = vpop.eup %7194  ;;  %v1449_v16 = vmul.f32 0.6931472, %v7191_v2  ;;  %v1501_v36 = vadd.f32 1.0, %v8478_v52  ;;  %v1452_v34 = vmul.f32 %v8459_v12, %v1451_v57  ;;  %7216 = vpow2.f32 %v1443_v39 }
 0x126   : > { %v8622_v8 = vpop.eup %7196  ;;  %v1348_v5 = vand.u32 2147483647, %v8610_v3  ;;  %v1489_v15 = vand.u32 2147483647, %v8483_v49  ;;  %v1461_v4 = vmul.f32 %v8469_v37, %v1460_v42  ;;  %vm8634_vm6 = vcmp.lt.f32.partialorder %v1462_v14, 0.0004427343 }
 0x127   : > { %v8626_v10 = vpop.eup %7198  ;;  %v1445_v2 = vmul.f32 1.442695, %v1382_v31  ;;  %7218 = vlog2.f32 %v1492_v30  ;;  %v8639_v59 = vmul.f32 %v8483_v49, %v1487_v20  ;;  %v1495_v12 = vmul.f32 -0.5, %v8522_v62 }
 0x128   : > { %v8631_v43 = vpop.eup %7200  ;;  %7220 = vpow2.f32 %v1439_v63  ;;  %v1510_v39 = vadd.f32 1.0, %v8519_v0  ;;  %v1455_v57 = vsel %vm8618_vm5, %v1452_v34, %v1449_v16  ;;  %v1504_v42 = vmul.f32 -0.5, %v8478_v52 }
 0x129   : > { %v7203_v1 = vpop.eup %7202  ;;  %7222 = vlog2.f32 %v1501_v36  ;;  %v1380_v37 = vsub.f32 0.0, %v1348_v5  ;;  %vm8646_vm7 = vcmp.lt.f32.partialorder %v1489_v15, 0.0004427343  ;;  %v1519_v49 = vadd.f32 1.0, %v8529_v24 }
 0x12a   : > { %v1458_v3 = vmul.f32 0.6931472, %v7203_v1  ;;  %7224 = vlog2.f32 %v1510_v39  ;;  %v1513_v30 = vmul.f32 -0.5, %v8519_v0  ;;  %v1528_v7 = vadd.f32 1.0, %v8546_v19 }
 0x12b   : > { %7226 = vpow2.f32 %v1445_v2  ;;  %v8655_v63 = vpop.eup %7204  ;;  %v12561_v20 = vmax.f32 %v8381_v22, 0.0  ;;  %v12562_v36 = vmax.f32 %v8384_v32, 0.0  ;;  %v1522_v5 = vmul.f32 -0.5, %v8529_v24 }
 0x12c   : > { %v1464_v31 = vsel %vm8634_vm6, %v1461_v4, %v1458_v3  ;;  %7228 = vlog2.f32 %v1519_v49  ;;  %v1496_v1 = vadd.f32 1.0, %v1495_v12  ;;  %v1498_v3 = vand.u32 2147483647, %v8522_v62 }
 0x12d   : > { %v1735_v16 = vadd.f32 %v1455_v57, %v12561_v20  ;;  %v1736_v34 = vadd.f32 %v1464_v31, %v12562_v36  ;;  %v7207_v15 = vpop.eup %7206  ;;  %v1505_v4 = vadd.f32 1.0, %v1504_v42  ;;  %7230 = vlog2.f32 %v1528_v7 }
 0x12e   : > { %v8663_v44 = vpop.eup %7208  ;;  %v8665_v39 = vmul.f32 1.442695, %v1380_v37  ;;  %v1507_v22 = vand.u32 2147483647, %v8478_v52  ;;  %v1537_v57 = vadd.f32 1.0, %v8525_v29  ;;  %v1514_v31 = vadd.f32 1.0, %v1513_v30 }
 0x12f   : > { %v1783_v2 = vpack.c.bf16 %v1736_v34, %v1735_v16  ;;  %v8669_v32 = vpop.eup %7210  ;;  %v1485_v49 = vmul.f32 0.6931472, %v7207_v15  ;;  %v1516_v20 = vand.u32 2147483647, %v8519_v0  ;;  %v1531_v12 = vmul.f32 -0.5, %v8546_v19 }
 0x130   : > { %v1523_v42 = vadd.f32 1.0, %v1522_v5  ;;  %v1525_v7 = vand.u32 2147483647, %v8529_v24  ;;  %7232 = vlog2.f32 %v1537_v57  ;;  %v1546_v37 = vadd.f32 1.0, %v8537_v56  ;;  %v8675_v16 = vpop.eup %7212 }
 0x131   : > { %6855 = vmatprep.mubr.bf16.mxu0 %v1783_v2  ;;  %v12563_v36 = vpack.c.bf16 %v8558_v25, %v8553_v54  ;;  %v1497_v34 = vmul.f32 %v8522_v62, %v1496_v1  ;;  %vm8681_vm8 = vcmp.lt.f32.partialorder %v1498_v3, 0.0004427343  ;;  %v1506_v15 = vmul.f32 %v8478_v52, %v1505_v4  ;;  %v8687_v2 = vpop.eup %7214 }
 0x132   : > { %v1540_v5 = vmul.f32 -0.5, %v8525_v29  ;;  %vm8689_vm9 = vcmp.lt.f32.partialorder %v1507_v22, 0.0004427343  ;;  %v1534_v11 = vand.u32 2147483647, %v8546_v19  ;;  %7234 = vlog2.f32 %v1546_v37  ;;  %v8695_v62 = vpop.eup %7216 }
 0x133   : > { %6856 = vmatmul.mubr.bf16.vlgmr.msra.gmra.mxu0 %v12563_v36  ;;  %v1555_v54 = vadd.f32 1.0, %v8580_v23  ;;  %12568 = vst [vmem:[#allocation31_spill] sm:$0xff] %v8695_v62  ;;  %v1491_v25 = vsel %vm8646_vm7, %v8639_v59, %v1485_v49  ;;  %v1515_v52 = vmul.f32 %v8519_v0, %v1514_v31  ;;  %v1532_v1 = vadd.f32 1.0, %v1531_v12 }
 0x134   : > { %v1564_v3 = vadd.f32 1.0, %v8596_v13  ;;  %v7219_v4 = vpop.eup %7218  ;;  %vm8702_vm10 = vcmp.lt.f32.partialorder %v1516_v20, 0.0004427343  ;;  %v1524_v37 = vmul.f32 %v8529_v24, %v1523_v42  ;;  %vm8707_vm11 = vcmp.lt.f32.partialorder %v1525_v7, 0.0004427343 }
 0x135   : > { %7236 = vlog2.f32 %v1555_v54  ;;  %v8711_v17 = vpop.eup %7220  ;;  %v1494_v59 = vmul.f32 0.6931472, %v7219_v4  ;;  %v1541_v14 = vadd.f32 1.0, %v1540_v5  ;;  %v1543_v0 = vand.u32 2147483647, %v8525_v29 }
 0x136   : > { %12573 = vst [vmem:[#allocation32_spill] sm:$0xff] %v8711_v17  ;;  %7238 = vlog2.f32 %v1564_v3  ;;  %v7223_v49 = vpop.eup %7222  ;;  %v12574_v31 = vmax.f32 %v8391_v38, 0.0  ;;  %vm8716_vm12 = vcmp.lt.f32.partialorder %v1534_v11, 0.0004427343  ;;  %v1549_v24 = vmul.f32 -0.5, %v8537_v56 }
 0x137   : > { %v1573_v42 = vadd.f32 1.0, %v8576_v33  ;;  %v7225_v7 = vpop.eup %7224  ;;  %v1500_v54 = vsel %vm8681_vm8, %v1497_v34, %v1494_v59  ;;  %v1503_v5 = vmul.f32 0.6931472, %v7223_v49  ;;  %v1533_v4 = vmul.f32 %v8546_v19, %v1532_v1 }
 0x138   : > { %v1739_v20 = vadd.f32 %v1491_v25, %v12574_v31  ;;  %v1558_v3 = vmul.f32 -0.5, %v8580_v23  ;;  %v8726_v62 = vpop.eup %7226  ;;  %v12578_v38 = vmax.f32 %v8400_v60, 0.0  ;;  %v1512_v25 = vmul.f32 0.6931472, %v7225_v7 }
 0x139   : > { %12577 = vst [vmem:[#allocation33_spill] sm:$0xff] %v8726_v62  ;;  %v1552_v31 = vand.u32 2147483647, %v8537_v56  ;;  %v1567_v58 = vmul.f32 -0.5, %v8596_v13  ;;  %v7229_v41 = vpop.eup %7228  ;;  %v1509_v30 = vsel %vm8689_vm9, %v1506_v15, %v1503_v5  ;;  %v1542_v34 = vmul.f32 %v8525_v29, %v1541_v14 }
 0x13a   : > { %v1740_v11 = vadd.f32 %v1500_v54, %v12578_v38  ;;  %v1561_v19 = vand.u32 2147483647, %v8580_v23  ;;  %7240 = vlog2.f32 %v1573_v42  ;;  %v7231_v1 = vpop.eup %7230  ;;  %v1518_v60 = vsel %vm8702_vm10, %v1515_v52, %v1512_v25 }
 0x13b   : > { %v1521_v49 = vmul.f32 0.6931472, %v7229_v41  ;;  %v1550_v7 = vadd.f32 1.0, %v1549_v24  ;;  %v12579_v54 = vmax.f32 %v8387_v35, 0.0  ;;  %v12580_v62 = vmax.f32 %v8397_v55, 0.0 }
 0x13c   : > { %v1785_v59 = vpack.c.bf16 %v1740_v11, %v1739_v20  ;;  %v1530_v57 = vmul.f32 0.6931472, %v7231_v1  ;;  %v1559_v15 = vadd.f32 1.0, %v1558_v3  ;;  %v1568_v14 = vadd.f32 1.0, %v1567_v58 }
 0x13d   : > { %v1741_v38 = vadd.f32 %v1509_v30, %v12579_v54  ;;  %v1742_v17 = vadd.f32 %v1518_v60, %v12580_v62  ;;  %v1527_v29 = vsel %vm8707_vm11, %v1524_v37, %v1521_v49  ;;  %v1570_v20 = vand.u32 2147483647, %v8596_v13  ;;  %v7233_v52 = vpop.eup %7232 }
 0x13e   : > { %6859 = vmatprep.mubr.bf16.mxu0 %v1785_v59  ;;  %v1582_v22 = vadd.f32 1.0, %v8590_v40  ;;  %v1536_v35 = vsel %vm8716_vm12, %v1533_v4, %v1530_v57  ;;  %v1576_v24 = vmul.f32 -0.5, %v8576_v33  ;;  %v1591_v55 = vadd.f32 1.0, %v8605_v50 }
 0x13f   : > { %v1786_v41 = vpack.c.bf16 %v1742_v17, %v1741_v38  ;;  %v12581_v62 = vmax.f32 %v8409_v21, 0.0  ;;  %v12582_v36 = vmax.f32 %v8423_v47, 0.0  ;;  %v1539_v58 = vmul.f32 0.6931472, %v7233_v52  ;;  %v7235_v5 = vpop.eup %7234 }
 0x140   : > { %7242 = vlog2.f32 %v1582_v22  ;;  %vm8754_vm13 = vcmp.lt.f32.partialorder %v1543_v0, 0.0004427343  ;;  %vm8758_vm14 = vcmp.lt.f32.partialorder %v1552_v31, 0.0004427343  ;;  %vm8762_vm15 = vcmp.lt.f32.partialorder %v1561_v19, 0.0004427343 }
 0x141   : > { %v1743_v42 = vadd.f32 %v1527_v29, %v12581_v62  ;;  %v1744_v37 = vadd.f32 %v1536_v35, %v12582_v36  ;;  %6860 = vmatmul.mubr.bf16.gmra.mxu0 %v1786_v41  ;;  %7244 = vlog2.f32 %v1591_v55  ;;  %v1545_v47 = vsel %vm8754_vm13, %v1542_v34, %v1539_v58 }
 0x142   : > { %v1548_v4 = vmul.f32 0.6931472, %v7235_v5  ;;  %v1551_v11 = vmul.f32 %v8537_v56, %v1550_v7  ;;  %v7237_v0 = vpop.eup %7236  ;;  %v1560_v25 = vmul.f32 %v8580_v23, %v1559_v15  ;;  %v1569_v31 = vmul.f32 %v8596_v13, %v1568_v14 }
 0x143   : > { %v1787_v21 = vpack.c.bf16 %v1744_v37, %v1743_v42  ;;  %v1585_v30 = vmul.f32 -0.5, %v8590_v40  ;;  %v1600_v19 = vadd.f32 1.0, %v8616_v53  ;;  %v7239_v1 = vpop.eup %7238  ;;  %v1557_v60 = vmul.f32 0.6931472, %v7237_v0 }
 0x144   : > { %v1554_v59 = vsel %vm8758_vm14, %v1551_v11, %v1548_v4  ;;  %vm8775_vm3 = vcmp.lt.f32.partialorder %v1570_v20, 0.0004427343  ;;  %v1577_v56 = vadd.f32 1.0, %v1576_v24  ;;  %v12591_v49 = vmax.f32 %v8403_v6, 0.0 }
 0x145   : > { %6863 = vmatprep.mubr.bf16.mxu0 %v1787_v21  ;;  %v12592_v13 = vmax.f32 %v8414_v27, 0.0  ;;  %v1566_v54 = vmul.f32 0.6931472, %v7239_v1  ;;  %7246 = vlog2.f32 %v1600_v19  ;;  %v1563_v38 = vsel %vm8762_vm15, %v1560_v25, %v1557_v60 }
 0x146   : > { %v1745_v23 = vadd.f32 %v1545_v47, %v12591_v49  ;;  %v1579_v57 = vand.u32 2147483647, %v8576_v33  ;;  %v1588_v15 = vand.u32 2147483647, %v8590_v40  ;;  %v1609_v29 = vadd.f32 1.0, %v8600_v18 }
 0x147   : > { %v1746_v7 = vadd.f32 %v1554_v59, %v12592_v13  ;;  %v1572_v20 = vsel %vm8775_vm3, %v1569_v31, %v1566_v54  ;;  %v1586_v6 = vadd.f32 1.0, %v1585_v30  ;;  %v1594_v22 = vmul.f32 -0.5, %v8605_v50  ;;  %v7241_v27 = vpop.eup %7240 }
 0x148   : > { %v12593_v52 = vmax.f32 %v8448_v51, 0.0  ;;  %v12594_v35 = vmax.f32 %v8457_v48, 0.0  ;;  %v1597_v55 = vand.u32 2147483647, %v8605_v50  ;;  %7248 = vlog2.f32 %v1609_v29 }
 0x149   : > { %v1788_v14 = vpack.c.bf16 %v1746_v7, %v1745_v23  ;;  %7250 = vpow2.f32 %v8665_v39  ;;  %v1603_v62 = vmul.f32 -0.5, %v8616_v53  ;;  %v1612_v42 = vmul.f32 -0.5, %v8600_v18 }
 0x14a   : > { %v1747_v41 = vadd.f32 %v1563_v38, %v12593_v52  ;;  %v1748_v24 = vadd.f32 %v1572_v20, %v12594_v35  ;;  %v1618_v36 = vadd.f32 1.0, %v8612_v26  ;;  %v1575_v58 = vmul.f32 0.6931472, %v7241_v27 }
 0x14b   : > { %6864 = vmatmul.mubr.bf16.gmra.mxu0 %v1788_v14  ;;  %v1578_v51 = vmul.f32 %v8576_v33, %v1577_v56  ;;  %v1627_v5 = vadd.f32 1.0, %v8626_v10  ;;  %vm8802_vm4 = vcmp.lt.f32.partialorder %v1579_v57, 0.0004427343  ;;  %v1595_v3 = vadd.f32 1.0, %v1594_v22 }
 0x14c   : > { %v1789_v37 = vpack.c.bf16 %v1748_v24, %v1747_v41  ;;  %v1606_v39 = vand.u32 2147483647, %v8616_v53  ;;  %7252 = vlog2.f32 %v1618_v36  ;;  %v1587_v17 = vmul.f32 %v8590_v40, %v1586_v6 }
 0x14d   : > { %vm8808_vm5 = vcmp.lt.f32.partialorder %v1588_v15, 0.0004427343  ;;  %vm8812_vm6 = vcmp.lt.f32.partialorder %v1597_v55, 0.0004427343  ;;  %7254 = vlog2.f32 %v1627_v5  ;;  %v7243_v33 = vpop.eup %7242  ;;  %v1604_v47 = vadd.f32 1.0, %v1603_v62 }
 0x14e   : > { %6867 = vmatprep.mubr.bf16.mxu0 %v1789_v37  ;;  %v1613_v4 = vadd.f32 1.0, %v1612_v42  ;;  %v1615_v11 = vand.u32 2147483647, %v8600_v18  ;;  %v1636_v0 = vadd.f32 1.0, %v8655_v63  ;;  %v7245_v25 = vpop.eup %7244  ;;  %v1581_v40 = vsel %vm8802_vm4, %v1578_v51, %v1575_v58 }
 0x14f   : > { %v1584_v31 = vmul.f32 0.6931472, %v7243_v33  ;;  %v1621_v30 = vmul.f32 -0.5, %v8612_v26  ;;  %v1645_v19 = vadd.f32 1.0, %v8622_v8  ;;  %v1593_v1 = vmul.f32 0.6931472, %v7245_v25 }
 0x150   : > { %v1596_v59 = vmul.f32 %v8605_v50, %v1595_v3  ;;  %vm8823_vm7 = vcmp.lt.f32.partialorder %v1606_v39, 0.0004427343  ;;  %7256 = vlog2.f32 %v1636_v0  ;;  %v1624_v56 = vand.u32 2147483647, %v8612_v26 }
 0x151   : > { %v1590_v34 = vsel %vm8808_vm5, %v1587_v17, %v1584_v31  ;;  %v1630_v49 = vmul.f32 -0.5, %v8626_v10  ;;  %7258 = vlog2.f32 %v1645_v19  ;;  %v12603_v23 = vmax.f32 %v8437_v61, 0.0 }
 0x152   : > { %v12604_v7 = vmax.f32 %v8454_v45, 0.0  ;;  %v1605_v50 = vmul.f32 %v8616_v53, %v1604_v47  ;;  %v1639_v38 = vmul.f32 -0.5, %v8655_v63  ;;  %v7247_v57 = vpop.eup %7246  ;;  %v1614_v15 = vmul.f32 %v8600_v18, %v1613_v4  ;;  %v12623_v53 = vld [vmem:[#allocation22_spill] sm:$0xff] }
 0x153   : > { %v1749_v13 = vadd.f32 %v1581_v40, %v12603_v23  ;;  %vm8838_vm8 = vcmp.lt.f32.partialorder %v1615_v11, 0.0004427343  ;;  %v1622_v14 = vadd.f32 1.0, %v1621_v30  ;;  %v1654_v20 = vadd.f32 1.0, %v8631_v43 }
 0x154   : > { %v1750_v54 = vadd.f32 %v1590_v34, %v12604_v7  ;;  %v1599_v61 = vsel %vm8812_vm6, %v1596_v59, %v1593_v1  ;;  %v1602_v45 = vmul.f32 0.6931472, %v7247_v57  ;;  %v1633_v22 = vand.u32 2147483647, %v8626_v10  ;;  %v12617_v1 = vld [vmem:[#allocation18_spill] sm:$0xff] }
 0x155   : > { %vm8846_vm9 = vcmp.lt.f32.partialorder %v1624_v56, 0.0004427343  ;;  %v1631_v27 = vadd.f32 1.0, %v1630_v49  ;;  %7260 = vlog2.f32 %v1654_v20  ;;  %v1663_v18 = vadd.f32 1.0, %v8669_v32  ;;  %v7249_v52 = vpop.eup %7248  ;;  %v12620_v20 = vld [vmem:[#allocation32_spill] sm:$0xff] }
 0x156   : > { %v1790_v6 = vpack.c.bf16 %v1750_v54, %v1749_v13  ;;  %v1608_v41 = vsel %vm8823_vm7, %v1605_v50, %v1602_v45  ;;  %v1640_v35 = vadd.f32 1.0, %v1639_v38  ;;  %v1642_v24 = vand.u32 2147483647, %v8655_v63  ;;  %v8855_v62 = vpop.eup %7250 }
 0x157   : > { %v1648_v55 = vmul.f32 -0.5, %v8622_v8  ;;  %v12609_v42 = vmax.f32 %v8476_v46, 0.0  ;;  %v12610_v37 = vmax.f32 %v8501_v28, 0.0  ;;  %v1611_v51 = vmul.f32 0.6931472, %v7249_v52 }
 0x158   : > { %6868 = vmatmul.mubr.bf16.gmra.mxu0 %v1790_v6  ;;  %7262 = vlog2.f32 %v1663_v18  ;;  %v1623_v5 = vmul.f32 %v8612_v26, %v1622_v14  ;;  %vm8862_vm10 = vcmp.lt.f32.partialorder %v1633_v22, 0.0004427343  ;;  %v1651_v3 = vand.u32 2147483647, %v8622_v8 }
 0x159   : > { %v1751_v36 = vadd.f32 %v1599_v61, %v12609_v42  ;;  %v1752_v58 = vadd.f32 %v1608_v41, %v12610_v37  ;;  %v1672_v39 = vadd.f32 1.0, %v8687_v2  ;;  %v7253_v17 = vpop.eup %7252  ;;  %v1632_v46 = vmul.f32 %v8626_v10, %v1631_v27  ;;  %v12621_v61 = vld [vmem:[#allocation20_spill] sm:$0xff] }
 0x15a   : > { %v1657_v21 = vmul.f32 -0.5, %v8631_v43  ;;  %v1681_v28 = vadd.f32 1.0, %v8663_v44  ;;  %v7255_v33 = vpop.eup %7254  ;;  %v1617_v26 = vsel %vm8838_vm8, %v1614_v15, %v1611_v51  ;;  %v1620_v47 = vmul.f32 0.6931472, %v7253_v17 }
 0x15b   : > { %v1791_v12 = vpack.c.bf16 %v1752_v58, %v1751_v36  ;;  %vm8873_vm11 = vcmp.lt.f32.partialorder %v1642_v24, 0.0004427343  ;;  %v1666_v11 = vmul.f32 -0.5, %v8669_v32  ;;  %v1629_v0 = vmul.f32 0.6931472, %v7255_v33 }
 0x15c   : > { %v1641_v25 = vmul.f32 %v8655_v63, %v1640_v35  ;;  %v1649_v10 = vadd.f32 1.0, %v1648_v55  ;;  %7264 = vlog2.f32 %v1672_v39  ;;  %v1626_v40 = vsel %vm8846_vm9, %v1623_v5, %v1620_v47 }
 0x15d   : > { %6871 = vmatprep.mubr.bf16.mxu0 %v1791_v12  ;;  %vm8881_vm12 = vcmp.lt.f32.partialorder %v1651_v3, 0.0004427343  ;;  %v1660_v30 = vand.u32 2147483647, %v8631_v43  ;;  %7266 = vlog2.f32 %v1681_v28  ;;  %v7257_v19 = vpop.eup %7256  ;;  %v12618_v59 = vmax.f32 %v12617_v1, 0.0  ;;  %v12629_v12 = vld [vmem:[#allocation31_spill] sm:$0xff] }
 0x15e   : > { %v12619_v34 = vmax.f32 %v8496_v9, 0.0  ;;  %v1658_v63 = vadd.f32 1.0, %v1657_v21  ;;  %v1690_v49 = vadd.f32 1.0, %v8675_v16  ;;  %v7259_v23 = vpop.eup %7258  ;;  %v1635_v13 = vsel %vm8862_vm10, %v1632_v46, %v1629_v0  ;;  %v12630_v21 = vld [vmem:[#allocation19_spill] sm:$0xff]  ;;  %v12636_v1 = vld [vmem:[#allocation33_spill] sm:$0xff] }
 0x15f   : > { %v1753_v60 = vadd.f32 %v1617_v26, %v12618_v59  ;;  %v1638_v7 = vmul.f32 0.6931472, %v7257_v19  ;;  %v1667_v54 = vadd.f32 1.0, %v1666_v11  ;;  %v1675_v50 = vmul.f32 -0.5, %v8687_v2  ;;  %v12632_v26 = vld [vmem:[#allocation21_spill] sm:$0xff] }
 0x160   : > { %v1754_v56 = vadd.f32 %v1626_v40, %v12619_v34  ;;  %v1647_v57 = vmul.f32 0.6931472, %v7259_v23  ;;  %v1650_v15 = vmul.f32 %v8622_v8, %v1649_v10  ;;  %7268 = vlog2.f32 %v1690_v49  ;;  %v12637_v34 = vld [vmem:[#allocation23_spill] sm:$0xff]  ;;  %v7127_v49 = vld [vmem:[%s12444_s9 + $0x20] sm:$0xff]  }
 0x161   : > { %v1644_v9 = vsel %vm8873_vm11, %v1641_v25, %v1638_v7  ;;  %v1669_v29 = vand.u32 2147483647, %v8669_v32  ;;  %v1684_v14 = vmul.f32 -0.5, %v8663_v44  ;;  %v1699_v6 = vadd.f32 1.0, %v12620_v20 }
 0x162   : > { %v1792_v38 = vpack.c.bf16 %v1754_v56, %v1753_v60  ;;  %v12622_v45 = vmax.f32 %v12621_v61, 0.0  ;;  %v12624_v27 = vmax.f32 %v12623_v53, 0.0  ;;  %v1659_v52 = vmul.f32 %v8631_v43, %v1658_v63  ;;  %v7261_v41 = vpop.eup %7260 }
 0x163   : > { %vm8905_vm13 = vcmp.lt.f32.partialorder %v1660_v30, 0.0004427343  ;;  %v1668_v35 = vmul.f32 %v8669_v32, %v1667_v54  ;;  %v1676_v24 = vadd.f32 1.0, %v1675_v50  ;;  %v1678_v55 = vand.u32 2147483647, %v8687_v2 }
 0x164   : > { %6872 = vmatmul.mubr.bf16.gmra.mxu0 %v1792_v38  ;;  %v1755_v22 = vadd.f32 %v1635_v13, %v12622_v45  ;;  %v1756_v18 = vadd.f32 %v1644_v9, %v12624_v27  ;;  %7270 = vlog2.f32 %v1699_v6  ;;  %v1653_v36 = vsel %vm8881_vm12, %v1650_v15, %v1647_v57  ;;  %v12643_v6 = vld [vmem:[#allocation26_spill] sm:$0xff] }
 0x165   : > { %v1656_v37 = vmul.f32 0.6931472, %v7261_v41  ;;  %v1693_v58 = vmul.f32 -0.5, %v8675_v16  ;;  %v7263_v51 = vpop.eup %7262  ;;  %vm8914_vm14 = vcmp.lt.f32.partialorder %v1669_v29, 0.0004427343  ;;  %v1685_v5 = vadd.f32 1.0, %v1684_v14 }
 0x166   : > { %v1793_v42 = vpack.c.bf16 %v1756_v18, %v1755_v22  ;;  %v1687_v48 = vand.u32 2147483647, %v8663_v44  ;;  %v1708_v32 = vadd.f32 1.0, %v8855_v62  ;;  %v1665_v39 = vmul.f32 0.6931472, %v7263_v51  ;;  %v12642_v29 = vld [vmem:[#allocation25_spill] sm:$0xff] }
 0x167   : > { %v1662_v3 = vsel %vm8905_vm13, %v1659_v52, %v1656_v37  ;;  %v1702_v17 = vmul.f32 -0.5, %v12620_v20  ;;  %v1717_v46 = vadd.f32 1.0, %v12629_v12  ;;  %v12631_v28 = vmax.f32 %v12630_v21, 0.0 }
 0x168   : > { %6875 = vmatprep.mubr.bf16.mxu0 %v1793_v42  ;;  %v12633_v47 = vmax.f32 %v12632_v26, 0.0  ;;  %vm8928_vm15 = vcmp.lt.f32.partialorder %v1678_v55, 0.0004427343  ;;  %7272 = vlog2.f32 %v1708_v32  ;;  %v1671_v0 = vsel %vm8914_vm14, %v1668_v35, %v1665_v39  ;;  %v12648_v39 = vld [vmem:[#allocation30_spill] sm:$0xff]  ;;  %v12649_v26 = vld [vmem:[#allocation27_spill] sm:$0xff] }
 0x169   : > { %v1757_v33 = vadd.f32 %v1653_v36, %v12631_v28  ;;  %v1677_v25 = vmul.f32 %v8687_v2, %v1676_v24  ;;  %v1694_v10 = vadd.f32 1.0, %v1693_v58  ;;  %7274 = vlog2.f32 %v1717_v46  ;;  %v7265_v40 = vpop.eup %7264  ;;  %v12640_v2 = vld [vmem:[#allocation24_spill] sm:$0xff] }
 0x16a   : > { %v1758_v4 = vadd.f32 %v1662_v3, %v12633_v47  ;;  %v1686_v30 = vmul.f32 %v8663_v44, %v1685_v5  ;;  %v1696_v19 = vand.u32 2147483647, %v8675_v16  ;;  %v1726_v59 = vadd.f32 1.0, %v12636_v1  ;;  %v7267_v60 = vpop.eup %7266 }
 0x16b   : > { %v1313_v56 = vmax.f32 %v12637_v34, 0.0  ;;  %v1674_v63 = vmul.f32 0.6931472, %v7265_v40  ;;  %vm8939_vm3 = vcmp.lt.f32.partialorder %v1687_v48, 0.0004427343  ;;  %v1703_v23 = vadd.f32 1.0, %v1702_v17 }
 0x16c   : > { %v1794_v31 = vpack.c.bf16 %v1758_v4, %v1757_v33  ;;  %v12641_v13 = vmax.f32 %v12640_v2, 0.0  ;;  %v1683_v54 = vmul.f32 0.6931472, %v7267_v60  ;;  %v1711_v44 = vmul.f32 -0.5, %v8855_v62  ;;  %v7129_v2 = vld [vmem:[%s12444_s9 + $0x10] sm:$0xff]  }
 0x16d   : > { %7276 = vlog2.f32 %v1726_v59  ;;  %v1680_v50 = vsel %vm8928_vm15, %v1677_v25, %v1674_v63  ;;  %v1695_v38 = vmul.f32 %v8675_v16, %v1694_v10  ;;  %v1705_v57 = vand.u32 2147483647, %v12620_v20  ;;  %v7269_v9 = vpop.eup %7268  ;;  %v12650_v10 = vld [vmem:[#allocation29_spill] sm:$0xff]  ;;  %v12651_v63 = vld [vmem:[#allocation2_spill] sm:$0xff] }
 0x16e   : > { %6876 = vmatmul.mubr.bf16.gmra.mxu0 %v1794_v31  ;;  %v1759_v7 = vadd.f32 %v1671_v0, %v12641_v13  ;;  %v1720_v15 = vmul.f32 -0.5, %v12629_v12  ;;  %v1314_v14 = vmax.f32 %v12642_v29, 0.0  ;;  %v12644_v61 = vmax.f32 %v12643_v6, 0.0  ;;  %v7130_v13 = vld [vmem:[%s12444_s9 + $0x8] sm:$0xff]  }
 0x16f   : > { %v1689_v22 = vsel %vm8939_vm3, %v1686_v30, %v1683_v54  ;;  %vm1697_vm4 = vcmp.lt.f32.partialorder %v1696_v19, 0.0004427343  ;;  %v1692_v53 = vmul.f32 0.6931472, %v7269_v9  ;;  %v1704_v27 = vmul.f32 %v12620_v20, %v1703_v23  ;;  %v12647_v20 = vld [vmem:[#allocation28_spill] sm:$0xff]  ;;  %v7128_v23 = vld [vmem:[%s12444_s9 + $0x18] sm:$0xff]  }
 0x170   : > { %v1760_v45 = vadd.f32 %v1680_v50, %v12644_v61  ;;  %v1761_v52 = vadd.f32 %v1689_v22, %v1313_v56  ;;  %v1712_v16 = vadd.f32 1.0, %v1711_v44  ;;  %v1729_v8 = vmul.f32 -0.5, %v12636_v1  ;;  %v8997_v50 = vld [vmem:[%s12443_s8] ss:$0 sm:$0xff] }
 0x171   : > { %v7271_v41 = vpop.eup %7270  ;;  %v1698_v35 = vsel %vm1697_vm4, %v1695_v38, %v1692_v53  ;;  %vm8958_vm5 = vcmp.lt.f32.partialorder %v1705_v57, 0.0004427343  ;;  %v1714_v55 = vand.u32 2147483647, %v8855_v62  ;;  %v1721_v42 = vadd.f32 1.0, %v1720_v15 }
 0x172   : > { %v1795_v18 = vpack.c.bf16 %v1760_v45, %v1759_v7  ;;  %v1762_v36 = vadd.f32 %v1698_v35, %v1314_v14  ;;  %v1701_v37 = vmul.f32 0.6931472, %v7271_v41  ;;  %v1723_v58 = vand.u32 2147483647, %v12629_v12  ;;  %v7131_v7 = vld [vmem:[%s12444_s9] sm:$0xff]  }
 0x173   : > { %v1315_v51 = vmax.f32 %v12647_v20, 0.0  ;;  %v1713_v48 = vmul.f32 %v8855_v62, %v1712_v16  ;;  %v1730_v32 = vadd.f32 1.0, %v1729_v8  ;;  %v1316_v17 = vmax.f32 %v12648_v39, 0.0 }
 0x174   : > { %6879 = vmatprep.mubr.bf16.mxu0 %v1795_v18  ;;  %v1796_v43 = vpack.c.bf16 %v1762_v36, %v1761_v52  ;;  %v1707_v5 = vsel %vm8958_vm5, %v1704_v27, %v1701_v37  ;;  %vm1715_vm6 = vcmp.lt.f32.partialorder %v1714_v55, 0.0004427343  ;;  %v1722_v46 = vmul.f32 %v12629_v12, %v1721_v42 }
 0x175   : > { %v7273_v3 = vpop.eup %7272  ;;  %v1732_v21 = vand.u32 2147483647, %v12636_v1  ;;  %vm1724_vm7 = vcmp.lt.f32.partialorder %v1723_v58, 0.0004427343  ;;  %v1317_v47 = vmax.f32 %v12649_v26, 0.0  ;;  %v1763_v4 = vadd.f32 %v1707_v5, %v1315_v51 }
 0x176   : > { %v7275_v28 = vpop.eup %7274  ;;  %6880 = vmatmul.mubr.bf16.gmra.mxu0 %v1796_v43  ;;  %v1710_v33 = vmul.f32 0.6931472, %v7273_v3  ;;  %v1731_v62 = vmul.f32 %v12636_v1, %v1730_v32  ;;  %v1318_v40 = vmax.f32 %v12650_v10, 0.0  ;;  %v7126_v1 = vld [vmem:[%s12444_s9 + $0x28] sm:$0xff]  }
 0x177   : > { %v1719_v11 = vmul.f32 0.6931472, %v7275_v28  ;;  %vm1733_vm8 = vcmp.lt.f32.partialorder %v1732_v21, 0.0004427343  ;;  %6891 = vmatprep.subr.bf16.mxu1 %v7126_v1 }
 0x178   : > { %v1716_v0 = vsel %vm1715_vm6, %v1713_v48, %v1710_v33  ;;  %6892 = vmatpush3.bf16.msra.mxu1 %v7126_v1 }
 0x179   : > { %v1764_v31 = vadd.f32 %v1716_v0, %v1316_v17  ;;  %v1725_v30 = vsel %vm1724_vm7, %v1722_v46, %v1719_v11  ;;  %6893 = vmatprep.subr.bf16.mxu1 %v7127_v49 }
 0x17a   : > { %v7277_v25 = vpop.eup %7276  ;;  %v1765_v59 = vadd.f32 %v1725_v30, %v1317_v47 }
 0x17b   : > { %v1728_v12 = vmul.f32 0.6931472, %v7277_v25  ;;  %v1797_v19 = vpack.c.bf16 %v1764_v31, %v1763_v4 }
 0x17c   : > { %6894 = vmatpush3.bf16.msra.mxu1 %v7127_v49 }
 0x17d   : > { %v1734_v60 = vsel %vm1733_vm8, %v1731_v62, %v1728_v12  ;;  %6883 = vmatprep.mubr.bf16.mxu0 %v1797_v19  ;;  %6895 = vmatprep.subr.bf16.mxu1 %v7128_v23 }
 0x17e   : > { %v1766_v34 = vadd.f32 %v1734_v60, %v1318_v40 }
 0x180   : > { %v1798_v56 = vpack.c.bf16 %v1766_v34, %v1765_v59  ;;  %6896 = vmatpush3.bf16.msra.mxu1 %v7128_v23 }
 0x181   : > { %6897 = vmatprep.subr.bf16.mxu1 %v7129_v2 }
 0x182   : > { %6884 = vmatmul.mubr.bf16.gmra.mxu0 %v1798_v56 }
 0x183   : > { %6937 = vmatprep.mubr.msk.bf16.mxu0 %vm800_vm1, %v12651_v63 }
 0x184   : > { %6898 = vmatpush3.bf16.msra.mxu1 %v7129_v2 }
 0x185   : > { %6899 = vmatprep.subr.bf16.mxu1 %v7130_v13 }
 0x188   : > { %6900 = vmatpush3.bf16.msra.mxu1 %v7130_v13 }
 0x189   : > { %6901 = vmatprep.subr.bf16.mxu1 %v7131_v7 }
 0x18c   : > { %6902 = vmatpush3.bf16.msra.mxu1 %v7131_v7 }
 0x1f3   : > { %v6857_v54 = vpop.f32.mrf.mxu0 }
 0x1f4   : > { %v9000_v57 = vadd.f32 %v6857_v54, %v8997_v50 }
 0x1f5   : > { %v1888_v44 = vpop.f32.mrf.mxu0 }
 0x1f6   : > { %v9006_v9 = vadd.f32 %v8997_v50, %v1888_v44  ;;  %v2049_v29 = vand.u32 2147483647, %v9000_v57 }
 0x1f7   : > { %v6858_v38 = vpop.f32.mrf.mxu0 }
 0x1f8   : > { %v9003_v15 = vadd.f32 %v6858_v38, %v8997_v50  ;;  %v2047_v61 = vand.u32 2147483647, %v9006_v9  ;;  %v2081_v22 = vsub.f32 0.0, %v2049_v29  ;;  %v2017_v29 = vmax.f32 %v9000_v57, 0.0 }
 0x1f9   : > { %v1891_v14 = vpop.f32.mrf.mxu0 }
 0x1fa   : > { %v2050_v6 = vand.u32 2147483647, %v9003_v15  ;;  %v9012_v45 = vadd.f32 %v8997_v50, %v1891_v14  ;;  %v2079_v18 = vsub.f32 0.0, %v2047_v61  ;;  %v2115_v41 = vmul.f32 1.442695, %v2081_v22 }
 0x1fc   : > { %v2082_v27 = vsub.f32 0.0, %v2050_v6  ;;  %v2048_v16 = vand.u32 2147483647, %v9012_v45  ;;  %v2111_v55 = vmul.f32 1.442695, %v2079_v18  ;;  %7278 = vpow2.f32 %v2115_v41 }
 0x1fd   : > { %v2018_v18 = vmax.f32 %v9003_v15, 0.0 }
 0x1fe   : > { %v2117_v24 = vmul.f32 1.442695, %v2082_v27  ;;  %v2080_v36 = vsub.f32 0.0, %v2048_v16 }
 0x200   : > { %7280 = vpow2.f32 %v2117_v24  ;;  %v2113_v43 = vmul.f32 1.442695, %v2080_v36 }
 0x201   : > { %v6861_v53 = vpop.f32.mrf.mxu0  ;;  %7282 = vpow2.f32 %v2111_v55 }
 0x202   : > { %v9016_v8 = vadd.f32 %v6861_v53, %v8997_v50  ;;  %7284 = vpow2.f32 %v2113_v43  ;;  %v2015_v53 = vmax.f32 %v9006_v9, 0.0 }
 0x203   : > { %v1904_v52 = vpop.f32.mrf.mxu0 }
 0x204   : > { %v2053_v37 = vand.u32 2147483647, %v9016_v8  ;;  %v9020_v20 = vadd.f32 %v8997_v50, %v1904_v52 }
 0x205   : > { %v6862_v35 = vpop.f32.mrf.mxu0 }
 0x206   : > { %v9023_v51 = vadd.f32 %v6862_v35, %v8997_v50  ;;  %v2085_v5 = vsub.f32 0.0, %v2053_v37  ;;  %v2051_v32 = vand.u32 2147483647, %v9020_v20  ;;  %v2016_v35 = vmax.f32 %v9012_v45, 0.0 }
 0x207   : > { %v1907_v42 = vpop.f32.mrf.mxu0 }
 0x208   : > { %v2054_v3 = vand.u32 2147483647, %v9023_v51  ;;  %v2123_v39 = vmul.f32 1.442695, %v2085_v5  ;;  %v9028_v17 = vadd.f32 %v8997_v50, %v1907_v42  ;;  %v2083_v21 = vsub.f32 0.0, %v2051_v32 }
 0x209   : > { %v9031_v47 = vpop.eup %7278  ;;  %v2021_v32 = vmax.f32 %v9016_v8, 0.0 }
 0x20a   : > { %v2086_v28 = vsub.f32 0.0, %v2054_v3  ;;  %7286 = vpow2.f32 %v2123_v39  ;;  %v2052_v33 = vand.u32 2147483647, %v9028_v17  ;;  %v2119_v4 = vmul.f32 1.442695, %v2083_v21 }
 0x20b   : > { %v6865_v58 = vpop.f32.mrf.mxu0  ;;  %v2193_v10 = vadd.f32 1.0, %v9031_v47  ;;  %v2196_v14 = vmul.f32 -0.5, %v9031_v47  ;;  %v2199_v22 = vand.u32 2147483647, %v9031_v47  ;;  %v2019_v3 = vmax.f32 %v9020_v20, 0.0 }
 0x20c   : > { %v9034_v11 = vadd.f32 %v6865_v58, %v8997_v50  ;;  %v2125_v62 = vmul.f32 1.442695, %v2086_v28  ;;  %v2084_v40 = vsub.f32 0.0, %v2052_v33  ;;  %7288 = vpow2.f32 %v2119_v4 }
 0x20d   : > { %v1920_v48 = vpop.f32.mrf.mxu0  ;;  %v9036_v0 = vpop.eup %7280  ;;  %v2197_v37 = vadd.f32 1.0, %v2196_v14  ;;  %v2022_v39 = vmax.f32 %v9023_v51, 0.0  ;;  %v2020_v4 = vmax.f32 %v9028_v17, 0.0  ;;  %vm9090_vm9 = vcmp.lt.f32.partialorder %v2199_v22, 0.0004427343 }
 0x20e   : > { %v9038_v25 = vpop.eup %7282  ;;  %v9042_v31 = vadd.f32 %v8997_v50, %v1920_v48  ;;  %v2202_v12 = vadd.f32 1.0, %v9036_v0  ;;  %v2057_v19 = vand.u32 2147483647, %v9034_v11  ;;  %7290 = vpow2.f32 %v2125_v62 }
 0x20f   : > { %v6866_v46 = vpop.f32.mrf.mxu0  ;;  %v2175_v60 = vadd.f32 1.0, %v9038_v25  ;;  %v9050_v34 = vpop.eup %7284  ;;  %7292 = vlog2.f32 %v2193_v10  ;;  %v2121_v56 = vmul.f32 1.442695, %v2084_v40  ;;  %v2178_v27 = vmul.f32 -0.5, %v9038_v25 }
 0x210   : > { %v9047_v59 = vadd.f32 %v6866_v46, %v8997_v50  ;;  %v2055_v63 = vand.u32 2147483647, %v9042_v31  ;;  %7294 = vlog2.f32 %v2202_v12  ;;  %v2089_v49 = vsub.f32 0.0, %v2057_v19 }
 0x211   : > { %v1923_v26 = vpop.f32.mrf.mxu0  ;;  %7296 = vlog2.f32 %v2175_v60  ;;  %v2184_v2 = vadd.f32 1.0, %v9050_v34  ;;  %v2205_v52 = vmul.f32 -0.5, %v9036_v0  ;;  %v2187_v24 = vmul.f32 -0.5, %v9050_v34 }
 0x212   : > { %v2058_v23 = vand.u32 2147483647, %v9047_v59  ;;  %v9056_v13 = vadd.f32 %v8997_v50, %v1923_v26  ;;  %7298 = vpow2.f32 %v2121_v56  ;;  %v2087_v54 = vsub.f32 0.0, %v2055_v63 }
 0x213   : > { %v2131_v6 = vmul.f32 1.442695, %v2089_v49  ;;  %7300 = vlog2.f32 %v2184_v2  ;;  %v2181_v58 = vand.u32 2147483647, %v9038_v25  ;;  %v2179_v48 = vadd.f32 1.0, %v2178_v27 }
 0x214   : > { %v2090_v61 = vsub.f32 0.0, %v2058_v23  ;;  %v2056_v41 = vand.u32 2147483647, %v9056_v13  ;;  %v2127_v55 = vmul.f32 1.442695, %v2087_v54  ;;  %v2206_v21 = vadd.f32 1.0, %v2205_v52 }
 0x215   : > { %7302 = vpow2.f32 %v2131_v6  ;;  %v2208_v28 = vand.u32 2147483647, %v9036_v0  ;;  %v2188_v26 = vadd.f32 1.0, %v2187_v24  ;;  %vm9094_vm10 = vcmp.lt.f32.partialorder %v2181_v58, 0.0004427343 }
 0x216   : > { %v2133_v43 = vmul.f32 1.442695, %v2090_v61  ;;  %v2088_v33 = vsub.f32 0.0, %v2056_v41  ;;  %v2180_v63 = vmul.f32 %v9038_v25, %v2179_v48  ;;  %v2190_v49 = vand.u32 2147483647, %v9050_v34 }
 0x217   : > { %v9058_v7 = vpop.eup %7286  ;;  %v2207_v54 = vmul.f32 %v9036_v0, %v2206_v21  ;;  %vm9106_vm11 = vcmp.lt.f32.partialorder %v2208_v28, 0.0004427343  ;;  %v2025_v6 = vmax.f32 %v9034_v11, 0.0  ;;  %v9112_v22 = vmul.f32 %v9050_v34, %v2188_v26 }
 0x218   : > { %v6869_v30 = vpop.f32.mrf.mxu0  ;;  %v2229_v16 = vadd.f32 1.0, %v9058_v7  ;;  %v2129_v61 = vmul.f32 1.442695, %v2088_v33  ;;  %v2232_v25 = vmul.f32 -0.5, %v9058_v7  ;;  %vm9119_vm12 = vcmp.lt.f32.partialorder %v2190_v49, 0.0004427343 }
 0x219   : > { %v9061_v44 = vadd.f32 %v6869_v30, %v8997_v50  ;;  %v9078_v5 = vpop.eup %7288  ;;  %v2198_v30 = vmul.f32 %v9031_v47, %v2197_v37  ;;  %v2235_v33 = vand.u32 2147483647, %v9058_v7 }
 0x21a   : > { %v1936_v1 = vpop.f32.mrf.mxu0  ;;  %7304 = vlog2.f32 %v2229_v16  ;;  %v2211_v60 = vadd.f32 1.0, %v9078_v5  ;;  %v2214_v24 = vmul.f32 -0.5, %v9078_v5  ;;  %v2233_v28 = vadd.f32 1.0, %v2232_v25 }
 0x21b   : > { %v2061_v42 = vand.u32 2147483647, %v9061_v44  ;;  %v9083_v46 = vpop.eup %7290  ;;  %7306 = vpow2.f32 %v2127_v55  ;;  %v9103_v47 = vadd.f32 %v8997_v50, %v1936_v1  ;;  %vm9155_vm13 = vcmp.lt.f32.partialorder %v2235_v33, 0.0004427343 }
 0x21c   : > { %v9063_v38 = vpop.f32.mrf.mxu0  ;;  %v7293_v40 = vpop.eup %7292  ;;  %7308 = vpow2.f32 %v2133_v43  ;;  %v2238_v23 = vadd.f32 1.0, %v9083_v46  ;;  %v2241_v58 = vmul.f32 -0.5, %v9083_v46  ;;  %v9153_v12 = vmul.f32 %v9058_v7, %v2233_v28 }
 0x21d   : > { %v2093_v62 = vsub.f32 0.0, %v2061_v42  ;;  %v7295_v56 = vpop.eup %7294  ;;  %v2195_v41 = vmul.f32 0.6931472, %v7293_v40  ;;  %7310 = vlog2.f32 %v2211_v60  ;;  %v2059_v34 = vand.u32 2147483647, %v9103_v47 }
 0x21e   : > { %v1939_v36 = vpop.f32.mrf.mxu0  ;;  %v7297_v2 = vpop.eup %7296  ;;  %v2204_v0 = vmul.f32 0.6931472, %v7295_v56  ;;  %7312 = vlog2.f32 %v2238_v23  ;;  %v9126_v37 = vadd.f32 %v9063_v38, %v8997_v50  ;;  %v2215_v40 = vadd.f32 1.0, %v2214_v24 }
 0x21f   : > { %v2139_v52 = vmul.f32 1.442695, %v2093_v62  ;;  %v9116_v16 = vpop.eup %7298  ;;  %v2177_v55 = vmul.f32 0.6931472, %v7297_v2  ;;  %7314 = vpow2.f32 %v2129_v61  ;;  %v9131_v48 = vadd.f32 %v8997_v50, %v1939_v36 }
 0x220   : > { %v7301_v21 = vpop.eup %7300  ;;  %v2220_v26 = vadd.f32 1.0, %v9116_v16  ;;  %v2210_v38 = vsel %vm9106_vm11, %v2207_v54, %v2204_v0  ;;  %v2201_v36 = vsel %vm9090_vm9, %v2198_v30, %v2195_v41  ;;  %v2091_v2 = vsub.f32 0.0, %v2059_v34 }
 0x221   : > { %7316 = vpow2.f32 %v2139_v52  ;;  %v2183_v23 = vsel %vm9094_vm10, %v2180_v63, %v2177_v55  ;;  %v2062_v61 = vand.u32 2147483647, %v9126_v37  ;;  %v2186_v25 = vmul.f32 0.6931472, %v7301_v21 }
 0x222   : > { %v9139_v49 = vpop.eup %7302  ;;  %v2242_v52 = vadd.f32 1.0, %v2241_v58  ;;  %v2223_v54 = vmul.f32 -0.5, %v9116_v16  ;;  %v2060_v14 = vand.u32 2147483647, %v9131_v48  ;;  %v9150_v24 = vadd.f32 %v2210_v38, %v2018_v18 }
 0x223   : > { %v2217_v19 = vand.u32 2147483647, %v9078_v5  ;;  %7318 = vlog2.f32 %v2220_v26  ;;  %v9164_v55 = vadd.f32 %v2201_v36, %v2017_v29  ;;  %v9168_v15 = vadd.f32 %v2183_v23, %v2015_v53 }
 0x224   : > { %v9087_v10 = vpop.f32.mrf.mxu0  ;;  %v9171_v7 = vmul.f32 %v9078_v5, %v2215_v40  ;;  %v2265_v18 = vadd.f32 1.0, %v9139_v49  ;;  %v2244_v58 = vand.u32 2147483647, %v9083_v46  ;;  %v2135_v21 = vmul.f32 1.442695, %v2091_v2 }
 0x225   : > { %v2094_v28 = vsub.f32 0.0, %v2062_v61  ;;  %v2192_v57 = vsel %vm9119_vm12, %v9112_v22, %v2186_v25  ;;  %v9184_v9 = vmul.f32 %v9083_v46, %v2242_v52  ;;  %v2224_v29 = vadd.f32 1.0, %v2223_v54 }
 0x226   : > { %v1952_v1 = vpop.f32.mrf.mxu0  ;;  %v2092_v53 = vsub.f32 0.0, %v2060_v14  ;;  %v2226_v26 = vand.u32 2147483647, %v9116_v16  ;;  %vm9194_vm14 = vcmp.lt.f32.partialorder %v2217_v19, 0.0004427343  ;;  %7320 = vlog2.f32 %v2265_v18 }
 0x227   : > { %v7305_v0 = vpop.eup %7304  ;;  %v9178_v33 = vadd.f32 %v8997_v50, %v1952_v1  ;;  %v9192_v1 = vadd.f32 %v9087_v10, %v8997_v50  ;;  %v9204_v2 = vadd.f32 %v2192_v57, %v2016_v35  ;;  %7322 = vpow2.f32 %v2135_v21 }
 0x228   : > { %v6874_v62 = vpop.f32.mrf.mxu0  ;;  %v9160_v41 = vpop.eup %7306  ;;  %v2231_v36 = vmul.f32 0.6931472, %v7305_v0  ;;  %v2141_v10 = vmul.f32 1.442695, %v2094_v28  ;;  %v9208_v52 = vmul.f32 %v9116_v16, %v2224_v29  ;;  %v2268_v54 = vmul.f32 -0.5, %v9139_v49 }
 0x229   : > { %v9174_v34 = vpop.eup %7308  ;;  %v2247_v38 = vadd.f32 1.0, %v9160_v41  ;;  %v2063_v61 = vand.u32 2147483647, %v9178_v33  ;;  %v2137_v14 = vmul.f32 1.442695, %v2092_v53  ;;  %v9212_v0 = vadd.f32 %v6874_v62, %v8997_v50 }
 0x22a   : > { %v1955_v63 = vpop.f32.mrf.mxu0  ;;  %v2274_v46 = vadd.f32 1.0, %v9174_v34  ;;  %v7311_v23 = vpop.eup %7310  ;;  %vm9216_vm15 = vcmp.lt.f32.partialorder %v2244_v58, 0.0004427343  ;;  %v2271_v35 = vand.u32 2147483647, %v9139_v49  ;;  %v2237_v62 = vsel %vm9155_vm13, %v9153_v12, %v2231_v36 }
 0x22b   : > { %v9200_v42 = vadd.f32 %v8997_v50, %v1955_v63  ;;  %v7313_v25 = vpop.eup %7312  ;;  %7324 = vlog2.f32 %v2247_v38  ;;  %v2065_v58 = vand.u32 2147483647, %v9192_v1  ;;  %v2213_v57 = vmul.f32 0.6931472, %v7311_v23 }
 0x22c   : > { %v9214_v19 = vpop.eup %7314  ;;  %7326 = vlog2.f32 %v2274_v46  ;;  %v2250_v29 = vmul.f32 -0.5, %v9160_v41  ;;  %v2095_v53 = vsub.f32 0.0, %v2063_v61  ;;  %vm9231_vm3 = vcmp.lt.f32.partialorder %v2226_v26, 0.0004427343 }
 0x22d   : > { %v2064_v28 = vand.u32 2147483647, %v9200_v42  ;;  %7328 = vpow2.f32 %v2141_v10  ;;  %v2256_v16 = vadd.f32 1.0, %v9214_v19  ;;  %v2240_v30 = vmul.f32 0.6931472, %v7313_v25 }
 0x22e   : > { %v6877_v40 = vpop.f32.mrf.mxu0  ;;  %v9223_v21 = vpop.eup %7316  ;;  %7330 = vpow2.f32 %v2137_v14  ;;  %v2253_v36 = vand.u32 2147483647, %v9160_v41  ;;  %v2277_v46 = vmul.f32 -0.5, %v9174_v34  ;;  %v2269_v26 = vadd.f32 1.0, %v2268_v54 }
 0x22f   : > { %v2096_v63 = vsub.f32 0.0, %v2064_v28  ;;  %v2301_v23 = vadd.f32 1.0, %v9223_v21  ;;  %v2097_v56 = vsub.f32 0.0, %v2065_v58  ;;  %v2066_v60 = vand.u32 2147483647, %v9212_v0 }
 0x230   : > { %v1968_v18 = vpop.f32.mrf.mxu0  ;;  %v7319_v61 = vpop.eup %7318  ;;  %v9245_v14 = vadd.f32 %v2237_v62, %v2021_v32  ;;  %v2219_v25 = vsel %vm9194_vm14, %v9171_v7, %v2213_v57  ;;  %v2143_v28 = vmul.f32 1.442695, %v2095_v53  ;;  %v2280_v27 = vand.u32 2147483647, %v9174_v34 }
 0x231   : > { %v9237_v12 = vadd.f32 %v8997_v50, %v1968_v18  ;;  %v2145_v43 = vmul.f32 1.442695, %v2096_v63  ;;  %v2251_v18 = vadd.f32 1.0, %v2250_v29  ;;  %7332 = vlog2.f32 %v2256_v16 }
 0x232   : > { %v6878_v10 = vpop.f32.mrf.mxu0  ;;  %v2259_v5 = vmul.f32 -0.5, %v9214_v19  ;;  %v2222_v58 = vmul.f32 0.6931472, %v7319_v61  ;;  %vm9253_vm4 = vcmp.lt.f32.partialorder %v2271_v35, 0.0004427343  ;;  %v2278_v8 = vadd.f32 1.0, %v2277_v46 }
 0x233   : > { %v2067_v54 = vand.u32 2147483647, %v9237_v12  ;;  %7334 = vlog2.f32 %v2301_v23  ;;  %v9258_v32 = vadd.f32 %v6877_v40, %v8997_v50  ;;  %v2246_v22 = vsel %vm9216_vm15, %v9184_v9, %v2240_v30  ;;  %v7321_v57 = vpop.eup %7320 }
 0x234   : > { %v1971_v7 = vpop.f32.mrf.mxu0  ;;  %v2147_v16 = vmul.f32 1.442695, %v2097_v56  ;;  %v2098_v62 = vsub.f32 0.0, %v2066_v60  ;;  %7336 = vpow2.f32 %v2145_v43  ;;  %v2270_v29 = vmul.f32 %v9139_v49, %v2269_v26  ;;  %v9268_v46 = vpop.eup %7322 }
 0x235   : > { %v2028_v35 = vmax.f32 %v9131_v48, 0.0  ;;  %7338 = vpow2.f32 %v2143_v28  ;;  %v9266_v53 = vadd.f32 %v6878_v10, %v8997_v50  ;;  %v9272_v40 = vadd.f32 %v2219_v25, %v2019_v3 }
 0x236   : > { %v9275_v9 = vmul.f32 %v9160_v41, %v2251_v18  ;;  %v2260_v60 = vadd.f32 1.0, %v2259_v5  ;;  %v2099_v43 = vsub.f32 0.0, %v2067_v54  ;;  %v9279_v56 = vadd.f32 %v2246_v22, %v2022_v39  ;;  %v6881_v20 = vpop.f32.mrf.mxu0 }
 0x237   : > { %v2228_v49 = vsel %vm9231_vm3, %v9208_v52, %v2222_v58  ;;  %v2304_v45 = vmul.f32 -0.5, %v9223_v21  ;;  %v2069_v30 = vand.u32 2147483647, %v9258_v32  ;;  %v2267_v23 = vmul.f32 0.6931472, %v7321_v57 }
 0x238   : > { %v7325_v3 = vpop.eup %7324  ;;  %vm9286_vm5 = vcmp.lt.f32.partialorder %v2253_v36, 0.0004427343  ;;  %v9291_v5 = vmul.f32 %v9174_v34, %v2278_v8  ;;  %vm9293_vm6 = vcmp.lt.f32.partialorder %v2280_v27, 0.0004427343  ;;  %7340 = vpow2.f32 %v2147_v16  ;;  %v1984_v16 = vpop.f32.mrf.mxu0 }
 0x239   : > { %v2149_v39 = vmul.f32 1.442695, %v2098_v62  ;;  %v7327_v52 = vpop.eup %7326  ;;  %v2262_v38 = vand.u32 2147483647, %v9214_v19  ;;  %v2283_v10 = vadd.f32 1.0, %v9268_v46  ;;  %v2031_v61 = vmax.f32 %v9178_v33, 0.0 }
 0x23a   : > { %v2070_v36 = vand.u32 2147483647, %v9266_v53  ;;  %v9301_v26 = vpop.eup %7328  ;;  %v9305_v34 = vadd.f32 %v2228_v49, %v2020_v4  ;;  %v9308_v27 = vmul.f32 %v9214_v19, %v2260_v60  ;;  %v2151_v25 = vmul.f32 1.442695, %v2099_v43 }
 0x23b   : > { %v9311_v18 = vadd.f32 %v8997_v50, %v1971_v7  ;;  %v9313_v28 = vpop.eup %7330  ;;  %v2305_v54 = vadd.f32 1.0, %v2304_v45  ;;  %v2307_v58 = vand.u32 2147483647, %v9223_v21  ;;  %v2101_v8 = vsub.f32 0.0, %v2069_v30 }
 0x23c   : > { %v9317_v22 = vadd.f32 %v6881_v20, %v8997_v50  ;;  %v2273_v17 = vsel %vm9253_vm4, %v2270_v29, %v2267_v23  ;;  %v2249_v4 = vmul.f32 0.6931472, %v7325_v3  ;;  %7342 = vpow2.f32 %v2149_v39 }
 0x23d   : > { %v2276_v62 = vmul.f32 0.6931472, %v7327_v52  ;;  %vm9322_vm7 = vcmp.lt.f32.partialorder %v2262_v38, 0.0004427343  ;;  %7344 = vlog2.f32 %v2283_v10  ;;  %v2310_v57 = vadd.f32 1.0, %v9301_v26  ;;  %v6882_v10 = vpop.f32.mrf.mxu0 }
 0x23e   : > { %v2102_v60 = vsub.f32 0.0, %v2070_v36  ;;  %v2292_v43 = vadd.f32 1.0, %v9313_v28  ;;  %7346 = vpow2.f32 %v2151_v25  ;;  %v2068_v49 = vand.u32 2147483647, %v9311_v18  ;;  %v7333_v29 = vpop.eup %7332 }
 0x23f   : > { %v9330_v63 = vadd.f32 %v8997_v50, %v1984_v16  ;;  %v2306_v45 = vmul.f32 %v9223_v21, %v2305_v54  ;;  %vm9333_vm8 = vcmp.lt.f32.partialorder %v2307_v58, 0.0004427343  ;;  %v2155_v20 = vmul.f32 1.442695, %v2101_v8 }
 0x240   : > { %v2073_v3 = vand.u32 2147483647, %v9317_v22  ;;  %v7335_v23 = vpop.eup %7334  ;;  %v9340_v39 = vadd.f32 %v2273_v17, %v2025_v6  ;;  %v2286_v52 = vmul.f32 -0.5, %v9268_v46  ;;  %v2100_v38 = vsub.f32 0.0, %v2068_v49 }
 0x241   : > { %v2511_v36 = vpack.c.bf16 %v9204_v2, %v9168_v15  ;;  %v9345_v21 = vpop.eup %7336  ;;  %v2255_v25 = vsel %vm9286_vm5, %v9275_v9, %v2249_v4  ;;  %v2282_v54 = vsel %vm9293_vm6, %v9291_v5, %v2276_v62  ;;  %7348 = vlog2.f32 %v2310_v57  ;;  %v1987_v62 = vpop.f32.mrf.mxu0 }
 0x242   : > { %v2157_v11 = vmul.f32 1.442695, %v2102_v60  ;;  %v9353_v6 = vpop.eup %7338  ;;  %v2258_v58 = vmul.f32 0.6931472, %v7333_v29  ;;  %7350 = vlog2.f32 %v2292_v43  ;;  %v2153_v8 = vmul.f32 1.442695, %v2100_v38 }
 0x243   : > { %v2071_v16 = vand.u32 2147483647, %v9330_v63  ;;  %6903 = vmatprep.mubr.bf16.mxu1 %v2511_v36  ;;  %v2303_v15 = vmul.f32 0.6931472, %v7335_v23  ;;  %v2313_v2 = vmul.f32 -0.5, %v9301_v26  ;;  %7352 = vpow2.f32 %v2155_v20  ;;  %v6885_v7 = vpop.f32.mrf.mxu0 }
 0x244   : > { %v2105_v41 = vsub.f32 0.0, %v2073_v3  ;;  %v12678_v9 = vpack.c.bf16 %v9150_v24, %v9164_v55  ;;  %v12679_v5 = vmax.f32 %v9042_v31, 0.0  ;;  %v2287_v17 = vadd.f32 1.0, %v2286_v52 }
 0x245   : > { %v2328_v4 = vadd.f32 1.0, %v9345_v21  ;;  %7354 = vpow2.f32 %v2153_v8  ;;  %v9365_v57 = vpop.eup %7340  ;;  %v2289_v60 = vand.u32 2147483647, %v9268_v46  ;;  %v2319_v43 = vadd.f32 1.0, %v9353_v6 }
 0x246   : > { %6904 = vmatmul.mubr.bf16.vlgmr.msra.gmra.mxu1 %v12678_v9  ;;  %v9362_v51 = vadd.f32 %v2255_v25, %v12679_v5  ;;  %7356 = vpow2.f32 %v2157_v11  ;;  %v9370_v49 = vadd.f32 %v6882_v10, %v8997_v50  ;;  %v12680_v24 = vmax.f32 %v9047_v59, 0.0 }
 0x247   : > { %v2264_v55 = vsel %vm9322_vm7, %v9308_v27, %v2258_v58  ;;  %v2032_v29 = vmax.f32 %v9200_v42, 0.0  ;;  %v2103_v20 = vsub.f32 0.0, %v2071_v16  ;;  %v2309_v3 = vsel %vm9333_vm8, %v2306_v45, %v2303_v15 }
 0x248   : > { %v9374_v31 = vadd.f32 %v2282_v54, %v12680_v24  ;;  %v2314_v23 = vadd.f32 1.0, %v2313_v2  ;;  %v2295_v52 = vmul.f32 -0.5, %v9313_v28  ;;  %v2163_v38 = vmul.f32 1.442695, %v2105_v41 }
 0x249   : > { %v9384_v10 = vmul.f32 %v9268_v46, %v2287_v17  ;;  %v2316_v59 = vand.u32 2147483647, %v9301_v26  ;;  %v2337_v36 = vadd.f32 1.0, %v9365_v57  ;;  %7358 = vlog2.f32 %v2328_v4  ;;  %v9388_v27 = vpop.eup %7342 }
 0x24a   : > { %v12681_v25 = vmax.f32 %v9056_v13, 0.0  ;;  %vm9394_vm9 = vcmp.lt.f32.partialorder %v2289_v60, 0.0004427343  ;;  %v2340_v30 = vmul.f32 -0.5, %v9365_v57  ;;  %7360 = vlog2.f32 %v2319_v43  ;;  %v7345_v11 = vpop.eup %7344 }
 0x24b   : > { %v2074_v46 = vand.u32 2147483647, %v9370_v49  ;;  %v12684_v58 = vmax.f32 %v9061_v44, 0.0  ;;  %v2298_v16 = vand.u32 2147483647, %v9313_v28  ;;  %v9406_v13 = vadd.f32 %v8997_v50, %v1987_v62  ;;  %v9408_v2 = vpop.eup %7346 }
 0x24c   : > { %v9392_v54 = vadd.f32 %v2264_v55, %v12681_v25  ;;  %v2159_v15 = vmul.f32 1.442695, %v2103_v20  ;;  %v9411_v41 = vmul.f32 %v9301_v26, %v2314_v23  ;;  %v2296_v9 = vadd.f32 1.0, %v2295_v52 }
 0x24d   : > { %v9402_v8 = vadd.f32 %v2309_v3, %v12684_v58  ;;  %7362 = vpow2.f32 %v2163_v38  ;;  %v9414_v5 = vadd.f32 %v6885_v7, %v8997_v50  ;;  %vm9416_vm10 = vcmp.lt.f32.partialorder %v2316_v59, 0.0004427343 }
 0x24e   : > { %7364 = vlog2.f32 %v2337_v36  ;;  %v2343_v17 = vand.u32 2147483647, %v9365_v57  ;;  %v2322_v4 = vmul.f32 -0.5, %v9353_v6  ;;  %v2346_v62 = vadd.f32 1.0, %v9388_v27  ;;  %v7349_v55 = vpop.eup %7348 }
 0x24f   : > { %v2285_v60 = vmul.f32 0.6931472, %v7345_v11  ;;  %v9423_v43 = vadd.f32 1.0, %v2340_v30  ;;  %v2106_v24 = vsub.f32 0.0, %v2074_v46  ;;  %vm9426_vm11 = vcmp.lt.f32.partialorder %v2298_v16, 0.0004427343  ;;  %v7351_v38 = vpop.eup %7350  ;;  %v2000_v30 = vpop.f32.mrf.mxu0 }
 0x250   : > { %v2349_v3 = vmul.f32 -0.5, %v9388_v27  ;;  %v2355_v23 = vadd.f32 1.0, %v9408_v2  ;;  %7366 = vpow2.f32 %v2159_v15  ;;  %v2072_v52 = vand.u32 2147483647, %v9406_v13  ;;  %v9436_v46 = vpop.eup %7352 }
 0x251   : > { %v2297_v59 = vmul.f32 %v9313_v28, %v2296_v9  ;;  %v2325_v36 = vand.u32 2147483647, %v9353_v6  ;;  %v2165_v7 = vmul.f32 1.442695, %v2106_v24  ;;  %v2077_v25 = vand.u32 2147483647, %v9414_v5 }
 0x252   : > { %v2323_v11 = vadd.f32 1.0, %v2322_v4  ;;  %7368 = vlog2.f32 %v2346_v62  ;;  %v2104_v58 = vsub.f32 0.0, %v2072_v52  ;;  %v2513_v16 = vpack.c.bf16 %v9305_v34, %v9272_v40  ;;  %v9440_v15 = vpop.eup %7354 }
 0x253   : > { %v2312_v19 = vmul.f32 0.6931472, %v7349_v55  ;;  %v2331_v26 = vmul.f32 -0.5, %v9345_v21  ;;  %7370 = vpow2.f32 %v2165_v7  ;;  %v2514_v28 = vpack.c.bf16 %v9279_v56, %v9245_v14  ;;  %v9445_v9 = vpop.eup %7356  ;;  %v6886_v7 = vpop.f32.mrf.mxu0 }
 0x254   : > { %v2291_v4 = vsel %vm9394_vm9, %v9384_v10, %v2285_v60  ;;  %v2350_v62 = vadd.f32 1.0, %v2349_v3  ;;  %7372 = vlog2.f32 %v2355_v23  ;;  %v2364_v24 = vadd.f32 1.0, %v9440_v15  ;;  %6907 = vmatprep.mubr.bf16.mxu1 %v2513_v16 }
 0x255   : > { %v2294_v40 = vmul.f32 0.6931472, %v7351_v38  ;;  %v2373_v34 = vadd.f32 1.0, %v9436_v46  ;;  %v2109_v55 = vsub.f32 0.0, %v2077_v25  ;;  %v9453_v52 = vadd.f32 %v8997_v50, %v2000_v30  ;;  %6908 = vmatmul.mubr.bf16.gmra.mxu1 %v2514_v28 }
 0x256   : > { %vm9455_vm12 = vcmp.lt.f32.partialorder %v2325_v36, 0.0004427343  ;;  %v2334_v56 = vand.u32 2147483647, %v9345_v21  ;;  %7374 = vlog2.f32 %v2364_v24  ;;  %v2161_v10 = vmul.f32 1.442695, %v2104_v58  ;;  %v7359_v45 = vpop.eup %7358 }
 0x257   : > { %v2318_v60 = vsel %vm9416_vm10, %v9411_v41, %v2312_v19  ;;  %v2352_v3 = vand.u32 2147483647, %v9388_v27  ;;  %v2332_v23 = vadd.f32 1.0, %v2331_v26  ;;  %v2382_v38 = vadd.f32 1.0, %v9445_v9  ;;  %v7361_v25 = vpop.eup %7360 }
 0x258   : > { %v12691_v36 = vmax.f32 %v9103_v47, 0.0  ;;  %v2324_v16 = vmul.f32 %v9353_v6, %v2323_v11  ;;  %v9469_v28 = vmul.f32 %v9388_v27, %v2350_v62  ;;  %v9472_v58 = vadd.f32 %v6886_v7, %v8997_v50  ;;  %v2003_v62 = vpop.f32.mrf.mxu0 }
 0x259   : > { %v2300_v19 = vsel %vm9426_vm11, %v2297_v59, %v2294_v40  ;;  %7376 = vlog2.f32 %v2373_v34  ;;  %v2171_v41 = vmul.f32 1.442695, %v2109_v55  ;;  %v2075_v44 = vand.u32 2147483647, %v9453_v52 }
 0x25a   : > { %v2475_v30 = vadd.f32 %v2291_v4, %v12691_v36  ;;  %v9477_v26 = vpop.eup %7362  ;;  %v12692_v47 = vmax.f32 %v9126_v37, 0.0  ;;  %v2330_v6 = vmul.f32 0.6931472, %v7359_v45  ;;  %vm9483_vm13 = vcmp.lt.f32.partialorder %v2334_v56, 0.0004427343 }
 0x25b   : > { %7378 = vpow2.f32 %v2161_v10  ;;  %v7365_v24 = vpop.eup %7364  ;;  %v2321_v20 = vmul.f32 0.6931472, %v7361_v25  ;;  %v2333_v59 = vmul.f32 %v9345_v21, %v2332_v23  ;;  %v2107_v40 = vsub.f32 0.0, %v2075_v44 }
 0x25c   : > { %v9481_v4 = vadd.f32 %v2318_v60, %v12692_v47  ;;  %7380 = vlog2.f32 %v2382_v38  ;;  %v2476_v34 = vadd.f32 %v2300_v19, %v2028_v35  ;;  %v2367_v37 = vmul.f32 -0.5, %v9440_v15 }
 0x25d   : > { %7382 = vpow2.f32 %v2171_v41  ;;  %v2078_v55 = vand.u32 2147483647, %v9472_v58  ;;  %v9492_v7 = vpop.eup %7366  ;;  %v2409_v56 = vadd.f32 1.0, %v9477_v26  ;;  %v2167_v10 = vmul.f32 1.442695, %v2107_v40 }
 0x25e   : > { %v9496_v45 = vadd.f32 %v8997_v50, %v2003_v62  ;;  %v2515_v21 = vpack.c.bf16 %v9392_v54, %v9362_v51  ;;  %v2336_v48 = vsel %vm9483_vm13, %v2333_v59, %v2330_v6  ;;  %v2358_v35 = vmul.f32 -0.5, %v9408_v2 }
 0x25f   : > { %v2110_v60 = vsub.f32 0.0, %v2078_v55  ;;  %v2516_v23 = vpack.c.bf16 %v9374_v31, %v9340_v39  ;;  %v7369_v38 = vpop.eup %7368  ;;  %v2327_v25 = vsel %vm9455_vm12, %v2324_v16, %v2321_v20  ;;  %v2370_v36 = vand.u32 2147483647, %v9440_v15 }
 0x260   : > { %7384 = vpow2.f32 %v2167_v10  ;;  %v2076_v50 = vand.u32 2147483647, %v9496_v45  ;;  %6911 = vmatprep.mubr.bf16.mxu1 %v2515_v21  ;;  %v9509_v51 = vpop.eup %7370  ;;  %v2368_v54 = vadd.f32 1.0, %v2367_v37  ;;  %v2391_v19 = vadd.f32 1.0, %v9492_v7 }
 0x261   : > { %v2173_v41 = vmul.f32 1.442695, %v2110_v60  ;;  %6912 = vmatmul.mubr.bf16.gmra.mxu1 %v2516_v23  ;;  %v2517_v44 = vpack.c.bf16 %v2476_v34, %v2475_v30  ;;  %v7373_v47 = vpop.eup %7372  ;;  %v2480_v39 = vadd.f32 %v2336_v48, %v2032_v29  ;;  %7386 = vlog2.f32 %v2409_v56 }
 0x262   : > { %v2418_v31 = vadd.f32 1.0, %v9509_v51  ;;  %v2108_v14 = vsub.f32 0.0, %v2076_v50  ;;  %v2359_v16 = vadd.f32 1.0, %v2358_v35  ;;  %v2361_v6 = vand.u32 2147483647, %v9408_v2 }
 0x263   : > { %v2385_v11 = vmul.f32 -0.5, %v9445_v9  ;;  %7388 = vpow2.f32 %v2173_v41  ;;  %6915 = vmatprep.mubr.bf16.mxu1 %v2517_v44  ;;  %v7375_v62 = vpop.eup %7374  ;;  %v2479_v20 = vadd.f32 %v2327_v25, %v2031_v61  ;;  %v2348_v30 = vmul.f32 0.6931472, %v7369_v38 }
 0x264   : > { %7390 = vlog2.f32 %v2418_v31  ;;  %v2169_v59 = vmul.f32 1.442695, %v2108_v14  ;;  %v2357_v42 = vmul.f32 0.6931472, %v7373_v47  ;;  %v2366_v29 = vmul.f32 0.6931472, %v7375_v62 }
 0x265   : > { %v2369_v40 = vmul.f32 %v9440_v15, %v2368_v54  ;;  %7392 = vlog2.f32 %v2391_v19  ;;  %v2339_v34 = vmul.f32 0.6931472, %v7365_v24  ;;  %vm9520_vm14 = vcmp.lt.f32.partialorder %v2370_v36, 0.0004427343 }
 0x266   : > { %7394 = vpow2.f32 %v2169_v59  ;;  %v2519_v55 = vpack.c.bf16 %v2480_v39, %v2479_v20  ;;  %v7377_v56 = vpop.eup %7376  ;;  %vm9526_vm15 = vcmp.lt.f32.partialorder %v2352_v3, 0.0004427343  ;;  %v2360_v61 = vmul.f32 %v9408_v2, %v2359_v16 }
 0x267   : > { %v2372_v15 = vsel %vm9520_vm14, %v2369_v40, %v2366_v29  ;;  %v2518_v24 = vpack.c.bf16 %v9481_v4, %v9402_v8  ;;  %v2342_v21 = vmul.f32 %v9365_v57, %v9423_v43  ;;  %v2354_v27 = vsel %vm9526_vm15, %v9469_v28, %v2348_v30 }
 0x268   : > { %v9535_v10 = vpop.eup %7378  ;;  %v2376_v3 = vmul.f32 -0.5, %v9436_v46  ;;  %vm9543_vm3 = vcmp.lt.f32.partialorder %v2361_v6, 0.0004427343  ;;  %vm9549_vm4 = vcmp.lt.f32.partialorder %v2343_v17, 0.0004427343  ;;  %v2386_v4 = vadd.f32 1.0, %v2385_v11 }
 0x269   : > { %v7381_v2 = vpop.eup %7380  ;;  %v2363_v43 = vsel %vm9543_vm3, %v2360_v61, %v2357_v42  ;;  %v2400_v35 = vadd.f32 1.0, %v9535_v10  ;;  %6916 = vmatmul.mubr.bf16.gmra.mxu1 %v2518_v24  ;;  %v2033_v60 = vmax.f32 %v9192_v1, 0.0  ;;  %v2345_v23 = vsel %vm9549_vm4, %v2342_v21, %v2339_v34 }
 0x26a   : > { %v9556_v28 = vpop.eup %7382  ;;  %v2035_v57 = vmax.f32 %v9237_v12, 0.0  ;;  %v12703_v17 = vmax.f32 %v9311_v18, 0.0  ;;  %6919 = vmatprep.mubr.bf16.mxu1 %v2519_v55  ;;  %v12704_v25 = vmax.f32 %v9212_v0, 0.0  ;;  %v2379_v50 = vand.u32 2147483647, %v9436_v46 }
 0x26b   : > { %v2388_v54 = vand.u32 2147483647, %v9445_v9  ;;  %7396 = vlog2.f32 %v2400_v35  ;;  %v2037_v19 = vmax.f32 %v9258_v32, 0.0  ;;  %v2377_v1 = vadd.f32 1.0, %v2376_v3 }
 0x26c   : > { %v2484_v38 = vadd.f32 %v2372_v15, %v12703_v17  ;;  %v2482_v36 = vadd.f32 %v2354_v27, %v12704_v25  ;;  %v2483_v41 = vadd.f32 %v2363_v43, %v2035_v57  ;;  %v2384_v44 = vmul.f32 0.6931472, %v7381_v2 }
 0x26d   : > { %v9569_v47 = vpop.eup %7384  ;;  %v2481_v12 = vadd.f32 %v2345_v23, %v2033_v60  ;;  %v2038_v18 = vmax.f32 %v9266_v53, 0.0  ;;  %v2387_v39 = vmul.f32 %v9445_v9, %v2386_v4  ;;  %v2445_v0 = vadd.f32 1.0, %v9556_v28 }
 0x26e   : > { %v2375_v31 = vmul.f32 0.6931472, %v7377_v56  ;;  %v2421_v14 = vmul.f32 -0.5, %v9509_v51  ;;  %v2427_v16 = vadd.f32 1.0, %v9569_v47  ;;  %v2521_v6 = vpack.c.bf16 %v2484_v38, %v2483_v41  ;;  %v7387_v11 = vpop.eup %7386 }
 0x26f   : > { %vm9576_vm5 = vcmp.lt.f32.partialorder %v2379_v50, 0.0004427343  ;;  %vm9580_vm6 = vcmp.lt.f32.partialorder %v2388_v54, 0.0004427343  ;;  %v2394_v53 = vmul.f32 -0.5, %v9492_v7  ;;  %v2520_v9 = vpack.c.bf16 %v2482_v36, %v2481_v12 }
 0x270   : > { %v9585_v20 = vpop.eup %7388  ;;  %v2378_v30 = vmul.f32 %v9436_v46, %v2377_v1  ;;  %v2390_v59 = vsel %vm9580_vm6, %v2387_v39, %v2384_v44  ;;  %v2412_v42 = vmul.f32 -0.5, %v9477_v26  ;;  %7398 = vlog2.f32 %v2427_v16 }
 0x271   : > { %v7391_v29 = vpop.eup %7390  ;;  %v2415_v40 = vand.u32 2147483647, %v9477_v26  ;;  %v2403_v34 = vmul.f32 -0.5, %v9535_v10  ;;  %7400 = vlog2.f32 %v2445_v0  ;;  %v2454_v37 = vadd.f32 1.0, %v9585_v20  ;;  %6920 = vmatmul.mubr.bf16.gmra.mxu1 %v2520_v9 }
 0x272   : > { %v7393_v55 = vpop.eup %7392  ;;  %v2381_v56 = vsel %vm9576_vm5, %v2378_v30, %v2375_v31  ;;  %v2039_v46 = vmax.f32 %v9330_v63, 0.0  ;;  %v2042_v33 = vmax.f32 %v9370_v49, 0.0  ;;  %v2422_v61 = vadd.f32 1.0, %v2421_v14  ;;  %6923 = vmatprep.mubr.bf16.mxu1 %v2521_v6 }
 0x273   : > { %v9598_v15 = vpop.eup %7394  ;;  %v2486_v24 = vadd.f32 %v2390_v59, %v2038_v18  ;;  %v2395_v21 = vadd.f32 1.0, %v2394_v53  ;;  %v2424_v27 = vand.u32 2147483647, %v9509_v51  ;;  %7402 = vlog2.f32 %v2454_v37 }
 0x274   : > { %v2413_v3 = vadd.f32 1.0, %v2412_v42  ;;  %v2397_v48 = vand.u32 2147483647, %v9492_v7  ;;  %v2420_v2 = vmul.f32 0.6931472, %v7391_v29  ;;  %v2436_v8 = vadd.f32 1.0, %v9598_v15 }
 0x275   : > { %v2485_v43 = vadd.f32 %v2381_v56, %v2037_v19  ;;  %vm9603_vm7 = vcmp.lt.f32.partialorder %v2415_v40, 0.0004427343  ;;  %v2393_v49 = vmul.f32 0.6931472, %v7393_v55  ;;  %v2404_v4 = vadd.f32 1.0, %v2403_v34 }
 0x276   : > { %v2411_v35 = vmul.f32 0.6931472, %v7387_v11  ;;  %v2423_v60 = vmul.f32 %v9509_v51, %v2422_v61  ;;  %v2406_v23 = vand.u32 2147483647, %v9535_v10  ;;  %7404 = vlog2.f32 %v2436_v8 }
 0x277   : > { %v2396_v57 = vmul.f32 %v9492_v7, %v2395_v21  ;;  %vm9610_vm8 = vcmp.lt.f32.partialorder %v2424_v27, 0.0004427343  ;;  %v2457_v38 = vmul.f32 -0.5, %v9585_v20  ;;  %v2522_v25 = vpack.c.bf16 %v2486_v24, %v2485_v43 }
 0x278   : > { %v7397_v36 = vpop.eup %7396  ;;  %v2414_v50 = vmul.f32 %v9477_v26, %v2413_v3  ;;  %vm9616_vm9 = vcmp.lt.f32.partialorder %v2397_v48, 0.0004427343  ;;  %v2426_v51 = vsel %vm9610_vm8, %v2423_v60, %v2420_v2  ;;  %v2430_v19 = vmul.f32 -0.5, %v9569_v47 }
 0x279   : > { %v2399_v7 = vsel %vm9616_vm9, %v2396_v57, %v2393_v49  ;;  %v2402_v1 = vmul.f32 0.6931472, %v7397_v36  ;;  %v2405_v41 = vmul.f32 %v9535_v10, %v2404_v4  ;;  %v2448_v44 = vmul.f32 -0.5, %v9556_v28  ;;  %6924 = vmatmul.mubr.bf16.gmra.mxu1 %v2522_v25 }
 0x27a   : > { %v2417_v26 = vsel %vm9603_vm7, %v2414_v50, %v2411_v35  ;;  %v2040_v12 = vmax.f32 %v9406_v13, 0.0  ;;  %vm2407_vm10 = vcmp.lt.f32.partialorder %v2406_v23, 0.0004427343  ;;  %v2439_v18 = vmul.f32 -0.5, %v9598_v15 }
 0x27b   : > { %v2041_v39 = vmax.f32 %v9317_v22, 0.0  ;;  %v2490_v0 = vadd.f32 %v2426_v51, %v2042_v33  ;;  %v2408_v31 = vsel %vm2407_vm10, %v2405_v41, %v2402_v1  ;;  %v2458_v14 = vadd.f32 1.0, %v2457_v38 }
 0x27c   : > { %v2487_v16 = vadd.f32 %v2399_v7, %v2039_v46  ;;  %v2488_v6 = vadd.f32 %v2408_v31, %v2040_v12  ;;  %v2431_v11 = vadd.f32 1.0, %v2430_v19  ;;  %v2460_v10 = vand.u32 2147483647, %v9585_v20 }
 0x27d   : > { %v7399_v32 = vpop.eup %7398  ;;  %v2489_v62 = vadd.f32 %v2417_v26, %v2041_v39  ;;  %v2449_v53 = vadd.f32 1.0, %v2448_v44  ;;  %v2433_v9 = vand.u32 2147483647, %v9569_v47  ;;  %v2451_v13 = vand.u32 2147483647, %v9556_v28 }
 0x27e   : > { %v7401_v30 = vpop.eup %7400  ;;  %v2440_v59 = vadd.f32 1.0, %v2439_v18  ;;  %v2523_v42 = vpack.c.bf16 %v2488_v6, %v2487_v16  ;;  %v2459_v22 = vmul.f32 %v9585_v20, %v2458_v14  ;;  %v2442_v29 = vand.u32 2147483647, %v9598_v15 }
 0x27f   : > { %v2524_v40 = vpack.c.bf16 %v2490_v0, %v2489_v62  ;;  %v2429_v37 = vmul.f32 0.6931472, %v7399_v32  ;;  %v2432_v55 = vmul.f32 %v9569_v47, %v2431_v11  ;;  %vm9638_vm11 = vcmp.lt.f32.partialorder %v2460_v10, 0.0004427343 }
 0x280   : > { %v7403_v34 = vpop.eup %7402  ;;  %6927 = vmatprep.mubr.bf16.mxu1 %v2523_v42  ;;  %v2447_v46 = vmul.f32 0.6931472, %v7401_v30  ;;  %v2450_v33 = vmul.f32 %v9556_v28, %v2449_v53  ;;  %vm9643_vm12 = vcmp.lt.f32.partialorder %v2433_v9, 0.0004427343  ;;  %vm9647_vm13 = vcmp.lt.f32.partialorder %v2451_v13, 0.0004427343 }
 0x281   : > { %v2456_v20 = vmul.f32 0.6931472, %v7403_v34  ;;  %6928 = vmatmul.mubr.bf16.gmra.mxu1 %v2524_v40  ;;  %v2441_v47 = vmul.f32 %v9598_v15, %v2440_v59  ;;  %vm2443_vm14 = vcmp.lt.f32.partialorder %v2442_v29, 0.0004427343  ;;  %v2435_v28 = vsel %vm9643_vm12, %v2432_v55, %v2429_v37 }
 0x282   : > { %v2046_v3 = vmax.f32 %v9472_v58, 0.0  ;;  %v2453_v2 = vsel %vm9647_vm13, %v2450_v33, %v2447_v46  ;;  %v2043_v8 = vmax.f32 %v9453_v52, 0.0  ;;  %v2044_v43 = vmax.f32 %v9496_v45, 0.0  ;;  %v9665_v58 = vld [vmem:[%s12445_s10] ss:$0 sm:$0xff] }
 0x283   : > { %v7405_v21 = vpop.eup %7404  ;;  %v2462_v27 = vsel %vm9638_vm11, %v2459_v22, %v2456_v20  ;;  %v2045_v15 = vmax.f32 %v9414_v5, 0.0  ;;  %vm3738_vm15 = vcmask 130048   ;;  %vm5955_vm3 = vcmask 261120  }
 0x284   : > { %v2438_v48 = vmul.f32 0.6931472, %v7405_v21  ;;  %v2494_v63 = vadd.f32 %v2462_v27, %v2046_v3  ;;  %v2491_v4 = vadd.f32 %v2435_v28, %v2043_v8 }
 0x285   : > { %v2493_v60 = vadd.f32 %v2453_v2, %v2045_v15 }
 0x286   : > { %v2444_v49 = vsel %vm2443_vm14, %v2441_v47, %v2438_v48 }
 0x287   : > { %v2492_v35 = vadd.f32 %v2444_v49, %v2044_v43  ;;  %v2526_v57 = vpack.c.bf16 %v2494_v63, %v2493_v60 }
 0x289   : > { %v2525_v23 = vpack.c.bf16 %v2492_v35, %v2491_v4 }
 0x28b   : > { %6931 = vmatprep.mubr.bf16.mxu1 %v2525_v23 }
 0x28c   : > { %6932 = vmatmul.mubr.bf16.gmra.mxu1 %v2526_v57 }
 0x306   : > { %v6905_v17 = vpop.f32.mrf.mxu1 }
 0x307   : > { %v9668_v52 = vadd.f32 %v6905_v17, %v9665_v58 }
 0x308   : > { %v2616_v45 = vpop.f32.mrf.mxu1 }
 0x309   : > { %v2777_v5 = vand.u32 2147483647, %v9668_v52  ;;  %v9672_v38 = vadd.f32 %v9665_v58, %v2616_v45  ;;  %v2745_v57 = vmax.f32 %v9668_v52, 0.0 }
 0x30a   : > { %v6906_v25 = vpop.f32.mrf.mxu1 }
 0x30b   : > { %v2809_v36 = vsub.f32 0.0, %v2777_v5  ;;  %v2775_v50 = vand.u32 2147483647, %v9672_v38  ;;  %v9676_v54 = vadd.f32 %v6906_v25, %v9665_v58  ;;  %v2743_v17 = vmax.f32 %v9672_v38, 0.0 }
 0x30c   : > { %v2619_v51 = vpop.f32.mrf.mxu1 }
 0x30d   : > { %v2843_v19 = vmul.f32 1.442695, %v2809_v36  ;;  %v2807_v7 = vsub.f32 0.0, %v2775_v50  ;;  %v2778_v1 = vand.u32 2147483647, %v9676_v54  ;;  %v9680_v41 = vadd.f32 %v9665_v58, %v2619_v51 }
 0x30f   : > { %7406 = vpow2.f32 %v2843_v19  ;;  %v2839_v44 = vmul.f32 1.442695, %v2807_v7  ;;  %v2810_v26 = vsub.f32 0.0, %v2778_v1  ;;  %v2776_v12 = vand.u32 2147483647, %v9680_v41 }
 0x310   : > { %v2746_v19 = vmax.f32 %v9676_v54, 0.0 }
 0x311   : > { %7408 = vpow2.f32 %v2839_v44  ;;  %v2845_v18 = vmul.f32 1.442695, %v2810_v26  ;;  %v2808_v39 = vsub.f32 0.0, %v2776_v12 }
 0x313   : > { %7410 = vpow2.f32 %v2845_v18  ;;  %v2841_v0 = vmul.f32 1.442695, %v2808_v39 }
 0x315   : > { %7412 = vpow2.f32 %v2841_v0  ;;  %v6909_v31 = vpop.f32.mrf.mxu1 }
 0x316   : > { %v9684_v14 = vadd.f32 %v6909_v31, %v9665_v58 }
 0x317   : > { %v2632_v16 = vpop.f32.mrf.mxu1 }
 0x318   : > { %v2781_v6 = vand.u32 2147483647, %v9684_v14  ;;  %v9688_v11 = vadd.f32 %v9665_v58, %v2632_v16 }
 0x319   : > { %v6910_v10 = vpop.f32.mrf.mxu1 }
 0x31a   : > { %v2813_v32 = vsub.f32 0.0, %v2781_v6  ;;  %v2779_v62 = vand.u32 2147483647, %v9688_v11  ;;  %v9692_v53 = vadd.f32 %v6910_v10, %v9665_v58 }
 0x31b   : > { %v2635_v59 = vpop.f32.mrf.mxu1 }
 0x31c   : > { %v7407_v9 = vpop.eup %7406  ;;  %v2851_v13 = vmul.f32 1.442695, %v2813_v32  ;;  %v2811_v22 = vsub.f32 0.0, %v2779_v62  ;;  %v2782_v40 = vand.u32 2147483647, %v9692_v53  ;;  %v9699_v56 = vadd.f32 %v9665_v58, %v2635_v59 }
 0x31d   : > { %v2921_v30 = vadd.f32 1.0, %v7407_v9  ;;  %v2924_v24 = vmul.f32 -0.5, %v7407_v9  ;;  %v2927_v8 = vand.u32 2147483647, %v7407_v9 }
 0x31e   : > { %v7409_v42 = vpop.eup %7408  ;;  %v2847_v37 = vmul.f32 1.442695, %v2811_v22  ;;  %v2814_v61 = vsub.f32 0.0, %v2782_v40  ;;  %v2780_v27 = vand.u32 2147483647, %v9699_v56 }
 0x31f   : > { %7414 = vlog2.f32 %v2921_v30  ;;  %v2903_v29 = vadd.f32 1.0, %v7409_v42  ;;  %v2906_v3 = vmul.f32 -0.5, %v7409_v42  ;;  %v2925_v63 = vadd.f32 1.0, %v2924_v24 }
 0x320   : > { %v9695_v34 = vpop.eup %7410  ;;  %7416 = vpow2.f32 %v2851_v13  ;;  %v2853_v21 = vmul.f32 1.442695, %v2814_v61  ;;  %v2812_v15 = vsub.f32 0.0, %v2780_v27  ;;  %v2909_v35 = vand.u32 2147483647, %v7409_v42 }
 0x321   : > { %7418 = vlog2.f32 %v2903_v29  ;;  %v2930_v55 = vadd.f32 1.0, %v9695_v34  ;;  %v6913_v46 = vpop.f32.mrf.mxu1  ;;  %v2933_v43 = vmul.f32 -0.5, %v9695_v34  ;;  %v2907_v45 = vadd.f32 1.0, %v2906_v3 }
 0x322   : > { %7420 = vpow2.f32 %v2847_v37  ;;  %v9701_v33 = vpop.eup %7412  ;;  %v9706_v48 = vadd.f32 %v6913_v46, %v9665_v58  ;;  %v2849_v60 = vmul.f32 1.442695, %v2812_v15  ;;  %vm9719_vm4 = vcmp.lt.f32.partialorder %v2927_v8, 0.0004427343 }
 0x323   : > { %7422 = vlog2.f32 %v2930_v55  ;;  %v2648_v20 = vpop.f32.mrf.mxu1  ;;  %v2912_v47 = vadd.f32 1.0, %v9701_v33  ;;  %v2934_v36 = vadd.f32 1.0, %v2933_v43  ;;  %v2915_v7 = vmul.f32 -0.5, %v9701_v33 }
 0x324   : > { %12721 = vst [vmem:[#allocation18_spill] sm:$0xff] %v9706_v48  ;;  %v9709_v2 = vadd.f32 %v9665_v58, %v2648_v20  ;;  %v2785_v49 = vand.u32 2147483647, %v9706_v48  ;;  %v2926_v39 = vmul.f32 %v7407_v9, %v2925_v63  ;;  %vm9728_vm5 = vcmp.lt.f32.partialorder %v2909_v35, 0.0004427343 }
 0x325   : > { %v6914_v28 = vpop.f32.mrf.mxu1  ;;  %7424 = vlog2.f32 %v2912_v47  ;;  %v2908_v6 = vmul.f32 %v7409_v42, %v2907_v45  ;;  %v2936_v10 = vand.u32 2147483647, %v9695_v34  ;;  %v2935_v9 = vmul.f32 %v9695_v34, %v2934_v36 }
 0x326   : > { %12722 = vst [vmem:[#allocation32_spill] sm:$0xff] %v9709_v2  ;;  %7426 = vpow2.f32 %v2853_v21  ;;  %v9714_v4 = vadd.f32 %v6914_v28, %v9665_v58  ;;  %v2783_v23 = vand.u32 2147483647, %v9709_v2  ;;  %v2817_v5 = vsub.f32 0.0, %v2785_v49 }
 0x327   : > { %7428 = vpow2.f32 %v2849_v60  ;;  %v2651_v26 = vpop.f32.mrf.mxu1  ;;  %v2916_v22 = vadd.f32 1.0, %v2915_v7  ;;  %vm2937_vm6 = vcmp.lt.f32.partialorder %v2936_v10, 0.0004427343  ;;  %v2918_v24 = vand.u32 2147483647, %v9701_v33 }
 0x328   : > { %12723 = vst [vmem:[#allocation20_spill] sm:$0xff] %v9714_v4  ;;  %v2815_v50 = vsub.f32 0.0, %v2783_v23  ;;  %v2859_v1 = vmul.f32 1.442695, %v2817_v5  ;;  %v2786_v44 = vand.u32 2147483647, %v9714_v4  ;;  %v9751_v46 = vadd.f32 %v9665_v58, %v2651_v26 }
 0x329   : > { %v6917_v40 = vpop.f32.mrf.mxu1  ;;  %v2917_v63 = vmul.f32 %v9701_v33, %v2916_v22  ;;  %v2744_v23 = vmax.f32 %v9680_v41, 0.0  ;;  %vm2919_vm7 = vcmp.lt.f32.partialorder %v2918_v24, 0.0004427343 }
 0x32a   : > { %v2855_v31 = vmul.f32 1.442695, %v2815_v50  ;;  %7430 = vpow2.f32 %v2859_v1  ;;  %v2818_v29 = vsub.f32 0.0, %v2786_v44  ;;  %12728 = vst [vmem:[#allocation22_spill] sm:$0xff] %v9751_v46  ;;  %v9762_v27 = vadd.f32 %v6917_v40, %v9665_v58 }
 0x32b   : > { %v2784_v35 = vand.u32 2147483647, %v9751_v46  ;;  %v2664_v26 = vpop.f32.mrf.mxu1 }
 0x32c   : > { %v7415_v51 = vpop.eup %7414  ;;  %7432 = vpow2.f32 %v2855_v31  ;;  %12729 = vst [vmem:[#allocation31_spill] sm:$0xff] %v9762_v27  ;;  %v2861_v43 = vmul.f32 1.442695, %v2818_v29  ;;  %v2789_v33 = vand.u32 2147483647, %v9762_v27  ;;  %v9808_v22 = vadd.f32 %v9665_v58, %v2664_v26 }
 0x32d   : > { %v9726_v12 = vpop.eup %7416  ;;  %v2923_v18 = vmul.f32 0.6931472, %v7415_v51  ;;  %v2816_v50 = vsub.f32 0.0, %v2784_v35 }
 0x32e   : > { %v7419_v16 = vpop.eup %7418  ;;  %v2957_v32 = vadd.f32 1.0, %v9726_v12  ;;  %v2963_v1 = vand.u32 2147483647, %v9726_v12  ;;  %v2821_v44 = vsub.f32 0.0, %v2789_v33  ;;  %12730 = vst [vmem:[#allocation19_spill] sm:$0xff] %v9808_v22 }
 0x32f   : > { %v9734_v62 = vpop.eup %7420  ;;  %v2929_v30 = vsel %vm9719_vm4, %v2926_v39, %v2923_v18  ;;  %v2905_v13 = vmul.f32 0.6931472, %v7419_v16 }
 0x330   : > { %v7423_v59 = vpop.eup %7422  ;;  %v9745_v42 = vadd.f32 %v2929_v30, %v2745_v57  ;;  %7434 = vlog2.f32 %v2957_v32  ;;  %v2939_v34 = vadd.f32 1.0, %v9734_v62  ;;  %v2960_v57 = vmul.f32 -0.5, %v9726_v12 }
 0x331   : > { %v2911_v37 = vsel %vm9728_vm5, %v2908_v6, %v2905_v13  ;;  %v2932_v55 = vmul.f32 0.6931472, %v7423_v59  ;;  %v2942_v25 = vmul.f32 -0.5, %v9734_v62  ;;  %v2945_v0 = vand.u32 2147483647, %v9734_v62 }
 0x332   : > { %v5925_v61 = vsel %vm3738_vm15, %v9668_v52, %v9745_v42  ;;  %v9756_v20 = vadd.f32 %v2911_v37, %v2743_v17  ;;  %v7425_v47 = vpop.eup %7424  ;;  %7436 = vlog2.f32 %v2939_v34  ;;  %v2749_v6 = vmax.f32 %v9684_v14, 0.0  ;;  %v6918_v37 = vpop.f32.mrf.mxu1 }
 0x333   : > { %5958 = vst.msk [vmem:[%s9743_s29 + $0x10] sm:$0xff] %vm5955_vm3, %v5925_v61  ;;  %v2938_v21 = vsel %vm2937_vm6, %v2935_v9, %v2932_v55  ;;  %v9764_v28 = vpop.eup %7426  ;;  %v2914_v15 = vmul.f32 0.6931472, %v7425_v47  ;;  %v2943_v39 = vadd.f32 1.0, %v2942_v25  ;;  %v2857_v30 = vmul.f32 1.442695, %v2816_v50 }
 0x334   : > { %v5923_v3 = vsel %vm3738_vm15, %v9672_v38, %v9756_v20  ;;  %v9769_v8 = vadd.f32 %v2938_v21, %v2746_v19  ;;  %v2966_v49 = vadd.f32 1.0, %v9764_v28  ;;  %v9784_v45 = vpop.eup %7428  ;;  %v2961_v19 = vadd.f32 1.0, %v2960_v57  ;;  %v2667_v35 = vpop.f32.mrf.mxu1 }
 0x335   : > { %5956 = vst.msk [vmem:[%s9743_s29] sm:$0xff] %vm5955_vm3, %v5923_v3  ;;  %v2920_v17 = vsel %vm2919_vm7, %v2917_v63, %v2914_v15  ;;  %v2948_v36 = vadd.f32 1.0, %v9784_v45  ;;  %v2969_v10 = vmul.f32 -0.5, %v9764_v28  ;;  %v2747_v59 = vmax.f32 %v9688_v11, 0.0 }
 0x336   : > { %v5926_v60 = vsel %vm3738_vm15, %v9676_v54, %v9769_v8  ;;  %7438 = vlog2.f32 %v2966_v49  ;;  %v9786_v5 = vadd.f32 %v2920_v17, %v2744_v23  ;;  %v2962_v9 = vmul.f32 %v9726_v12, %v2961_v19 }
 0x337   : > { %5959 = vst.msk [vmem:[%s9743_s29 + $0x18] sm:$0xff] %vm5955_vm3, %v5926_v60  ;;  %7440 = vpow2.f32 %v2861_v43  ;;  %v9793_v7 = vpop.eup %7430  ;;  %vm2964_vm8 = vcmp.lt.f32.partialorder %v2963_v1, 0.0004427343  ;;  %v2951_v29 = vmul.f32 -0.5, %v9784_v45  ;;  %v2867_v40 = vmul.f32 1.442695, %v2821_v44 }
 0x338   : > { %v5924_v51 = vsel %vm3738_vm15, %v9680_v41, %v9786_v5  ;;  %7442 = vlog2.f32 %v2948_v36  ;;  %v2993_v31 = vadd.f32 1.0, %v9793_v7  ;;  %v2944_v61 = vmul.f32 %v9734_v62, %v2943_v39 }
 0x339   : > { %5957 = vst.msk [vmem:[%s9743_s29 + $0x8] sm:$0xff] %vm5955_vm3, %v5924_v51  ;;  %v9798_v18 = vpop.eup %7432  ;;  %vm9812_vm9 = vcmp.lt.f32.partialorder %v2945_v0, 0.0004427343  ;;  %v2970_v21 = vadd.f32 1.0, %v2969_v10  ;;  %v2972_v3 = vand.u32 2147483647, %v9764_v28  ;;  %v9821_v15 = vadd.f32 %v6918_v37, %v9665_v58 }
 0x33a   : > { %v2975_v32 = vadd.f32 1.0, %v9798_v18  ;;  %7444 = vlog2.f32 %v2993_v31  ;;  %v2787_v43 = vand.u32 2147483647, %v9808_v22  ;;  %v2952_v49 = vadd.f32 1.0, %v2951_v29 }
 0x33b   : > { %12733 = vst [vmem:[#allocation21_spill] sm:$0xff] %v9821_v15  ;;  %v2996_v57 = vmul.f32 -0.5, %v9793_v7  ;;  %v2978_v17 = vmul.f32 -0.5, %v9798_v18  ;;  %v2750_v36 = vmax.f32 %v9692_v53, 0.0  ;;  %v2971_v51 = vmul.f32 %v9764_v28, %v2970_v21 }
 0x33c   : > { %7446 = vlog2.f32 %v2975_v32  ;;  %v2819_v33 = vsub.f32 0.0, %v2787_v43  ;;  %v2790_v19 = vand.u32 2147483647, %v9821_v15  ;;  %vm2973_vm10 = vcmp.lt.f32.partialorder %v2972_v3, 0.0004427343 }
 0x33d   : > { %v7435_v16 = vpop.eup %7434  ;;  %7448 = vpow2.f32 %v2857_v30  ;;  %v2954_v44 = vand.u32 2147483647, %v9784_v45  ;;  %v2953_v0 = vmul.f32 %v9784_v45, %v2952_v49  ;;  %v2999_v31 = vand.u32 2147483647, %v9793_v7 }
 0x33e   : > { %v2959_v13 = vmul.f32 0.6931472, %v7435_v16  ;;  %7450 = vpow2.f32 %v2867_v40  ;;  %v2863_v28 = vmul.f32 1.442695, %v2819_v33  ;;  %v6921_v16 = vpop.f32.mrf.mxu1  ;;  %v2997_v32 = vadd.f32 1.0, %v2996_v57 }
 0x33f   : > { %v7437_v55 = vpop.eup %7436  ;;  %v2979_v30 = vadd.f32 1.0, %v2978_v17  ;;  %v2748_v29 = vmax.f32 %v9699_v56, 0.0  ;;  %vm2955_vm11 = vcmp.lt.f32.partialorder %v2954_v44, 0.0004427343  ;;  %v9858_v40 = vadd.f32 %v6921_v16, %v9665_v58 }
 0x340   : > { %v2965_v34 = vsel %vm2964_vm8, %v2962_v9, %v2959_v13  ;;  %v2941_v47 = vmul.f32 0.6931472, %v7437_v55  ;;  %v2822_v9 = vsub.f32 0.0, %v2790_v19  ;;  %v2981_v55 = vand.u32 2147483647, %v9798_v18  ;;  %v2680_v33 = vpop.f32.mrf.mxu1 }
 0x341   : > { %v9816_v12 = vadd.f32 %v2965_v34, %v2749_v6  ;;  %12735 = vst [vmem:[#allocation23_spill] sm:$0xff] %v9858_v40  ;;  %v2998_v21 = vmul.f32 %v9793_v7, %v2997_v32  ;;  %vm9867_vm12 = vcmp.lt.f32.partialorder %v2999_v31, 0.0004427343  ;;  %v2793_v17 = vand.u32 2147483647, %v9858_v40 }
 0x342   : > { %v2947_v63 = vsel %vm9812_vm9, %v2944_v61, %v2941_v47  ;;  %v2869_v34 = vmul.f32 1.442695, %v2822_v9  ;;  %v2753_v47 = vmax.f32 %v9706_v48, 0.0  ;;  %vm2982_vm13 = vcmp.lt.f32.partialorder %v2981_v55, 0.0004427343  ;;  %v6922_v16 = vpop.f32.mrf.mxu1 }
 0x343   : > { %v5929_v62 = vsel %vm3738_vm15, %v9684_v14, %v9816_v12  ;;  %v7439_v60 = vpop.eup %7438  ;;  %v9830_v23 = vadd.f32 %v2947_v63, %v2747_v59  ;;  %v9851_v59 = vadd.f32 %v9665_v58, %v2667_v35  ;;  %v2980_v63 = vmul.f32 %v9798_v18, %v2979_v30 }
 0x344   : > { %5962 = vst.msk [vmem:[%s9743_s29 + $0x30] sm:$0xff] %vm5955_vm3, %v5929_v62  ;;  %v9834_v25 = vpop.eup %7440  ;;  %v2968_v50 = vmul.f32 0.6931472, %v7439_v60  ;;  %v9905_v30 = vadd.f32 %v9665_v58, %v2680_v33  ;;  %v2754_v9 = vmax.f32 %v9714_v4, 0.0 }
 0x345   : > { %v5927_v1 = vsel %vm3738_vm15, %v9688_v11, %v9830_v23  ;;  %v3002_v26 = vadd.f32 1.0, %v9834_v25  ;;  %v7443_v6 = vpop.eup %7442  ;;  %12734 = vst [vmem:[#allocation33_spill] sm:$0xff] %v9851_v59  ;;  %v2788_v49 = vand.u32 2147483647, %v9851_v59  ;;  %v3005_v7 = vmul.f32 -0.5, %v9834_v25 }
 0x346   : > { %5960 = vst.msk [vmem:[%s9743_s29 + $0x20] sm:$0xff] %vm5955_vm3, %v5927_v1  ;;  %v2974_v39 = vsel %vm2973_vm10, %v2971_v51, %v2968_v50  ;;  %v2950_v13 = vmul.f32 0.6931472, %v7443_v6  ;;  %v2751_v50 = vmax.f32 %v9709_v2, 0.0  ;;  %v3008_v32 = vand.u32 2147483647, %v9834_v25 }
 0x347   : > { %v9848_v10 = vadd.f32 %v2974_v39, %v2750_v36  ;;  %7452 = vlog2.f32 %v3002_v26  ;;  %v7445_v61 = vpop.eup %7444  ;;  %v2820_v39 = vsub.f32 0.0, %v2788_v49  ;;  %v3006_v31 = vadd.f32 1.0, %v3005_v7  ;;  %12738 = vst [vmem:[#allocation24_spill] sm:$0xff] %v9905_v30 }
 0x348   : > { %7454 = vpow2.f32 %v2863_v28  ;;  %v2956_v37 = vsel %vm2955_vm11, %v2953_v0, %v2950_v13  ;;  %v2995_v62 = vmul.f32 0.6931472, %v7445_v61  ;;  %v2825_v28 = vsub.f32 0.0, %v2793_v17 }
 0x349   : > { %v5930_v45 = vsel %vm3738_vm15, %v9692_v53, %v9848_v10  ;;  %v9863_v24 = vadd.f32 %v2956_v37, %v2748_v29  ;;  %v7447_v43 = vpop.eup %7446  ;;  %7456 = vpow2.f32 %v2869_v34  ;;  %v3007_v55 = vmul.f32 %v9834_v25, %v3006_v31 }
 0x34a   : > { %5963 = vst.msk [vmem:[%s9743_s29 + $0x38] sm:$0xff] %vm5955_vm3, %v5930_v45  ;;  %v9873_v35 = vpop.eup %7448  ;;  %v2977_v57 = vmul.f32 0.6931472, %v7447_v43  ;;  %v3001_v18 = vsel %vm9867_vm12, %v2998_v21, %v2995_v62  ;;  %v2865_v45 = vmul.f32 1.442695, %v2820_v39  ;;  %v9912_v61 = vadd.f32 %v6922_v16, %v9665_v58 }
 0x34b   : > { %v5928_v60 = vsel %vm3738_vm15, %v9699_v56, %v9863_v24  ;;  %v9880_v36 = vpop.eup %7450  ;;  %v2984_v51 = vadd.f32 1.0, %v9873_v35  ;;  %v9888_v19 = vadd.f32 %v3001_v18, %v2753_v47  ;;  %v2875_v34 = vmul.f32 1.442695, %v2825_v28  ;;  %v2683_v47 = vpop.f32.mrf.mxu1 }
 0x34c   : > { %5961 = vst.msk [vmem:[%s9743_s29 + $0x28] sm:$0xff] %vm5955_vm3, %v5928_v60  ;;  %v2983_v1 = vsel %vm2982_vm13, %v2980_v63, %v2977_v57  ;;  %v3029_v44 = vadd.f32 1.0, %v9880_v36  ;;  %12739 = vst [vmem:[#allocation25_spill] sm:$0xff] %v9912_v61  ;;  %v3258_v21 = vmul.f32 0.5, %v9769_v8  ;;  %vm3009_vm14 = vcmp.lt.f32.partialorder %v3008_v32, 0.0004427343 }
 0x34d   : > { %v9891_v26 = vadd.f32 %v2983_v1, %v2751_v50  ;;  %7458 = vlog2.f32 %v2984_v51  ;;  %v5933_v0 = vsel %vm3738_vm15, %v9706_v48, %v9888_v19  ;;  %v2987_v3 = vmul.f32 -0.5, %v9873_v35  ;;  %v6925_v18 = vpop.f32.mrf.mxu1 }
 0x34e   : > { %5966 = vst.msk [vmem:[%s9743_s29 + $0x50] sm:$0xff] %vm5955_vm3, %v5933_v0  ;;  %7460 = vlog2.f32 %v3029_v44  ;;  %v2752_v63 = vmax.f32 %v9751_v46, 0.0  ;;  %v2791_v49 = vand.u32 2147483647, %v9905_v30  ;;  %v3032_v60 = vmul.f32 -0.5, %v9880_v36 }
 0x34f   : > { %v5931_v6 = vsel %vm3738_vm15, %v9709_v2, %v9891_v26  ;;  %7462 = vpow2.f32 %v2865_v45  ;;  %v9923_v57 = vadd.f32 %v9665_v58, %v2683_v47  ;;  %v2757_v7 = vmax.f32 %v9762_v27, 0.0 }
 0x350   : > { %5964 = vst.msk [vmem:[%s9743_s29 + $0x40] sm:$0xff] %vm5955_vm3, %v5931_v6  ;;  %v2823_v17 = vsub.f32 0.0, %v2791_v49  ;;  %v2794_v33 = vand.u32 2147483647, %v9912_v61  ;;  %v3293_v50 = vmul.f32 1.442695, %v3258_v21  ;;  %v9939_v32 = vadd.f32 %v6925_v18, %v9665_v58  ;;  %v2696_v49 = vpop.f32.mrf.mxu1 }
 0x351   : > { %12740 = vst [vmem:[#allocation26_spill] sm:$0xff] %v9923_v57  ;;  %v2988_v1 = vadd.f32 1.0, %v2987_v3  ;;  %v3256_v39 = vmul.f32 0.5, %v9786_v5  ;;  %v2990_v0 = vand.u32 2147483647, %v9873_v35  ;;  %v3033_v16 = vadd.f32 1.0, %v3032_v60 }
 0x352   : > { %v2871_v31 = vmul.f32 1.442695, %v2823_v17  ;;  %v2826_v28 = vsub.f32 0.0, %v2794_v33  ;;  %v2792_v6 = vand.u32 2147483647, %v9923_v57  ;;  %12741 = vst [vmem:[#allocation28_spill] sm:$0xff] %v9939_v32 }
 0x353   : > { %v9950_v21 = vld [vmem:[%s12447_s12] sm:$0x1f]   ;;  %vm2991_vm4 = vcmp.lt.f32.partialorder %v2990_v0, 0.0004427343  ;;  %v3034_v33 = vmul.f32 %v9880_v36, %v3033_v16  ;;  %v9968_v16 = vmul.f32 0.5, %v9745_v42 }
 0x354   : > { %v7453_v13 = vpop.eup %7452  ;;  %v2877_v5 = vmul.f32 1.442695, %v2826_v28  ;;  %v2824_v47 = vsub.f32 0.0, %v2792_v6  ;;  %7100 = vmatprep.subr.msk.bf16.mxu0 %vm849_vm0, %v9950_v21  ;;  %v6926_v28 = vpop.f32.mrf.mxu1  ;;  %v2755_v6 = vmax.f32 %v9808_v22, 0.0 }
 0x355   : > { %v9908_v29 = vpop.eup %7454  ;;  %v3004_v37 = vmul.f32 0.6931472, %v7453_v13 }
 0x356   : > { %v3011_v43 = vadd.f32 1.0, %v9908_v29  ;;  %v9925_v8 = vpop.eup %7456  ;;  %v3014_v45 = vmul.f32 -0.5, %v9908_v29  ;;  %v2873_v18 = vmul.f32 1.442695, %v2824_v47  ;;  %v3017_v0 = vand.u32 2147483647, %v9908_v29 }
 0x357   : > { %v3010_v62 = vsel %vm3009_vm14, %v3007_v55, %v3004_v37  ;;  %v3038_v44 = vadd.f32 1.0, %v9925_v8  ;;  %v7133_v37 = vld [vmem:[%s12446_s11] sm:$0xff]   ;;  %v9987_v47 = vadd.f32 %v6926_v28, %v9665_v58 }
 0x358   : > { %v9919_v25 = vadd.f32 %v3010_v62, %v2754_v9  ;;  %7464 = vlog2.f32 %v3011_v43  ;;  %v3035_v9 = vand.u32 2147483647, %v9880_v36  ;;  %v3289_v43 = vmul.f32 1.442695, %v3256_v39  ;;  %6969 = vmatprep.subr.bf16.mxu1 %v7133_v37 }
 0x359   : > { %7466 = vpow2.f32 %v2875_v34  ;;  %v2989_v34 = vmul.f32 %v9873_v35, %v2988_v1  ;;  %v2797_v62 = vand.u32 2147483647, %v9939_v32  ;;  %6970 = vmatpush3.bf16.msra.mxu1 %v7133_v37  ;;  %vm3018_vm6 = vcmp.lt.f32.partialorder %v3017_v0, 0.0004427343 }
 0x35a   : > { %v5934_v51 = vsel %vm3738_vm15, %v9714_v4, %v9919_v25  ;;  %7468 = vlog2.f32 %v3038_v44  ;;  %v7459_v13 = vpop.eup %7458  ;;  %vm3036_vm5 = vcmp.lt.f32.partialorder %v3035_v9, 0.0004427343  ;;  %v3041_v44 = vmul.f32 -0.5, %v9925_v8 }
 0x35b   : > { %5967 = vst.msk [vmem:[%s9743_s29 + $0x58] sm:$0xff] %vm5955_vm3, %v5934_v51  ;;  %7470 = vpow2.f32 %v2871_v31  ;;  %v2986_v55 = vmul.f32 0.6931472, %v7459_v13  ;;  %v7461_v3 = vpop.eup %7460  ;;  %v2829_v51 = vsub.f32 0.0, %v2797_v62  ;;  %v9974_v13 = vadd.f32 %v9665_v58, %v2696_v49 }
 0x35c   : > { %7472 = vpow2.f32 %v3293_v50  ;;  %v3031_v17 = vmul.f32 0.6931472, %v7461_v3  ;;  %v3015_v50 = vadd.f32 1.0, %v3014_v45  ;;  %v3261_v9 = vmul.f32 0.5, %v9816_v12 }
 0x35d   : > { %7474 = vpow2.f32 %v2877_v5  ;;  %v2992_v60 = vsel %vm2991_vm4, %v2989_v34, %v2986_v55  ;;  %v2883_v31 = vmul.f32 1.442695, %v2829_v51  ;;  %v3042_v34 = vadd.f32 1.0, %v3041_v44 }
 0x35e   : > { %v9956_v35 = vadd.f32 %v2992_v60, %v2752_v63  ;;  %v3037_v1 = vsel %vm3036_vm5, %v3034_v33, %v3031_v17  ;;  %7476 = vpow2.f32 %v2873_v18  ;;  %v9965_v63 = vpop.eup %7462  ;;  %v3016_v5 = vmul.f32 %v9908_v29, %v3015_v50 }
 0x35f   : > { %v9962_v36 = vadd.f32 %v3037_v1, %v2757_v7  ;;  %7478 = vpow2.f32 %v3289_v43  ;;  %v3020_v42 = vadd.f32 1.0, %v9965_v63  ;;  %v3259_v12 = vmul.f32 0.5, %v9830_v23 }
 0x360   : > { %v5932_v39 = vsel %vm3738_vm15, %v9751_v46, %v9956_v35  ;;  %7480 = vpow2.f32 %v2883_v31  ;;  %v3044_v3 = vand.u32 2147483647, %v9925_v8  ;;  %v2758_v62 = vmax.f32 %v9821_v15, 0.0 }
 0x361   : > { %5965 = vst.msk [vmem:[%s9743_s29 + $0x48] sm:$0xff] %vm5955_vm3, %v5932_v39  ;;  %v5937_v45 = vsel %vm3738_vm15, %v9762_v27, %v9962_v36  ;;  %7482 = vlog2.f32 %v3020_v42  ;;  %v2795_v49 = vand.u32 2147483647, %v9974_v13  ;;  %v3299_v17 = vmul.f32 1.442695, %v3261_v9  ;;  %v2699_v39 = vpop.f32.mrf.mxu1 }
 0x362   : > { %5970 = vst.msk [vmem:[%s9743_s29 + $0x70] sm:$0xff] %vm5955_vm3, %v5937_v45  ;;  %v3262_v33 = vmul.f32 0.5, %v9848_v10  ;;  %v3043_v1 = vmul.f32 %v9925_v8, %v3042_v34  ;;  %v2798_v44 = vand.u32 2147483647, %v9987_v47  ;;  %v3295_v31 = vmul.f32 1.442695, %v3259_v12 }
 0x363   : > { %vm3045_vm7 = vcmp.lt.f32.partialorder %v3044_v3, 0.0004427343  ;;  %v3023_v28 = vmul.f32 -0.5, %v9965_v63  ;;  %v2827_v45 = vsub.f32 0.0, %v2795_v49  ;;  %v10019_v3 = vadd.f32 %v9665_v58, %v2699_v39 }
 0x364   : > { %v2830_v12 = vsub.f32 0.0, %v2798_v44  ;;  %v10033_v44 = vmul.f32 0.5, %v9863_v24  ;;  %v10036_v39 = vmul.f32 0.5, %v9888_v19  ;;  %v2759_v24 = vmax.f32 %v9905_v30, 0.0 }
 0x365   : > { %v7465_v7 = vpop.eup %7464 }
 0x366   : > { %v9982_v37 = vpop.eup %7466  ;;  %v3013_v55 = vmul.f32 0.6931472, %v7465_v7 }
 0x367   : > { %v3065_v43 = vadd.f32 1.0, %v9982_v37  ;;  %v7469_v60 = vpop.eup %7468  ;;  %v3068_v8 = vmul.f32 -0.5, %v9982_v37 }
 0x368   : > { %v3019_v29 = vsel %vm3018_vm6, %v3016_v5, %v3013_v55  ;;  %v9998_v50 = vpop.eup %7470  ;;  %v3040_v51 = vmul.f32 0.6931472, %v7469_v60  ;;  %v3301_v5 = vmul.f32 1.442695, %v3262_v33  ;;  %v3024_v60 = vadd.f32 1.0, %v3023_v28 }
 0x369   : > { %v9995_v18 = vadd.f32 %v3019_v29, %v2755_v6  ;;  %7484 = vlog2.f32 %v3065_v43  ;;  %v10002_v0 = vpop.eup %7472  ;;  %v3047_v9 = vadd.f32 1.0, %v9998_v50  ;;  %v6929_v43 = vpop.f32.mrf.mxu1  ;;  %v2885_v28 = vmul.f32 1.442695, %v2830_v12 }
 0x36a   : > { %v10008_v6 = vpop.eup %7474  ;;  %v3046_v7 = vsel %vm3045_vm7, %v3043_v1, %v3040_v51  ;;  %7486 = vpow2.f32 %v3299_v17  ;;  %v3069_v17 = vadd.f32 1.0, %v3068_v8  ;;  %v2879_v51 = vmul.f32 1.442695, %v2827_v45 }
 0x36b   : > { %v5935_v10 = vsel %vm3738_vm15, %v9808_v22, %v9995_v18  ;;  %v10014_v42 = vadd.f32 %v3046_v7, %v2758_v62  ;;  %v3074_v55 = vadd.f32 1.0, %v10008_v6  ;;  %7488 = vlog2.f32 %v3047_v9  ;;  %v10021_v29 = vpop.eup %7476 }
 0x36c   : > { %5968 = vst.msk [vmem:[%s9743_s29 + $0x60] sm:$0xff] %vm5955_vm3, %v5935_v10  ;;  %7490 = vpow2.f32 %v3295_v31  ;;  %v3026_v62 = vand.u32 2147483647, %v9965_v63  ;;  %v3056_v33 = vadd.f32 1.0, %v10021_v29  ;;  %v10030_v1 = vpop.eup %7478  ;;  %v10039_v31 = vadd.f32 %v6929_v43, %v9665_v58  ;;  %v2712_v43 = vpop.f32.mrf.mxu1 }
 0x36d   : > { %v5938_v49 = vsel %vm3738_vm15, %v9821_v15, %v10014_v42  ;;  %7492 = vlog2.f32 %v3074_v55  ;;  %v3071_v10 = vand.u32 2147483647, %v9982_v37  ;;  %v2796_v7 = vand.u32 2147483647, %v10019_v3  ;;  %v10043_v8 = vpop.eup %7480 }
 0x36e   : > { %5971 = vst.msk [vmem:[%s9743_s29 + $0x78] sm:$0xff] %vm5955_vm3, %v5938_v49  ;;  %7494 = vpow2.f32 %v3301_v5  ;;  %v3025_v9 = vmul.f32 %v9965_v63, %v3024_v60  ;;  %vm10046_vm8 = vcmp.lt.f32.partialorder %v3026_v62, 0.0004427343  ;;  %v3070_v5 = vmul.f32 %v9982_v37, %v3069_v17  ;;  %v7483_v49 = vpop.eup %7482  ;;  %v6930_v15 = vpop.f32.mrf.mxu1 }
 0x36f   : > { %7496 = vlog2.f32 %v3056_v33  ;;  %v3050_v55 = vmul.f32 -0.5, %v9998_v50  ;;  %v3101_v12 = vadd.f32 1.0, %v10043_v8  ;;  %v3077_v33 = vmul.f32 -0.5, %v10008_v6 }
 0x370   : > { %7498 = vpow2.f32 %v2879_v51  ;;  %v2828_v63 = vsub.f32 0.0, %v2796_v7  ;;  %v2801_v60 = vand.u32 2147483647, %v10039_v31  ;;  %v3022_v62 = vmul.f32 0.6931472, %v7483_v49 }
 0x371   : > { %7500 = vpow2.f32 %v2885_v28  ;;  %vm10057_vm9 = vcmp.lt.f32.partialorder %v3071_v10, 0.0004427343  ;;  %v3059_v37 = vmul.f32 -0.5, %v10021_v29  ;;  %v3053_v19 = vand.u32 2147483647, %v9998_v50 }
 0x372   : > { %7502 = vlog2.f32 %v3101_v12  ;;  %v2881_v51 = vmul.f32 1.442695, %v2828_v63  ;;  %v2833_v23 = vsub.f32 0.0, %v2801_v60  ;;  %v10064_v27 = vadd.f32 %v9665_v58, %v2712_v43 }
 0x373   : > { %v3028_v28 = vsel %vm10046_vm8, %v3025_v9, %v3022_v62  ;;  %v3051_v49 = vadd.f32 1.0, %v3050_v55  ;;  %v3080_v10 = vand.u32 2147483647, %v10008_v6  ;;  %v12746_v22 = vmax.f32 %v9851_v59, 0.0 }
 0x374   : > { %v3078_v48 = vadd.f32 1.0, %v3077_v33  ;;  %7504 = vpow2.f32 %v2881_v51  ;;  %v2891_v63 = vmul.f32 1.442695, %v2833_v23  ;;  %v3060_v45 = vadd.f32 1.0, %v3059_v37 }
 0x375   : > { %v10071_v12 = vadd.f32 %v3028_v28, %v12746_v22  ;;  %v3104_v9 = vmul.f32 -0.5, %v10043_v8  ;;  %v2799_v55 = vand.u32 2147483647, %v10064_v27  ;;  %v12747_v22 = vmax.f32 %v9858_v40, 0.0 }
 0x376   : > { %v7485_v17 = vpop.eup %7484  ;;  %7506 = vpow2.f32 %v2891_v63  ;;  %v10087_v23 = vadd.f32 %v6930_v15, %v9665_v58  ;;  %v3052_v37 = vmul.f32 %v9998_v50, %v3051_v49  ;;  %v2760_v51 = vmax.f32 %v9923_v57, 0.0 }
 0x377   : > { %v3067_v7 = vmul.f32 0.6931472, %v7485_v17  ;;  %v10073_v60 = vpop.eup %7486  ;;  %v5936_v17 = vsel %vm3738_vm15, %v9851_v59, %v10071_v12  ;;  %v2831_v28 = vsub.f32 0.0, %v2799_v55  ;;  %vm3054_vm10 = vcmp.lt.f32.partialorder %v3053_v19, 0.0004427343 }
 0x378   : > { %v7489_v62 = vpop.eup %7488  ;;  %5969 = vst.msk [vmem:[%s9743_s29 + $0x68] sm:$0xff] %vm5955_vm3, %v5936_v17  ;;  %vm10098_vm11 = vcmp.lt.f32.partialorder %v3080_v10, 0.0004427343  ;;  %v3062_v15 = vand.u32 2147483647, %v10021_v29  ;;  %v3079_v55 = vmul.f32 %v10008_v6, %v3078_v48  ;;  %v3061_v19 = vmul.f32 %v10021_v29, %v3060_v45 }
 0x379   : > { %v3073_v43 = vsel %vm10057_vm9, %v3070_v5, %v3067_v7  ;;  %v10089_v34 = vpop.eup %7490  ;;  %v3049_v5 = vmul.f32 0.6931472, %v7489_v62  ;;  %v2887_v62 = vmul.f32 1.442695, %v2831_v28  ;;  %v3105_v10 = vadd.f32 1.0, %v3104_v9 }
 0x37a   : > { %v10084_v33 = vadd.f32 %v3073_v43, %v12747_v22  ;;  %v7493_v7 = vpop.eup %7492  ;;  %v2715_v22 = vpop.f32.mrf.mxu1  ;;  %v12750_v6 = vmax.f32 %v9912_v61, 0.0  ;;  %vm3063_vm12 = vcmp.lt.f32.partialorder %v3062_v15, 0.0004427343 }
 0x37b   : > { %v10103_v17 = vpop.eup %7494  ;;  %v3055_v50 = vsel %vm3054_vm10, %v3052_v37, %v3049_v5  ;;  %v3076_v49 = vmul.f32 0.6931472, %v7493_v7  ;;  %7508 = vpow2.f32 %v2887_v62  ;;  %v10115_v5 = vadd.f32 %v9665_v58, %v2715_v22 }
 0x37c   : > { %v5941_v43 = vsel %vm3738_vm15, %v9858_v40, %v10084_v33  ;;  %v7497_v59 = vpop.eup %7496  ;;  %v10108_v4 = vadd.f32 %v3055_v50, %v2759_v24  ;;  %v2802_v40 = vand.u32 2147483647, %v10087_v23  ;;  %v3107_v24 = vand.u32 2147483647, %v10043_v8 }
 0x37d   : > { %5974 = vst.msk [vmem:[%s9743_s29 + $0x90] sm:$0xff] %vm5955_vm3, %v5941_v43  ;;  %v3082_v2 = vsel %vm10098_vm11, %v3079_v55, %v3076_v49  ;;  %v3058_v46 = vmul.f32 0.6931472, %v7497_v59  ;;  %v10117_v37 = vpop.eup %7498  ;;  %v3297_v59 = vmul.f32 1.442695, %v10033_v44  ;;  %v3263_v58 = vmul.f32 0.5, %v9891_v26 }
 0x37e   : > { %v5939_v48 = vsel %vm3738_vm15, %v9905_v30, %v10108_v4  ;;  %v10124_v29 = vadd.f32 %v3082_v2, %v12750_v6  ;;  %v10127_v45 = vpop.eup %7500  ;;  %v3083_v28 = vadd.f32 1.0, %v10117_v37  ;;  %v3307_v43 = vmul.f32 1.442695, %v10036_v39 }
 0x37f   : > { %5972 = vst.msk [vmem:[%s9743_s29 + $0x80] sm:$0xff] %vm5955_vm3, %v5939_v48  ;;  %v3064_v9 = vsel %vm3063_vm12, %v3061_v19, %v3058_v46  ;;  %v7503_v7 = vpop.eup %7502  ;;  %v2834_v15 = vsub.f32 0.0, %v2802_v40  ;;  %v3106_v26 = vmul.f32 %v10043_v8, %v3105_v10  ;;  %v2800_v46 = vand.u32 2147483647, %v10115_v5 }
 0x380   : > { %v5942_v2 = vsel %vm3738_vm15, %v9912_v61, %v10124_v29  ;;  %v10138_v63 = vadd.f32 %v3064_v9, %v2760_v51  ;;  %v3103_v44 = vmul.f32 0.6931472, %v7503_v7  ;;  %7510 = vlog2.f32 %v3083_v28  ;;  %v6933_v51 = vpop.f32.mrf.mxu1 }
 0x381   : > { %5975 = vst.msk [vmem:[%s9743_s29 + $0x98] sm:$0xff] %vm5955_vm3, %v5942_v2  ;;  %v3264_v22 = vmul.f32 0.5, %v9956_v35  ;;  %v2765_v50 = vmax.f32 %v9939_v32, 0.0  ;;  %vm3108_vm13 = vcmp.lt.f32.partialorder %v3107_v24, 0.0004427343  ;;  %v10149_v49 = vpop.eup %7504  ;;  %v3255_v40 = vmul.f32 0.5, %v9756_v20 }
 0x382   : > { %v5940_v39 = vsel %vm3738_vm15, %v9923_v57, %v10138_v63  ;;  %7512 = vpow2.f32 %v3297_v59  ;;  %v3109_v8 = vsel %vm3108_vm13, %v3106_v26, %v3103_v44  ;;  %v3110_v55 = vadd.f32 1.0, %v10127_v45 }
 0x383   : > { %5973 = vst.msk [vmem:[%s9743_s29 + $0x88] sm:$0xff] %vm5955_vm3, %v5940_v39  ;;  %v3303_v35 = vmul.f32 1.442695, %v3263_v58  ;;  %v3266_v62 = vmul.f32 0.5, %v9919_v25  ;;  %v10156_v19 = vadd.f32 %v3109_v8, %v2765_v50  ;;  %v2893_v10 = vmul.f32 1.442695, %v2834_v15  ;;  %v10158_v48 = vpop.eup %7506  ;;  %v2728_v58 = vpop.f32.mrf.mxu1 }
 0x384   : > { %v3086_v6 = vmul.f32 -0.5, %v10117_v37  ;;  %7514 = vlog2.f32 %v3110_v55  ;;  %v3092_v20 = vadd.f32 1.0, %v10149_v49  ;;  %v2832_v24 = vsub.f32 0.0, %v2800_v46 }
 0x385   : > { %7516 = vpow2.f32 %v3307_v43  ;;  %v3305_v59 = vmul.f32 1.442695, %v3264_v22  ;;  %v5945_v9 = vsel %vm3738_vm15, %v9939_v32, %v10156_v19  ;;  %v3291_v25 = vmul.f32 1.442695, %v9968_v16  ;;  %v8046_v43 = vld [vmem:[%s12445_s10] ss:$0 sm:$0xff] }
 0x386   : > { %v3287_v28 = vmul.f32 1.442695, %v3255_v40  ;;  %5978 = vst.msk [vmem:[%s9743_s29 + $0xb0] sm:$0xff] %vm5955_vm3, %v5945_v9  ;;  %7518 = vlog2.f32 %v3092_v20  ;;  %v10168_v7 = vmul.f32 1.442695, %v3266_v62  ;;  %v3137_v2 = vadd.f32 1.0, %v10158_v48  ;;  %v6934_v40 = vpop.f32.mrf.mxu1 }
 0x387   : > { %7520 = vpow2.f32 %v3303_v35  ;;  %v10174_v15 = vadd.f32 %v8046_v43, %v6933_v51  ;;  %v3087_v44 = vadd.f32 1.0, %v3086_v6  ;;  %v3089_v26 = vand.u32 2147483647, %v10117_v37 }
 0x388   : > { %7522 = vpow2.f32 %v2893_v10  ;;  %v2889_v16 = vmul.f32 1.442695, %v2832_v24  ;;  %v10177_v46 = vpop.eup %7508  ;;  %v2763_v22 = vmax.f32 %v9974_v13, 0.0  ;;  %v2766_v39 = vmax.f32 %v9987_v47, 0.0 }
 0x389   : > { %7524 = vpow2.f32 %v3305_v59  ;;  %v3116_v50 = vand.u32 2147483647, %v10127_v45  ;;  %v3113_v8 = vmul.f32 -0.5, %v10127_v45  ;;  %v3095_v51 = vmul.f32 -0.5, %v10149_v49 }
 0x38a   : > { %7526 = vlog2.f32 %v3137_v2  ;;  %v3119_v55 = vadd.f32 1.0, %v10177_v46  ;;  %v10186_v35 = vmul.f32 0.5, %v9962_v36  ;;  %v2805_v62 = vand.u32 2147483647, %v10174_v15 }
 0x38b   : > { %7528 = vpow2.f32 %v2889_v16  ;;  %v10189_v10 = vadd.f32 %v8046_v43, %v2728_v58  ;;  %v3088_v6 = vmul.f32 %v10117_v37, %v3087_v44  ;;  %vm10192_vm14 = vcmp.lt.f32.partialorder %v3089_v26, 0.0004427343  ;;  %v2731_v58 = vpop.f32.mrf.mxu1 }
 0x38c   : > { %7530 = vlog2.f32 %v3119_v55  ;;  %v10196_v24 = vadd.f32 %v8046_v43, %v6934_v40  ;;  %vm10198_vm4 = vcmp.lt.f32.partialorder %v3116_v50, 0.0004427343  ;;  %v2837_v36 = vsub.f32 0.0, %v2805_v62 }
 0x38d   : > { %v7511_v59 = vpop.eup %7510  ;;  %v2803_v2 = vand.u32 2147483647, %v10189_v10  ;;  %7532 = vpow2.f32 %v3291_v25  ;;  %v3114_v32 = vadd.f32 1.0, %v3113_v8  ;;  %v3096_v37 = vadd.f32 1.0, %v3095_v51 }
 0x38e   : > { %v3085_v16 = vmul.f32 0.6931472, %v7511_v59  ;;  %v2806_v44 = vand.u32 2147483647, %v10196_v24  ;;  %v3140_v40 = vmul.f32 -0.5, %v10158_v48  ;;  %7534 = vpow2.f32 %v3287_v28 }
 0x38f   : > { %v10204_v26 = vpop.eup %7512  ;;  %v2899_v55 = vmul.f32 1.442695, %v2837_v36  ;;  %v2835_v61 = vsub.f32 0.0, %v2803_v2  ;;  %v10209_v30 = vadd.f32 %v8046_v43, %v2731_v58  ;;  %v3569_v25 = vsel %vm849_vm0, %v9950_v21, 0 }
 0x390   : > { %v3091_v50 = vsel %vm10192_vm14, %v3088_v6, %v3085_v16  ;;  %v2838_v62 = vsub.f32 0.0, %v2806_v44  ;;  %v3098_v59 = vand.u32 2147483647, %v10149_v49  ;;  %6936 = vmatpush3.bf16.msra.mxu0 %v3569_v25  ;;  %v3115_v6 = vmul.f32 %v10127_v45, %v3114_v32  ;;  %v12755_v44 = vld [vmem:[#allocation3_spill] sm:$0xff] }
 0x391   : > { %v7515_v8 = vpop.eup %7514  ;;  %v10213_v51 = vadd.f32 %v3091_v50, %v2763_v22  ;;  %7536 = vpow2.f32 %v2899_v55  ;;  %v2895_v57 = vmul.f32 1.442695, %v2835_v61  ;;  %v3122_v43 = vmul.f32 -0.5, %v10177_v46 }
 0x392   : > { %v10216_v36 = vpop.eup %7516  ;;  %v3112_v28 = vmul.f32 0.6931472, %v7515_v8  ;;  %v2901_v20 = vmul.f32 1.442695, %v2838_v62  ;;  %v3097_v22 = vmul.f32 %v10149_v49, %v3096_v37  ;;  %v3141_v58 = vadd.f32 1.0, %v3140_v40  ;;  %v12756_v37 = vld [vmem:[#allocation4_spill] sm:$0xff] }
 0x393   : > { %v7519_v2 = vpop.eup %7518  ;;  %v5943_v21 = vsel %vm3738_vm15, %v9974_v13, %v10213_v51  ;;  %7538 = vpow2.f32 %v2895_v57  ;;  %v2804_v45 = vand.u32 2147483647, %v10209_v30  ;;  %6938 = vmatmul.mubr.msk.bf16.vlgmr.msra.gmra.mxu0 %vm800_vm1, %v12755_v44  ;;  %v2764_v57 = vmax.f32 %v10019_v3, 0.0 }
 0x394   : > { %v10224_v16 = vpop.eup %7520  ;;  %5976 = vst.msk [vmem:[%s9743_s29 + $0xa0] sm:$0xff] %vm5955_vm3, %v5943_v21  ;;  %v3118_v61 = vsel %vm10198_vm4, %v3115_v6, %v3112_v28  ;;  %v3094_v32 = vmul.f32 0.6931472, %v7519_v2  ;;  %7540 = vpow2.f32 %v2901_v20  ;;  %vm3099_vm0 = vcmp.lt.f32.partialorder %v3098_v59, 0.0004427343  ;;  %6941 = vmatprep.mubr.msk.bf16.mxu0 %vm800_vm1, %v12756_v37 }
 0x395   : > { %v10233_v55 = vpop.eup %7522  ;;  %v10235_v50 = vadd.f32 %v3118_v61, %v2766_v39  ;;  %v3143_v49 = vand.u32 2147483647, %v10158_v48  ;;  %v3267_v40 = vmul.f32 0.5, %v9995_v18  ;;  %v3123_v25 = vadd.f32 1.0, %v3122_v43 }
 0x396   : > { %v10241_v9 = vpop.eup %7524  ;;  %v3100_v62 = vsel %vm3099_vm0, %v3097_v22, %v3094_v32  ;;  %v3146_v8 = vadd.f32 1.0, %v10233_v55  ;;  %v3270_v39 = vmul.f32 0.5, %v10014_v42  ;;  %v3125_v20 = vand.u32 2147483647, %v10177_v46 }
 0x397   : > { %v7527_v28 = vpop.eup %7526  ;;  %v5946_v59 = vsel %vm3738_vm15, %v9987_v47, %v10235_v50  ;;  %v10249_v6 = vadd.f32 %v3100_v62, %v2764_v57  ;;  %v3142_v43 = vmul.f32 %v10158_v48, %v3141_v58  ;;  %v2836_v21 = vsub.f32 0.0, %v2804_v45 }
 0x398   : > { %v10252_v2 = vpop.eup %7528  ;;  %5979 = vst.msk [vmem:[%s9743_s29 + $0xb8] sm:$0xff] %vm5955_vm3, %v5946_v59  ;;  %v3139_v18 = vmul.f32 0.6931472, %v7527_v28  ;;  %7542 = vlog2.f32 %v3146_v8  ;;  %v2769_v61 = vmax.f32 %v10039_v31, 0.0  ;;  %vm3144_vm5 = vcmp.lt.f32.partialorder %v3143_v49, 0.0004427343 }
 0x399   : > { %v7531_v22 = vpop.eup %7530  ;;  %v5944_v42 = vsel %vm3738_vm15, %v10019_v3, %v10249_v6  ;;  %v3128_v32 = vadd.f32 1.0, %v10252_v2  ;;  %v3315_v57 = vmul.f32 1.442695, %v10186_v35  ;;  %v3124_v48 = vmul.f32 %v10177_v46, %v3123_v25 }
 0x39a   : > { %v7533_v44 = vpop.eup %7532  ;;  %5977 = vst.msk [vmem:[%s9743_s29 + $0xa8] sm:$0xff] %vm5955_vm3, %v5944_v42  ;;  %v3145_v37 = vsel %vm3144_vm5, %v3142_v43, %v3139_v18  ;;  %v3121_v62 = vmul.f32 0.6931472, %v7531_v22  ;;  %v3268_v58 = vmul.f32 0.5, %v10071_v12  ;;  %v2767_v8 = vmax.f32 %v10064_v27, 0.0  ;;  %v12757_v18 = vld [vmem:[#allocation5_spill] sm:$0xff] }
 0x39b   : > { %v10267_v45 = vadd.f32 %v3145_v37, %v2769_v61  ;;  %vm3126_vm6 = vcmp.lt.f32.partialorder %v3125_v20, 0.0004427343  ;;  %3387 = vrot.lane.b32.xlu1 %v7533_v44, %s8055_s24  ;;  %v7535_v49 = vpop.eup %7534  ;;  %v3311_v28 = vmul.f32 1.442695, %v3267_v40  ;;  %7544 = vlog2.f32 %v3128_v32  ;;  %6942 = vmatmul.mubr.msk.bf16.gmra.mxu0 %vm800_vm1, %v12757_v18  ;;  %v12758_v20 = vld [vmem:[#allocation6_spill] sm:$0xff] }
 0x39c   : > { %v3127_v35 = vsel %vm3126_vm6, %v3124_v48, %v3121_v62  ;;  %v2897_v59 = vmul.f32 1.442695, %v2836_v21  ;;  %7546 = vpow2.f32 %v10168_v7  ;;  %v3317_v12 = vmul.f32 1.442695, %v3270_v39  ;;  %3383 = vrot.lane.b32.xlu0 %v7535_v49, %s8055_s24  ;;  %6945 = vmatprep.mubr.msk.bf16.mxu0 %vm800_vm1, %v12758_v20  ;;  %v12759_v48 = vld [vmem:[#allocation7_spill] sm:$0xff] }
 0x39d   : > { %v5949_v46 = vsel %vm3738_vm15, %v10039_v31, %v10267_v45  ;;  %v10277_v25 = vadd.f32 %v3127_v35, %v2767_v8  ;;  %v3149_v43 = vmul.f32 -0.5, %v10233_v55  ;;  %v3313_v7 = vmul.f32 1.442695, %v3268_v58  ;;  %v12760_v8 = vld [vmem:[#allocation8_spill] sm:$0xff] }
 0x39e   : > { %v10282_v40 = vpop.eup %7536  ;;  %5982 = vst.msk [vmem:[%s9743_s29 + $0xd0] sm:$0xff] %vm5955_vm3, %v5949_v46  ;;  %7548 = vpow2.f32 %v2897_v59  ;;  %v3273_v61 = vmul.f32 0.5, %v10084_v33  ;;  %v3272_v44 = vmul.f32 0.5, %v10138_v63  ;;  %v3152_v37 = vand.u32 2147483647, %v10233_v55 }
 0x39f   : > { %7550 = vpow2.f32 %v3315_v57  ;;  %v5947_v39 = vsel %vm3738_vm15, %v10064_v27, %v10277_v25  ;;  %v3173_v21 = vadd.f32 1.0, %v10282_v40  ;;  %3389 = vrot.lane.b32.xlu1 %v10002_v0, %s8055_s24  ;;  %v3150_v57 = vadd.f32 1.0, %v3149_v43 }
 0x3a0   : > { %v10293_v22 = vpop.eup %7538  ;;  %7552 = vpow2.f32 %v3311_v28  ;;  %5980 = vst.msk [vmem:[%s9743_s29 + $0xc0] sm:$0xff] %vm5955_vm3, %v5947_v39  ;;  %3385 = vrot.lane.b32.xlu0 %v10030_v1, %s8055_s24  ;;  %v3131_v0 = vmul.f32 -0.5, %v10252_v2  ;;  %v3271_v33 = vmul.f32 0.5, %v10108_v4  ;;  %v3323_v63 = vmul.f32 1.442695, %v3273_v61 }
 0x3a1   : > { %v10297_v42 = vpop.eup %7540  ;;  %7554 = vpow2.f32 %v3317_v12  ;;  %v3155_v32 = vadd.f32 1.0, %v10293_v22  ;;  %v3274_v58 = vmul.f32 0.5, %v10124_v29  ;;  %v3321_v49 = vmul.f32 1.442695, %v3272_v44 }
 0x3a2   : > { %7556 = vlog2.f32 %v3173_v21  ;;  %v3182_v62 = vadd.f32 1.0, %v10297_v42  ;;  %v3132_v4 = vadd.f32 1.0, %v3131_v0  ;;  %v3275_v35 = vmul.f32 0.5, %v10213_v51 }
 0x3a3   : > { %7558 = vpow2.f32 %v3313_v7  ;;  %3393 = vrot.lane.b32.xlu1 %v10204_v26, %s8055_s24  ;;  %6946 = vmatmul.mubr.msk.bf16.gmra.mxu0 %vm800_vm1, %v12759_v48  ;;  %v3151_v26 = vmul.f32 %v10233_v55, %v3150_v57  ;;  %v2770_v59 = vmax.f32 %v10087_v23, 0.0  ;;  %vm3153_vm7 = vcmp.lt.f32.partialorder %v3152_v37, 0.0004427343  ;;  %v12761_v37 = vld [vmem:[#allocation9_spill] sm:$0xff] }
 0x3a4   : > { %7560 = vlog2.f32 %v3155_v32  ;;  %3391 = vrot.lane.b32.xlu0 %v10089_v34, %s8055_s24  ;;  %6949 = vmatprep.mubr.msk.bf16.mxu0 %vm800_vm1, %v12760_v8  ;;  %v3134_v18 = vand.u32 2147483647, %v10252_v2  ;;  %v3319_v29 = vmul.f32 1.442695, %v3271_v33  ;;  %v2768_v12 = vmax.f32 %v10115_v5, 0.0 }
 0x3a5   : > { %v7543_v1 = vpop.eup %7542  ;;  %7562 = vlog2.f32 %v3182_v62  ;;  %v3176_v46 = vmul.f32 -0.5, %v10282_v40  ;;  %v3325_v55 = vmul.f32 1.442695, %v3274_v58  ;;  %v3276_v43 = vmul.f32 0.5, %v10249_v6 }
 0x3a6   : > { %v3148_v28 = vmul.f32 0.6931472, %v7543_v1  ;;  %7564 = vpow2.f32 %v3323_v63  ;;  %v3133_v39 = vmul.f32 %v10252_v2, %v3132_v4  ;;  %v3158_v21 = vmul.f32 -0.5, %v10293_v22 }
 0x3a7   : > { %3397 = vrot.lane.b32.xlu1 %v10103_v17, %s8055_s24  ;;  %7566 = vpow2.f32 %v3321_v49  ;;  %v3327_v32 = vmul.f32 1.442695, %v3275_v35  ;;  %vm3135_vm8 = vcmp.lt.f32.partialorder %v3134_v18, 0.0004427343  ;;  %v3185_v44 = vmul.f32 -0.5, %v10297_v42 }
 0x3a8   : > { %v3154_v34 = vsel %vm3153_vm7, %v3151_v26, %v3148_v28  ;;  %v7545_v20 = vpop.eup %7544  ;;  %3395 = vrot.lane.b32.xlu0 %v10073_v60, %s8055_s24  ;;  %7568 = vpow2.f32 %v3319_v29  ;;  %v3177_v57 = vadd.f32 1.0, %v3176_v46  ;;  %v3329_v33 = vmul.f32 1.442695, %v3276_v43 }
 0x3a9   : > { %v10326_v51 = vadd.f32 %v3154_v34, %v2770_v59  ;;  %v7547_v7 = vpop.eup %7546  ;;  %v3130_v17 = vmul.f32 0.6931472, %v7545_v20  ;;  %7570 = vpow2.f32 %v3325_v55  ;;  %v3179_v1 = vand.u32 2147483647, %v10282_v40 }
 0x3aa   : > { %v3277_v58 = vmul.f32 0.5, %v10156_v19  ;;  %v3159_v8 = vadd.f32 1.0, %v3158_v21  ;;  %v3161_v49 = vand.u32 2147483647, %v10293_v22  ;;  %v2773_v4 = vmax.f32 %v10174_v15, 0.0 }
 0x3ab   : > { %v10332_v61 = vpop.eup %7548  ;;  %v5950_v6 = vsel %vm3738_vm15, %v10087_v23, %v10326_v51  ;;  %3401 = vrot.lane.b32.xlu1 %v10241_v9, %s8055_s24  ;;  %v3136_v2 = vsel %vm3135_vm8, %v3133_v39, %v3130_v17  ;;  %6950 = vmatmul.mubr.msk.bf16.gmra.mxu0 %vm800_vm1, %v12761_v37  ;;  %v12762_v9 = vld [vmem:[#allocation10_spill] sm:$0xff]  ;;  %v3186_v35 = vadd.f32 1.0, %v3185_v44  ;;  %v3278_v59 = vmul.f32 0.5, %v10235_v50 }
 0x3ac   : > { %v10340_v60 = vpop.eup %7550  ;;  %5983 = vst.msk [vmem:[%s9743_s29 + $0xd8] sm:$0xff] %vm5955_vm3, %v5950_v6  ;;  %v3164_v0 = vadd.f32 1.0, %v10332_v61  ;;  %v3216_v48 = vadd.f32 %v3136_v2, %v2768_v12  ;;  %3399 = vrot.lane.b32.xlu0 %v10224_v16, %s8055_s24  ;;  %6953 = vmatprep.mubr.msk.bf16.mxu0 %vm800_vm1, %v12762_v9  ;;  %v3178_v18 = vmul.f32 %v10282_v40, %v3177_v57  ;;  %v3188_v29 = vand.u32 2147483647, %v10297_v42 }
 0x3ad   : > { %v7553_v62 = vpop.eup %7552  ;;  %vm3180_vm9 = vcmp.lt.f32.partialorder %v3179_v1, 0.0004427343  ;;  %v2771_v12 = vmax.f32 %v10189_v10, 0.0  ;;  %v2774_v46 = vmax.f32 %v10196_v24, 0.0  ;;  %v3160_v43 = vmul.f32 %v10293_v22, %v3159_v8 }
 0x3ae   : > { %v7555_v63 = vpop.eup %7554  ;;  %7572 = vlog2.f32 %v3164_v0  ;;  %v5948_v26 = vsel %vm3738_vm15, %v10115_v5, %v3216_v48  ;;  %vm3162_vm10 = vcmp.lt.f32.partialorder %v3161_v49, 0.0004427343  ;;  %v3187_v39 = vmul.f32 %v10297_v42, %v3186_v35  ;;  %v12764_v42 = vld [vmem:[#allocation12_spill] sm:$0xff] }
 0x3af   : > { %v7557_v28 = vpop.eup %7556  ;;  %7574 = vpow2.f32 %v3327_v32  ;;  %3405 = vrot.lane.b32.xlu1 %v7547_v7, %s8055_s24  ;;  %5981 = vst.msk [vmem:[%s9743_s29 + $0xc8] sm:$0xff] %vm5955_vm3, %v5948_v26  ;;  %v3280_v7 = vmul.f32 0.5, %v3216_v48  ;;  %v3333_v21 = vmul.f32 1.442695, %v3278_v59  ;;  %vm3189_vm11 = vcmp.lt.f32.partialorder %v3188_v29, 0.0004427343 }
 0x3b0   : > { %v7559_v16 = vpop.eup %7558  ;;  %v3175_v19 = vmul.f32 0.6931472, %v7557_v28  ;;  %7576 = vpow2.f32 %v3329_v33  ;;  %3403 = vrot.lane.b32.xlu0 %v10216_v36, %s8055_s24  ;;  %v3167_v6 = vmul.f32 -0.5, %v10332_v61  ;;  %v12763_v36 = vld [vmem:[#allocation11_spill] sm:$0xff]  ;;  %v3279_v22 = vmul.f32 0.5, %v10277_v25 }
 0x3b1   : > { %v7561_v34 = vpop.eup %7560  ;;  %v3331_v37 = vmul.f32 1.442695, %v3277_v58  ;;  %v3337_v1 = vmul.f32 1.442695, %v3280_v7  ;;  %7578 = vpow2.f32 %v3333_v21  ;;  %v3282_v58 = vmul.f32 0.5, %v10326_v51  ;;  %v12768_v21 = vld [vmem:[#allocation16_spill] sm:$0xff] }
 0x3b2   : > { %v7563_v20 = vpop.eup %7562  ;;  %v3181_v55 = vsel %vm3180_vm9, %v3178_v18, %v3175_v19  ;;  %v3157_v50 = vmul.f32 0.6931472, %v7561_v34  ;;  %v3168_v9 = vadd.f32 1.0, %v3167_v6  ;;  %v3335_v49 = vmul.f32 1.442695, %v3279_v22  ;;  %v12765_v19 = vld [vmem:[#allocation13_spill] sm:$0xff] }
 0x3b3   : > { %v3221_v40 = vadd.f32 %v3181_v55, %v2773_v4  ;;  %v3184_v17 = vmul.f32 0.6931472, %v7563_v20  ;;  %3409 = vrot.lane.b32.xlu1 %v7559_v16, %s8055_s24  ;;  %6954 = vmatmul.mubr.msk.bf16.gmra.mxu0 %vm800_vm1, %v12763_v36  ;;  %v7565_v0 = vpop.eup %7564  ;;  %v3170_v28 = vand.u32 2147483647, %v10332_v61  ;;  %7580 = vpow2.f32 %v3331_v37  ;;  %v7134_v37 = vld [vmem:[%s12449_s14 + $0x38] sm:$0xff]  }
 0x3b4   : > { %v3163_v32 = vsel %vm3162_vm10, %v3160_v43, %v3157_v50  ;;  %3407 = vrot.lane.b32.xlu0 %v7553_v62, %s8055_s24  ;;  %6957 = vmatprep.mubr.msk.bf16.mxu0 %vm800_vm1, %v12764_v42  ;;  %v7567_v48 = vpop.eup %7566  ;;  %v3281_v4 = vmul.f32 0.5, %v10267_v45  ;;  %7582 = vpow2.f32 %v3337_v1  ;;  %v3169_v51 = vmul.f32 %v10332_v61, %v3168_v9  ;;  %v12766_v45 = vld [vmem:[#allocation14_spill] sm:$0xff] }
 0x3b5   : > { %v5953_v44 = vsel %vm3738_vm15, %v10174_v15, %v3221_v40  ;;  %v3219_v2 = vadd.f32 %v3163_v32, %v2771_v12  ;;  %v3190_v57 = vsel %vm3189_vm11, %v3187_v39, %v3184_v17  ;;  %v7569_v8 = vpop.eup %7568  ;;  %7584 = vpow2.f32 %v3335_v49  ;;  %v12767_v17 = vld [vmem:[#allocation15_spill] sm:$0xff]  ;;  %7003 = vmatprep.subr.bf16.mxu0 %v7134_v37 }
 0x3b6   : > { %5986 = vst.msk [vmem:[%s9743_s29 + $0xf0] sm:$0xff] %vm5955_vm3, %v5953_v44  ;;  %v3222_v33 = vadd.f32 %v3190_v57, %v2774_v46  ;;  %v7571_v26 = vpop.eup %7570  ;;  %v3341_v18 = vmul.f32 1.442695, %v3282_v58  ;;  %vm3171_vm12 = vcmp.lt.f32.partialorder %v3170_v28, 0.0004427343  ;;  %v3285_v43 = vmul.f32 0.5, %v3221_v40  ;;  %7004 = vmatpush3.bf16.msra.mxu0 %v7134_v37 }
 0x3b7   : > { %v5951_v25 = vsel %vm3738_vm15, %v10189_v10, %v3219_v2  ;;  %3413 = vrot.lane.b32.xlu1 %v7555_v63, %s8055_s24  ;;  %v3283_v16 = vmul.f32 0.5, %v3219_v2  ;;  %v3339_v12 = vmul.f32 1.442695, %v3281_v4  ;;  %v12769_v44 = vld [vmem:[#allocation17_spill] sm:$0xff] }
 0x3b8   : > { %5984 = vst.msk [vmem:[%s9743_s29 + $0xe0] sm:$0xff] %vm5955_vm3, %v5951_v25  ;;  %v5954_v62 = vsel %vm3738_vm15, %v10196_v24, %v3222_v33  ;;  %3411 = vrot.lane.b32.xlu0 %v10340_v60, %s8055_s24  ;;  %v2772_v60 = vmax.f32 %v10209_v30, 0.0  ;;  %7586 = vpow2.f32 %v3341_v18  ;;  %v3286_v20 = vmul.f32 0.5, %v3222_v33 }
 0x3b9   : > { %5987 = vst.msk [vmem:[%s9743_s29 + $0xf8] sm:$0xff] %vm5955_vm3, %v5954_v62  ;;  %v3343_v61 = vmul.f32 1.442695, %v3283_v16  ;;  %7588 = vpow2.f32 %v3339_v12  ;;  %v3347_v36 = vmul.f32 1.442695, %v3285_v43 }
 0x3ba   : > { %v3349_v39 = vmul.f32 1.442695, %v3286_v20 }
 0x3bb   : > { %v7573_v63 = vpop.eup %7572  ;;  %3417 = vrot.lane.b32.xlu1 %v7567_v48, %s8055_s24  ;;  %6958 = vmatmul.mubr.msk.bf16.gmra.mxu0 %vm800_vm1, %v12765_v19  ;;  %7590 = vpow2.f32 %v3343_v61 }
 0x3bc   : > { %v7575_v35 = vpop.eup %7574  ;;  %v3166_v59 = vmul.f32 0.6931472, %v7573_v63  ;;  %3415 = vrot.lane.b32.xlu0 %v7569_v8, %s8055_s24  ;;  %6961 = vmatprep.mubr.msk.bf16.mxu0 %vm800_vm1, %v12766_v45 }
 0x3bd   : > { %v7577_v29 = vpop.eup %7576 }
 0x3be   : > { %v3172_v34 = vsel %vm3171_vm12, %v3169_v51, %v3166_v59  ;;  %v7579_v32 = vpop.eup %7578 }
 0x3bf   : > { %v3220_v46 = vadd.f32 %v3172_v34, %v2772_v60  ;;  %3421 = vrot.lane.b32.xlu1 %v7571_v26, %s8055_s24 }
 0x3c0   : > { %3419 = vrot.lane.b32.xlu0 %v7565_v0, %s8055_s24  ;;  %v7581_v6 = vpop.eup %7580 }
 0x3c1   : > { %v3284_v55 = vmul.f32 0.5, %v3220_v46  ;;  %v5952_v50 = vsel %vm3738_vm15, %v10209_v30, %v3220_v46  ;;  %v7583_v40 = vpop.eup %7582 }
 0x3c2   : > { %5985 = vst.msk [vmem:[%s9743_s29 + $0xe8] sm:$0xff] %vm5955_vm3, %v5952_v50  ;;  %v7585_v22 = vpop.eup %7584  ;;  %s12770_s29 = sld [smem:[#allocation36_spill]] }
 0x3c3   : > { %v3345_v7 = vmul.f32 1.442695, %v3284_v55  ;;  %3425 = vrot.lane.b32.xlu1 %v7577_v29, %s8055_s24  ;;  %6962 = vmatmul.mubr.msk.bf16.gmra.mxu0 %vm800_vm1, %v12767_v17 }
 0x3c4   : > { %3423 = vrot.lane.b32.xlu0 %v7575_v35, %s8055_s24  ;;  %6965 = vmatprep.mubr.msk.bf16.mxu0 %vm800_vm1, %v12768_v21 }
 0x3c5   : > { %7592 = vpow2.f32 %v3345_v7  ;;  %v7587_v2 = vpop.eup %7586 }
 0x3c6   : > { %7594 = vpow2.f32 %v3349_v39  ;;  %v7589_v57 = vpop.eup %7588 }
 0x3c7   : > { %3429 = vrot.lane.b32.xlu1 %v7579_v32, %s8055_s24  ;;  %7596 = vpow2.f32 %v3347_v36 }
 0x3c8   : > { %3427 = vrot.lane.b32.xlu0 %v7581_v6, %s8055_s24  ;;  %v7591_v42 = vpop.eup %7590  ;;  %s10434_s30 = scalar_lea.vmem %s12770_s29, %s8185_s28 }
 0x3c9   : > { %v3223_v25 = vld [vmem:[%s10434_s30] sm:$0xff]  ;;  %v3226_v9 = vld [vmem:[%s10434_s30 + $0x18] sm:$0xff]  ;;  %v3225_v8 = vld [vmem:[%s10434_s30 + $0x10] sm:$0xff] }
 0x3ca   : > { %v3224_v58 = vld [vmem:[%s10434_s30 + $0x8] sm:$0xff]  ;;  %v3227_v51 = vld [vmem:[%s10434_s30 + $0x20] sm:$0xff]  ;;  %v3230_v12 = vld [vmem:[%s10434_s30 + $0x38] sm:$0xff] }
 0x3cb   : > { %3433 = vrot.lane.b32.xlu1 %v7583_v40, %s8055_s24  ;;  %6966 = vmatmul.mubr.msk.bf16.gmra.mxu0 %vm800_vm1, %v12769_v44  ;;  %v3228_v35 = vld [vmem:[%s10434_s30 + $0x28] sm:$0xff]  ;;  %v3229_v50 = vld [vmem:[%s10434_s30 + $0x30] sm:$0xff]  ;;  %v3231_v21 = vld [vmem:[%s10434_s30 + $0x40] sm:$0xff] }
 0x3cc   : > { %3431 = vrot.lane.b32.xlu0 %v7585_v22, %s8055_s24  ;;  %v3234_v36 = vld [vmem:[%s10434_s30 + $0x58] sm:$0xff]  ;;  %v12771_v44 = vld [vmem:[#allocation22_spill] sm:$0xff] }
 0x3cf   : > { %3437 = vrot.lane.b32.xlu1 %v7587_v2, %s8055_s24 }
 0x3d0   : > { %3435 = vrot.lane.b32.xlu0 %v7589_v57, %s8055_s24  ;;  %v3233_v57 = vld [vmem:[%s10434_s30 + $0x50] sm:$0xff] }
 0x3d2   : > { %v7593_v0 = vpop.eup %7592 }
 0x3d3   : > { %3441 = vrot.lane.b32.xlu1 %v7593_v0, %s8055_s24  ;;  %v7595_v33 = vpop.eup %7594  ;;  %v12772_v0 = vld [vmem:[#allocation32_spill] sm:$0xff] }
 0x3d4   : > { %3439 = vrot.lane.b32.xlu0 %v7591_v42, %s8055_s24  ;;  %v7597_v48 = vpop.eup %7596 }
 0x3d7   : > { %3445 = vrot.lane.b32.xlu1 %v7595_v33, %s8055_s24 }
 0x3d8   : > { %3443 = vrot.lane.b32.xlu0 %v7597_v48, %s8055_s24 }
 0x40d   : > { %v3388_v1 = vpop.permute.xlu1 %3387 }
 0x40e   : > { %v3384_v62 = vpop.permute.xlu0 %3383  ;;  %v3481_v63 = vmul.f32 %v3388_v1, %v3225_v8 }
 0x40f   : > { %v3479_v28 = vmul.f32 %v3384_v62, %v3223_v25  ;;  %v12773_v25 = vld [vmem:[#allocation20_spill] sm:$0xff] }
 0x410   : > { %v3513_v29 = vadd.f32 %v3481_v63, %v9668_v52  ;;  %v3238_v63 = vld [vmem:[%s10434_s30 + $0x78] sm:$0xff] }
 0x411   : > { %v3390_v49 = vpop.permute.xlu1 %3389  ;;  %v3511_v18 = vadd.f32 %v3479_v28, %v9672_v38 }
 0x412   : > { %v3482_v26 = vmul.f32 %v3390_v49, %v3226_v9  ;;  %v3386_v4 = vpop.permute.xlu0 %3385  ;;  %v3235_v9 = vld [vmem:[%s10434_s30 + $0x60] sm:$0xff] }
 0x413   : > { %v3480_v16 = vmul.f32 %v3386_v4, %v3224_v58  ;;  %v12774_v49 = vld [vmem:[#allocation18_spill] sm:$0xff] }
 0x414   : > { %v3514_v59 = vadd.f32 %v3482_v26, %v9676_v54 }
 0x415   : > { %v3394_v19 = vpop.permute.xlu1 %3393  ;;  %v3512_v60 = vadd.f32 %v3480_v16, %v9680_v41  ;;  %v3232_v41 = vld [vmem:[%s10434_s30 + $0x48] sm:$0xff]  ;;  %v12775_v16 = vld [vmem:[#allocation33_spill] sm:$0xff] }
 0x416   : > { %v3484_v45 = vmul.f32 %v3394_v19, %v3228_v35  ;;  %v3392_v34 = vpop.permute.xlu0 %3391  ;;  %v3546_v55 = vpack.c.bf16 %v3514_v59, %v3513_v29 }
 0x417   : > { %v3545_v46 = vpack.c.bf16 %v3512_v60, %v3511_v18  ;;  %v3483_v61 = vmul.f32 %v3392_v34, %v3227_v51  ;;  %v3237_v51 = vld [vmem:[%s10434_s30 + $0x70] sm:$0xff]  ;;  %v12776_v18 = vld [vmem:[#allocation19_spill] sm:$0xff] }
 0x418   : > { %v3516_v20 = vadd.f32 %v3484_v45, %v9699_v56  ;;  %v3240_v34 = vld [vmem:[%s10434_s30 + $0x88] sm:$0xff] }
 0x419   : > { %v3398_v54 = vpop.permute.xlu1 %3397  ;;  %v3515_v43 = vadd.f32 %v3483_v61, %v9688_v11  ;;  %6971 = vmatprep.mubr.msk.bf16.mxu1 %vm3738_vm15, %v3545_v46  ;;  %v12777_v61 = vld [vmem:[#allocation21_spill] sm:$0xff] }
 0x41a   : > { %v3486_v38 = vmul.f32 %v3398_v54, %v3230_v12  ;;  %6972 = vmatmul.mubr.msk.bf16.vlgmr.msra.gmra.mxu1 %vm3738_vm15, %v3546_v55  ;;  %v3396_v52 = vpop.permute.xlu0 %3395  ;;  %v3239_v55 = vld [vmem:[%s10434_s30 + $0x80] sm:$0xff]  ;;  %v12778_v54 = vld [vmem:[#allocation31_spill] sm:$0xff] }
 0x41b   : > { %v3547_v7 = vpack.c.bf16 %v3516_v20, %v3515_v43  ;;  %v3485_v17 = vmul.f32 %v3396_v52, %v3229_v50 }
 0x41c   : > { %v3518_v39 = vadd.f32 %v3486_v38, %v9692_v53 }
 0x41d   : > { %v3402_v56 = vpop.permute.xlu1 %3401  ;;  %v3517_v32 = vadd.f32 %v3485_v17, %v9684_v14  ;;  %6975 = vmatprep.mubr.msk.bf16.mxu1 %vm3738_vm15, %v3547_v7  ;;  %v3236_v14 = vld [vmem:[%s10434_s30 + $0x68] sm:$0xff] }
 0x41e   : > { %v3488_v11 = vmul.f32 %v3402_v56, %v3232_v41  ;;  %v3400_v6 = vpop.permute.xlu0 %3399  ;;  %v3242_v41 = vld [vmem:[%s10434_s30 + $0x98] sm:$0xff]  ;;  %v3241_v56 = vld [vmem:[%s10434_s30 + $0x90] sm:$0xff] }
 0x41f   : > { %v3548_v40 = vpack.c.bf16 %v3518_v39, %v3517_v32  ;;  %v3487_v22 = vmul.f32 %v3400_v6, %v3231_v21  ;;  %v12779_v39 = vld [vmem:[#allocation26_spill] sm:$0xff] }
 0x420   : > { %v3520_v2 = vadd.f32 %v3488_v11, %v12771_v44  ;;  %v12780_v11 = vld [vmem:[#allocation24_spill] sm:$0xff] }
 0x421   : > { %v3406_v42 = vpop.permute.xlu1 %3405  ;;  %v3519_v53 = vadd.f32 %v3487_v22, %v12772_v0  ;;  %v3244_v22 = vld [vmem:[%s10434_s30 + $0xa8] sm:$0xff]  ;;  %v3243_v0 = vld [vmem:[%s10434_s30 + $0xa0] sm:$0xff] }
 0x422   : > { %v3490_v37 = vmul.f32 %v3406_v42, %v3234_v36  ;;  %v3404_v33 = vpop.permute.xlu0 %3403  ;;  %6976 = vmatmul.mubr.msk.bf16.gmra.mxu1 %vm3738_vm15, %v3548_v40 }
 0x423   : > { %v3549_v48 = vpack.c.bf16 %v3520_v2, %v3519_v53  ;;  %v3489_v1 = vmul.f32 %v3404_v33, %v3233_v57  ;;  %v12781_v57 = vld [vmem:[#allocation25_spill] sm:$0xff] }
 0x424   : > { %v3522_v62 = vadd.f32 %v3490_v37, %v12773_v25  ;;  %v12782_v37 = vld [vmem:[#allocation23_spill] sm:$0xff] }
 0x425   : > { %v3410_v8 = vpop.permute.xlu1 %3409  ;;  %v3521_v58 = vadd.f32 %v3489_v1, %v12774_v49  ;;  %6979 = vmatprep.mubr.msk.bf16.mxu1 %vm3738_vm15, %v3549_v48  ;;  %v3246_v1 = vld [vmem:[%s10434_s30 + $0xb8] sm:$0xff] }
 0x426   : > { %v3492_v28 = vmul.f32 %v3410_v8, %v3236_v14  ;;  %v3408_v26 = vpop.permute.xlu0 %3407  ;;  %v3245_v8 = vld [vmem:[%s10434_s30 + $0xb0] sm:$0xff] }
 0x427   : > { %v3550_v4 = vpack.c.bf16 %v3522_v62, %v3521_v58  ;;  %v3491_v35 = vmul.f32 %v3408_v26, %v3235_v9 }
 0x428   : > { %v3524_v59 = vadd.f32 %v3492_v28, %v12775_v16 }
 0x429   : > { %v3414_v19 = vpop.permute.xlu1 %3413  ;;  %v3523_v60 = vadd.f32 %v3491_v35, %v12776_v18 }
 0x42a   : > { %v3494_v45 = vmul.f32 %v3414_v19, %v3238_v63  ;;  %v3412_v29 = vpop.permute.xlu0 %3411  ;;  %6980 = vmatmul.mubr.msk.bf16.gmra.mxu1 %vm3738_vm15, %v3550_v4  ;;  %v3248_v63 = vld [vmem:[%s10434_s30 + $0xc8] sm:$0xff]  ;;  %v12783_v19 = vld [vmem:[#allocation28_spill] sm:$0xff] }
 0x42b   : > { %v3551_v12 = vpack.c.bf16 %v3524_v59, %v3523_v60  ;;  %v3493_v46 = vmul.f32 %v3412_v29, %v3237_v51  ;;  %v3247_v59 = vld [vmem:[%s10434_s30 + $0xc0] sm:$0xff]  ;;  %v3250_v60 = vld [vmem:[%s10434_s30 + $0xd8] sm:$0xff] }
 0x42c   : > { %v3526_v20 = vadd.f32 %v3494_v45, %v12777_v61 }
 0x42d   : > { %v3418_v50 = vpop.permute.xlu1 %3417  ;;  %v3525_v43 = vadd.f32 %v3493_v46, %v12778_v54  ;;  %6983 = vmatprep.mubr.msk.bf16.mxu1 %vm3738_vm15, %v3551_v12  ;;  %v3249_v12 = vld [vmem:[%s10434_s30 + $0xd0] sm:$0xff] }
 0x42e   : > { %v3496_v38 = vmul.f32 %v3418_v50, %v3240_v34  ;;  %v3416_v52 = vpop.permute.xlu0 %3415 }
 0x42f   : > { %v3552_v7 = vpack.c.bf16 %v3526_v20, %v3525_v43  ;;  %v3495_v17 = vmul.f32 %v3416_v52, %v3239_v55  ;;  %v3252_v55 = vld [vmem:[%s10434_s30 + $0xe8] sm:$0xff] }
 0x430   : > { %v3528_v21 = vadd.f32 %v3496_v38, %v12779_v39  ;;  %v3251_v38 = vld [vmem:[%s10434_s30 + $0xe0] sm:$0xff] }
 0x431   : > { %v3422_v32 = vpop.permute.xlu1 %3421  ;;  %v3527_v6 = vadd.f32 %v3495_v17, %v12780_v11  ;;  %v3254_v17 = vld [vmem:[%s10434_s30 + $0xf8] sm:$0xff] }
 0x432   : > { %v3498_v36 = vmul.f32 %v3422_v32, %v3242_v41  ;;  %v3420_v40 = vpop.permute.xlu0 %3419  ;;  %6984 = vmatmul.mubr.msk.bf16.gmra.mxu1 %vm3738_vm15, %v3552_v7 }
 0x433   : > { %v3553_v44 = vpack.c.bf16 %v3528_v21, %v3527_v6  ;;  %v3497_v2 = vmul.f32 %v3420_v40, %v3241_v56  ;;  %v3253_v56 = vld [vmem:[%s10434_s30 + $0xf0] sm:$0xff] }
 0x434   : > { %v3530_v42 = vadd.f32 %v3498_v36, %v12781_v57  ;;  %v7140_v57 = vld [vmem:[%s12449_s14 + $0x8] sm:$0xff]  }
 0x435   : > { %v3426_v53 = vpop.permute.xlu1 %3425  ;;  %v3529_v33 = vadd.f32 %v3497_v2, %v12782_v37  ;;  %6987 = vmatprep.mubr.msk.bf16.mxu1 %vm3738_vm15, %v3553_v44  ;;  %v7139_v2 = vld [vmem:[%s12449_s14 + $0x10] sm:$0xff]  }
 0x436   : > { %v3500_v14 = vmul.f32 %v3426_v53, %v3244_v22  ;;  %v3424_v48 = vpop.permute.xlu0 %3423 }
 0x437   : > { %v3554_v25 = vpack.c.bf16 %v3530_v42, %v3529_v33  ;;  %v3499_v62 = vmul.f32 %v3424_v48, %v3243_v0  ;;  %v7141_v42 = vld [vmem:[%s12449_s14] sm:$0xff]  }
 0x438   : > { %v3532_v9 = vadd.f32 %v3500_v14, %v10019_v3 }
 0x439   : > { %v3430_v49 = vpop.permute.xlu1 %3429  ;;  %v3531_v58 = vadd.f32 %v3499_v62, %v9974_v13 }
 0x43a   : > { %v3502_v28 = vmul.f32 %v3430_v49, %v3246_v1  ;;  %v3428_v26 = vpop.permute.xlu0 %3427  ;;  %6988 = vmatmul.mubr.msk.bf16.gmra.mxu1 %vm3738_vm15, %v3554_v25 }
 0x43b   : > { %v3555_v4 = vpack.c.bf16 %v3532_v9, %v3531_v58  ;;  %v3501_v35 = vmul.f32 %v3428_v26, %v3245_v8 }
 0x43c   : > { %v3534_v16 = vadd.f32 %v3502_v28, %v9987_v47 }
 0x43d   : > { %v3434_v51 = vpop.permute.xlu1 %3433  ;;  %v3533_v3 = vadd.f32 %v3501_v35, %v12783_v19  ;;  %6991 = vmatprep.mubr.msk.bf16.mxu1 %vm3738_vm15, %v3555_v4 }
 0x43e   : > { %v3504_v18 = vmul.f32 %v3434_v51, %v3248_v63  ;;  %v3432_v13 = vpop.permute.xlu0 %3431 }
 0x43f   : > { %v3556_v45 = vpack.c.bf16 %v3534_v16, %v3533_v3  ;;  %v3503_v29 = vmul.f32 %v3432_v13, %v3247_v59  ;;  %v10548_v59 = vld [vmem:[%s12448_s13] ss:$0 sm:$0xff] }
 0x440   : > { %v3536_v34 = vadd.f32 %v3504_v18, %v10115_v5 }
 0x441   : > { %v3438_v46 = vpop.permute.xlu1 %3437  ;;  %v3535_v47 = vadd.f32 %v3503_v29, %v10064_v27 }
 0x442   : > { %v3506_v61 = vmul.f32 %v3438_v46, %v3250_v60  ;;  %v3436_v20 = vpop.permute.xlu0 %3435  ;;  %6992 = vmatmul.mubr.msk.bf16.gmra.mxu1 %vm3738_vm15, %v3556_v45 }
 0x443   : > { %v3557_v50 = vpack.c.bf16 %v3536_v34, %v3535_v47  ;;  %v3505_v54 = vmul.f32 %v3436_v20, %v3249_v12 }
 0x444   : > { %v3538_v43 = vadd.f32 %v3506_v61, %v10087_v23 }
 0x445   : > { %v3442_v52 = vpop.permute.xlu1 %3441  ;;  %v3537_v41 = vadd.f32 %v3505_v54, %v10039_v31  ;;  %6995 = vmatprep.mubr.msk.bf16.mxu1 %vm3738_vm15, %v3557_v50 }
 0x446   : > { %v3508_v5 = vmul.f32 %v3442_v52, %v3252_v55  ;;  %v3440_v7 = vpop.permute.xlu0 %3439 }
 0x447   : > { %v3558_v27 = vpack.c.bf16 %v3538_v43, %v3537_v41  ;;  %v3507_v39 = vmul.f32 %v3440_v7, %v3251_v38 }
 0x448   : > { %v3540_v21 = vadd.f32 %v3508_v5, %v10209_v30  ;;  %v7135_v30 = vld [vmem:[%s12449_s14 + $0x30] sm:$0xff]  }
 0x449   : > { %v3446_v32 = vpop.permute.xlu1 %3445  ;;  %v3539_v11 = vadd.f32 %v3507_v39, %v10189_v10  ;;  %7005 = vmatprep.subr.bf16.mxu0 %v7135_v30  ;;  %v7136_v10 = vld [vmem:[%s12449_s14 + $0x28] sm:$0xff]  }
 0x44a   : > { %v3510_v6 = vmul.f32 %v3446_v32, %v3254_v17  ;;  %v3444_v36 = vpop.permute.xlu0 %3443  ;;  %6996 = vmatmul.mubr.msk.bf16.gmra.mxu1 %vm3738_vm15, %v3558_v27  ;;  %7006 = vmatpush3.bf16.msra.mxu0 %v7135_v30 }
 0x44b   : > { %v3559_v23 = vpack.c.bf16 %v3540_v21, %v3539_v11  ;;  %v3509_v40 = vmul.f32 %v3444_v36, %v3253_v56  ;;  %7007 = vmatprep.subr.bf16.mxu0 %v7136_v10 }
 0x44c   : > { %v3542_v31 = vadd.f32 %v3510_v6, %v10196_v24  ;;  %v7138_v24 = vld [vmem:[%s12449_s14 + $0x18] sm:$0xff]  }
 0x44d   : > { %v3541_v22 = vadd.f32 %v3509_v40, %v10174_v15  ;;  %6999 = vmatprep.mubr.msk.bf16.mxu1 %vm3738_vm15, %v3559_v23  ;;  %v7137_v15 = vld [vmem:[%s12449_s14 + $0x20] sm:$0xff]  }
 0x44e   : > { %7008 = vmatpush3.bf16.msra.mxu0 %v7136_v10 }
 0x44f   : > { %v3560_v44 = vpack.c.bf16 %v3542_v31, %v3541_v22  ;;  %7009 = vmatprep.subr.bf16.mxu0 %v7137_v15 }
 0x452   : > { %7000 = vmatmul.mubr.msk.bf16.gmra.mxu1 %vm3738_vm15, %v3560_v44  ;;  %7010 = vmatpush3.bf16.msra.mxu0 %v7137_v15 }
 0x453   : > { %7011 = vmatprep.subr.bf16.mxu0 %v7138_v24  ;;  %v6939_v0 = vpop.f32.mrf.mxu0 }
 0x455   : > { %v3605_v53 = vpop.f32.mrf.mxu0 }
 0x456   : > { %7012 = vmatpush3.bf16.msra.mxu0 %v7138_v24 }
 0x457   : > { %7013 = vmatprep.subr.bf16.mxu0 %v7139_v2  ;;  %v6940_v37 = vpop.f32.mrf.mxu0 }
 0x459   : > { %v3608_v33 = vpop.f32.mrf.mxu0 }
 0x45a   : > { %7014 = vmatpush3.bf16.msra.mxu0 %v7139_v2 }
 0x45b   : > { %7015 = vmatprep.subr.bf16.mxu0 %v7140_v57  ;;  %v6943_v14 = vpop.f32.mrf.mxu0 }
 0x45d   : > { %v3621_v48 = vpop.f32.mrf.mxu0 }
 0x45e   : > { %7016 = vmatpush3.bf16.msra.mxu0 %v7140_v57 }
 0x45f   : > { %7017 = vmatprep.subr.bf16.mxu0 %v7141_v42  ;;  %v6944_v1 = vpop.f32.mrf.mxu0 }
 0x461   : > { %v3624_v25 = vpop.f32.mrf.mxu0 }
 0x462   : > { %7018 = vmatpush3.bf16.msra.mxu0 %v7141_v42 }
 0x463   : > { %v6947_v62 = vpop.f32.mrf.mxu0 }
 0x465   : > { %v10537_v9 = vpop.f32.mrf.mxu0 }
 0x467   : > { %v10539_v49 = vpop.f32.mrf.mxu0 }
 0x469   : > { %v10541_v26 = vpop.f32.mrf.mxu0 }
 0x46b   : > { %v10543_v16 = vpop.f32.mrf.mxu0 }
 0x46d   : > { %v10556_v13 = vpop.f32.mrf.mxu0 }
 0x46f   : > { %v10560_v12 = vpop.f32.mrf.mxu0 }
 0x471   : > { %v10562_v54 = vpop.f32.mrf.mxu0 }
 0x473   : > { %v6955_v39 = vpop.f32.mrf.mxu0 }
 0x475   : > { %v10580_v31 = vpop.f32.mrf.mxu0 }
 0x4da   : > { %v6973_v8 = vpop.f32.mrf.mxu1 }
 0x4db   : > { %v3830_v35 = vadd.f32 %v6973_v8, %v6939_v0  ;;  %v6956_v0 = vpop.f32.mrf.mxu0 }
 0x4dc   : > { %v3821_v58 = vpop.f32.mrf.mxu1 }
 0x4dd   : > { %v10554_v18 = vadd.f32 %v10548_v59, %v3830_v35  ;;  %v3822_v47 = vadd.f32 %v3821_v58, %v3605_v53 }
 0x4de   : > { %v6974_v28 = vpop.f32.mrf.mxu1 }
 0x4df   : > { %v3833_v63 = vadd.f32 %v6974_v28, %v6940_v37  ;;  %v4021_v34 = vand.u32 2147483647, %v10554_v18  ;;  %v10565_v41 = vadd.f32 %v10548_v59, %v3822_v47  ;;  %v3989_v58 = vmax.f32 %v10554_v18, 0.0 }
 0x4e0   : > { %v3824_v4 = vpop.f32.mrf.mxu1 }
 0x4e1   : > { %v10551_v19 = vadd.f32 %v10548_v59, %v3833_v63  ;;  %v4053_v55 = vsub.f32 0.0, %v4021_v34  ;;  %v3825_v50 = vadd.f32 %v3824_v4, %v3608_v33  ;;  %v4019_v36 = vand.u32 2147483647, %v10565_v41  ;;  %v10604_v4 = vpop.f32.mrf.mxu0 }
 0x4e2   : > { %v6977_v51 = vpop.f32.mrf.mxu1 }
 0x4e3   : > { %v4022_v45 = vand.u32 2147483647, %v10551_v19  ;;  %v3846_v43 = vadd.f32 %v6977_v51, %v6943_v14  ;;  %v4087_v17 = vmul.f32 1.442695, %v4053_v55  ;;  %v10568_v27 = vadd.f32 %v10548_v59, %v3825_v50 }
 0x4e4   : > { %v3837_v3 = vpop.f32.mrf.mxu1  ;;  %v4051_v24 = vsub.f32 0.0, %v4019_v36 }
 0x4e5   : > { %v4054_v61 = vsub.f32 0.0, %v4022_v45  ;;  %v3838_v52 = vadd.f32 %v3837_v3, %v3621_v48  ;;  %v10571_v21 = vadd.f32 %v10548_v59, %v3846_v43  ;;  %v4020_v40 = vand.u32 2147483647, %v10568_v27 }
 0x4e6   : > { %v6978_v60 = vpop.f32.mrf.mxu1 }
 0x4e7   : > { %v4089_v5 = vmul.f32 1.442695, %v4054_v61  ;;  %v3849_v56 = vadd.f32 %v6978_v60, %v6944_v1  ;;  %v10574_v11 = vadd.f32 %v10548_v59, %v3838_v52  ;;  %v4025_v22 = vand.u32 2147483647, %v10571_v21  ;;  %v6959_v52 = vpop.f32.mrf.mxu0 }
 0x4e8   : > { %v3840_v29 = vpop.f32.mrf.mxu1  ;;  %v4052_v57 = vsub.f32 0.0, %v4020_v40  ;;  %v4083_v1 = vmul.f32 1.442695, %v4051_v24 }
 0x4e9   : > { %v3841_v6 = vadd.f32 %v3840_v29, %v3624_v25  ;;  %7598 = vpow2.f32 %v4089_v5  ;;  %v10584_v44 = vadd.f32 %v10548_v59, %v3849_v56  ;;  %v4023_v10 = vand.u32 2147483647, %v10574_v11 }
 0x4ea   : > { %v6981_v46 = vpop.f32.mrf.mxu1  ;;  %7600 = vpow2.f32 %v4087_v17  ;;  %v4057_v53 = vsub.f32 0.0, %v4025_v22  ;;  %v4085_v28 = vmul.f32 1.442695, %v4052_v57 }
 0x4eb   : > { %v10590_v15 = vadd.f32 %v10548_v59, %v3841_v6  ;;  %v3862_v42 = vadd.f32 %v6981_v46, %v6947_v62  ;;  %v4026_v37 = vand.u32 2147483647, %v10584_v44  ;;  %v4055_v14 = vsub.f32 0.0, %v4023_v10 }
 0x4ec   : > { %v3853_v20 = vpop.f32.mrf.mxu1  ;;  %v4095_v51 = vmul.f32 1.442695, %v4057_v53  ;;  %7602 = vpow2.f32 %v4083_v1 }
 0x4ed   : > { %v4024_v48 = vand.u32 2147483647, %v10590_v15  ;;  %v3854_v25 = vadd.f32 %v3853_v20, %v10537_v9  ;;  %v10601_v63 = vadd.f32 %v10548_v59, %v3862_v42  ;;  %v4058_v3 = vsub.f32 0.0, %v4026_v37 }
 0x4ee   : > { %v6982_v38 = vpop.f32.mrf.mxu1  ;;  %v3990_v9 = vmax.f32 %v10551_v19, 0.0  ;;  %v4091_v34 = vmul.f32 1.442695, %v4055_v14  ;;  %7604 = vpow2.f32 %v4085_v28 }
 0x4ef   : > { %v3865_v62 = vadd.f32 %v6982_v38, %v10539_v49  ;;  %v4056_v46 = vsub.f32 0.0, %v4024_v48  ;;  %v10611_v61 = vadd.f32 %v10548_v59, %v3854_v25  ;;  %v4029_v43 = vand.u32 2147483647, %v10601_v63 }
 0x4f0   : > { %v3856_v7 = vpop.f32.mrf.mxu1  ;;  %7606 = vpow2.f32 %v4095_v51 }
 0x4f1   : > { %v3857_v49 = vadd.f32 %v3856_v7, %v10541_v26  ;;  %v10621_v38 = vadd.f32 %v10548_v59, %v3865_v62  ;;  %7608 = vpow2.f32 %v4091_v34  ;;  %v4093_v6 = vmul.f32 1.442695, %v4056_v46 }
 0x4f2   : > { %v6985_v32 = vpop.f32.mrf.mxu1  ;;  %v4027_v10 = vand.u32 2147483647, %v10611_v61  ;;  %v4061_v42 = vsub.f32 0.0, %v4029_v43 }
 0x4f3   : > { %v3878_v36 = vadd.f32 %v6985_v32, %v10543_v16  ;;  %v10635_v24 = vadd.f32 %v10548_v59, %v3857_v49  ;;  %v4030_v53 = vand.u32 2147483647, %v10621_v38 }
 0x4f4   : > { %v10577_v23 = vpop.f32.mrf.mxu1  ;;  %v4059_v62 = vsub.f32 0.0, %v4027_v10 }
 0x4f5   : > { %v3870_v37 = vadd.f32 %v10577_v23, %v10556_v13  ;;  %v10650_v25 = vadd.f32 %v10548_v59, %v3878_v36  ;;  %v7142_v13 = vld [vmem:[%s12451_s16 + $0x38] sm:$0xff]   ;;  %v7143_v23 = vld [vmem:[%s12451_s16 + $0x30] sm:$0xff]   ;;  %v4028_v51 = vand.u32 2147483647, %v10635_v24  ;;  %v4062_v34 = vsub.f32 0.0, %v4030_v53 }
 0x4f6   : > { %v10586_v30 = vpop.f32.mrf.mxu1  ;;  %v10616_v55 = vpop.eup %7598  ;;  %7051 = vmatprep.subr.bf16.mxu1 %v7142_v13  ;;  %v4099_v10 = vmul.f32 1.442695, %v4059_v62 }
 0x4f7   : > { %v10623_v5 = vpop.eup %7600  ;;  %v4174_v40 = vadd.f32 1.0, %v10616_v55  ;;  %v4177_v43 = vmul.f32 -0.5, %v10616_v55  ;;  %7052 = vmatpush3.bf16.msra.mxu1 %v7142_v13 }
 0x4f8   : > { %v10592_v2 = vpop.f32.mrf.mxu1  ;;  %v4165_v57 = vadd.f32 1.0, %v10623_v5  ;;  %v4168_v32 = vmul.f32 -0.5, %v10623_v5  ;;  %v4171_v1 = vand.u32 2147483647, %v10623_v5  ;;  %7053 = vmatprep.subr.bf16.mxu1 %v7143_v23 }
 0x4fa   : > { %v6989_v33 = vpop.f32.mrf.mxu1  ;;  %v4169_v49 = vadd.f32 1.0, %v4168_v32  ;;  %vm10723_vm15 = vcmp.lt.f32.partialorder %v4171_v1, 0.0004427343 }
 0x4fb   : > { %v3894_v60 = vadd.f32 %v6989_v33, %v6955_v39  ;;  %v4097_v39 = vmul.f32 1.442695, %v4058_v3  ;;  %v10641_v33 = vpop.f32.mrf.mxu0  ;;  %v3881_v3 = vadd.f32 %v10586_v30, %v10560_v12  ;;  %v4033_v12 = vand.u32 2147483647, %v10650_v25  ;;  %7054 = vmatpush3.bf16.msra.mxu1 %v7143_v23 }
 0x4fc   : > { %v10597_v8 = vpop.f32.mrf.mxu1 }
 0x4fd   : > { %v10627_v26 = vadd.f32 %v10548_v59, %v3894_v60  ;;  %7610 = vpow2.f32 %v4097_v39  ;;  %v4103_v60 = vmul.f32 1.442695, %v4061_v42  ;;  %v3873_v39 = vadd.f32 %v10592_v2, %v10562_v54  ;;  %v10677_v54 = vpop.eup %7602 }
 0x4fe   : > { %v6990_v45 = vpop.f32.mrf.mxu1  ;;  %7612 = vpow2.f32 %v4093_v6  ;;  %v3886_v30 = vadd.f32 %v10597_v8, %v10580_v31  ;;  %v10675_v42 = vadd.f32 %v10548_v59, %v3881_v3  ;;  %v4105_v2 = vmul.f32 1.442695, %v4062_v34  ;;  %v10680_v31 = vpop.eup %7604 }
 0x4ff   : > { %v4037_v48 = vand.u32 2147483647, %v10627_v26  ;;  %v3897_v28 = vadd.f32 %v6990_v45, %v6956_v0  ;;  %7614 = vlog2.f32 %v4174_v40  ;;  %v10662_v0 = vadd.f32 %v10548_v59, %v3870_v37  ;;  %v6960_v45 = vpop.f32.mrf.mxu0 }
 0x500   : > { %v10614_v20 = vpop.f32.mrf.mxu1  ;;  %7616 = vlog2.f32 %v4165_v57  ;;  %v4060_v57 = vsub.f32 0.0, %v4028_v51  ;;  %v10683_v8 = vmul.f32 %v10623_v5, %v4169_v49  ;;  %v10686_v62 = vadd.f32 %v10548_v59, %v3873_v39 }
 0x501   : > { %v4069_v6 = vsub.f32 0.0, %v4037_v48  ;;  %v10672_v40 = vadd.f32 %v10548_v59, %v3897_v28  ;;  %7618 = vpow2.f32 %v4103_v60  ;;  %v4031_v37 = vand.u32 2147483647, %v10662_v0  ;;  %v3688_v48 = vpop.f32.mrf.mxu0 }
 0x502   : > { %v6993_v7 = vpop.f32.mrf.mxu1  ;;  %v4178_v28 = vadd.f32 1.0, %v4177_v43  ;;  %v4065_v3 = vsub.f32 0.0, %v4033_v12  ;;  %v10692_v60 = vadd.f32 %v10548_v59, %v3886_v30  ;;  %7620 = vpow2.f32 %v4099_v10 }
 0x503   : > { %v3910_v53 = vadd.f32 %v6993_v7, %v6959_v52  ;;  %v4119_v51 = vmul.f32 1.442695, %v4069_v6  ;;  %v10688_v52 = vpop.eup %7606  ;;  %v4180_v7 = vand.u32 2147483647, %v10616_v55  ;;  %v4038_v34 = vand.u32 2147483647, %v10672_v40  ;;  %v6963_v6 = vpop.f32.mrf.mxu0 }
 0x504   : > { %v10643_v16 = vpop.f32.mrf.mxu1  ;;  %v4034_v49 = vand.u32 2147483647, %v10675_v42  ;;  %7622 = vpow2.f32 %v4105_v2  ;;  %v4063_v23 = vsub.f32 0.0, %v4031_v37  ;;  %v4147_v30 = vadd.f32 1.0, %v10677_v54 }
 0x505   : > { %v10699_v43 = vadd.f32 %v10548_v59, %v3910_v53  ;;  %v10706_v36 = vmul.f32 %v10616_v55, %v4178_v28  ;;  %7624 = vpow2.f32 %v4119_v51  ;;  %vm10712_vm1 = vcmp.lt.f32.partialorder %v4180_v7, 0.0004427343  ;;  %v3701_v56 = vpop.f32.mrf.mxu0 }
 0x506   : > { %v6994_v46 = vpop.f32.mrf.mxu1  ;;  %v4111_v37 = vmul.f32 1.442695, %v4065_v3  ;;  %v4070_v14 = vsub.f32 0.0, %v4038_v34  ;;  %v4066_v55 = vsub.f32 0.0, %v4034_v49  ;;  %v4107_v47 = vmul.f32 1.442695, %v4063_v23 }
 0x507   : > { %v3913_v32 = vadd.f32 %v6994_v46, %v6960_v45  ;;  %v10695_v45 = vpop.eup %7608  ;;  %v4101_v46 = vmul.f32 1.442695, %v4060_v57  ;;  %12784 = vst [vmem:[#allocation30_spill] sm:$0xff] %v10699_v43  ;;  %v4032_v57 = vand.u32 2147483647, %v10686_v62  ;;  %v3889_v3 = vadd.f32 %v10614_v20, %v10604_v4 }
 0x508   : > { %v3904_v13 = vpop.f32.mrf.mxu1  ;;  %v4041_v28 = vand.u32 2147483647, %v10699_v43  ;;  %v4121_v1 = vmul.f32 1.442695, %v4070_v14  ;;  %v3902_v23 = vadd.f32 %v10643_v16, %v10641_v33  ;;  %v4153_v33 = vand.u32 2147483647, %v10677_v54 }
 0x509   : > { %v10702_v39 = vadd.f32 %v10548_v59, %v3913_v32  ;;  %v4035_v32 = vand.u32 2147483647, %v10692_v60  ;;  %7626 = vpow2.f32 %v4101_v46  ;;  %v3905_v29 = vadd.f32 %v3904_v13, %v3688_v48 }
 0x50a   : > { %v6997_v12 = vpop.f32.mrf.mxu1  ;;  %v10710_v22 = vpop.eup %7610  ;;  %7628 = vlog2.f32 %v4147_v30  ;;  %v4073_v20 = vsub.f32 0.0, %v4041_v28  ;;  %v4113_v46 = vmul.f32 1.442695, %v4066_v55  ;;  %v10745_v48 = vadd.f32 %v10548_v59, %v3902_v23 }
 0x50b   : > { %12785 = vst [vmem:[#allocation27_spill] sm:$0xff] %v10702_v39  ;;  %v10718_v17 = vpop.eup %7612  ;;  %v3926_v10 = vadd.f32 %v6997_v12, %v6963_v6  ;;  %v4042_v34 = vand.u32 2147483647, %v10702_v39  ;;  %v4064_v6 = vsub.f32 0.0, %v4032_v57  ;;  %v4156_v12 = vadd.f32 1.0, %v10680_v31 }
 0x50c   : > { %v7615_v51 = vpop.eup %7614  ;;  %7630 = vpow2.f32 %v4111_v37  ;;  %v4067_v5 = vsub.f32 0.0, %v4035_v32  ;;  %v3917_v50 = vpop.f32.mrf.mxu1  ;;  %v10739_v57 = vadd.f32 %v10548_v59, %v3889_v3  ;;  %12792 = vst [vmem:[#allocation3_spill] sm:$0xff] %v10745_v48  ;;  %v4127_v13 = vmul.f32 1.442695, %v4073_v20 }
 0x50d   : > { %v7617_v2 = vpop.eup %7616  ;;  %v4176_v4 = vmul.f32 0.6931472, %v7615_v51  ;;  %v10736_v30 = vadd.f32 %v10548_v59, %v3926_v10  ;;  %7632 = vpow2.f32 %v4107_v47  ;;  %v4074_v49 = vsub.f32 0.0, %v4042_v34  ;;  %v6964_v51 = vpop.f32.mrf.mxu0 }
 0x50e   : > { %12791 = vst [vmem:[#allocation2_spill] sm:$0xff] %v10739_v57  ;;  %v10741_v37 = vpop.eup %7618  ;;  %v4167_v14 = vmul.f32 0.6931472, %v7617_v2  ;;  %v4109_v32 = vmul.f32 1.442695, %v4064_v6  ;;  %v3918_v35 = vadd.f32 %v3917_v50, %v3701_v56  ;;  %7634 = vlog2.f32 %v4156_v12  ;;  %v6998_v3 = vpop.f32.mrf.mxu1 }
 0x50f   : > { %12790 = vst [vmem:[#allocation29_spill] sm:$0xff] %v10736_v30  ;;  %v4115_v16 = vmul.f32 1.442695, %v4067_v5  ;;  %7636 = vpow2.f32 %v4121_v1  ;;  %v4182_v47 = vsel %vm10712_vm1, %v10706_v36, %v4176_v4  ;;  %v10751_v10 = vadd.f32 %v10548_v59, %v3905_v29  ;;  %v10754_v55 = vpop.eup %7620  ;;  %v3704_v23 = vpop.f32.mrf.mxu0 }
 0x510   : > { %v4045_v2 = vand.u32 2147483647, %v10736_v30  ;;  %7638 = vpow2.f32 %v4113_v46  ;;  %v4036_v56 = vand.u32 2147483647, %v10739_v57  ;;  %v4129_v28 = vmul.f32 1.442695, %v4074_v49  ;;  %v3920_v4 = vpop.f32.mrf.mxu1 }
 0x511   : > { %12793 = vst [vmem:[#allocation4_spill] sm:$0xff] %v10751_v10  ;;  %v10758_v34 = vpop.eup %7622  ;;  %v4173_v36 = vsel %vm10723_vm15, %v10683_v8, %v4167_v14  ;;  %7640 = vpow2.f32 %v4109_v32  ;;  %v10765_v53 = vadd.f32 %v10548_v59, %v3918_v35  ;;  %v10771_v6 = vadd.f32 %v4182_v47, %v3990_v9  ;;  %v6967_v30 = vpop.f32.mrf.mxu0 }
 0x512   : > { %v10767_v46 = vpop.eup %7624  ;;  %7642 = vpow2.f32 %v4115_v16  ;;  %v4039_v49 = vand.u32 2147483647, %v10745_v48  ;;  %v4150_v12 = vmul.f32 -0.5, %v10677_v54  ;;  %v4040_v8 = vand.u32 2147483647, %v10751_v10  ;;  %v7001_v43 = vpop.f32.mrf.mxu1 }
 0x513   : > { %12794 = vst [vmem:[#allocation5_spill] sm:$0xff] %v10765_v53  ;;  %7644 = vpow2.f32 %v4127_v13  ;;  %v4077_v5 = vsub.f32 0.0, %v4045_v2  ;;  %v10781_v35 = vadd.f32 %v4173_v36, %v3989_v58  ;;  %v4068_v19 = vsub.f32 0.0, %v4036_v56 }
 0x514   : > { %7646 = vpow2.f32 %v4129_v28  ;;  %v4159_v9 = vmul.f32 -0.5, %v10680_v31  ;;  %v4309_v14 = vadd.f32 1.0, %v10767_v46  ;;  %v4043_v47 = vand.u32 2147483647, %v10765_v53 }
 0x515   : > { %v4071_v58 = vsub.f32 0.0, %v4039_v49  ;;  %v4151_v13 = vadd.f32 1.0, %v4150_v12  ;;  %v3929_v2 = vadd.f32 %v6998_v3, %v6964_v51  ;;  %v4072_v36 = vsub.f32 0.0, %v4040_v8 }
 0x516   : > { %v10777_v1 = vpop.eup %7626  ;;  %v4135_v29 = vmul.f32 1.442695, %v4077_v5  ;;  %v4117_v7 = vmul.f32 1.442695, %v4068_v19  ;;  %v4160_v50 = vadd.f32 1.0, %v4159_v9  ;;  %v3921_v16 = vadd.f32 %v3920_v4, %v3704_v23 }
 0x517   : > { %v7629_v20 = vpop.eup %7628  ;;  %7648 = vlog2.f32 %v4309_v14  ;;  %v4312_v49 = vmul.f32 -0.5, %v10767_v46  ;;  %v4075_v51 = vsub.f32 0.0, %v4043_v47  ;;  %v4162_v3 = vand.u32 2147483647, %v10680_v31 }
 0x518   : > { %v4149_v32 = vmul.f32 0.6931472, %v7629_v20  ;;  %v4123_v28 = vmul.f32 1.442695, %v4071_v58  ;;  %v4152_v5 = vmul.f32 %v10677_v54, %v4151_v13  ;;  %v10801_v19 = vadd.f32 %v10548_v59, %v3929_v2 }
 0x519   : > { %v10790_v56 = vpop.eup %7630  ;;  %v4125_v23 = vmul.f32 1.442695, %v4072_v36  ;;  %7650 = vpow2.f32 %v4135_v29  ;;  %vm10805_vm3 = vcmp.lt.f32.partialorder %v4153_v33, 0.0004427343  ;;  %v3942_v20 = vadd.f32 %v7001_v43, %v6967_v30 }
 0x51a   : > { %v10794_v57 = vpop.eup %7632  ;;  %12795 = vst [vmem:[#allocation6_spill] sm:$0xff] %v10801_v19  ;;  %v4155_v14 = vsel %vm10805_vm3, %v4152_v5, %v4149_v32  ;;  %v4161_v58 = vmul.f32 %v10680_v31, %v4160_v50  ;;  %v10813_v54 = vadd.f32 %v10548_v59, %v3921_v16  ;;  %v4313_v2 = vadd.f32 1.0, %v4312_v49 }
 0x51b   : > { %v7635_v12 = vpop.eup %7634  ;;  %7652 = vpow2.f32 %v4117_v7  ;;  %v4131_v36 = vmul.f32 1.442695, %v4075_v51  ;;  %vm4163_vm13 = vcmp.lt.f32.partialorder %v4162_v3, 0.0004427343  ;;  %v4046_v30 = vand.u32 2147483647, %v10801_v19  ;;  %v3717_v51 = vpop.f32.mrf.mxu0 }
 0x51c   : > { %v10803_v9 = vpop.eup %7636  ;;  %v4158_v47 = vmul.f32 0.6931472, %v7635_v12  ;;  %12798 = vst [vmem:[#allocation7_spill] sm:$0xff] %v10813_v54  ;;  %v4183_v32 = vadd.f32 1.0, %v10695_v45  ;;  %7654 = vpow2.f32 %v4123_v28  ;;  %v12799_v31 = vmax.f32 %v10565_v41, 0.0  ;;  %v3933_v3 = vpop.f32.mrf.mxu1 }
 0x51d   : > { %v10815_v13 = vpop.eup %7638  ;;  %v4321_v29 = vmul.f32 -0.5, %v10803_v9  ;;  %v12800_v16 = vmax.f32 %v10568_v27, 0.0  ;;  %v10829_v49 = vadd.f32 %v10548_v59, %v3942_v20  ;;  %v4315_v4 = vand.u32 2147483647, %v10767_v46  ;;  %v6968_v18 = vpop.f32.mrf.mxu0 }
 0x51e   : > { %v10817_v33 = vpop.eup %7640  ;;  %v4164_v43 = vsel %vm4163_vm13, %v4161_v58, %v4158_v47  ;;  %v4435_v50 = vadd.f32 %v4155_v14, %v12799_v31  ;;  %v4318_v47 = vadd.f32 1.0, %v10803_v9  ;;  %7656 = vpow2.f32 %v4125_v23  ;;  %v7002_v19 = vpop.f32.mrf.mxu1 }
 0x51f   : > { %v10822_v12 = vpop.eup %7642  ;;  %v4436_v7 = vadd.f32 %v4164_v43, %v12800_v16  ;;  %12801 = vst [vmem:[#allocation8_spill] sm:$0xff] %v10829_v49  ;;  %v4044_v28 = vand.u32 2147483647, %v10813_v54  ;;  %7658 = vpow2.f32 %v4131_v36  ;;  %v10841_v14 = vmul.f32 %v10767_v46, %v4313_v2 }
 0x520   : > { %v10831_v5 = vpop.eup %7644  ;;  %v4322_v43 = vadd.f32 1.0, %v4321_v29  ;;  %v4078_v31 = vsub.f32 0.0, %v4046_v30  ;;  %7660 = vlog2.f32 %v4183_v32  ;;  %v4049_v8 = vand.u32 2147483647, %v10829_v49 }
 0x521   : > { %v10836_v58 = vpop.eup %7646  ;;  %v4483_v20 = vpack.c.bf16 %v4436_v7, %v4435_v50  ;;  %v4345_v16 = vadd.f32 1.0, %v10831_v5  ;;  %v4348_v23 = vmul.f32 -0.5, %v10831_v5  ;;  %v4192_v41 = vadd.f32 1.0, %v10718_v17 }
 0x522   : > { %vm10847_vm14 = vcmp.lt.f32.partialorder %v4315_v4, 0.0004427343  ;;  %7662 = vlog2.f32 %v4318_v47  ;;  %v4354_v46 = vadd.f32 1.0, %v10836_v58  ;;  %v4357_v2 = vmul.f32 -0.5, %v10836_v58 }
 0x523   : > { %7019 = vmatprep.mubr.bf16.mxu0 %v4483_v20  ;;  %v12804_v29 = vpack.c.bf16 %v10771_v6, %v10781_v35  ;;  %v4076_v30 = vsub.f32 0.0, %v4044_v28  ;;  %7664 = vlog2.f32 %v4192_v41  ;;  %v4201_v7 = vadd.f32 1.0, %v10688_v52  ;;  %v3720_v28 = vpop.f32.mrf.mxu0 }
 0x524   : > { %v7649_v4 = vpop.eup %7648  ;;  %v10860_v20 = vmul.f32 %v10803_v9, %v4322_v43  ;;  %v4137_v47 = vmul.f32 1.442695, %v4078_v31  ;;  %v3934_v27 = vadd.f32 %v3933_v3, %v3717_v51  ;;  %v3945_v49 = vadd.f32 %v7002_v19, %v6968_v18 }
 0x525   : > { %7020 = vmatmul.mubr.bf16.vlgmr.msra.gmra.mxu0 %v12804_v29  ;;  %7666 = vlog2.f32 %v4345_v16  ;;  %v4349_v53 = vadd.f32 1.0, %v4348_v23  ;;  %v4081_v35 = vsub.f32 0.0, %v4049_v8  ;;  %v3936_v29 = vpop.f32.mrf.mxu1  ;;  %v4358_v41 = vadd.f32 1.0, %v4357_v2 }
 0x526   : > { %v10863_v32 = vpop.eup %7650  ;;  %7668 = vlog2.f32 %v4354_v46  ;;  %v4133_v54 = vmul.f32 1.442695, %v4076_v30  ;;  %v4311_v39 = vmul.f32 0.6931472, %v7649_v4  ;;  %v4186_v43 = vmul.f32 -0.5, %v10695_v45 }
 0x527   : > { %7670 = vlog2.f32 %v4201_v7  ;;  %v4210_v18 = vadd.f32 1.0, %v10710_v22  ;;  %v10871_v8 = vadd.f32 %v10548_v59, %v3934_v27  ;;  %v10874_v51 = vadd.f32 %v10548_v59, %v3945_v49 }
 0x528   : > { %v10868_v19 = vpop.eup %7652  ;;  %7672 = vpow2.f32 %v4137_v47  ;;  %v3937_v3 = vadd.f32 %v3936_v29, %v3720_v28  ;;  %v10877_v31 = vmul.f32 %v10831_v5, %v4349_v53  ;;  %v4143_v16 = vmul.f32 1.442695, %v4081_v35 }
 0x529   : > { %12805 = vst [vmem:[#allocation9_spill] sm:$0xff] %v10871_v8  ;;  %12806 = vst [vmem:[#allocation10_spill] sm:$0xff] %v10874_v51  ;;  %v4195_v23 = vmul.f32 -0.5, %v10718_v17  ;;  %7674 = vlog2.f32 %v4210_v18  ;;  %v10880_v46 = vpop.eup %7654  ;;  %v10883_v2 = vmul.f32 %v10836_v58, %v4358_v41  ;;  %v4381_v30 = vadd.f32 1.0, %v10863_v32 }
 0x52a   : > { %12807 = vst [vmem:[#allocation11_spill] sm:$0xff] %v10877_v31  ;;  %v4384_v27 = vmul.f32 -0.5, %v10863_v32  ;;  %v4317_v53 = vsel %vm10847_vm14, %v10841_v14, %v4311_v39  ;;  %7676 = vpow2.f32 %v4133_v54  ;;  %v4187_v4 = vadd.f32 1.0, %v4186_v43 }
 0x52b   : > { %12808 = vst [vmem:[#allocation12_spill] sm:$0xff] %v10883_v2  ;;  %v10888_v7 = vpop.eup %7656  ;;  %v4219_v47 = vadd.f32 1.0, %v10754_v55  ;;  %v4050_v28 = vand.u32 2147483647, %v10874_v51  ;;  %v10898_v29 = vadd.f32 %v10548_v59, %v3937_v3  ;;  %v4189_v41 = vand.u32 2147483647, %v10695_v45 }
 0x52c   : > { %v10894_v35 = vpop.eup %7658  ;;  %v4228_v18 = vadd.f32 1.0, %v10777_v1  ;;  %v4047_v6 = vand.u32 2147483647, %v10871_v8  ;;  %v4196_v36 = vadd.f32 1.0, %v4195_v23  ;;  %v4204_v39 = vmul.f32 -0.5, %v10688_v52 }
 0x52d   : > { %12809 = vst [vmem:[#allocation13_spill] sm:$0xff] %v10898_v29  ;;  %v7661_v49 = vpop.eup %7660  ;;  %7678 = vlog2.f32 %v4219_v47  ;;  %v12810_v54 = vmax.f32 %v10627_v26, 0.0  ;;  %v4198_v50 = vand.u32 2147483647, %v10718_v17  ;;  %v10909_v3 = vadd.f32 1.0, %v4384_v27 }
 0x52e   : > { %v4185_v43 = vmul.f32 0.6931472, %v7661_v49  ;;  %7680 = vlog2.f32 %v4228_v18  ;;  %v4188_v51 = vmul.f32 %v10695_v45, %v4187_v4  ;;  %v4213_v8 = vmul.f32 -0.5, %v10710_v22 }
 0x52f   : > { %v10906_v14 = vadd.f32 %v4317_v53, %v12810_v54  ;;  %v7663_v59 = vpop.eup %7662  ;;  %7682 = vlog2.f32 %v4381_v30  ;;  %v4082_v31 = vsub.f32 0.0, %v4050_v28  ;;  %v4048_v47 = vand.u32 2147483647, %v10898_v29 }
 0x530   : > { %v7665_v23 = vpop.eup %7664  ;;  %7684 = vpow2.f32 %v4143_v16  ;;  %vm10914_vm4 = vcmp.lt.f32.partialorder %v4189_v41, 0.0004427343  ;;  %v4197_v30 = vmul.f32 %v10718_v17, %v4196_v36  ;;  %v4205_v27 = vadd.f32 1.0, %v4204_v39 }
 0x531   : > { %v4191_v49 = vsel %vm10914_vm4, %v4188_v51, %v4185_v43  ;;  %v4194_v53 = vmul.f32 0.6931472, %v7665_v23  ;;  %vm4199_vm0 = vcmp.lt.f32.partialorder %v4198_v50, 0.0004427343  ;;  %v4207_v45 = vand.u32 2147483647, %v10688_v52 }
 0x532   : > { %v10921_v18 = vpop.eup %7666  ;;  %v4222_v16 = vmul.f32 -0.5, %v10754_v55  ;;  %v4237_v4 = vadd.f32 1.0, %v10741_v37  ;;  %v4214_v54 = vadd.f32 1.0, %v4213_v8  ;;  %v4216_v26 = vand.u32 2147483647, %v10710_v22 }
 0x533   : > { %v10926_v28 = vpop.eup %7668  ;;  %v4200_v41 = vsel %vm4199_vm0, %v4197_v30, %v4194_v53  ;;  %v4231_v51 = vmul.f32 -0.5, %v10777_v1  ;;  %v12813_v17 = vmax.f32 %v10574_v11, 0.0  ;;  %v12814_v50 = vmax.f32 %v10590_v15, 0.0 }
 0x534   : > { %v7671_v43 = vpop.eup %7670  ;;  %7686 = vlog2.f32 %v4237_v4  ;;  %v4246_v23 = vadd.f32 1.0, %v10758_v34  ;;  %v10937_v2 = vmul.f32 0.6931472, %v7663_v59  ;;  %v4206_v8 = vmul.f32 %v10688_v52, %v4205_v27 }
 0x535   : > { %v4439_v36 = vadd.f32 %v4191_v49, %v12813_v17  ;;  %v4440_v39 = vadd.f32 %v4200_v41, %v12814_v50  ;;  %v10935_v29 = vpop.eup %7672  ;;  %v4203_v53 = vmul.f32 0.6931472, %v7671_v43  ;;  %v4225_v30 = vand.u32 2147483647, %v10754_v55 }
 0x536   : > { %v7675_v10 = vpop.eup %7674  ;;  %vm10941_vm5 = vcmp.lt.f32.partialorder %v4207_v45, 0.0004427343  ;;  %v4223_v15 = vadd.f32 1.0, %v4222_v16  ;;  %7688 = vlog2.f32 %v4246_v23  ;;  %v12817_v49 = vand.u32 2147483647, %v10803_v9 }
 0x537   : > { %v4485_v48 = vpack.c.bf16 %v4440_v39, %v4439_v36  ;;  %v4209_v59 = vsel %vm10941_vm5, %v4206_v8, %v4203_v53  ;;  %v4212_v52 = vmul.f32 0.6931472, %v7675_v10  ;;  %v4215_v27 = vmul.f32 %v10710_v22, %v4214_v54  ;;  %v10954_v43 = vpop.eup %7676 }
 0x538   : > { %vm10947_vm6 = vcmp.lt.f32.partialorder %v12817_v49, 0.0004427343  ;;  %v4232_v41 = vadd.f32 1.0, %v4231_v51  ;;  %v4079_v45 = vsub.f32 0.0, %v4047_v6  ;;  %v4145_v17 = vmul.f32 1.442695, %v4082_v31 }
 0x539   : > { %v4080_v36 = vsub.f32 0.0, %v4048_v47  ;;  %7023 = vmatprep.mubr.bf16.mxu0 %v4485_v48  ;;  %vm4217_vm7 = vcmp.lt.f32.partialorder %v4216_v26, 0.0004427343  ;;  %vm10956_vm8 = vcmp.lt.f32.partialorder %v4225_v30, 0.0004427343  ;;  %v4255_v39 = vadd.f32 1.0, %v10794_v57 }
 0x53a   : > { %v4218_v16 = vsel %vm4217_vm7, %v4215_v27, %v4212_v52  ;;  %v4234_v50 = vand.u32 2147483647, %v10777_v1  ;;  %v7679_v10 = vpop.eup %7678  ;;  %v12822_v22 = vmax.f32 %v10571_v21, 0.0  ;;  %v12823_v51 = vmax.f32 %v10584_v44, 0.0 }
 0x53b   : > { %v4240_v31 = vmul.f32 -0.5, %v10741_v37  ;;  %v4264_v48 = vadd.f32 1.0, %v10817_v33  ;;  %v7681_v47 = vpop.eup %7680  ;;  %v4221_v26 = vmul.f32 0.6931472, %v7679_v10  ;;  %v4224_v23 = vmul.f32 %v10754_v55, %v4223_v15 }
 0x53c   : > { %v4441_v54 = vadd.f32 %v4209_v59, %v12822_v22  ;;  %v4442_v6 = vadd.f32 %v4218_v16, %v12823_v51  ;;  %v4233_v53 = vmul.f32 %v10777_v1, %v4232_v41  ;;  %7690 = vlog2.f32 %v4255_v39  ;;  %v10970_v8 = vpop.eup %7682 }
 0x53d   : > { %v4230_v11 = vmul.f32 0.6931472, %v7681_v47  ;;  %v4249_v21 = vmul.f32 -0.5, %v10758_v34  ;;  %7692 = vlog2.f32 %v4264_v48  ;;  %v10973_v44 = vpop.eup %7684  ;;  %v4139_v49 = vmul.f32 1.442695, %v4079_v45 }
 0x53e   : > { %v4486_v30 = vpack.c.bf16 %v4442_v6, %v4441_v54  ;;  %7694 = vpow2.f32 %v4145_v17  ;;  %v4227_v59 = vsel %vm10956_vm8, %v4224_v23, %v4221_v26  ;;  %vm4235_vm9 = vcmp.lt.f32.partialorder %v4234_v50, 0.0004427343 }
 0x53f   : > { %v4141_v52 = vmul.f32 1.442695, %v4080_v36  ;;  %v4236_v55 = vsel %vm4235_vm9, %v4233_v53, %v4230_v11  ;;  %v4241_v1 = vadd.f32 1.0, %v4240_v31  ;;  %v4273_v15 = vadd.f32 1.0, %v10790_v56 }
 0x540   : > { %7024 = vmatmul.mubr.bf16.gmra.mxu0 %v4486_v30  ;;  %v10980_v27 = vmul.f32 %v10863_v32, %v10909_v3  ;;  %v12824_v41 = vmax.f32 %v10611_v61, 0.0  ;;  %v12825_v45 = vmax.f32 %v10635_v24, 0.0  ;;  %v4243_v9 = vand.u32 2147483647, %v10741_v37 }
 0x541   : > { %v4326_v36 = vsel %vm10947_vm6, %v10860_v20, %v10937_v2  ;;  %v4250_v50 = vadd.f32 1.0, %v4249_v21  ;;  %7696 = vlog2.f32 %v4273_v15  ;;  %v4282_v39 = vadd.f32 1.0, %v10815_v13  ;;  %v7687_v10 = vpop.eup %7686 }
 0x542   : > { %v4443_v16 = vadd.f32 %v4227_v59, %v12824_v41  ;;  %v4444_v17 = vadd.f32 %v4236_v55, %v12825_v45  ;;  %7698 = vpow2.f32 %v4139_v49  ;;  %v4252_v61 = vand.u32 2147483647, %v10758_v34 }
 0x543   : > { %v4258_v22 = vmul.f32 -0.5, %v10794_v57  ;;  %7700 = vpow2.f32 %v4141_v52  ;;  %v4239_v24 = vmul.f32 0.6931472, %v7687_v10  ;;  %v4242_v54 = vmul.f32 %v10741_v37, %v4241_v1  ;;  %v7689_v6 = vpop.eup %7688 }
 0x544   : > { %v4487_v3 = vpack.c.bf16 %v4444_v17, %v4443_v16  ;;  %v4267_v51 = vmul.f32 -0.5, %v10817_v33  ;;  %v12826_v20 = vmax.f32 %v10672_v40, 0.0  ;;  %vm11000_vm10 = vcmp.lt.f32.partialorder %v4243_v9, 0.0004427343 }
 0x545   : > { %7702 = vlog2.f32 %v4282_v39  ;;  %v4291_v31 = vadd.f32 1.0, %v10822_v12  ;;  %v4245_v48 = vsel %vm11000_vm10, %v4242_v54, %v4239_v24  ;;  %v4248_v47 = vmul.f32 0.6931472, %v7689_v6 }
 0x546   : > { %v10998_v2 = vadd.f32 %v4326_v36, %v12826_v20  ;;  %7027 = vmatprep.mubr.bf16.mxu0 %v4487_v3  ;;  %v4251_v37 = vmul.f32 %v10758_v34, %v4250_v50  ;;  %v4261_v26 = vand.u32 2147483647, %v10794_v57  ;;  %vm4253_vm11 = vcmp.lt.f32.partialorder %v4252_v61, 0.0004427343 }
 0x547   : > { %v4259_v40 = vadd.f32 1.0, %v4258_v22  ;;  %v4270_v23 = vand.u32 2147483647, %v10817_v33  ;;  %7704 = vlog2.f32 %v4291_v31  ;;  %v4268_v30 = vadd.f32 1.0, %v4267_v51 }
 0x548   : > { %v4254_v53 = vsel %vm4253_vm11, %v4251_v37, %v4248_v47  ;;  %v4276_v11 = vmul.f32 -0.5, %v10790_v56  ;;  %v4300_v21 = vadd.f32 1.0, %v10868_v19  ;;  %v11013_v49 = vmul.f32 0.6931472, %v10921_v18 }
 0x549   : > { %v4390_v59 = vadd.f32 1.0, %v10935_v29  ;;  %v12829_v34 = vmax.f32 %v10601_v63, 0.0  ;;  %v12830_v55 = vmax.f32 %v10621_v38, 0.0  ;;  %v7691_v15 = vpop.eup %7690  ;;  %vm11020_vm12 = vcmp.lt.f32.partialorder %v4261_v26, 0.0004427343 }
 0x54a   : > { %v4285_v16 = vmul.f32 -0.5, %v10815_v13  ;;  %7706 = vlog2.f32 %v4300_v21  ;;  %v4327_v45 = vadd.f32 1.0, %v10880_v46  ;;  %v7693_v18 = vpop.eup %7692  ;;  %v4257_v9 = vmul.f32 0.6931472, %v7691_v15 }
 0x54b   : > { %v4445_v52 = vadd.f32 %v4245_v48, %v12829_v34  ;;  %v4446_v1 = vadd.f32 %v4254_v53, %v12830_v55  ;;  %v4260_v36 = vmul.f32 %v10794_v57, %v4259_v40  ;;  %vm11027_vm1 = vcmp.lt.f32.partialorder %v4270_v23, 0.0004427343  ;;  %v11031_v38 = vpop.eup %7694 }
 0x54c   : > { %v4266_v50 = vmul.f32 0.6931472, %v7693_v18  ;;  %v4269_v39 = vmul.f32 %v10817_v33, %v4268_v30  ;;  %v4277_v10 = vadd.f32 1.0, %v4276_v11  ;;  %7708 = vlog2.f32 %v4327_v45 }
 0x54d   : > { %v4488_v17 = vpack.c.bf16 %v4446_v1, %v4445_v52  ;;  %v4263_v3 = vsel %vm11020_vm12, %v4260_v36, %v4257_v9  ;;  %v4279_v61 = vand.u32 2147483647, %v10790_v56  ;;  %v4294_v22 = vmul.f32 -0.5, %v10822_v12 }
 0x54e   : > { %v4336_v57 = vadd.f32 1.0, %v10888_v7  ;;  %7710 = vlog2.f32 %v4390_v59  ;;  %v4272_v24 = vsel %vm11027_vm1, %v4269_v39, %v4266_v50  ;;  %v4286_v54 = vadd.f32 1.0, %v4285_v16  ;;  %v7697_v33 = vpop.eup %7696 }
 0x54f   : > { %7028 = vmatmul.mubr.bf16.gmra.mxu0 %v4488_v17  ;;  %v4288_v51 = vand.u32 2147483647, %v10815_v13  ;;  %v12835_v6 = vmax.f32 %v10662_v0, 0.0  ;;  %v12836_v4 = vmax.f32 %v10686_v62, 0.0  ;;  %v4303_v48 = vmul.f32 -0.5, %v10868_v19  ;;  %v11047_v47 = vpop.eup %7698 }
 0x550   : > { %7712 = vlog2.f32 %v4336_v57  ;;  %v4426_v37 = vadd.f32 1.0, %v11031_v38  ;;  %v4275_v26 = vmul.f32 0.6931472, %v7697_v33  ;;  %v4297_v40 = vand.u32 2147483647, %v10822_v12  ;;  %v11052_v53 = vpop.eup %7700 }
 0x551   : > { %v4447_v20 = vadd.f32 %v4263_v3, %v12835_v6  ;;  %v4448_v31 = vadd.f32 %v4272_v24, %v12836_v4  ;;  %v4363_v23 = vadd.f32 1.0, %v10894_v35  ;;  %v4278_v0 = vmul.f32 %v10790_v56, %v4277_v10 }
 0x552   : > { %vm11055_vm15 = vcmp.lt.f32.partialorder %v4279_v61, 0.0004427343  ;;  %v4295_v11 = vadd.f32 1.0, %v4294_v22  ;;  %v7703_v21 = vpop.eup %7702  ;;  %v4287_v59 = vmul.f32 %v10815_v13, %v4286_v54  ;;  %v4330_v34 = vmul.f32 -0.5, %v10880_v46 }
 0x553   : > { %v4489_v30 = vpack.c.bf16 %v4448_v31, %v4447_v20  ;;  %7714 = vlog2.f32 %v4363_v23  ;;  %v4372_v52 = vadd.f32 1.0, %v10954_v43  ;;  %v4281_v55 = vsel %vm11055_vm15, %v4278_v0, %v4275_v26  ;;  %v12850_v0 = vld [vmem:[#allocation2_spill] sm:$0xff] }
 0x554   : > { %v4284_v1 = vmul.f32 0.6931472, %v7703_v21  ;;  %vm4289_vm3 = vcmp.lt.f32.partialorder %v4288_v51, 0.0004427343  ;;  %v4304_v56 = vadd.f32 1.0, %v4303_v48  ;;  %v7705_v15 = vpop.eup %7704  ;;  %v4339_v13 = vmul.f32 -0.5, %v10888_v7 }
 0x555   : > { %7031 = vmatprep.mubr.bf16.mxu0 %v4489_v30  ;;  %vm11064_vm13 = vcmp.lt.f32.partialorder %v4297_v40, 0.0004427343  ;;  %v4306_v16 = vand.u32 2147483647, %v10868_v19  ;;  %7716 = vlog2.f32 %v4372_v52  ;;  %v4293_v18 = vmul.f32 0.6931472, %v7705_v15 }
 0x556   : > { %v4290_v45 = vsel %vm4289_vm3, %v4287_v59, %v4284_v1  ;;  %v4296_v17 = vmul.f32 %v10822_v12, %v4295_v11  ;;  %v4399_v9 = vadd.f32 1.0, %v11047_v47  ;;  %v12841_v36 = vmax.f32 %v10650_v25, 0.0 }
 0x557   : > { %v12842_v50 = vmax.f32 %v10675_v42, 0.0  ;;  %v4331_v10 = vadd.f32 1.0, %v4330_v34  ;;  %v4333_v3 = vand.u32 2147483647, %v10880_v46  ;;  %v7707_v61 = vpop.eup %7706  ;;  %v4305_v22 = vmul.f32 %v10868_v19, %v4304_v56 }
 0x558   : > { %v4449_v63 = vadd.f32 %v4281_v55, %v12841_v36  ;;  %v4366_v57 = vmul.f32 -0.5, %v10894_v35  ;;  %7718 = vlog2.f32 %v4399_v9  ;;  %v4408_v24 = vadd.f32 1.0, %v11052_v53  ;;  %v12856_v36 = vld [vmem:[#allocation4_spill] sm:$0xff] }
 0x559   : > { %v4450_v39 = vadd.f32 %v4290_v45, %v12842_v50  ;;  %v12843_v12 = vand.u32 2147483647, %v10836_v58  ;;  %v4299_v42 = vsel %vm11064_vm13, %v4296_v17, %v4293_v18  ;;  %v4302_v51 = vmul.f32 0.6931472, %v7707_v61  ;;  %v7709_v6 = vpop.eup %7708  ;;  %v12854_v18 = vld [vmem:[#allocation3_spill] sm:$0xff] }
 0x55a   : > { %v4340_v33 = vadd.f32 1.0, %v4339_v13  ;;  %v4356_v19 = vmul.f32 0.6931472, %v10926_v28  ;;  %v4417_v20 = vadd.f32 1.0, %v10973_v44  ;;  %vm4307_vm4 = vcmp.lt.f32.partialorder %v4306_v16, 0.0004427343 }
 0x55b   : > { %vm11082_vm14 = vcmp.lt.f32.partialorder %v12843_v12, 0.0004427343  ;;  %v4490_v25 = vpack.c.bf16 %v4450_v39, %v4449_v63  ;;  %7720 = vlog2.f32 %v4408_v24  ;;  %v12846_v4 = vand.u32 2147483647, %v10831_v5  ;;  %v7711_v23 = vpop.eup %7710 }
 0x55c   : > { %v4308_v31 = vsel %vm4307_vm4, %v4305_v22, %v4302_v51  ;;  %v4329_v48 = vmul.f32 0.6931472, %v7709_v6  ;;  %v4342_v26 = vand.u32 2147483647, %v10888_v7  ;;  %v4375_v40 = vmul.f32 -0.5, %v10954_v43  ;;  %v12862_v51 = vld [vmem:[#allocation11_spill] sm:$0xff] }
 0x55d   : > { %vm11092_vm0 = vcmp.lt.f32.partialorder %v12846_v4, 0.0004427343  ;;  %7032 = vmatmul.mubr.bf16.gmra.mxu0 %v4490_v25  ;;  %v12849_v28 = vmax.f32 %v10692_v60, 0.0  ;;  %v12851_v62 = vmax.f32 %v12850_v0, 0.0  ;;  %v4332_v5 = vmul.f32 %v10880_v46, %v4331_v10  ;;  %v7713_v59 = vpop.eup %7712  ;;  %v12858_v10 = vld [vmem:[#allocation12_spill] sm:$0xff] }
 0x55e   : > { %v4367_v21 = vadd.f32 1.0, %v4366_v57  ;;  %v4393_v34 = vmul.f32 -0.5, %v10935_v29  ;;  %7722 = vlog2.f32 %v4426_v37  ;;  %vm11104_vm5 = vcmp.lt.f32.partialorder %v4333_v3, 0.0004427343 }
 0x55f   : > { %v4451_v30 = vadd.f32 %v4299_v42, %v12849_v28  ;;  %v4452_v11 = vadd.f32 %v4308_v31, %v12851_v62  ;;  %v4341_v55 = vmul.f32 %v10888_v7, %v4340_v33  ;;  %v4335_v60 = vsel %vm11104_vm5, %v4332_v5, %v4329_v48  ;;  %v12867_v62 = vld [vmem:[#allocation7_spill] sm:$0xff] }
 0x560   : > { %v4338_v56 = vmul.f32 0.6931472, %v7713_v59  ;;  %v4369_v15 = vand.u32 2147483647, %v10894_v35  ;;  %7724 = vlog2.f32 %v4417_v20  ;;  %v4492_v46 = vpack.c.bf16 %v10998_v2, %v10906_v14  ;;  %v7715_v37 = vpop.eup %7714  ;;  %v12863_v20 = vld [vmem:[#allocation27_spill] sm:$0xff] }
 0x561   : > { %v4491_v1 = vpack.c.bf16 %v4452_v11, %v4451_v30  ;;  %vm4343_vm6 = vcmp.lt.f32.partialorder %v4342_v26, 0.0004427343  ;;  %v4376_v41 = vadd.f32 1.0, %v4375_v40  ;;  %v4368_v13 = vmul.f32 %v10894_v35, %v4367_v21  ;;  %v12859_v35 = vld [vmem:[#allocation13_spill] sm:$0xff]  ;;  %v12869_v21 = vld [vmem:[#allocation30_spill] sm:$0xff] }
 0x562   : > { %v4344_v16 = vsel %vm4343_vm6, %v4341_v55, %v4338_v56  ;;  %v4378_v7 = vand.u32 2147483647, %v10954_v43  ;;  %v4411_v45 = vmul.f32 -0.5, %v11052_v53  ;;  %v12855_v17 = vmax.f32 %v12854_v18, 0.0  ;;  %v7717_v2 = vpop.eup %7716  ;;  %v12878_v18 = vld [vmem:[#allocation6_spill] sm:$0xff] }
 0x563   : > { %7035 = vmatprep.mubr.bf16.mxu0 %v4491_v1  ;;  %v12857_v63 = vmax.f32 %v12856_v36, 0.0  ;;  %v4365_v39 = vmul.f32 0.6931472, %v7715_v37  ;;  %v4402_v14 = vmul.f32 -0.5, %v11047_v47  ;;  %v4362_v3 = vsel %vm11082_vm14, %v12858_v10, %v4356_v19 }
 0x564   : > { %v4455_v9 = vadd.f32 %v4335_v60, %v12855_v17  ;;  %v4394_v61 = vadd.f32 1.0, %v4393_v34  ;;  %v4016_v22 = vmax.f32 %v12859_v35, 0.0  ;;  %vm11126_vm7 = vcmp.lt.f32.partialorder %v4369_v15, 0.0004427343 }
 0x565   : > { %v4456_v50 = vadd.f32 %v4344_v16, %v12857_v63  ;;  %7036 = vmatmul.mubr.bf16.gmra.mxu0 %v4492_v46  ;;  %v4371_v12 = vsel %vm11126_vm7, %v4368_v13, %v4365_v39  ;;  %v4374_v25 = vmul.f32 0.6931472, %v7717_v2  ;;  %v4377_v42 = vmul.f32 %v10954_v43, %v4376_v41  ;;  %v7719_v19 = vpop.eup %7718  ;;  %v12865_v43 = vld [vmem:[#allocation5_spill] sm:$0xff] }
 0x566   : > { %v4353_v54 = vsel %vm11092_vm0, %v12862_v51, %v11013_v49  ;;  %v4396_v33 = vand.u32 2147483647, %v10935_v29  ;;  %vm4379_vm8 = vcmp.lt.f32.partialorder %v4378_v7, 0.0004427343  ;;  %v4412_v6 = vadd.f32 1.0, %v4411_v45  ;;  %v12879_v63 = vld [vmem:[#allocation9_spill] sm:$0xff] }
 0x567   : > { %v4493_v24 = vpack.c.bf16 %v4456_v50, %v4455_v9  ;;  %v12864_v4 = vmax.f32 %v12863_v20, 0.0  ;;  %v4380_v48 = vsel %vm4379_vm8, %v4377_v42, %v4374_v25  ;;  %v4403_v26 = vadd.f32 1.0, %v4402_v14  ;;  %v12880_v14 = vld [vmem:[#allocation29_spill] sm:$0xff]  ;;  %v12882_v20 = vld [vmem:[#allocation8_spill] sm:$0xff] }
 0x568   : > { %v4414_v40 = vand.u32 2147483647, %v11052_v53  ;;  %v4392_v28 = vmul.f32 0.6931472, %v7711_v23  ;;  %v12866_v30 = vmax.f32 %v12865_v43, 0.0  ;;  %v12868_v58 = vmax.f32 %v12867_v62, 0.0  ;;  %v7721_v5 = vpop.eup %7720 }
 0x569   : > { %v4458_v31 = vadd.f32 %v4362_v3, %v12864_v4  ;;  %7039 = vmatprep.mubr.bf16.mxu0 %v4493_v24  ;;  %v4405_v11 = vand.u32 2147483647, %v11047_v47  ;;  %v12870_v59 = vmax.f32 %v12869_v21, 0.0  ;;  %v4383_v52 = vmul.f32 0.6931472, %v10970_v8  ;;  %v7148_v43 = vld [vmem:[%s12451_s16 + $0x8] sm:$0xff]  }
 0x56a   : > { %v4459_v0 = vadd.f32 %v4371_v12, %v12866_v30  ;;  %v4460_v49 = vadd.f32 %v4380_v48, %v12868_v58  ;;  %v4395_v55 = vmul.f32 %v10935_v29, %v4394_v61  ;;  %v4401_v1 = vmul.f32 0.6931472, %v7719_v19  ;;  %v7149_v30 = vld [vmem:[%s12451_s16] sm:$0xff]  }
 0x56b   : > { %v4457_v34 = vadd.f32 %v4353_v54, %v12870_v59  ;;  %v4429_v60 = vmul.f32 -0.5, %v11031_v38  ;;  %v4410_v56 = vmul.f32 0.6931472, %v7721_v5  ;;  %v4413_v15 = vmul.f32 %v11052_v53, %v4412_v6  ;;  %v7723_v16 = vpop.eup %7722 }
 0x56c   : > { %v4495_v23 = vpack.c.bf16 %v4460_v49, %v4459_v0  ;;  %vm11152_vm9 = vcmp.lt.f32.partialorder %v4396_v33, 0.0004427343  ;;  %v4404_v37 = vmul.f32 %v11047_v47, %v4403_v26  ;;  %vm4415_vm10 = vcmp.lt.f32.partialorder %v4414_v40, 0.0004427343  ;;  %v12881_v33 = vld [vmem:[#allocation10_spill] sm:$0xff]  ;;  %v7146_v40 = vld [vmem:[%s12451_s16 + $0x18] sm:$0xff]  }
 0x56d   : > { %v4494_v41 = vpack.c.bf16 %v4458_v31, %v4457_v34  ;;  %v4398_v8 = vsel %vm11152_vm9, %v4395_v55, %v4392_v28  ;;  %v4420_v29 = vmul.f32 -0.5, %v10973_v44  ;;  %vm11160_vm11 = vcmp.lt.f32.partialorder %v4405_v11, 0.0004427343  ;;  %v7725_v9 = vpop.eup %7724  ;;  %v7147_v28 = vld [vmem:[%s12451_s16 + $0x10] sm:$0xff]   ;;  %v11205_v0 = vld [vmem:[%s12450_s15] ss:$0 sm:$0xff] }
 0x56e   : > { %v4416_v7 = vsel %vm4415_vm10, %v4413_v15, %v4410_v56  ;;  %v12875_v53 = vand.u32 2147483647, %v10863_v32  ;;  %v4014_v47 = vmax.f32 %v12878_v18, 0.0  ;;  %v4407_v17 = vsel %vm11160_vm11, %v4404_v37, %v4401_v1 }
 0x56f   : > { %7040 = vmatmul.mubr.bf16.gmra.mxu0 %v4494_v41  ;;  %v4015_v50 = vmax.f32 %v12879_v63, 0.0  ;;  %v4430_v39 = vadd.f32 1.0, %v4429_v60  ;;  %v4464_v32 = vadd.f32 %v4416_v7, %v4016_v22  ;;  %v4013_v2 = vmax.f32 %v12880_v14, 0.0 }
 0x570   : > { %vm11166_vm12 = vcmp.lt.f32.partialorder %v12875_v53, 0.0004427343  ;;  %7043 = vmatprep.mubr.bf16.mxu0 %v4495_v23  ;;  %v4462_v10 = vadd.f32 %v4398_v8, %v4014_v47  ;;  %v4432_v3 = vand.u32 2147483647, %v11031_v38  ;;  %v4421_v61 = vadd.f32 1.0, %v4420_v29 }
 0x571   : > { %v4389_v36 = vsel %vm11166_vm12, %v10980_v27, %v4383_v52  ;;  %v4428_v35 = vmul.f32 0.6931472, %v7723_v16  ;;  %v4463_v57 = vadd.f32 %v4407_v17, %v4015_v50  ;;  %v4423_v12 = vand.u32 2147483647, %v10973_v44 }
 0x572   : > { %v4461_v24 = vadd.f32 %v4389_v36, %v4013_v2  ;;  %v4419_v25 = vmul.f32 0.6931472, %v7725_v9  ;;  %v4431_v42 = vmul.f32 %v11031_v38, %v4430_v39  ;;  %vm4433_vm1 = vcmp.lt.f32.partialorder %v4432_v3, 0.0004427343  ;;  %v7144_v38 = vld [vmem:[%s12451_s16 + $0x28] sm:$0xff]  }
 0x573   : > { %v4497_v27 = vpack.c.bf16 %v4464_v32, %v4463_v57  ;;  %v4422_v54 = vmul.f32 %v10973_v44, %v4421_v61  ;;  %vm4424_vm15 = vcmp.lt.f32.partialorder %v4423_v12, 0.0004427343  ;;  %v4018_v6 = vmax.f32 %v12881_v33, 0.0  ;;  %7055 = vmatprep.subr.bf16.mxu1 %v7144_v38  ;;  %v7145_v44 = vld [vmem:[%s12451_s16 + $0x20] sm:$0xff]  }
 0x574   : > { %v4496_v51 = vpack.c.bf16 %v4462_v10, %v4461_v24  ;;  %v4434_v22 = vsel %vm4433_vm1, %v4431_v42, %v4428_v35  ;;  %v4017_v4 = vmax.f32 %v12882_v20, 0.0  ;;  %7056 = vmatpush3.bf16.msra.mxu1 %v7144_v38 }
 0x575   : > { %v4425_v19 = vsel %vm4424_vm15, %v4422_v54, %v4419_v25  ;;  %v4466_v31 = vadd.f32 %v4434_v22, %v4018_v6  ;;  %7057 = vmatprep.subr.bf16.mxu1 %v7145_v44 }
 0x576   : > { %v4465_v48 = vadd.f32 %v4425_v19, %v4017_v4 }
 0x577   : > { %7044 = vmatmul.mubr.bf16.gmra.mxu0 %v4496_v51 }
 0x578   : > { %7047 = vmatprep.mubr.bf16.mxu0 %v4497_v27  ;;  %v4498_v26 = vpack.c.bf16 %v4466_v31, %v4465_v48  ;;  %7058 = vmatpush3.bf16.msra.mxu1 %v7145_v44 }
 0x579   : > { %7059 = vmatprep.subr.bf16.mxu1 %v7146_v40 }
 0x57c   : > { %7060 = vmatpush3.bf16.msra.mxu1 %v7146_v40 }
 0x57d   : > { %7061 = vmatprep.subr.bf16.mxu1 %v7147_v28 }
 0x57f   : > { %7048 = vmatmul.mubr.bf16.gmra.mxu0 %v4498_v26 }
 0x580   : > { %7062 = vmatpush3.bf16.msra.mxu1 %v7147_v28 }
 0x581   : > { %7063 = vmatprep.subr.bf16.mxu1 %v7148_v43 }
 0x584   : > { %7064 = vmatpush3.bf16.msra.mxu1 %v7148_v43 }
 0x585   : > { %7065 = vmatprep.subr.bf16.mxu1 %v7149_v30 }
 0x588   : > { %7066 = vmatpush3.bf16.msra.mxu1 %v7149_v30 }
 0x5e5   : > { %v7021_v62 = vpop.f32.mrf.mxu0 }
 0x5e6   : > { %v11208_v58 = vadd.f32 %v7021_v62, %v11205_v0 }
 0x5e7   : > { %v4588_v49 = vpop.f32.mrf.mxu0 }
 0x5e8   : > { %v4749_v11 = vand.u32 2147483647, %v11208_v58  ;;  %v11212_v5 = vadd.f32 %v11205_v0, %v4588_v49 }
 0x5e9   : > { %v7022_v21 = vpop.f32.mrf.mxu0 }
 0x5ea   : > { %v4781_v59 = vsub.f32 0.0, %v4749_v11  ;;  %v4747_v34 = vand.u32 2147483647, %v11212_v5  ;;  %v11216_v52 = vadd.f32 %v7022_v21, %v11205_v0 }
 0x5eb   : > { %v4591_v55 = vpop.f32.mrf.mxu0 }
 0x5ec   : > { %v4815_v1 = vmul.f32 1.442695, %v4781_v59  ;;  %v4779_v60 = vsub.f32 0.0, %v4747_v34  ;;  %v4750_v23 = vand.u32 2147483647, %v11216_v52  ;;  %v11220_v56 = vadd.f32 %v11205_v0, %v4591_v55 }
 0x5ed   : > { %v4718_v12 = vmax.f32 %v11216_v52, 0.0 }
 0x5ee   : > { %7726 = vpow2.f32 %v4815_v1  ;;  %v4811_v15 = vmul.f32 1.442695, %v4779_v60  ;;  %v4782_v46 = vsub.f32 0.0, %v4750_v23  ;;  %v4748_v41 = vand.u32 2147483647, %v11220_v56 }
 0x5ef   : > { %v4716_v19 = vmax.f32 %v11220_v56, 0.0 }
 0x5f0   : > { %7728 = vpow2.f32 %v4811_v15  ;;  %v4817_v37 = vmul.f32 1.442695, %v4782_v46  ;;  %v4780_v16 = vsub.f32 0.0, %v4748_v41 }
 0x5f2   : > { %7730 = vpow2.f32 %v4817_v37  ;;  %v4813_v8 = vmul.f32 1.442695, %v4780_v16  ;;  %v4715_v37 = vmax.f32 %v11212_v5, 0.0 }
 0x5f4   : > { %7732 = vpow2.f32 %v4813_v8 }
 0x5fb   : > { %v7727_v29 = vpop.eup %7726 }
 0x5fc   : > { %v4893_v7 = vadd.f32 1.0, %v7727_v29  ;;  %v4896_v39 = vmul.f32 -0.5, %v7727_v29  ;;  %v4899_v24 = vand.u32 2147483647, %v7727_v29 }
 0x5fd   : > { %v7729_v13 = vpop.eup %7728 }
 0x5fe   : > { %v4875_v53 = vadd.f32 1.0, %v7729_v13  ;;  %v4878_v14 = vmul.f32 -0.5, %v7729_v13  ;;  %v4897_v57 = vadd.f32 1.0, %v4896_v39  ;;  %v4881_v51 = vand.u32 2147483647, %v7729_v13 }
 0x5ff   : > { %v7731_v45 = vpop.eup %7730  ;;  %vm11239_vm3 = vcmp.lt.f32.partialorder %v4899_v24, 0.0004427343 }
 0x600   : > { %7734 = vlog2.f32 %v4875_v53  ;;  %v4902_v18 = vadd.f32 1.0, %v7731_v45  ;;  %v7025_v47 = vpop.f32.mrf.mxu0  ;;  %v4905_v32 = vmul.f32 -0.5, %v7731_v45  ;;  %v4879_v27 = vadd.f32 1.0, %v4878_v14 }
 0x601   : > { %7736 = vlog2.f32 %v4893_v7  ;;  %v7733_v17 = vpop.eup %7732  ;;  %v11224_v50 = vadd.f32 %v7025_v47, %v11205_v0  ;;  %v4908_v54 = vand.u32 2147483647, %v7731_v45  ;;  %v4898_v43 = vmul.f32 %v7727_v29, %v4897_v57 }
 0x602   : > { %7738 = vlog2.f32 %v4902_v18  ;;  %v4884_v9 = vadd.f32 1.0, %v7733_v17  ;;  %v4604_v36 = vpop.f32.mrf.mxu0  ;;  %v4887_v10 = vmul.f32 -0.5, %v7733_v17  ;;  %v4906_v25 = vadd.f32 1.0, %v4905_v32 }
 0x603   : > { %v4753_v3 = vand.u32 2147483647, %v11224_v50  ;;  %v11228_v61 = vadd.f32 %v11205_v0, %v4604_v36  ;;  %v4890_v4 = vand.u32 2147483647, %v7733_v17  ;;  %v4880_v11 = vmul.f32 %v7729_v13, %v4879_v27 }
 0x604   : > { %7740 = vlog2.f32 %v4884_v9  ;;  %v7026_v63 = vpop.f32.mrf.mxu0  ;;  %v4888_v20 = vadd.f32 1.0, %v4887_v10  ;;  %v4907_v62 = vmul.f32 %v7731_v45, %v4906_v25  ;;  %vm11243_vm13 = vcmp.lt.f32.partialorder %v4881_v51, 0.0004427343 }
 0x605   : > { %v11232_v22 = vadd.f32 %v7026_v63, %v11205_v0  ;;  %v4785_v31 = vsub.f32 0.0, %v4753_v3  ;;  %v4751_v38 = vand.u32 2147483647, %v11228_v61  ;;  %vm11247_vm14 = vcmp.lt.f32.partialorder %v4908_v54, 0.0004427343 }
 0x606   : > { %v4607_v2 = vpop.f32.mrf.mxu0  ;;  %v4889_v1 = vmul.f32 %v7733_v17, %v4888_v20  ;;  %vm4891_vm4 = vcmp.lt.f32.partialorder %v4890_v4, 0.0004427343  ;;  %v4717_v29 = vmax.f32 %v11208_v58, 0.0  ;;  %v4721_v21 = vmax.f32 %v11224_v50, 0.0 }
 0x607   : > { %v11237_v44 = vadd.f32 %v11205_v0, %v4607_v2  ;;  %v4754_v34 = vand.u32 2147483647, %v11232_v22  ;;  %v4823_v60 = vmul.f32 1.442695, %v4785_v31  ;;  %v4783_v15 = vsub.f32 0.0, %v4751_v38 }
 0x609   : > { %v4752_v46 = vand.u32 2147483647, %v11237_v44  ;;  %v4786_v53 = vsub.f32 0.0, %v4754_v34  ;;  %7742 = vpow2.f32 %v4823_v60  ;;  %v4819_v17 = vmul.f32 1.442695, %v4783_v15 }
 0x60a   : > { %v4722_v60 = vmax.f32 %v11232_v22, 0.0 }
 0x60b   : > { %v4784_v9 = vsub.f32 0.0, %v4752_v46  ;;  %v4825_v5 = vmul.f32 1.442695, %v4786_v53  ;;  %7744 = vpow2.f32 %v4819_v17 }
 0x60d   : > { %v7735_v35 = vpop.eup %7734  ;;  %v4821_v14 = vmul.f32 1.442695, %v4784_v9  ;;  %7746 = vpow2.f32 %v4825_v5 }
 0x60e   : > { %v7737_v42 = vpop.eup %7736  ;;  %v4877_v48 = vmul.f32 0.6931472, %v7735_v35 }
 0x60f   : > { %v7029_v33 = vpop.f32.mrf.mxu0  ;;  %v7739_v6 = vpop.eup %7738  ;;  %v4895_v28 = vmul.f32 0.6931472, %v7737_v42  ;;  %7748 = vpow2.f32 %v4821_v14 }
 0x610   : > { %v4904_v26 = vmul.f32 0.6931472, %v7739_v6  ;;  %v4883_v56 = vsel %vm11243_vm13, %v4880_v11, %v4877_v48  ;;  %v11261_v8 = vadd.f32 %v7029_v33, %v11205_v0 }
 0x611   : > { %v4620_v40 = vpop.f32.mrf.mxu0  ;;  %v7741_v49 = vpop.eup %7740  ;;  %v4901_v41 = vsel %vm11239_vm3, %v4898_v43, %v4895_v28  ;;  %v5163_v45 = vadd.f32 %v4883_v56, %v4715_v37 }
 0x612   : > { %v4910_v52 = vsel %vm11247_vm14, %v4907_v62, %v4904_v26  ;;  %v4886_v55 = vmul.f32 0.6931472, %v7741_v49  ;;  %v5165_v47 = vadd.f32 %v4901_v41, %v4717_v29  ;;  %v4757_v36 = vand.u32 2147483647, %v11261_v8 }
 0x613   : > { %v7030_v23 = vpop.f32.mrf.mxu0  ;;  %v5166_v13 = vadd.f32 %v4910_v52, %v4718_v12  ;;  %v11266_v58 = vadd.f32 %v11205_v0, %v4620_v40  ;;  %v4719_v52 = vmax.f32 %v11228_v61, 0.0 }
 0x614   : > { %v4892_v16 = vsel %vm4891_vm4, %v4889_v1, %v4886_v55  ;;  %v4789_v2 = vsub.f32 0.0, %v4757_v36  ;;  %v11270_v12 = vadd.f32 %v7030_v23, %v11205_v0  ;;  %v4720_v23 = vmax.f32 %v11237_v44, 0.0 }
 0x615   : > { %v5164_v7 = vadd.f32 %v4892_v16, %v4716_v19  ;;  %v4623_v18 = vpop.f32.mrf.mxu0  ;;  %v5212_v39 = vpack.c.bf16 %v5166_v13, %v5165_v47  ;;  %v4755_v35 = vand.u32 2147483647, %v11266_v58  ;;  %v4725_v16 = vmax.f32 %v11261_v8, 0.0 }
 0x616   : > { %v4831_v57 = vmul.f32 1.442695, %v4789_v2  ;;  %v11272_v25 = vpop.eup %7742  ;;  %v11275_v27 = vadd.f32 %v11205_v0, %v4623_v18  ;;  %v4758_v33 = vand.u32 2147483647, %v11270_v12  ;;  %v4726_v5 = vmax.f32 %v11270_v12, 0.0 }
 0x617   : > { %v5211_v63 = vpack.c.bf16 %v5164_v7, %v5163_v45  ;;  %v4787_v42 = vsub.f32 0.0, %v4755_v35  ;;  %v4929_v54 = vadd.f32 1.0, %v11272_v25  ;;  %v4932_v37 = vmul.f32 -0.5, %v11272_v25 }
 0x618   : > { %7750 = vpow2.f32 %v4831_v57  ;;  %v11279_v19 = vpop.eup %7744  ;;  %v4756_v20 = vand.u32 2147483647, %v11275_v27  ;;  %v4790_v26 = vsub.f32 0.0, %v4758_v33  ;;  %v4935_v13 = vand.u32 2147483647, %v11272_v25 }
 0x619   : > { %7067 = vmatprep.mubr.bf16.mxu1 %v5211_v63  ;;  %v4827_v6 = vmul.f32 1.442695, %v4787_v42  ;;  %7752 = vlog2.f32 %v4929_v54  ;;  %v4911_v40 = vadd.f32 1.0, %v11279_v19  ;;  %v4723_v7 = vmax.f32 %v11266_v58, 0.0 }
 0x61a   : > { %7068 = vmatmul.mubr.bf16.vlgmr.msra.gmra.mxu1 %v5212_v39  ;;  %v11287_v48 = vpop.eup %7746  ;;  %v4788_v30 = vsub.f32 0.0, %v4756_v20  ;;  %v4833_v59 = vmul.f32 1.442695, %v4790_v26  ;;  %v4914_v45 = vmul.f32 -0.5, %v11279_v19  ;;  %v4933_v39 = vadd.f32 1.0, %v4932_v37 }
 0x61b   : > { %7754 = vpow2.f32 %v4827_v6  ;;  %v4938_v49 = vadd.f32 1.0, %v11287_v48  ;;  %v4941_v18 = vmul.f32 -0.5, %v11287_v48  ;;  %vm11329_vm0 = vcmp.lt.f32.partialorder %v4935_v13, 0.0004427343 }
 0x61c   : > { %v11296_v43 = vpop.eup %7748  ;;  %7756 = vlog2.f32 %v4911_v40  ;;  %v4829_v56 = vmul.f32 1.442695, %v4788_v30  ;;  %v4915_v57 = vadd.f32 1.0, %v4914_v45 }
 0x61d   : > { %v7033_v32 = vpop.f32.mrf.mxu0  ;;  %v4920_v55 = vadd.f32 1.0, %v11296_v43  ;;  %7758 = vlog2.f32 %v4938_v49  ;;  %v4923_v17 = vmul.f32 -0.5, %v11296_v43  ;;  %v4942_v6 = vadd.f32 1.0, %v4941_v18 }
 0x61e   : > { %v11285_v31 = vadd.f32 %v7033_v32, %v11205_v0  ;;  %7760 = vpow2.f32 %v4833_v59 }
 0x61f   : > { %v4636_v10 = vpop.f32.mrf.mxu0  ;;  %7762 = vlog2.f32 %v4920_v55  ;;  %v4924_v20 = vadd.f32 1.0, %v4923_v17 }
 0x620   : > { %v11290_v38 = vadd.f32 %v11205_v0, %v4636_v10  ;;  %v4761_v11 = vand.u32 2147483647, %v11285_v31  ;;  %7764 = vpow2.f32 %v4829_v56  ;;  %v4917_v10 = vand.u32 2147483647, %v11279_v19 }
 0x621   : > { %v7034_v3 = vpop.f32.mrf.mxu0  ;;  %v11364_v18 = vmul.f32 %v11296_v43, %v4924_v20 }
 0x622   : > { %v11294_v28 = vadd.f32 %v7034_v3, %v11205_v0  ;;  %v4759_v34 = vand.u32 2147483647, %v11290_v38  ;;  %v4793_v29 = vsub.f32 0.0, %v4761_v11  ;;  %v4934_v11 = vmul.f32 %v11272_v25, %v4933_v39 }
 0x623   : > { %v4639_v24 = vpop.f32.mrf.mxu0  ;;  %vm11344_vm5 = vcmp.lt.f32.partialorder %v4917_v10, 0.0004427343  ;;  %v4943_v25 = vmul.f32 %v11287_v48, %v4942_v6 }
 0x624   : > { %v4762_v1 = vand.u32 2147483647, %v11294_v28  ;;  %v11310_v15 = vadd.f32 %v11205_v0, %v4639_v24  ;;  %v4791_v53 = vsub.f32 0.0, %v4759_v34  ;;  %v4839_v32 = vmul.f32 1.442695, %v4793_v29 }
 0x625   : > { %v7037_v51 = vpop.f32.mrf.mxu0  ;;  %v11312_v41 = vpop.eup %7750  ;;  %v4944_v24 = vand.u32 2147483647, %v11287_v48  ;;  %v4926_v34 = vand.u32 2147483647, %v11296_v43 }
 0x626   : > { %v4794_v47 = vsub.f32 0.0, %v4762_v1  ;;  %v4965_v9 = vadd.f32 1.0, %v11312_v41  ;;  %v4760_v36 = vand.u32 2147483647, %v11310_v15  ;;  %v11327_v14 = vadd.f32 %v7037_v51, %v11205_v0  ;;  %v7753_v35 = vpop.eup %7752 }
 0x627   : > { %v11282_v4 = vpop.f32.mrf.mxu0  ;;  %v4835_v3 = vmul.f32 1.442695, %v4791_v53  ;;  %v4968_v40 = vmul.f32 -0.5, %v11312_v41  ;;  %v4931_v55 = vmul.f32 0.6931472, %v7753_v35 }
 0x628   : > { %v4841_v54 = vmul.f32 1.442695, %v4794_v47  ;;  %v11336_v33 = vpop.eup %7754  ;;  %7766 = vlog2.f32 %v4965_v9  ;;  %v4792_v51 = vsub.f32 0.0, %v4760_v36  ;;  %v4765_v30 = vand.u32 2147483647, %v11327_v14 }
 0x629   : > { %v11298_v62 = vpop.f32.mrf.mxu0  ;;  %7768 = vpow2.f32 %v4839_v32  ;;  %v4947_v1 = vadd.f32 1.0, %v11336_v33  ;;  %v11352_v56 = vadd.f32 %v11205_v0, %v11282_v4  ;;  %v7757_v37 = vpop.eup %7756  ;;  %vm11356_vm6 = vcmp.lt.f32.partialorder %v4944_v24, 0.0004427343 }
 0x62a   : > { %7770 = vpow2.f32 %v4835_v3  ;;  %v4837_v53 = vmul.f32 1.442695, %v4792_v51  ;;  %v4969_v47 = vadd.f32 1.0, %v4968_v40  ;;  %v4797_v4 = vsub.f32 0.0, %v4765_v30  ;;  %v7759_v9 = vpop.eup %7758 }
 0x62b   : > { %v4655_v46 = vpop.f32.mrf.mxu0  ;;  %7772 = vpow2.f32 %v4841_v54  ;;  %vm11367_vm7 = vcmp.lt.f32.partialorder %v4926_v34, 0.0004427343  ;;  %v4950_v48 = vmul.f32 -0.5, %v11336_v33  ;;  %v11375_v10 = vpop.eup %7760  ;;  %v4937_v43 = vsel %vm11329_vm0, %v4934_v11, %v4931_v55 }
 0x62c   : > { %v11341_v49 = vadd.f32 %v11205_v0, %v4655_v46  ;;  %v4916_v46 = vmul.f32 %v11279_v19, %v4915_v57  ;;  %v4913_v3 = vmul.f32 0.6931472, %v7757_v37  ;;  %7774 = vlog2.f32 %v4947_v1  ;;  %v7763_v57 = vpop.eup %7762 }
 0x62d   : > { %v4763_v35 = vand.u32 2147483647, %v11352_v56  ;;  %v4971_v24 = vand.u32 2147483647, %v11312_v41  ;;  %v4953_v54 = vand.u32 2147483647, %v11336_v33  ;;  %7776 = vpow2.f32 %v4837_v53  ;;  %v11386_v51 = vpop.eup %7764 }
 0x62e   : > { %v4764_v17 = vand.u32 2147483647, %v11341_v49  ;;  %v11384_v6 = vadd.f32 %v11298_v62, %v11205_v0  ;;  %v4940_v40 = vmul.f32 0.6931472, %v7759_v9  ;;  %v11389_v2 = vmul.f32 %v11312_v41, %v4969_v47 }
 0x62f   : > { %v11323_v63 = vpop.f32.mrf.mxu0  ;;  %v4847_v30 = vmul.f32 1.442695, %v4797_v4  ;;  %v11393_v34 = vadd.f32 %v4937_v43, %v4721_v21  ;;  %v4951_v55 = vadd.f32 1.0, %v4950_v48  ;;  %v4974_v1 = vadd.f32 1.0, %v11375_v10 }
 0x630   : > { %v4796_v11 = vsub.f32 0.0, %v4764_v17  ;;  %v4919_v62 = vsel %vm11344_vm5, %v4916_v46, %v4913_v3  ;;  %v4922_v53 = vmul.f32 0.6931472, %v7763_v57  ;;  %v4795_v32 = vsub.f32 0.0, %v4763_v35 }
 0x631   : > { %v4668_v26 = vpop.f32.mrf.mxu0  ;;  %v4977_v41 = vmul.f32 -0.5, %v11375_v10  ;;  %v4956_v47 = vadd.f32 1.0, %v11386_v51  ;;  %v4766_v50 = vand.u32 2147483647, %v11384_v6  ;;  %v4946_v59 = vsel %vm11356_vm6, %v4943_v25, %v4940_v40 }
 0x632   : > { %v11400_v9 = vadd.f32 %v11205_v0, %v4668_v26  ;;  %v4959_v46 = vmul.f32 -0.5, %v11386_v51  ;;  %7778 = vpow2.f32 %v4847_v30  ;;  %v4845_v26 = vmul.f32 1.442695, %v4796_v11 }
 0x633   : > { %v11361_v45 = vpop.f32.mrf.mxu0  ;;  %v11417_v43 = vadd.f32 %v4919_v62, %v4719_v52  ;;  %vm11419_vm8 = vcmp.lt.f32.partialorder %v4971_v24, 0.0004427343  ;;  %v11424_v35 = vmul.f32 %v11336_v33, %v4951_v55  ;;  %7780 = vlog2.f32 %v4974_v1 }
 0x634   : > { %v4980_v25 = vand.u32 2147483647, %v11375_v10  ;;  %v4928_v57 = vsel %vm11367_vm7, %v11364_v18, %v4922_v53  ;;  %v4767_v61 = vand.u32 2147483647, %v11400_v9  ;;  %v11438_v33 = vadd.f32 %v4946_v59, %v4722_v60 }
 0x635   : > { %v4671_v20 = vpop.f32.mrf.mxu0  ;;  %v7767_v17 = vpop.eup %7766  ;;  %v4978_v40 = vadd.f32 1.0, %v4977_v41  ;;  %7782 = vlog2.f32 %v4956_v47  ;;  %v4798_v30 = vsub.f32 0.0, %v4766_v50  ;;  %v4960_v55 = vadd.f32 1.0, %v4959_v46 }
 0x636   : > { %v11406_v21 = vadd.f32 %v11205_v0, %v4671_v20  ;;  %v11413_v48 = vpop.eup %7768  ;;  %v4843_v20 = vmul.f32 1.442695, %v4795_v32  ;;  %7784 = vpow2.f32 %v4845_v26  ;;  %v11443_v19 = vadd.f32 %v4928_v57, %v4720_v23 }
 0x637   : > { %v11408_v4 = vpop.f32.mrf.mxu0  ;;  %v11427_v29 = vpop.eup %7770  ;;  %v5001_v1 = vadd.f32 1.0, %v11413_v48  ;;  %v4967_v32 = vmul.f32 0.6931472, %v7767_v17  ;;  %v11448_v22 = vadd.f32 %v11361_v45, %v11205_v0  ;;  %vm11450_vm9 = vcmp.lt.f32.partialorder %v4953_v54, 0.0004427343 }
 0x638   : > { %v4768_v52 = vand.u32 2147483647, %v11406_v21  ;;  %v11434_v24 = vpop.eup %7772  ;;  %v4983_v62 = vadd.f32 1.0, %v11427_v29  ;;  %7786 = vpow2.f32 %v4843_v20  ;;  %v4799_v41 = vsub.f32 0.0, %v4767_v61 }
 0x639   : > { %v4684_v11 = vpop.f32.mrf.mxu0  ;;  %v5010_v53 = vadd.f32 1.0, %v11434_v24  ;;  %v7775_v44 = vpop.eup %7774  ;;  %v11459_v23 = vmul.f32 %v11375_v10, %v4978_v40  ;;  %v4962_v50 = vand.u32 2147483647, %v11386_v51  ;;  %v4849_v17 = vmul.f32 1.442695, %v4798_v30 }
 0x63a   : > { %v4800_v18 = vsub.f32 0.0, %v4768_v52  ;;  %v11456_v47 = vadd.f32 %v11205_v0, %v4684_v11  ;;  %v11464_v45 = vadd.f32 %v11323_v63, %v11205_v0  ;;  %v11466_v54 = vpop.eup %7776  ;;  %v11469_v59 = vmul.f32 %v11386_v51, %v4960_v55 }
 0x63b   : > { %7788 = vlog2.f32 %v5001_v1  ;;  %v5004_v57 = vmul.f32 -0.5, %v11413_v48  ;;  %v4770_v20 = vand.u32 2147483647, %v11448_v22  ;;  %v7046_v61 = vpop.f32.mrf.mxu0  ;;  %v4973_v63 = vsel %vm11419_vm8, %v11389_v2, %v4967_v32 }
 0x63c   : > { %v4853_v26 = vmul.f32 1.442695, %v4800_v18  ;;  %7790 = vlog2.f32 %v4983_v62  ;;  %v4851_v52 = vmul.f32 1.442695, %v4799_v41  ;;  %v4771_v51 = vand.u32 2147483647, %v11456_v47 }
 0x63d   : > { %7792 = vlog2.f32 %v5010_v53  ;;  %v4949_v40 = vmul.f32 0.6931472, %v7775_v44  ;;  %v4992_v30 = vadd.f32 1.0, %v11466_v54  ;;  %v4769_v11 = vand.u32 2147483647, %v11464_v45  ;;  %v4687_v41 = vpop.f32.mrf.mxu0 }
 0x63e   : > { %7794 = vpow2.f32 %v4849_v17  ;;  %vm11481_vm10 = vcmp.lt.f32.partialorder %v4980_v25, 0.0004427343  ;;  %v4986_v1 = vmul.f32 -0.5, %v11427_v29  ;;  %v11489_v2 = vadd.f32 %v11408_v4, %v11205_v0 }
 0x63f   : > { %7796 = vpow2.f32 %v4853_v26  ;;  %v11491_v3 = vpop.eup %7778  ;;  %v5005_v32 = vadd.f32 1.0, %v5004_v57  ;;  %v5007_v62 = vand.u32 2147483647, %v11413_v48  ;;  %v4802_v53 = vsub.f32 0.0, %v4770_v20 }
 0x640   : > { %12903 = vst [vmem:[#allocation14_spill] sm:$0xff] %v11489_v2  ;;  %v11495_v25 = vadd.f32 %v7046_v61, %v11205_v0  ;;  %v7781_v44 = vpop.eup %7780  ;;  %v11499_v17 = vadd.f32 %v4973_v63, %v4725_v16  ;;  %vm11501_vm11 = vcmp.lt.f32.partialorder %v4962_v50, 0.0004427343  ;;  %v5013_v4 = vmul.f32 -0.5, %v11434_v24 }
 0x641   : > { %7798 = vpow2.f32 %v4851_v52  ;;  %v4803_v57 = vsub.f32 0.0, %v4771_v51  ;;  %v4955_v20 = vsel %vm11450_vm9, %v11424_v35, %v4949_v40  ;;  %v4989_v61 = vand.u32 2147483647, %v11427_v29 }
 0x642   : > { %7800 = vlog2.f32 %v4992_v30  ;;  %v4801_v10 = vsub.f32 0.0, %v4769_v11  ;;  %v7783_v46 = vpop.eup %7782  ;;  %v4987_v8 = vadd.f32 1.0, %v4986_v1  ;;  %v5037_v16 = vadd.f32 1.0, %v11491_v3 }
 0x643   : > { %v4773_v50 = vand.u32 2147483647, %v11489_v2  ;;  %v11513_v63 = vadd.f32 %v11205_v0, %v4687_v41  ;;  %v11515_v37 = vpop.eup %7784  ;;  %v4976_v52 = vmul.f32 0.6931472, %v7781_v44  ;;  %v11518_v51 = vmul.f32 %v11413_v48, %v5005_v32  ;;  %v7049_v32 = vpop.f32.mrf.mxu0 }
 0x644   : > { %v4857_v35 = vmul.f32 1.442695, %v4802_v53  ;;  %v4774_v60 = vand.u32 2147483647, %v11495_v25  ;;  %v11523_v40 = vadd.f32 %v4955_v20, %v4723_v7  ;;  %v5014_v30 = vadd.f32 1.0, %v5013_v4 }
 0x645   : > { %v5016_v11 = vand.u32 2147483647, %v11434_v24  ;;  %v4859_v1 = vmul.f32 1.442695, %v4803_v57  ;;  %v11526_v18 = vpop.eup %7786  ;;  %v4958_v41 = vmul.f32 0.6931472, %v7783_v46  ;;  %7802 = vlog2.f32 %v5037_v16 }
 0x646   : > { %v4995_v39 = vmul.f32 -0.5, %v11466_v54  ;;  %v5040_v44 = vmul.f32 -0.5, %v11491_v3  ;;  %v4855_v48 = vmul.f32 1.442695, %v4801_v10  ;;  %vm11530_vm12 = vcmp.lt.f32.partialorder %v5007_v62, 0.0004427343 }
 0x647   : > { %vm11534_vm1 = vcmp.lt.f32.partialorder %v4989_v61, 0.0004427343  ;;  %v5028_v7 = vadd.f32 1.0, %v11515_v37  ;;  %v4805_v4 = vsub.f32 0.0, %v4773_v50  ;;  %v4772_v46 = vand.u32 2147483647, %v11513_v63 }
 0x648   : > { %v7789_v57 = vpop.eup %7788  ;;  %v4982_v10 = vsel %vm11481_vm10, %v11459_v23, %v4976_v52  ;;  %v4988_v62 = vmul.f32 %v11427_v29, %v4987_v8  ;;  %7804 = vpow2.f32 %v4857_v35  ;;  %v4806_v20 = vsub.f32 0.0, %v4774_v60  ;;  %v4700_v8 = vpop.f32.mrf.mxu0 }
 0x649   : > { %v7791_v36 = vpop.eup %7790  ;;  %vm11544_vm15 = vcmp.lt.f32.partialorder %v5016_v11, 0.0004427343  ;;  %v4998_v16 = vand.u32 2147483647, %v11466_v54  ;;  %v5019_v50 = vadd.f32 1.0, %v11526_v18  ;;  %7806 = vpow2.f32 %v4859_v1 }
 0x64a   : > { %v11551_v13 = vadd.f32 %v7049_v32, %v11205_v0  ;;  %v7793_v42 = vpop.eup %7792  ;;  %v4964_v29 = vsel %vm11501_vm11, %v11469_v59, %v4958_v41  ;;  %v5015_v23 = vmul.f32 %v11434_v24, %v5014_v30  ;;  %v4996_v55 = vadd.f32 1.0, %v4995_v39 }
 0x64b   : > { %7808 = vpow2.f32 %v4855_v48  ;;  %v11557_v52 = vpop.eup %7794  ;;  %v5041_v35 = vadd.f32 1.0, %v5040_v44  ;;  %v4863_v60 = vmul.f32 1.442695, %v4805_v4  ;;  %v4804_v11 = vsub.f32 0.0, %v4772_v46 }
 0x64c   : > { %7810 = vlog2.f32 %v5028_v7  ;;  %v11559_v1 = vpop.eup %7796  ;;  %v11563_v32 = vadd.f32 %v4982_v10, %v4726_v5  ;;  %v5003_v2 = vmul.f32 0.6931472, %v7789_v57  ;;  %v4985_v26 = vmul.f32 0.6931472, %v7791_v36  ;;  %v7050_v7 = vpop.f32.mrf.mxu0 }
 0x64d   : > { %v4865_v59 = vmul.f32 1.442695, %v4806_v20  ;;  %v12912_v24 = vmax.f32 %v11275_v27, 0.0  ;;  %vm11569_vm3 = vcmp.lt.f32.partialorder %v4998_v16, 0.0004427343  ;;  %7812 = vlog2.f32 %v5019_v50 }
 0x64e   : > { %v5043_v41 = vand.u32 2147483647, %v11491_v3  ;;  %v4777_v44 = vand.u32 2147483647, %v11551_v13  ;;  %v11575_v48 = vpop.eup %7798  ;;  %v5012_v12 = vmul.f32 0.6931472, %v7793_v42  ;;  %v4997_v5 = vmul.f32 %v11466_v54, %v4996_v55 }
 0x64f   : > { %v11567_v39 = vadd.f32 %v4964_v29, %v12912_v24  ;;  %v5046_v36 = vadd.f32 1.0, %v11557_v52  ;;  %v4735_v27 = vmax.f32 %v11400_v9, 0.0  ;;  %v7801_v4 = vpop.eup %7800  ;;  %v11581_v46 = vmul.f32 %v11491_v3, %v5041_v35 }
 0x650   : > { %v5064_v57 = vadd.f32 1.0, %v11559_v1  ;;  %7814 = vpow2.f32 %v4863_v60  ;;  %v4861_v10 = vmul.f32 1.442695, %v4804_v11  ;;  %v5009_v20 = vsel %vm11530_vm12, %v11518_v51, %v5003_v2 }
 0x651   : > { %v4991_v42 = vsel %vm11534_vm1, %v4988_v62, %v4985_v26  ;;  %7816 = vpow2.f32 %v4865_v59  ;;  %v11590_v54 = vadd.f32 %v11205_v0, %v4700_v8  ;;  %v5055_v16 = vadd.f32 1.0, %v11575_v48  ;;  %v4703_v26 = vpop.f32.mrf.mxu0 }
 0x652   : > { %7818 = vpow2.f32 %v4861_v10  ;;  %v4809_v3 = vsub.f32 0.0, %v4777_v44  ;;  %v11594_v50 = vadd.f32 %v7050_v7, %v11205_v0  ;;  %v5018_v29 = vsel %vm11544_vm15, %v5015_v23, %v5012_v12  ;;  %v7803_v8 = vpop.eup %7802 }
 0x653   : > { %v4994_v55 = vmul.f32 0.6931472, %v7801_v4  ;;  %v5022_v2 = vmul.f32 -0.5, %v11526_v18  ;;  %7820 = vlog2.f32 %v5046_v36  ;;  %v12915_v51 = vmax.f32 %v11285_v31, 0.0 }
 0x654   : > { %v4738_v58 = vmax.f32 %v11448_v22, 0.0  ;;  %v4736_v62 = vmax.f32 %v11406_v21, 0.0  ;;  %7822 = vlog2.f32 %v5064_v57  ;;  %v12916_v35 = vmax.f32 %v11290_v38, 0.0 }
 0x655   : > { %v11601_v53 = vadd.f32 %v5009_v20, %v12915_v51  ;;  %v5025_v61 = vand.u32 2147483647, %v11526_v18  ;;  %v5031_v23 = vmul.f32 -0.5, %v11515_v37  ;;  %v4775_v11 = vand.u32 2147483647, %v11590_v54  ;;  %v11612_v31 = vpop.eup %7804 }
 0x656   : > { %v11607_v60 = vadd.f32 %v4991_v42, %v12916_v35  ;;  %v12917_v59 = vmax.f32 %v11294_v28, 0.0  ;;  %vm11618_vm13 = vcmp.lt.f32.partialorder %v5043_v41, 0.0004427343  ;;  %7824 = vlog2.f32 %v5055_v16  ;;  %v11623_v36 = vpop.eup %7806 }
 0x657   : > { %v4871_v38 = vmul.f32 1.442695, %v4809_v3  ;;  %v4778_v12 = vand.u32 2147483647, %v11594_v50  ;;  %v5000_v7 = vsel %vm11569_vm3, %v4997_v5, %v4994_v55  ;;  %v5023_v4 = vadd.f32 1.0, %v5022_v2 }
 0x658   : > { %v11616_v24 = vadd.f32 %v5018_v29, %v12917_v59  ;;  %v4807_v57 = vsub.f32 0.0, %v4775_v11  ;;  %v5213_v28 = vpack.c.bf16 %v11443_v19, %v11417_v43  ;;  %v11629_v10 = vpop.eup %7808  ;;  %v5214_v20 = vpack.c.bf16 %v11438_v33, %v11393_v34 }
 0x659   : > { %v4810_v41 = vsub.f32 0.0, %v4778_v12  ;;  %v11634_v42 = vadd.f32 %v11205_v0, %v4703_v26  ;;  %v5215_v16 = vpack.c.bf16 %v11567_v39, %v11523_v40  ;;  %v7811_v3 = vpop.eup %7810  ;;  %v5039_v30 = vmul.f32 0.6931472, %v7803_v8 }
 0x65a   : > { %vm11638_vm14 = vcmp.lt.f32.partialorder %v5025_v61, 0.0004427343  ;;  %v5032_v29 = vadd.f32 1.0, %v5031_v23  ;;  %v5082_v43 = vadd.f32 1.0, %v11612_v31  ;;  %v4867_v19 = vmul.f32 1.442695, %v4807_v57  ;;  %7071 = vmatprep.mubr.bf16.mxu1 %v5213_v28  ;;  %v7813_v40 = vpop.eup %7812 }
 0x65b   : > { %v12922_v55 = vmax.f32 %v11310_v15, 0.0  ;;  %v5091_v0 = vadd.f32 1.0, %v11623_v36  ;;  %7826 = vpow2.f32 %v4871_v38  ;;  %v4873_v33 = vmul.f32 1.442695, %v4810_v41  ;;  %7072 = vmatmul.mubr.bf16.gmra.mxu1 %v5214_v20 }
 0x65c   : > { %v5034_v39 = vand.u32 2147483647, %v11515_v37  ;;  %v5073_v2 = vadd.f32 1.0, %v11629_v10  ;;  %7828 = vpow2.f32 %v4867_v19  ;;  %v4776_v51 = vand.u32 2147483647, %v11634_v42  ;;  %7075 = vmatprep.mubr.bf16.mxu1 %v5215_v16 }
 0x65d   : > { %v5176_v34 = vadd.f32 %v5000_v7, %v12922_v55  ;;  %v5049_v8 = vmul.f32 -0.5, %v11557_v52  ;;  %v5052_v35 = vand.u32 2147483647, %v11557_v52  ;;  %v5030_v15 = vmul.f32 0.6931472, %v7811_v3  ;;  %v11651_v61 = vpop.eup %7814 }
 0x65e   : > { %7830 = vpow2.f32 %v4873_v33  ;;  %v5024_v23 = vmul.f32 %v11526_v18, %v5023_v4  ;;  %v5033_v11 = vmul.f32 %v11515_v37, %v5032_v29  ;;  %v5058_v26 = vmul.f32 -0.5, %v11575_v48  ;;  %v11656_v59 = vpop.eup %7816 }
 0x65f   : > { %7832 = vlog2.f32 %v5082_v43  ;;  %v5021_v38 = vmul.f32 0.6931472, %v7813_v40  ;;  %v5067_v12 = vmul.f32 -0.5, %v11559_v1  ;;  %v4808_v7 = vsub.f32 0.0, %v4776_v51  ;;  %v11659_v57 = vpop.eup %7818 }
 0x660   : > { %7834 = vlog2.f32 %v5091_v0  ;;  %v5045_v28 = vsel %vm11618_vm13, %v11581_v46, %v5039_v30  ;;  %vm11664_vm4 = vcmp.lt.f32.partialorder %v5034_v39, 0.0004427343  ;;  %v5217_v37 = vpack.c.bf16 %v5176_v34, %v11607_v60  ;;  %v7821_v4 = vpop.eup %7820 }
 0x661   : > { %7836 = vlog2.f32 %v5073_v2  ;;  %v5050_v41 = vadd.f32 1.0, %v5049_v8  ;;  %v5036_v20 = vsel %vm11664_vm4, %v5033_v11, %v5030_v15  ;;  %v5100_v16 = vadd.f32 1.0, %v11659_v57  ;;  %v7823_v29 = vpop.eup %7822 }
 0x662   : > { %v5216_v3 = vpack.c.bf16 %v11563_v32, %v11499_v17  ;;  %v5076_v46 = vmul.f32 -0.5, %v11629_v10  ;;  %v5059_v44 = vadd.f32 1.0, %v5058_v26  ;;  %v5118_v30 = vadd.f32 1.0, %v11656_v59 }
 0x663   : > { %v4869_v43 = vmul.f32 1.442695, %v4808_v7  ;;  %v5027_v60 = vsel %vm11638_vm14, %v5024_v23, %v5021_v38  ;;  %v5068_v19 = vadd.f32 1.0, %v5067_v12  ;;  %v5109_v55 = vadd.f32 1.0, %v11651_v61  ;;  %v7825_v34 = vpop.eup %7824 }
 0x664   : > { %7838 = vlog2.f32 %v5100_v16  ;;  %7076 = vmatmul.mubr.bf16.gmra.mxu1 %v5216_v3  ;;  %v5048_v0 = vmul.f32 0.6931472, %v7821_v4  ;;  %v12925_v33 = vmax.f32 %v11341_v49, 0.0  ;;  %v5070_v32 = vand.u32 2147483647, %v11559_v1 }
 0x665   : > { %7840 = vpow2.f32 %v4869_v43  ;;  %7079 = vmatprep.mubr.bf16.mxu1 %v5217_v37  ;;  %v12926_v40 = vmax.f32 %v11327_v14, 0.0  ;;  %v5051_v5 = vmul.f32 %v11557_v52, %v5050_v41  ;;  %vm11687_vm0 = vcmp.lt.f32.partialorder %v5052_v35, 0.0004427343 }
 0x666   : > { %v5180_v17 = vadd.f32 %v5036_v20, %v12925_v33  ;;  %v5066_v51 = vmul.f32 0.6931472, %v7823_v29  ;;  %v12929_v8 = vmax.f32 %v11352_v56, 0.0  ;;  %v5077_v49 = vadd.f32 1.0, %v5076_v46 }
 0x667   : > { %v11684_v39 = vadd.f32 %v5045_v28, %v12926_v40  ;;  %v5061_v23 = vand.u32 2147483647, %v11575_v48  ;;  %7842 = vlog2.f32 %v5118_v30  ;;  %v5057_v11 = vmul.f32 0.6931472, %v7825_v34 }
 0x668   : > { %v5179_v15 = vadd.f32 %v5027_v60, %v12929_v8  ;;  %v5085_v26 = vmul.f32 -0.5, %v11612_v31  ;;  %v5069_v14 = vmul.f32 %v11559_v1, %v5068_v19  ;;  %7844 = vlog2.f32 %v5109_v55  ;;  %v11696_v38 = vpop.eup %7826 }
 0x669   : > { %v5054_v52 = vsel %vm11687_vm0, %v5051_v5, %v5048_v0  ;;  %v5060_v35 = vmul.f32 %v11575_v48, %v5059_v44  ;;  %vm11701_vm5 = vcmp.lt.f32.partialorder %v5070_v32, 0.0004427343  ;;  %v11705_v7 = vpop.eup %7828  ;;  %v5094_v1 = vmul.f32 -0.5, %v11623_v36 }
 0x66a   : > { %v5219_v12 = vpack.c.bf16 %v5180_v17, %v5179_v15  ;;  %v5072_v28 = vsel %vm11701_vm5, %v5069_v14, %v5066_v51  ;;  %v5103_v18 = vmul.f32 -0.5, %v11659_v57  ;;  %v5218_v37 = vpack.c.bf16 %v11616_v24, %v11601_v53 }
 0x66b   : > { %v11713_v4 = vpop.eup %7830  ;;  %v5079_v48 = vand.u32 2147483647, %v11629_v10  ;;  %vm11716_vm6 = vcmp.lt.f32.partialorder %v5061_v23, 0.0004427343  ;;  %v4740_v20 = vmax.f32 %v11513_v63, 0.0  ;;  %v5127_v16 = vadd.f32 1.0, %v11705_v7 }
 0x66c   : > { %v7833_v3 = vpop.eup %7832  ;;  %v5063_v29 = vsel %vm11716_vm6, %v5060_v35, %v5057_v11  ;;  %v5086_v46 = vadd.f32 1.0, %v5085_v26  ;;  %v5088_v44 = vand.u32 2147483647, %v11612_v31  ;;  %v5154_v53 = vadd.f32 1.0, %v11713_v4  ;;  %7080 = vmatmul.mubr.bf16.gmra.mxu1 %v5218_v37 }
 0x66d   : > { %v7835_v24 = vpop.eup %7834  ;;  %v12934_v30 = vmax.f32 %v11384_v6, 0.0  ;;  %v5078_v60 = vmul.f32 %v11629_v10, %v5077_v49  ;;  %v5184_v63 = vadd.f32 %v5072_v28, %v4736_v62  ;;  %v5145_v19 = vadd.f32 1.0, %v11696_v38  ;;  %7083 = vmatprep.mubr.bf16.mxu1 %v5219_v12 }
 0x66e   : > { %v7837_v55 = vpop.eup %7836  ;;  %v5095_v34 = vadd.f32 1.0, %v5094_v1  ;;  %v5097_v0 = vand.u32 2147483647, %v11623_v36  ;;  %v5104_v33 = vadd.f32 1.0, %v5103_v18  ;;  %7846 = vlog2.f32 %v5127_v16 }
 0x66f   : > { %v5182_v43 = vadd.f32 %v5054_v52, %v12934_v30  ;;  %v5183_v17 = vadd.f32 %v5063_v29, %v4735_v27  ;;  %v5084_v32 = vmul.f32 0.6931472, %v7833_v3  ;;  %v5106_v6 = vand.u32 2147483647, %v11659_v57 }
 0x670   : > { %7848 = vlog2.f32 %v5154_v53  ;;  %v5087_v10 = vmul.f32 %v11612_v31, %v5086_v46  ;;  %vm11737_vm7 = vcmp.lt.f32.partialorder %v5088_v44, 0.0004427343  ;;  %v5112_v62 = vmul.f32 -0.5, %v11651_v61 }
 0x671   : > { %v5093_v40 = vmul.f32 0.6931472, %v7835_v24  ;;  %v7839_v5 = vpop.eup %7838  ;;  %v5075_v2 = vmul.f32 0.6931472, %v7837_v55  ;;  %v5121_v51 = vmul.f32 -0.5, %v11656_v59  ;;  %7850 = vlog2.f32 %v5145_v19  ;;  %v12945_v55 = vld [vmem:[#allocation14_spill] sm:$0xff] }
 0x672   : > { %v5221_v9 = vpack.c.bf16 %v5184_v63, %v5183_v17  ;;  %v11743_v27 = vpop.eup %7840  ;;  %v5220_v8 = vpack.c.bf16 %v5182_v43, %v11684_v39  ;;  %v5096_v15 = vmul.f32 %v11623_v36, %v5095_v34  ;;  %v5102_v31 = vmul.f32 0.6931472, %v7839_v5 }
 0x673   : > { %v5105_v49 = vmul.f32 %v11659_v57, %v5104_v33  ;;  %v5090_v23 = vsel %vm11737_vm7, %v5087_v10, %v5084_v32  ;;  %vm11750_vm8 = vcmp.lt.f32.partialorder %v5097_v0, 0.0004427343  ;;  %vm5107_vm9 = vcmp.lt.f32.partialorder %v5106_v6, 0.0004427343 }
 0x674   : > { %v5136_v26 = vadd.f32 1.0, %v11743_v27  ;;  %v7843_v14 = vpop.eup %7842  ;;  %vm11755_vm10 = vcmp.lt.f32.partialorder %v5079_v48, 0.0004427343  ;;  %v4739_v36 = vmax.f32 %v11456_v47, 0.0  ;;  %v5099_v57 = vsel %vm11750_vm8, %v5096_v15, %v5093_v40  ;;  %7084 = vmatmul.mubr.bf16.gmra.mxu1 %v5220_v8 }
 0x675   : > { %v5108_v39 = vsel %vm5107_vm9, %v5105_v49, %v5102_v31  ;;  %v7845_v35 = vpop.eup %7844  ;;  %v5081_v56 = vsel %vm11755_vm10, %v5078_v60, %v5075_v2  ;;  %v5122_v12 = vadd.f32 1.0, %v5121_v51  ;;  %7087 = vmatprep.mubr.bf16.mxu1 %v5221_v9  ;;  %v4737_v1 = vmax.f32 %v11464_v45, 0.0 }
 0x676   : > { %v5188_v28 = vadd.f32 %v5108_v39, %v4740_v20  ;;  %7852 = vlog2.f32 %v5136_v26  ;;  %v5186_v18 = vadd.f32 %v5090_v23, %v4738_v58  ;;  %v5124_v47 = vand.u32 2147483647, %v11656_v59 }
 0x677   : > { %v5113_v37 = vadd.f32 1.0, %v5112_v62  ;;  %v5187_v48 = vadd.f32 %v5099_v57, %v4739_v36  ;;  %v5120_v41 = vmul.f32 0.6931472, %v7843_v14  ;;  %v5185_v16 = vadd.f32 %v5081_v56, %v4737_v1 }
 0x678   : > { %v5111_v3 = vmul.f32 0.6931472, %v7845_v35  ;;  %v5115_v29 = vand.u32 2147483647, %v11651_v61  ;;  %v5123_v46 = vmul.f32 %v11656_v59, %v5122_v12  ;;  %v5130_v20 = vmul.f32 -0.5, %v11705_v7 }
 0x679   : > { %v5157_v44 = vmul.f32 -0.5, %v11713_v4  ;;  %v5223_v53 = vpack.c.bf16 %v5188_v28, %v5187_v48  ;;  %v5222_v45 = vpack.c.bf16 %v5186_v18, %v5185_v16  ;;  %vm11772_vm11 = vcmp.lt.f32.partialorder %v5124_v47, 0.0004427343 }
 0x67a   : > { %v5148_v58 = vmul.f32 -0.5, %v11696_v38  ;;  %v5114_v30 = vmul.f32 %v11651_v61, %v5113_v37  ;;  %v5126_v43 = vsel %vm11772_vm11, %v5123_v46, %v5120_v41  ;;  %v5139_v59 = vmul.f32 -0.5, %v11743_v27 }
 0x67b   : > { %v7847_v24 = vpop.eup %7846  ;;  %vm11781_vm12 = vcmp.lt.f32.partialorder %v5115_v29, 0.0004427343  ;;  %v4742_v19 = vmax.f32 %v11495_v25, 0.0  ;;  %v4741_v34 = vmax.f32 %v12945_v55, 0.0  ;;  %v5131_v33 = vadd.f32 1.0, %v5130_v20 }
 0x67c   : > { %7088 = vmatmul.mubr.bf16.gmra.mxu1 %v5222_v45  ;;  %v5117_v0 = vsel %vm11781_vm12, %v5114_v30, %v5111_v3  ;;  %v5158_v61 = vadd.f32 1.0, %v5157_v44  ;;  %v5149_v6 = vadd.f32 1.0, %v5148_v58  ;;  %v5133_v10 = vand.u32 2147483647, %v11705_v7 }
 0x67d   : > { %v7849_v60 = vpop.eup %7848  ;;  %7091 = vmatprep.mubr.bf16.mxu1 %v5223_v53  ;;  %v5190_v32 = vadd.f32 %v5126_v43, %v4742_v19  ;;  %v5160_v21 = vand.u32 2147483647, %v11713_v4  ;;  %v5129_v62 = vmul.f32 0.6931472, %v7847_v24  ;;  %v5140_v5 = vadd.f32 1.0, %v5139_v59 }
 0x67e   : > { %v7851_v17 = vpop.eup %7850  ;;  %v5156_v40 = vmul.f32 0.6931472, %v7849_v60  ;;  %v5189_v25 = vadd.f32 %v5117_v0, %v4741_v34  ;;  %v5151_v2 = vand.u32 2147483647, %v11696_v38  ;;  %v5142_v51 = vand.u32 2147483647, %v11743_v27 }
 0x67f   : > { %v5147_v9 = vmul.f32 0.6931472, %v7851_v17  ;;  %v4743_v8 = vmax.f32 %v11590_v54, 0.0  ;;  %v5132_v15 = vmul.f32 %v11705_v7, %v5131_v33  ;;  %v5159_v31 = vmul.f32 %v11713_v4, %v5158_v61 }
 0x680   : > { %v5224_v23 = vpack.c.bf16 %v5190_v32, %v5189_v25  ;;  %v5150_v11 = vmul.f32 %v11696_v38, %v5149_v6  ;;  %vm5134_vm1 = vcmp.lt.f32.partialorder %v5133_v10, 0.0004427343  ;;  %vm5161_vm15 = vcmp.lt.f32.partialorder %v5160_v21, 0.0004427343 }
 0x681   : > { %v5135_v26 = vsel %vm5134_vm1, %v5132_v15, %v5129_v62  ;;  %v5162_v14 = vsel %vm5161_vm15, %v5159_v31, %v5156_v40  ;;  %v5141_v36 = vmul.f32 %v11743_v27, %v5140_v5  ;;  %vm5152_vm3 = vcmp.lt.f32.partialorder %v5151_v2, 0.0004427343 }
 0x682   : > { %v4746_v57 = vmax.f32 %v11594_v50, 0.0  ;;  %v4744_v54 = vmax.f32 %v11634_v42, 0.0  ;;  %vm5143_vm13 = vcmp.lt.f32.partialorder %v5142_v51, 0.0004427343  ;;  %v5153_v7 = vsel %vm5152_vm3, %v5150_v11, %v5147_v9  ;;  %v11804_v50 = vld [vmem:[%s12452_s17] ss:$0 sm:$0xff] }
 0x683   : > { %v7853_v49 = vpop.eup %7852  ;;  %v4745_v39 = vmax.f32 %v11551_v13, 0.0  ;;  %v5191_v35 = vadd.f32 %v5135_v26, %v4743_v8 }
 0x684   : > { %v5138_v52 = vmul.f32 0.6931472, %v7853_v49  ;;  %7092 = vmatmul.mubr.bf16.gmra.mxu1 %v5224_v23  ;;  %v5194_v38 = vadd.f32 %v5162_v14, %v4746_v57 }
 0x685   : > { %v5193_v12 = vadd.f32 %v5153_v7, %v4745_v39 }
 0x686   : > { %v5144_v4 = vsel %vm5143_vm13, %v5141_v36, %v5138_v52 }
 0x687   : > { %v5192_v56 = vadd.f32 %v5144_v4, %v4744_v54  ;;  %v5226_v1 = vpack.c.bf16 %v5194_v38, %v5193_v12 }
 0x689   : > { %v5225_v28 = vpack.c.bf16 %v5192_v56, %v5191_v35 }
 0x68b   : > { %7095 = vmatprep.mubr.bf16.mxu1 %v5225_v28 }
 0x68c   : > { %7096 = vmatmul.mubr.bf16.gmra.mxu1 %v5226_v1 }
 0x6da   : > { %v7069_v42 = vpop.f32.mrf.mxu1 }
 0x6db   : > { %v5325_v27 = vadd.f32 %v7069_v42, %v11804_v50 }
 0x6dc   : > { %v5316_v18 = vpop.f32.mrf.mxu1 }
 0x6dd   : > { %6152 = vrot.lane.b32.xlu0 %v5325_v27, %s8056_s20  ;;  %v11809_v47 = vadd.f32 %v11804_v50, %v5316_v18  ;;  %v5637_v16 = vmul.f32 0.5, %v5325_v27  ;;  %v5445_v60 = vsub.f32 0.0, %v5325_v27 }
 0x6de   : > { %v7070_v13 = vpop.f32.mrf.mxu1 }
 0x6df   : > { %v5328_v37 = vadd.f32 %v7070_v13, %v11804_v50  ;;  %v5671_v3 = vmul.f32 1.442695, %v5637_v16  ;;  %v5635_v20 = vmul.f32 0.5, %v11809_v47  ;;  %v5479_v61 = vmul.f32 1.442695, %v5445_v60 }
 0x6e0   : > { %v5319_v48 = vpop.f32.mrf.mxu1  ;;  %v5443_v15 = vsub.f32 0.0, %v11809_v47 }
 0x6e1   : > { %6148 = vrot.lane.b32.xlu0 %v11809_v47, %s8056_s20  ;;  %6154 = vrot.lane.b32.xlu1 %v5328_v37, %s8056_s20  ;;  %v11816_v41 = vadd.f32 %v11804_v50, %v5319_v48  ;;  %v5638_v29 = vmul.f32 0.5, %v5328_v37  ;;  %7854 = vpow2.f32 %v5671_v3  ;;  %v5667_v58 = vmul.f32 1.442695, %v5635_v20 }
 0x6e2   : > { %v5446_v32 = vsub.f32 0.0, %v5328_v37  ;;  %v5475_v14 = vmul.f32 1.442695, %v5443_v15 }
 0x6e3   : > { %v5673_v53 = vmul.f32 1.442695, %v5638_v29  ;;  %v5636_v30 = vmul.f32 0.5, %v11816_v41  ;;  %v5444_v57 = vsub.f32 0.0, %v11816_v41 }
 0x6e4   : > { %v5481_v5 = vmul.f32 1.442695, %v5446_v32 }
 0x6e5   : > { %6150 = vrot.lane.b32.xlu1 %v11816_v41, %s8056_s20  ;;  %7856 = vpow2.f32 %v5673_v53  ;;  %v5669_v34 = vmul.f32 1.442695, %v5636_v30  ;;  %v5477_v56 = vmul.f32 1.442695, %v5444_v57 }
 0x6e6   : > { %7858 = vpow2.f32 %v5667_v58 }
 0x6e7   : > { %7860 = vpow2.f32 %v5669_v34 }
 0x6e8   : > { %7862 = vpow2.f32 %v5479_v61 }
 0x6ee   : > { %v7855_v21 = vpop.eup %7854 }
 0x6f2   : > { %v7857_v9 = vpop.eup %7856 }
 0x6f3   : > { %v7859_v49 = vpop.eup %7858 }
 0x6f4   : > { %v7861_v7 = vpop.eup %7860 }
 0x6f5   : > { %v7863_v39 = vpop.eup %7862 }
 0x6f6   : > { %v5541_v42 = vadd.f32 1.0, %v7863_v39 }
 0x71b   : > { %v7073_v46 = vpop.f32.mrf.mxu1 }
 0x71c   : > { %v11822_v44 = vadd.f32 %v7073_v46, %v11804_v50 }
 0x71d   : > { %v5332_v45 = vpop.f32.mrf.mxu1 }
 0x71e   : > { %6160 = vrot.lane.b32.xlu0 %v11822_v44, %s8056_s20  ;;  %v11827_v24 = vadd.f32 %v11804_v50, %v5332_v45  ;;  %v5641_v19 = vmul.f32 0.5, %v11822_v44  ;;  %v5449_v27 = vsub.f32 0.0, %v11822_v44 }
 0x71f   : > { %v7074_v22 = vpop.f32.mrf.mxu1 }
 0x720   : > { %v11831_v43 = vadd.f32 %v7074_v22, %v11804_v50  ;;  %v5679_v6 = vmul.f32 1.442695, %v5641_v19  ;;  %v5639_v25 = vmul.f32 0.5, %v11827_v24  ;;  %v5487_v41 = vmul.f32 1.442695, %v5449_v27 }
 0x721   : > { %v5335_v59 = vpop.f32.mrf.mxu1 }
 0x722   : > { %6156 = vrot.lane.b32.xlu0 %v11827_v24, %s8056_s20  ;;  %6162 = vrot.lane.b32.xlu1 %v11831_v43, %s8056_s20  ;;  %v11842_v0 = vadd.f32 %v11804_v50, %v5335_v59  ;;  %v5642_v62 = vmul.f32 0.5, %v11831_v43  ;;  %7864 = vpow2.f32 %v5679_v6  ;;  %v5675_v31 = vmul.f32 1.442695, %v5639_v25 }
 0x723   : > { %7866 = vpow2.f32 %v5481_v5  ;;  %v5450_v20 = vsub.f32 0.0, %v11831_v43 }
 0x724   : > { %v7077_v63 = vpop.f32.mrf.mxu1  ;;  %v5681_v51 = vmul.f32 1.442695, %v5642_v62  ;;  %v5640_v23 = vmul.f32 0.5, %v11842_v0  ;;  %v5448_v25 = vsub.f32 0.0, %v11842_v0 }
 0x725   : > { %v11839_v55 = vadd.f32 %v7077_v63, %v11804_v50  ;;  %v5489_v43 = vmul.f32 1.442695, %v5450_v20 }
 0x726   : > { %v5348_v33 = vpop.f32.mrf.mxu1  ;;  %6158 = vrot.lane.b32.xlu1 %v11842_v0, %s8056_s20  ;;  %7868 = vpow2.f32 %v5681_v51  ;;  %v5677_v54 = vmul.f32 1.442695, %v5640_v23 }
 0x727   : > { %6168 = vrot.lane.b32.xlu0 %v11839_v55, %s8056_s20  ;;  %v11857_v2 = vadd.f32 %v11804_v50, %v5348_v33  ;;  %7870 = vpow2.f32 %v5675_v31  ;;  %v5645_v52 = vmul.f32 0.5, %v11839_v55  ;;  %v5447_v33 = vsub.f32 0.0, %v11827_v24 }
 0x728   : > { %v7078_v17 = vpop.f32.mrf.mxu1  ;;  %7872 = vpow2.f32 %v5475_v14  ;;  %v5485_v31 = vmul.f32 1.442695, %v5448_v25  ;;  %v5453_v14 = vsub.f32 0.0, %v11839_v55 }
 0x729   : > { %v11849_v10 = vadd.f32 %v7078_v17, %v11804_v50  ;;  %v5687_v35 = vmul.f32 1.442695, %v5645_v52  ;;  %7874 = vpow2.f32 %v5677_v54  ;;  %v5643_v16 = vmul.f32 0.5, %v11857_v2 }
 0x72a   : > { %v5351_v40 = vpop.f32.mrf.mxu1  ;;  %v5483_v62 = vmul.f32 1.442695, %v5447_v33  ;;  %v5495_v39 = vmul.f32 1.442695, %v5453_v14 }
 0x72b   : > { %5767 = vrot.lane.b32.xlu0 %v7855_v21, %s8056_s20  ;;  %6170 = vrot.lane.b32.xlu1 %v11849_v10, %s8056_s20  ;;  %v11865_v11 = vadd.f32 %v11804_v50, %v5351_v40  ;;  %v5646_v12 = vmul.f32 0.5, %v11849_v10  ;;  %7876 = vpow2.f32 %v5687_v35  ;;  %v5683_v45 = vmul.f32 1.442695, %v5643_v16 }
 0x72c   : > { %v7081_v8 = vpop.f32.mrf.mxu1  ;;  %7878 = vpow2.f32 %v5477_v56  ;;  %v5454_v56 = vsub.f32 0.0, %v11849_v10  ;;  %v5451_v16 = vsub.f32 0.0, %v11857_v2 }
 0x72d   : > { %v11872_v36 = vadd.f32 %v7081_v8, %v11804_v50  ;;  %v5689_v47 = vmul.f32 1.442695, %v5646_v12  ;;  %7880 = vrcp.f32 %v5541_v42  ;;  %v5644_v59 = vmul.f32 0.5, %v11865_v11 }
 0x72e   : > { %v5364_v26 = vpop.f32.mrf.mxu1 }
 0x72f   : > { %6164 = vrot.lane.b32.xlu0 %v11857_v2, %s8056_s20  ;;  %5769 = vrot.lane.b32.xlu1 %v7857_v9, %s8056_s20  ;;  %v7865_v38 = vpop.eup %7864  ;;  %v11888_v18 = vadd.f32 %v11804_v50, %v5364_v26  ;;  %7882 = vpow2.f32 %v5689_v47  ;;  %v5685_v17 = vmul.f32 1.442695, %v5644_v59  ;;  %v5649_v24 = vmul.f32 0.5, %v11872_v36 }
 0x730   : > { %v7082_v4 = vpop.f32.mrf.mxu1  ;;  %v7867_v13 = vpop.eup %7866  ;;  %7884 = vpow2.f32 %v5487_v41  ;;  %v5497_v47 = vmul.f32 1.442695, %v5454_v56  ;;  %v5457_v59 = vsub.f32 0.0, %v11872_v36 }
 0x731   : > { %v11880_v28 = vadd.f32 %v7082_v4, %v11804_v50  ;;  %v5542_v46 = vadd.f32 1.0, %v7867_v13  ;;  %v5695_v9 = vmul.f32 1.442695, %v5649_v24  ;;  %v5647_v35 = vmul.f32 0.5, %v11888_v18 }
 0x732   : > { %v5367_v1 = vpop.f32.mrf.mxu1 }
 0x733   : > { %5763 = vrot.lane.b32.xlu0 %v7859_v49, %s8056_s20  ;;  %6166 = vrot.lane.b32.xlu1 %v11865_v11, %s8056_s20  ;;  %v7869_v37 = vpop.eup %7868  ;;  %v11901_v44 = vadd.f32 %v11804_v50, %v5367_v1  ;;  %7886 = vrcp.f32 %v5542_v46  ;;  %v5650_v49 = vmul.f32 0.5, %v11880_v28  ;;  %v5691_v42 = vmul.f32 1.442695, %v5647_v35 }
 0x734   : > { %v7085_v48 = vpop.f32.mrf.mxu1  ;;  %v7871_v29 = vpop.eup %7870  ;;  %7888 = vpow2.f32 %v5683_v45 }
 0x735   : > { %v11909_v22 = vadd.f32 %v7085_v48, %v11804_v50  ;;  %v7873_v30 = vpop.eup %7872  ;;  %7890 = vpow2.f32 %v5489_v43  ;;  %v5697_v57 = vmul.f32 1.442695, %v5650_v49 }
 0x736   : > { %v5380_v53 = vpop.f32.mrf.mxu1  ;;  %v7875_v63 = vpop.eup %7874  ;;  %v5539_v34 = vadd.f32 1.0, %v7873_v30  ;;  %v5452_v30 = vsub.f32 0.0, %v11865_v11 }
 0x737   : > { %6176 = vrot.lane.b32.xlu0 %v11872_v36, %s8056_s20  ;;  %5765 = vrot.lane.b32.xlu1 %v7861_v7, %s8056_s20  ;;  %v11936_v8 = vadd.f32 %v11804_v50, %v5380_v53  ;;  %v5491_v53 = vmul.f32 1.442695, %v5451_v16  ;;  %v5653_v45 = vmul.f32 0.5, %v11909_v22 }
 0x738   : > { %v7086_v19 = vpop.f32.mrf.mxu1  ;;  %v7877_v61 = vpop.eup %7876  ;;  %7892 = vrcp.f32 %v5539_v34  ;;  %v5493_v34 = vmul.f32 1.442695, %v5452_v30 }
 0x739   : > { %v11921_v32 = vadd.f32 %v7086_v19, %v11804_v50  ;;  %v7879_v21 = vpop.eup %7878  ;;  %7894 = vpow2.f32 %v5685_v17  ;;  %v5503_v17 = vmul.f32 1.442695, %v5457_v59 }
 0x73a   : > { %v11929_v40 = vpop.eup %7880  ;;  %v5540_v5 = vadd.f32 1.0, %v7879_v21  ;;  %7896 = vpow2.f32 %v5483_v62  ;;  %v5383_v0 = vpop.f32.mrf.mxu1 }
 0x73b   : > { %5775 = vrot.lane.b32.xlu0 %v7865_v38, %s8056_s20  ;;  %6178 = vrot.lane.b32.xlu1 %v11880_v28, %s8056_s20  ;;  %v11947_v54 = vadd.f32 %v11804_v50, %v5383_v0  ;;  %v5654_v33 = vmul.f32 0.5, %v11921_v32  ;;  %v5455_v0 = vsub.f32 0.0, %v11888_v18 }
 0x73c   : > { %v7883_v51 = vpop.eup %7882  ;;  %7898 = vrcp.f32 %v5540_v5  ;;  %v7089_v4 = vpop.f32.mrf.mxu1 }
 0x73d   : > { %v7885_v15 = vpop.eup %7884  ;;  %7900 = vpow2.f32 %v5695_v9  ;;  %v11960_v27 = vadd.f32 %v7089_v4, %v11804_v50  ;;  %v5705_v62 = vmul.f32 1.442695, %v5654_v33  ;;  %v5651_v9 = vmul.f32 0.5, %v11936_v8 }
 0x73e   : > { %v5545_v26 = vadd.f32 1.0, %v7885_v15  ;;  %7902 = vpow2.f32 %v5485_v31  ;;  %v5396_v1 = vpop.f32.mrf.mxu1 }
 0x73f   : > { %6172 = vrot.lane.b32.xlu0 %v11888_v18, %s8056_s20  ;;  %5777 = vrot.lane.b32.xlu1 %v7869_v37, %s8056_s20  ;;  %v5648_v37 = vmul.f32 0.5, %v11901_v44  ;;  %v5456_v18 = vsub.f32 0.0, %v11901_v44 }
 0x740   : > { %v11939_v23 = vpop.eup %7886  ;;  %7904 = vrcp.f32 %v5545_v26  ;;  %v7090_v10 = vpop.f32.mrf.mxu1  ;;  %v5699_v26 = vmul.f32 1.442695, %v5651_v9 }
 0x741   : > { %v7889_v52 = vpop.eup %7888  ;;  %7906 = vpow2.f32 %v5697_v57  ;;  %v11971_v46 = vadd.f32 %v7090_v10, %v11804_v50  ;;  %v5652_v57 = vmul.f32 0.5, %v11947_v54 }
 0x742   : > { %v7891_v7 = vpop.eup %7890  ;;  %7908 = vpow2.f32 %v5495_v39  ;;  %v5499_v39 = vmul.f32 1.442695, %v5455_v0 }
 0x743   : > { %5771 = vrot.lane.b32.xlu0 %v7871_v29, %s8056_s20  ;;  %6174 = vrot.lane.b32.xlu1 %v11901_v44, %s8056_s20  ;;  %v5546_v55 = vadd.f32 1.0, %v7891_v7  ;;  %v5693_v29 = vmul.f32 1.442695, %v5648_v37  ;;  %v5658_v16 = vmul.f32 0.5, %v11971_v46 }
 0x745   : > { %v11953_v38 = vpop.eup %7892  ;;  %7910 = vrcp.f32 %v5546_v55  ;;  %v5657_v55 = vmul.f32 0.5, %v11960_v27 }
 0x746   : > { %v7895_v12 = vpop.eup %7894  ;;  %7912 = vpow2.f32 %v5691_v42 }
 0x747   : > { %6184 = vrot.lane.b32.xlu0 %v11909_v22, %s8056_s20  ;;  %5773 = vrot.lane.b32.xlu1 %v7875_v63, %s8056_s20  ;;  %v7897_v13 = vpop.eup %7896  ;;  %7914 = vpow2.f32 %v5497_v47  ;;  %v11985_v63 = vadd.f32 %v11804_v50, %v5396_v1  ;;  %v5461_v47 = vsub.f32 0.0, %v11909_v22  ;;  %v5711_v37 = vmul.f32 1.442695, %v5657_v55 }
 0x748   : > { %v5543_v41 = vadd.f32 1.0, %v7897_v13  ;;  %v5501_v13 = vmul.f32 1.442695, %v5456_v18 }
 0x749   : > { %v11963_v48 = vpop.eup %7898 }
 0x74a   : > { %7916 = vrcp.f32 %v5543_v41 }
 0x74b   : > { %5783 = vrot.lane.b32.xlu0 %v7877_v61, %s8056_s20  ;;  %6186 = vrot.lane.b32.xlu1 %v11921_v32, %s8056_s20  ;;  %7918 = vpow2.f32 %v5693_v29  ;;  %v5399_v61 = vpop.f32.mrf.mxu1  ;;  %v5511_v29 = vmul.f32 1.442695, %v5461_v47 }
 0x74c   : > { %7920 = vpow2.f32 %v5491_v53  ;;  %v11996_v24 = vadd.f32 %v11804_v50, %v5399_v61 }
 0x74d   : > { %v7093_v25 = vpop.f32.mrf.mxu1 }
 0x74e   : > { %v12009_v14 = vadd.f32 %v7093_v25, %v11804_v50  ;;  %v5465_v25 = vsub.f32 0.0, %v11960_v27 }
 0x74f   : > { %v6153_v3 = vpop.permute.xlu0 %6152  ;;  %6024 = vrot.lane.b32.xlu0 %v11929_v40, %s8056_s20  ;;  %5785 = vrot.lane.b32.xlu1 %v7883_v51, %s8056_s20  ;;  %v5412_v49 = vpop.f32.mrf.mxu1 }
 0x750   : > { %6281 = vst.msk [vmem:[%s11893_s23 + $0x28] sm:$0xff] %vm1038_vm2, %v6153_v3  ;;  %v7901_v3 = vpop.eup %7900  ;;  %v12035_v53 = vadd.f32 %v11804_v50, %v5412_v49 }
 0x751   : > { %v7903_v20 = vpop.eup %7902  ;;  %v7094_v4 = vpop.f32.mrf.mxu1 }
 0x752   : > { %v5544_v2 = vadd.f32 1.0, %v7903_v20  ;;  %v12021_v1 = vadd.f32 %v7094_v4, %v11804_v50  ;;  %v5462_v20 = vsub.f32 0.0, %v11921_v32  ;;  %v5659_v47 = vmul.f32 0.5, %v12035_v53 }
 0x753   : > { %v6149_v58 = vpop.permute.xlu0 %6148  ;;  %v6155_v60 = vpop.permute.xlu1 %6154  ;;  %6180 = vrot.lane.b32.xlu0 %v11936_v8, %s8056_s20  ;;  %6026 = vrot.lane.b32.xlu1 %v11939_v23, %s8056_s20 }
 0x754   : > { %6277 = vst.msk [vmem:[%s11893_s23 + $0x8] sm:$0xff] %vm1038_vm2, %v6149_v58  ;;  %6283 = vst.msk [vmem:[%s11893_s23 + $0x38] sm:$0xff] %vm1038_vm2, %v6155_v60  ;;  %v11977_v58 = vpop.eup %7904  ;;  %v5703_v60 = vmul.f32 1.442695, %v5653_v45  ;;  %7922 = vrcp.f32 %v5544_v2  ;;  %v5713_v2 = vmul.f32 1.442695, %v5658_v16  ;;  %v5415_v59 = vpop.f32.mrf.mxu1 }
 0x755   : > { %v7907_v43 = vpop.eup %7906  ;;  %v5513_v32 = vmul.f32 1.442695, %v5462_v20  ;;  %v12046_v33 = vadd.f32 %v11804_v50, %v5415_v59  ;;  %v5662_v55 = vmul.f32 0.5, %v12021_v1 }
 0x756   : > { %v7909_v19 = vpop.eup %7908  ;;  %7924 = vpow2.f32 %v5703_v60  ;;  %v5655_v60 = vmul.f32 0.5, %v11985_v63 }
 0x757   : > { %v6151_v6 = vpop.permute.xlu1 %6150  ;;  %5779 = vrot.lane.b32.xlu0 %v7889_v52, %s8056_s20  ;;  %6182 = vrot.lane.b32.xlu1 %v11947_v54, %s8056_s20  ;;  %v11988_v11 = vpop.eup %7910  ;;  %v5549_v36 = vadd.f32 1.0, %v7909_v19  ;;  %7926 = vpow2.f32 %v5493_v34  ;;  %v5721_v16 = vmul.f32 1.442695, %v5662_v55 }
 0x758   : > { %6279 = vst.msk [vmem:[%s11893_s23 + $0x18] sm:$0xff] %vm1038_vm2, %v6151_v6  ;;  %v5458_v6 = vsub.f32 0.0, %v11880_v28  ;;  %v7913_v21 = vpop.eup %7912  ;;  %7928 = vpow2.f32 %v5503_v17 }
 0x759   : > { %v7915_v5 = vpop.eup %7914  ;;  %7930 = vrcp.f32 %v5549_v36  ;;  %v5707_v36 = vmul.f32 1.442695, %v5655_v60 }
 0x75a   : > { %v5505_v51 = vmul.f32 1.442695, %v5458_v6  ;;  %v12002_v28 = vpop.eup %7916  ;;  %v5550_v15 = vadd.f32 1.0, %v7915_v5  ;;  %7932 = vpow2.f32 %v5705_v62 }
 0x75b   : > { %6020 = vrot.lane.b32.xlu0 %v11953_v38, %s8056_s20  ;;  %5781 = vrot.lane.b32.xlu1 %v7895_v12, %s8056_s20  ;;  %v7919_v31 = vpop.eup %7918  ;;  %v5701_v12 = vmul.f32 1.442695, %v5652_v57 }
 0x75c   : > { %7934 = vpow2.f32 %v5505_v51  ;;  %v7921_v52 = vpop.eup %7920  ;;  %v7097_v51 = vpop.f32.mrf.mxu1 }
 0x75d   : > { %7936 = vrcp.f32 %v5550_v15  ;;  %v5547_v35 = vadd.f32 1.0, %v7921_v52  ;;  %v5661_v15 = vmul.f32 0.5, %v12009_v14  ;;  %v12092_v59 = vadd.f32 %v7097_v51, %v11804_v50 }
 0x75e   : > { %7938 = vpow2.f32 %v5699_v26  ;;  %v5519_v26 = vmul.f32 1.442695, %v5465_v25  ;;  %v5428_v52 = vpop.f32.mrf.mxu1  ;;  %v5470_v51 = vsub.f32 0.0, %v12021_v1 }
 0x75f   : > { %6192 = vrot.lane.b32.xlu0 %v11960_v27, %s8056_s20  ;;  %6022 = vrot.lane.b32.xlu1 %v11963_v48, %s8056_s20  ;;  %7940 = vpow2.f32 %v5499_v39  ;;  %v5466_v27 = vsub.f32 0.0, %v11971_v46  ;;  %v5719_v4 = vmul.f32 1.442695, %v5661_v15 }
 0x760   : > { %7942 = vrcp.f32 %v5547_v35 }
 0x761   : > { %v12012_v7 = vpop.eup %7922  ;;  %7944 = vpow2.f32 %v5701_v12  ;;  %v7098_v12 = vpop.f32.mrf.mxu1 }
 0x762   : > { %7946 = vpow2.f32 %v5501_v13 }
 0x763   : > { %5791 = vrot.lane.b32.xlu0 %v7901_v3, %s8056_s20  ;;  %6194 = vrot.lane.b32.xlu1 %v11971_v46, %s8056_s20  ;;  %v7925_v56 = vpop.eup %7924  ;;  %7948 = vpow2.f32 %v5711_v37  ;;  %v5521_v46 = vmul.f32 1.442695, %v5466_v27  ;;  %v5468_v27 = vsub.f32 0.0, %v12046_v33 }
 0x764   : > { %v7927_v42 = vpop.eup %7926 }
 0x765   : > { %v7929_v44 = vpop.eup %7928  ;;  %v5548_v41 = vadd.f32 1.0, %v7927_v42  ;;  %v5463_v42 = vsub.f32 0.0, %v11985_v63 }
 0x766   : > { %v12027_v10 = vpop.eup %7930  ;;  %v5553_v22 = vadd.f32 1.0, %v7929_v44  ;;  %v12077_v44 = vadd.f32 %v11804_v50, %v5428_v52 }
 0x767   : > { %6032 = vrot.lane.b32.xlu0 %v11977_v58, %s8056_s20  ;;  %5793 = vrot.lane.b32.xlu1 %v7907_v43, %s8056_s20  ;;  %v7933_v3 = vpop.eup %7932  ;;  %7950 = vrcp.f32 %v5548_v41  ;;  %v5459_v43 = vsub.f32 0.0, %v11936_v8  ;;  %v5460_v8 = vsub.f32 0.0, %v11947_v54  ;;  %v5515_v20 = vmul.f32 1.442695, %v5463_v42 }
 0x768   : > { %7952 = vpow2.f32 %v5511_v29 }
 0x769   : > { %v7935_v45 = vpop.eup %7934  ;;  %7954 = vrcp.f32 %v5553_v22  ;;  %v5507_v61 = vmul.f32 1.442695, %v5459_v43  ;;  %v5509_v5 = vmul.f32 1.442695, %v5460_v8  ;;  %v5715_v43 = vmul.f32 1.442695, %v5659_v47 }
 0x76a   : > { %v12037_v30 = vpop.eup %7936  ;;  %v5554_v34 = vadd.f32 1.0, %v7935_v45  ;;  %7956 = vpow2.f32 %v5713_v2  ;;  %v5464_v45 = vsub.f32 0.0, %v11996_v24  ;;  %v5469_v2 = vsub.f32 0.0, %v12009_v14 }
 0x76b   : > { %6188 = vrot.lane.b32.xlu0 %v11985_v63, %s8056_s20  ;;  %6034 = vrot.lane.b32.xlu1 %v11988_v11, %s8056_s20  ;;  %v7939_v19 = vpop.eup %7938  ;;  %7958 = vpow2.f32 %v5513_v32  ;;  %v5431_v63 = vpop.f32.mrf.mxu1 }
 0x76c   : > { %v7941_v17 = vpop.eup %7940  ;;  %7960 = vrcp.f32 %v5554_v34  ;;  %v5660_v34 = vmul.f32 0.5, %v12046_v33 }
 0x76d   : > { %v12052_v6 = vpop.eup %7942  ;;  %7962 = vpow2.f32 %v5507_v61  ;;  %v5551_v9 = vadd.f32 1.0, %v7941_v17  ;;  %v12096_v61 = vadd.f32 %v11804_v50, %v5431_v63  ;;  %v5517_v17 = vmul.f32 1.442695, %v5464_v45 }
 0x76e   : > { %v7945_v62 = vpop.eup %7944  ;;  %7964 = vpow2.f32 %v5707_v36  ;;  %v5467_v36 = vsub.f32 0.0, %v12035_v53 }
 0x76f   : > { %5787 = vrot.lane.b32.xlu0 %v7913_v21, %s8056_s20  ;;  %6190 = vrot.lane.b32.xlu1 %v11996_v24, %s8056_s20  ;;  %v5656_v21 = vmul.f32 0.5, %v11996_v24  ;;  %v7947_v54 = vpop.eup %7946  ;;  %7966 = vpow2.f32 %v5509_v5 }
 0x770   : > { %7968 = vrcp.f32 %v5551_v9  ;;  %v5552_v35 = vadd.f32 1.0, %v7947_v54  ;;  %v5717_v54 = vmul.f32 1.442695, %v5660_v34  ;;  %v12113_v9 = vadd.f32 %v7098_v12, %v11804_v50 }
 0x771   : > { %v5709_v49 = vmul.f32 1.442695, %v5656_v21  ;;  %v5527_v21 = vmul.f32 1.442695, %v5469_v2  ;;  %v5473_v50 = vsub.f32 0.0, %v12092_v59  ;;  %v5471_v12 = vsub.f32 0.0, %v12077_v44 }
 0x772   : > { %v5472_v2 = vsub.f32 0.0, %v12096_v61 }
 0x773   : > { %6028 = vrot.lane.b32.xlu0 %v12002_v28, %s8056_s20  ;;  %5789 = vrot.lane.b32.xlu1 %v7919_v31, %s8056_s20  ;;  %v7949_v31 = vpop.eup %7948  ;;  %7970 = vpow2.f32 %v5709_v49  ;;  %v5535_v42 = vmul.f32 1.442695, %v5473_v50 }
 0x774   : > { %v12060_v0 = vpop.eup %7950  ;;  %7972 = vpow2.f32 %v5519_v26  ;;  %v5523_v26 = vmul.f32 1.442695, %v5467_v36 }
 0x775   : > { %v7953_v57 = vpop.eup %7952  ;;  %7974 = vpow2.f32 %v5719_v4  ;;  %v5529_v4 = vmul.f32 1.442695, %v5470_v51 }
 0x776   : > { %v12066_v18 = vpop.eup %7954  ;;  %v5557_v13 = vadd.f32 1.0, %v7953_v57  ;;  %7976 = vrcp.f32 %v5552_v35 }
 0x777   : > { %6200 = vrot.lane.b32.xlu0 %v12009_v14, %s8056_s20  ;;  %6030 = vrot.lane.b32.xlu1 %v12012_v7, %s8056_s20  ;;  %7978 = vpow2.f32 %v5521_v46  ;;  %v5525_v46 = vmul.f32 1.442695, %v5468_v27 }
 0x778   : > { %7980 = vrcp.f32 %v5557_v13  ;;  %v5663_v13 = vmul.f32 0.5, %v12077_v44 }
 0x779   : > { %7982 = vpow2.f32 %v5721_v16 }
 0x77a   : > { %7984 = vpow2.f32 %v5515_v20  ;;  %v5723_v45 = vmul.f32 1.442695, %v5663_v13 }
 0x77b   : > { %5799 = vrot.lane.b32.xlu0 %v7925_v56, %s8056_s20  ;;  %6202 = vrot.lane.b32.xlu1 %v12021_v1, %s8056_s20  ;;  %v7957_v56 = vpop.eup %7956  ;;  %7986 = vpow2.f32 %v5715_v43 }
 0x77c   : > { %v7959_v41 = vpop.eup %7958 }
 0x77d   : > { %v12081_v29 = vpop.eup %7960 }
 0x77e   : > { %v7963_v22 = vpop.eup %7962 }
 0x77f   : > { %6040 = vrot.lane.b32.xlu0 %v12027_v10, %s8056_s20  ;;  %5801 = vrot.lane.b32.xlu1 %v7933_v3, %s8056_s20  ;;  %v7965_v60 = vpop.eup %7964  ;;  %v5555_v8 = vadd.f32 1.0, %v7963_v22 }
 0x780   : > { %v7967_v14 = vpop.eup %7966 }
 0x781   : > { %v12109_v25 = vpop.eup %7968 }
 0x783   : > { %6196 = vrot.lane.b32.xlu0 %v12035_v53, %s8056_s20  ;;  %6042 = vrot.lane.b32.xlu1 %v12037_v30, %s8056_s20  ;;  %v7971_v53 = vpop.eup %7970 }
 0x784   : > { %v7973_v49 = vpop.eup %7972 }
 0x785   : > { %v7975_v57 = vpop.eup %7974 }
 0x786   : > { %v12127_v55 = vpop.eup %7976 }
 0x787   : > { %5795 = vrot.lane.b32.xlu0 %v7939_v19, %s8056_s20  ;;  %6198 = vrot.lane.b32.xlu1 %v12046_v33, %s8056_s20  ;;  %v5558_v19 = vadd.f32 1.0, %v7959_v41  ;;  %v5561_v33 = vadd.f32 1.0, %v7973_v49  ;;  %v5474_v41 = vsub.f32 0.0, %v12113_v9 }
 0x789   : > { %7988 = vrcp.f32 %v5558_v19  ;;  %v5664_v19 = vmul.f32 0.5, %v12096_v61 }
 0x78a   : > { %7990 = vrcp.f32 %v5555_v8 }
 0x78b   : > { %6036 = vrot.lane.b32.xlu0 %v12052_v6, %s8056_s20  ;;  %5797 = vrot.lane.b32.xlu1 %v7945_v62, %s8056_s20  ;;  %v5665_v62 = vmul.f32 0.5, %v12092_v59  ;;  %7992 = vpow2.f32 %v5517_v17 }
 0x78c   : > { %7994 = vpow2.f32 %v5527_v21 }
 0x78d   : > { %v5727_v1 = vmul.f32 1.442695, %v5665_v62  ;;  %7996 = vpow2.f32 %v5717_v54  ;;  %v5725_v62 = vmul.f32 1.442695, %v5664_v19 }
 0x78f   : > { %5807 = vrot.lane.b32.xlu0 %v7949_v31, %s8056_s20  ;;  %6038 = vrot.lane.b32.xlu1 %v12060_v0, %s8056_s20  ;;  %v5556_v31 = vadd.f32 1.0, %v7967_v14 }
 0x790   : > { %v6161_v39 = vpop.permute.xlu0 %6160 }
 0x791   : > { %6289 = vst.msk [vmem:[%s11893_s23 + $0x68] sm:$0xff] %vm1038_vm2, %v6161_v39  ;;  %v5666_v39 = vmul.f32 0.5, %v12113_v9  ;;  %7998 = vrcp.f32 %v5556_v31 }
 0x792   : > { %8000 = vpow2.f32 %v5523_v26 }
 0x793   : > { %6048 = vrot.lane.b32.xlu0 %v12066_v18, %s8056_s20  ;;  %5809 = vrot.lane.b32.xlu1 %v7957_v56, %s8056_s20  ;;  %v7979_v56 = vpop.eup %7978  ;;  %8002 = vpow2.f32 %v5727_v1  ;;  %v5729_v16 = vmul.f32 1.442695, %v5666_v39 }
 0x794   : > { %v6157_v37 = vpop.permute.xlu0 %6156  ;;  %v6163_v3 = vpop.permute.xlu1 %6162  ;;  %8004 = vpow2.f32 %v5529_v4  ;;  %v5562_v22 = vadd.f32 1.0, %v7979_v56 }
 0x795   : > { %6285 = vst.msk [vmem:[%s11893_s23 + $0x48] sm:$0xff] %vm1038_vm2, %v6157_v37  ;;  %6291 = vst.msk [vmem:[%s11893_s23 + $0x78] sm:$0xff] %vm1038_vm2, %v6163_v3  ;;  %v12136_v37 = vpop.eup %7980  ;;  %8006 = vrcp.f32 %v5561_v33 }
 0x796   : > { %v7983_v63 = vpop.eup %7982  ;;  %8008 = vpow2.f32 %v5525_v46 }
 0x797   : > { %6204 = vrot.lane.b32.xlu0 %v12077_v44, %s8056_s20  ;;  %6050 = vrot.lane.b32.xlu1 %v12081_v29, %s8056_s20  ;;  %v5531_v44 = vmul.f32 1.442695, %v5471_v12  ;;  %v7985_v20 = vpop.eup %7984  ;;  %8010 = vpow2.f32 %v5535_v42 }
 0x798   : > { %v6159_v24 = vpop.permute.xlu1 %6158  ;;  %8012 = vpow2.f32 %v5729_v16  ;;  %v5559_v14 = vadd.f32 1.0, %v7985_v20  ;;  %v5605_v16 = vld [vmem:[%s12181_s3 + $0x10] sm:$0xff] }
 0x799   : > { %v6169_v32 = vpop.permute.xlu0 %6168  ;;  %6287 = vst.msk [vmem:[%s11893_s23 + $0x58] sm:$0xff] %vm1038_vm2, %v6159_v24  ;;  %8014 = vrcp.f32 %v5562_v22 }
 0x79a   : > { %6297 = vst.msk [vmem:[%s11893_s23 + $0xa8] sm:$0xff] %vm1038_vm2, %v6169_v32  ;;  %v7987_v32 = vpop.eup %7986  ;;  %8016 = vpow2.f32 %v5531_v44 }
 0x79b   : > { %5803 = vrot.lane.b32.xlu0 %v7965_v60, %s8056_s20  ;;  %6206 = vrot.lane.b32.xlu1 %v12096_v61, %s8056_s20  ;;  %v5537_v60 = vmul.f32 1.442695, %v5474_v41  ;;  %v12150_v24 = vpop.eup %7988  ;;  %8018 = vpow2.f32 %v5723_v45  ;;  %v5533_v61 = vmul.f32 1.442695, %v5472_v2 }
 0x79c   : > { %v12153_v8 = vpop.eup %7990 }
 0x79d   : > { %v12107_v5 = vpop.permute.xlu0 %5767  ;;  %v6171_v15 = vpop.permute.xlu1 %6170  ;;  %8020 = vpow2.f32 %v5537_v60 }
 0x79e   : > { %6299 = vst.msk [vmem:[%s11893_s23 + $0xb8] sm:$0xff] %vm1038_vm2, %v6171_v15  ;;  %v7993_v17 = vpop.eup %7992  ;;  %8022 = vrcp.f32 %v5559_v14  ;;  %v5861_v45 = vmul.f32 %v12107_v5, %v5605_v16  ;;  %v5606_v14 = vld [vmem:[%s12181_s3 + $0x18] sm:$0xff] }
 0x79f   : > { %6044 = vrot.lane.b32.xlu0 %v12109_v25, %s8056_s20  ;;  %5805 = vrot.lane.b32.xlu1 %v7971_v53, %s8056_s20  ;;  %v7995_v21 = vpop.eup %7994  ;;  %8024 = vpow2.f32 %v5533_v61  ;;  %v5560_v27 = vadd.f32 1.0, %v7993_v17 }
 0x7a0   : > { %v7997_v54 = vpop.eup %7996  ;;  %v5565_v31 = vadd.f32 1.0, %v7995_v21  ;;  %8026 = vpow2.f32 %v5725_v62  ;;  %v5893_v5 = vadd.f32 %v11929_v40, %v5861_v45 }
 0x7a1   : > { %v6165_v52 = vpop.permute.xlu0 %6164  ;;  %v12123_v35 = vpop.permute.xlu1 %5769 }
 0x7a2   : > { %6293 = vst.msk [vmem:[%s11893_s23 + $0x88] sm:$0xff] %vm1038_vm2, %v6165_v52  ;;  %v12163_v15 = vpop.eup %7998  ;;  %8028 = vrcp.f32 %v5565_v31  ;;  %v5862_v21 = vmul.f32 %v12123_v35, %v5606_v14  ;;  %v5603_v35 = vld [vmem:[%s12181_s3] sm:$0xff] }
 0x7a3   : > { %5815 = vrot.lane.b32.xlu0 %v7975_v57, %s8056_s20  ;;  %6046 = vrot.lane.b32.xlu1 %v12127_v55, %s8056_s20  ;;  %v8001_v53 = vpop.eup %8000  ;;  %8030 = vrcp.f32 %v5560_v27 }
 0x7a4   : > { %v8003_v26 = vpop.eup %8002  ;;  %v5563_v4 = vadd.f32 1.0, %v8001_v53  ;;  %v5894_v40 = vadd.f32 %v11939_v23, %v5862_v21 }
 0x7a5   : > { %v12134_v47 = vpop.permute.xlu0 %5763  ;;  %v6167_v3 = vpop.permute.xlu1 %6166 }
 0x7a6   : > { %6295 = vst.msk [vmem:[%s11893_s23 + $0x98] sm:$0xff] %vm1038_vm2, %v6167_v3  ;;  %v8005_v1 = vpop.eup %8004  ;;  %8032 = vrcp.f32 %v5563_v4 }
 0x7a7   : > { %6056 = vrot.lane.b32.xlu0 %v12136_v37, %s8056_s20  ;;  %5817 = vrot.lane.b32.xlu1 %v7983_v63, %s8056_s20  ;;  %v12171_v52 = vpop.eup %8006  ;;  %v5566_v56 = vadd.f32 1.0, %v8005_v1 }
 0x7a8   : > { %v8009_v57 = vpop.eup %8008 }
 0x7a9   : > { %v6177_v43 = vpop.permute.xlu0 %6176  ;;  %v12146_v34 = vpop.permute.xlu1 %5765  ;;  %8034 = vrcp.f32 %v5566_v56  ;;  %v5564_v22 = vadd.f32 1.0, %v8009_v57 }
 0x7aa   : > { %6305 = vst.msk [vmem:[%s11893_s23 + $0xe8] sm:$0xff] %vm1038_vm2, %v6177_v43  ;;  %v8011_v33 = vpop.eup %8010 }
 0x7ab   : > { %5811 = vrot.lane.b32.xlu0 %v7987_v32, %s8056_s20  ;;  %6058 = vrot.lane.b32.xlu1 %v12150_v24, %s8056_s20  ;;  %v8013_v12 = vpop.eup %8012  ;;  %v5569_v41 = vadd.f32 1.0, %v8011_v33  ;;  %v5859_v33 = vmul.f32 %v12134_v47, %v5603_v35 }
 0x7ac   : > { %v12187_v42 = vpop.eup %8014 }
 0x7ad   : > { %v12157_v36 = vpop.permute.xlu0 %5775  ;;  %v6179_v51 = vpop.permute.xlu1 %6178  ;;  %8036 = vrcp.f32 %v5569_v41  ;;  %v5891_v47 = vadd.f32 %v11953_v38, %v5859_v33 }
 0x7ae   : > { %6307 = vst.msk [vmem:[%s11893_s23 + $0xf8] sm:$0xff] %vm1038_vm2, %v6179_v51  ;;  %v8017_v13 = vpop.eup %8016  ;;  %8038 = vrcp.f32 %v5564_v22 }
 0x7af   : > { %6052 = vrot.lane.b32.xlu0 %v12153_v8, %s8056_s20  ;;  %5813 = vrot.lane.b32.xlu1 %v7997_v54, %s8056_s20  ;;  %v8019_v63 = vpop.eup %8018  ;;  %v5567_v43 = vadd.f32 1.0, %v8017_v13 }
 0x7b0   : > { %v8021_v20 = vpop.eup %8020 }
 0x7b1   : > { %v6173_v49 = vpop.permute.xlu0 %6172  ;;  %v12166_v50 = vpop.permute.xlu1 %5777  ;;  %v5570_v19 = vadd.f32 1.0, %v8021_v20  ;;  %8040 = vrcp.f32 %v5567_v43 }
 0x7b2   : > { %6301 = vst.msk [vmem:[%s11893_s23 + $0xc8] sm:$0xff] %vm1038_vm2, %v6173_v49  ;;  %v12199_v2 = vpop.eup %8022 }
 0x7b3   : > { %5823 = vrot.lane.b32.xlu0 %v8003_v26, %s8056_s20  ;;  %6054 = vrot.lane.b32.xlu1 %v12163_v15, %s8056_s20  ;;  %v8025_v60 = vpop.eup %8024  ;;  %8042 = vrcp.f32 %v5570_v19 }
 0x7b4   : > { %v8027_v61 = vpop.eup %8026  ;;  %v5568_v54 = vadd.f32 1.0, %v8025_v60 }
 0x7b5   : > { %v12175_v39 = vpop.permute.xlu0 %5771  ;;  %v6175_v46 = vpop.permute.xlu1 %6174 }
 0x7b6   : > { %6303 = vst.msk [vmem:[%s11893_s23 + $0xd8] sm:$0xff] %vm1038_vm2, %v6175_v46  ;;  %v12211_v51 = vpop.eup %8028  ;;  %8044 = vrcp.f32 %v5568_v54  ;;  %v5604_v46 = vld [vmem:[%s12181_s3 + $0x8] sm:$0xff] }
 0x7b7   : > { %6064 = vrot.lane.b32.xlu0 %v12171_v52, %s8056_s20  ;;  %5825 = vrot.lane.b32.xlu1 %v8013_v12, %s8056_s20  ;;  %v12216_v49 = vpop.eup %8030  ;;  %v5860_v41 = vmul.f32 %v12146_v34, %v5604_v46  ;;  %v5609_v34 = vld [vmem:[%s12181_s3 + $0x30] sm:$0xff] }
 0x7b8   : > { %v12225_v27 = vpop.eup %8032  ;;  %v5865_v14 = vmul.f32 %v12157_v36, %v5609_v34 }
 0x7b9   : > { %v6185_v3 = vpop.permute.xlu0 %6184  ;;  %v12191_v44 = vpop.permute.xlu1 %5773  ;;  %v5892_v38 = vadd.f32 %v11963_v48, %v5860_v41 }
 0x7ba   : > { %6313 = vst.msk [vmem:[%s11893_s23 + $0x128] sm:$0xff] %vm1038_vm2, %v6185_v3  ;;  %v12229_v57 = vpop.eup %8034 }
 0x7bb   : > { %5819 = vrot.lane.b32.xlu0 %v8019_v63, %s8056_s20  ;;  %6066 = vrot.lane.b32.xlu1 %v12187_v42, %s8056_s20  ;;  %v12240_v56 = vpop.eup %8036 }
 0x7bc   : > { %v12243_v13 = vpop.eup %8038 }
 0x7bd   : > { %v12201_v32 = vpop.permute.xlu0 %5783  ;;  %v6187_v17 = vpop.permute.xlu1 %6186 }
 0x7be   : > { %6315 = vst.msk [vmem:[%s11893_s23 + $0x138] sm:$0xff] %vm1038_vm2, %v6187_v17  ;;  %v12253_v3 = vpop.eup %8040  ;;  %v5610_v17 = vld [vmem:[%s12181_s3 + $0x38] sm:$0xff] }
 0x7bf   : > { %6060 = vrot.lane.b32.xlu0 %v12199_v2, %s8056_s20  ;;  %5821 = vrot.lane.b32.xlu1 %v8027_v61, %s8056_s20 }
 0x7c0   : > { %v12258_v20 = vpop.eup %8042 }
 0x7c1   : > { %v6025_v62 = vpop.permute.xlu0 %6024  ;;  %v12213_v53 = vpop.permute.xlu1 %5785 }
 0x7c2   : > { %v6246_v31 = vsel %vm1038_vm2, %v5893_v5, %v6025_v62  ;;  %v5897_v5 = vadd.f32 %v11977_v58, %v5865_v14 }
 0x7c3   : > { %6280 = vst [vmem:[%s11893_s23 + $0x20] sm:$0xff] %v6246_v31  ;;  %6072 = vrot.lane.b32.xlu0 %v12211_v51, %s8056_s20  ;;  %6062 = vrot.lane.b32.xlu1 %v12216_v49, %s8056_s20  ;;  %v12269_v60 = vpop.eup %8044  ;;  %v5607_v31 = vld [vmem:[%s12181_s3 + $0x20] sm:$0xff] }
 0x7c5   : > { %v6181_v26 = vpop.permute.xlu0 %6180  ;;  %v6027_v1 = vpop.permute.xlu1 %6026 }
 0x7c6   : > { %6309 = vst.msk [vmem:[%s11893_s23 + $0x108] sm:$0xff] %vm1038_vm2, %v6181_v26  ;;  %v6247_v4 = vsel %vm1038_vm2, %v5894_v40, %v6027_v1  ;;  %v5608_v26 = vld [vmem:[%s12181_s3 + $0x28] sm:$0xff] }
 0x7c7   : > { %6068 = vrot.lane.b32.xlu0 %v12225_v27, %s8056_s20  ;;  %6282 = vst [vmem:[%s11893_s23 + $0x30] sm:$0xff] %v6247_v4  ;;  %6074 = vrot.lane.b32.xlu1 %v12229_v57, %s8056_s20  ;;  %v5864_v4 = vmul.f32 %v12191_v44, %v5608_v26 }
 0x7c9   : > { %v12238_v23 = vpop.permute.xlu0 %5779  ;;  %v6183_v12 = vpop.permute.xlu1 %6182 }
 0x7ca   : > { %6311 = vst.msk [vmem:[%s11893_s23 + $0x118] sm:$0xff] %vm1038_vm2, %v6183_v12  ;;  %v5896_v12 = vadd.f32 %v12012_v7, %v5864_v4 }
 0x7cb   : > { %6080 = vrot.lane.b32.xlu0 %v12240_v56, %s8056_s20  ;;  %6070 = vrot.lane.b32.xlu1 %v12243_v13, %s8056_s20 }
 0x7cd   : > { %v6021_v16 = vpop.permute.xlu0 %6020  ;;  %v12255_v63 = vpop.permute.xlu1 %5781 }
 0x7ce   : > { %v6244_v22 = vsel %vm1038_vm2, %v5891_v47, %v6021_v16  ;;  %v5613_v47 = vld [vmem:[%s12181_s3 + $0x50] sm:$0xff] }
 0x7cf   : > { %6276 = vst [vmem:[%s11893_s23] sm:$0xff] %v6244_v22  ;;  %6076 = vrot.lane.b32.xlu0 %v12253_v3, %s8056_s20  ;;  %6082 = vrot.lane.b32.xlu1 %v12258_v20, %s8056_s20  ;;  %v5869_v44 = vmul.f32 %v12201_v32, %v5613_v47 }
 0x7d1   : > { %v6193_v45 = vpop.permute.xlu0 %6192  ;;  %v6023_v43 = vpop.permute.xlu1 %6022  ;;  %v5901_v7 = vadd.f32 %v12027_v10, %v5869_v44 }
 0x7d2   : > { %6321 = vst.msk [vmem:[%s11893_s23 + $0x168] sm:$0xff] %vm1038_vm2, %v6193_v45  ;;  %v6245_v19 = vsel %vm1038_vm2, %v5892_v38, %v6023_v43  ;;  %v5614_v38 = vld [vmem:[%s12181_s3 + $0x58] sm:$0xff] }
 0x7d3   : > { %6208 = vrot.lane.b32.xlu0 %v12092_v59, %s8056_s20  ;;  %6278 = vst [vmem:[%s11893_s23 + $0x10] sm:$0xff] %v6245_v19  ;;  %6078 = vrot.lane.b32.xlu1 %v12269_v60, %s8056_s20  ;;  %v5866_v59 = vmul.f32 %v12166_v50, %v5610_v17  ;;  %v5870_v45 = vmul.f32 %v12213_v53, %v5614_v38  ;;  %v5611_v17 = vld [vmem:[%s12181_s3 + $0x40] sm:$0xff] }
 0x7d4   : > { %v5867_v10 = vmul.f32 %v12238_v23, %v5611_v17  ;;  %v5622_v17 = vld [vmem:[%s12181_s3 + $0x98] sm:$0xff] }
 0x7d5   : > { %v12278_v48 = vpop.permute.xlu0 %5791  ;;  %v6195_v61 = vpop.permute.xlu1 %6194  ;;  %v5898_v54 = vadd.f32 %v11988_v11, %v5866_v59  ;;  %v5902_v32 = vadd.f32 %v12037_v30, %v5870_v45 }
 0x7d6   : > { %6323 = vst.msk [vmem:[%s11893_s23 + $0x178] sm:$0xff] %vm1038_vm2, %v6195_v61  ;;  %v5899_v30 = vadd.f32 %v12052_v6, %v5867_v10 }
 0x7d7   : > { %6210 = vrot.lane.b32.xlu1 %v12113_v9, %s8056_s20  ;;  %v5863_v9 = vmul.f32 %v12175_v39, %v5607_v31  ;;  %v5617_v31 = vld [vmem:[%s12181_s3 + $0x70] sm:$0xff] }
 0x7d8   : > { %v5873_v23 = vmul.f32 %v12278_v48, %v5617_v31 }
 0x7d9   : > { %v6033_v36 = vpop.permute.xlu0 %6032  ;;  %v12287_v21 = vpop.permute.xlu1 %5793  ;;  %v5895_v11 = vadd.f32 %v12002_v28, %v5863_v9 }
 0x7da   : > { %v6250_v62 = vsel %vm1038_vm2, %v5897_v5, %v6033_v36  ;;  %v5612_v36 = vld [vmem:[%s12181_s3 + $0x48] sm:$0xff] }
 0x7db   : > { %6288 = vst [vmem:[%s11893_s23 + $0x60] sm:$0xff] %v6250_v62 }
 0x7dd   : > { %v6189_v40 = vpop.permute.xlu0 %6188  ;;  %v6035_v35 = vpop.permute.xlu1 %6034 }
 0x7de   : > { %6317 = vst.msk [vmem:[%s11893_s23 + $0x148] sm:$0xff] %vm1038_vm2, %v6189_v40  ;;  %v6251_v58 = vsel %vm1038_vm2, %v5898_v54, %v6035_v35  ;;  %v5868_v54 = vmul.f32 %v12255_v63, %v5612_v36  ;;  %v5905_v63 = vadd.f32 %v12066_v18, %v5873_v23 }
 0x7df   : > { %6290 = vst [vmem:[%s11893_s23 + $0x70] sm:$0xff] %v6251_v58 }
 0x7e0   : > { %v5900_v9 = vadd.f32 %v12060_v0, %v5868_v54  ;;  %v5620_v54 = vld [vmem:[%s12181_s3 + $0x88] sm:$0xff] }
 0x7e1   : > { %v12298_v50 = vpop.permute.xlu0 %5787  ;;  %v6191_v1 = vpop.permute.xlu1 %6190 }
 0x7e2   : > { %6319 = vst.msk [vmem:[%s11893_s23 + $0x158] sm:$0xff] %vm1038_vm2, %v6191_v1  ;;  %v5618_v1 = vld [vmem:[%s12181_s3 + $0x78] sm:$0xff] }
 0x7e3   : > { %v5874_v4 = vmul.f32 %v12287_v21, %v5618_v1 }
 0x7e5   : > { %v6029_v33 = vpop.permute.xlu0 %6028  ;;  %v12305_v46 = vpop.permute.xlu1 %5789  ;;  %v5906_v0 = vadd.f32 %v12081_v29, %v5874_v4 }
 0x7e6   : > { %v6248_v39 = vsel %vm1038_vm2, %v5895_v11, %v6029_v33 }
 0x7e7   : > { %6284 = vst [vmem:[%s11893_s23 + $0x40] sm:$0xff] %v6248_v39 }
 0x7e9   : > { %v6201_v41 = vpop.permute.xlu0 %6200  ;;  %v6031_v16 = vpop.permute.xlu1 %6030 }
 0x7ea   : > { %6329 = vst.msk [vmem:[%s11893_s23 + $0x1a8] sm:$0xff] %vm1038_vm2, %v6201_v41  ;;  %v6249_v28 = vsel %vm1038_vm2, %v5896_v12, %v6031_v16  ;;  %v5615_v12 = vld [vmem:[%s12181_s3 + $0x60] sm:$0xff] }
 0x7eb   : > { %6286 = vst [vmem:[%s11893_s23 + $0x50] sm:$0xff] %v6249_v28  ;;  %v5871_v16 = vmul.f32 %v12298_v50, %v5615_v12  ;;  %v5616_v28 = vld [vmem:[%s12181_s3 + $0x68] sm:$0xff] }
 0x7ec   : > { %v5872_v38 = vmul.f32 %v12305_v46, %v5616_v28 }
 0x7ed   : > { %v5800_v22 = vpop.permute.xlu0 %5799  ;;  %v6203_v34 = vpop.permute.xlu1 %6202  ;;  %v5903_v29 = vadd.f32 %v12109_v25, %v5871_v16 }
 0x7ee   : > { %6331 = vst.msk [vmem:[%s11893_s23 + $0x1b8] sm:$0xff] %vm1038_vm2, %v6203_v34  ;;  %v5621_v34 = vld [vmem:[%s12181_s3 + $0x90] sm:$0xff] }
 0x7ef   : > { %v5877_v50 = vmul.f32 %v5800_v22, %v5621_v34 }
 0x7f1   : > { %v6041_v43 = vpop.permute.xlu0 %6040  ;;  %v5802_v19 = vpop.permute.xlu1 %5801  ;;  %v5909_v25 = vadd.f32 %v12136_v37, %v5877_v50 }
 0x7f2   : > { %v6254_v14 = vsel %vm1038_vm2, %v5901_v7, %v6041_v43  ;;  %v5878_v46 = vmul.f32 %v5802_v19, %v5622_v17 }
 0x7f3   : > { %6296 = vst [vmem:[%s11893_s23 + $0xa0] sm:$0xff] %v6254_v14  ;;  %v5904_v14 = vadd.f32 %v12127_v55, %v5872_v38 }
 0x7f5   : > { %v6197_v61 = vpop.permute.xlu0 %6196  ;;  %v6043_v5 = vpop.permute.xlu1 %6042 }
 0x7f6   : > { %6325 = vst.msk [vmem:[%s11893_s23 + $0x188] sm:$0xff] %vm1038_vm2, %v6197_v61  ;;  %v6255_v59 = vsel %vm1038_vm2, %v5902_v32, %v6043_v5 }
 0x7f7   : > { %6298 = vst [vmem:[%s11893_s23 + $0xb0] sm:$0xff] %v6255_v59  ;;  %v5619_v59 = vld [vmem:[%s12181_s3 + $0x80] sm:$0xff] }
 0x7f9   : > { %v5796_v53 = vpop.permute.xlu0 %5795  ;;  %v6199_v62 = vpop.permute.xlu1 %6198 }
 0x7fa   : > { %6327 = vst.msk [vmem:[%s11893_s23 + $0x198] sm:$0xff] %vm1038_vm2, %v6199_v62  ;;  %v5875_v55 = vmul.f32 %v5796_v53, %v5619_v59  ;;  %v5910_v62 = vadd.f32 %v12150_v24, %v5878_v46  ;;  %v5631_v59 = vld [vmem:[%s12181_s3 + $0xe0] sm:$0xff] }
 0x7fc   : > { %v5907_v37 = vadd.f32 %v12153_v8, %v5875_v55 }
 0x7fd   : > { %v6037_v40 = vpop.permute.xlu0 %6036  ;;  %v5798_v35 = vpop.permute.xlu1 %5797 }
 0x7fe   : > { %v6252_v58 = vsel %vm1038_vm2, %v5899_v30, %v6037_v40  ;;  %v5876_v19 = vmul.f32 %v5798_v35, %v5620_v54 }
 0x7ff   : > { %6292 = vst [vmem:[%s11893_s23 + $0x80] sm:$0xff] %v6252_v58  ;;  %v5625_v58 = vld [vmem:[%s12181_s3 + $0xb0] sm:$0xff] }
 0x800   : > { %v5908_v1 = vadd.f32 %v12163_v15, %v5876_v19 }
 0x801   : > { %v5808_v26 = vpop.permute.xlu0 %5807  ;;  %v6039_v11 = vpop.permute.xlu1 %6038 }
 0x802   : > { %v6253_v6 = vsel %vm1038_vm2, %v5900_v9, %v6039_v11  ;;  %v5881_v24 = vmul.f32 %v5808_v26, %v5625_v58 }
 0x803   : > { %6294 = vst [vmem:[%s11893_s23 + $0x90] sm:$0xff] %v6253_v6  ;;  %v5626_v6 = vld [vmem:[%s12181_s3 + $0xb8] sm:$0xff] }
 0x804   : > { %v5913_v4 = vadd.f32 %v12171_v52, %v5881_v24 }
 0x805   : > { %v6049_v33 = vpop.permute.xlu0 %6048  ;;  %v5810_v39 = vpop.permute.xlu1 %5809 }
 0x806   : > { %v6258_v48 = vsel %vm1038_vm2, %v5905_v63, %v6049_v33  ;;  %v5882_v35 = vmul.f32 %v5810_v39, %v5626_v6  ;;  %v5623_v33 = vld [vmem:[%s12181_s3 + $0xa0] sm:$0xff] }
 0x807   : > { %6304 = vst [vmem:[%s11893_s23 + $0xe0] sm:$0xff] %v6258_v48 }
 0x808   : > { %v5914_v12 = vadd.f32 %v12187_v42, %v5882_v35 }
 0x809   : > { %v6205_v47 = vpop.permute.xlu0 %6204  ;;  %v6051_v41 = vpop.permute.xlu1 %6050 }
 0x80a   : > { %6333 = vst.msk [vmem:[%s11893_s23 + $0x1c8] sm:$0xff] %vm1038_vm2, %v6205_v47  ;;  %v6259_v18 = vsel %vm1038_vm2, %v5906_v0, %v6051_v41  ;;  %v5629_v47 = vld [vmem:[%s12181_s3 + $0xd0] sm:$0xff] }
 0x80b   : > { %6306 = vst [vmem:[%s11893_s23 + $0xf0] sm:$0xff] %v6259_v18  ;;  %v5624_v18 = vld [vmem:[%s12181_s3 + $0xa8] sm:$0xff] }
 0x80d   : > { %v5804_v21 = vpop.permute.xlu0 %5803  ;;  %v6207_v44 = vpop.permute.xlu1 %6206 }
 0x80e   : > { %6335 = vst.msk [vmem:[%s11893_s23 + $0x1d8] sm:$0xff] %vm1038_vm2, %v6207_v44  ;;  %v5879_v15 = vmul.f32 %v5804_v21, %v5623_v33  ;;  %v5630_v21 = vld [vmem:[%s12181_s3 + $0xd8] sm:$0xff] }
 0x810   : > { %v5911_v39 = vadd.f32 %v12199_v2, %v5879_v15 }
 0x811   : > { %v6045_v7 = vpop.permute.xlu0 %6044  ;;  %v5806_v45 = vpop.permute.xlu1 %5805 }
 0x812   : > { %v6256_v43 = vsel %vm1038_vm2, %v5903_v29, %v6045_v7  ;;  %v5880_v44 = vmul.f32 %v5806_v45, %v5624_v18  ;;  %v5627_v29 = vld [vmem:[%s12181_s3 + $0xc0] sm:$0xff]  ;;  %v5628_v45 = vld [vmem:[%s12181_s3 + $0xc8] sm:$0xff] }
 0x813   : > { %6300 = vst [vmem:[%s11893_s23 + $0xc0] sm:$0xff] %v6256_v43 }
 0x814   : > { %v5912_v50 = vadd.f32 %v12216_v49, %v5880_v44 }
 0x815   : > { %v5816_v32 = vpop.permute.xlu0 %5815  ;;  %v6047_v61 = vpop.permute.xlu1 %6046 }
 0x816   : > { %v6257_v5 = vsel %vm1038_vm2, %v5904_v14, %v6047_v61  ;;  %v5885_v28 = vmul.f32 %v5816_v32, %v5629_v47  ;;  %v5633_v14 = vld [vmem:[%s12181_s3 + $0xf0] sm:$0xff] }
 0x817   : > { %6302 = vst [vmem:[%s11893_s23 + $0xd0] sm:$0xff] %v6257_v5 }
 0x818   : > { %v5917_v7 = vadd.f32 %v12211_v51, %v5885_v28 }
 0x819   : > { %v6057_v10 = vpop.permute.xlu0 %6056  ;;  %v5818_v36 = vpop.permute.xlu1 %5817 }
 0x81a   : > { %v6262_v22 = vsel %vm1038_vm2, %v5909_v25, %v6057_v10  ;;  %v5886_v2 = vmul.f32 %v5818_v36, %v5630_v21  ;;  %v5634_v36 = vld [vmem:[%s12181_s3 + $0xf8] sm:$0xff] }
 0x81b   : > { %6312 = vst [vmem:[%s11893_s23 + $0x120] sm:$0xff] %v6262_v22 }
 0x81c   : > { %v5918_v49 = vadd.f32 %v12229_v57, %v5886_v2 }
 0x81d   : > { %v5812_v30 = vpop.permute.xlu0 %5811  ;;  %v6059_v31 = vpop.permute.xlu1 %6058 }
 0x81e   : > { %v6263_v40 = vsel %vm1038_vm2, %v5910_v62, %v6059_v31  ;;  %v5883_v43 = vmul.f32 %v5812_v30, %v5627_v29 }
 0x81f   : > { %6314 = vst [vmem:[%s11893_s23 + $0x130] sm:$0xff] %v6263_v40  ;;  %v5632_v40 = vld [vmem:[%s12181_s3 + $0xe8] sm:$0xff] }
 0x820   : > { %v5915_v25 = vadd.f32 %v12225_v27, %v5883_v43 }
 0x821   : > { %v6053_v23 = vpop.permute.xlu0 %6052  ;;  %v5814_v9 = vpop.permute.xlu1 %5813 }
 0x822   : > { %v6260_v53 = vsel %vm1038_vm2, %v5907_v37, %v6053_v23  ;;  %v5884_v46 = vmul.f32 %v5814_v9, %v5628_v45 }
 0x823   : > { %6308 = vst [vmem:[%s11893_s23 + $0x100] sm:$0xff] %v6260_v53 }
 0x824   : > { %v5916_v54 = vadd.f32 %v12243_v13, %v5884_v46 }
 0x825   : > { %v5824_v11 = vpop.permute.xlu0 %5823  ;;  %v6055_v63 = vpop.permute.xlu1 %6054 }
 0x826   : > { %v6261_v8 = vsel %vm1038_vm2, %v5908_v1, %v6055_v63  ;;  %v5889_v51 = vmul.f32 %v5824_v11, %v5633_v14 }
 0x827   : > { %6310 = vst [vmem:[%s11893_s23 + $0x110] sm:$0xff] %v6261_v8 }
 0x828   : > { %v5921_v30 = vadd.f32 %v12240_v56, %v5889_v51 }
 0x829   : > { %v6065_v48 = vpop.permute.xlu0 %6064  ;;  %v5826_v0 = vpop.permute.xlu1 %5825 }
 0x82a   : > { %v6266_v26 = vsel %vm1038_vm2, %v5913_v4, %v6065_v48  ;;  %v5890_v57 = vmul.f32 %v5826_v0, %v5634_v36 }
 0x82b   : > { %6320 = vst [vmem:[%s11893_s23 + $0x160] sm:$0xff] %v6266_v26 }
 0x82c   : > { %v5922_v56 = vadd.f32 %v12258_v20, %v5890_v57 }
 0x82d   : > { %v5820_v41 = vpop.permute.xlu0 %5819  ;;  %v6067_v16 = vpop.permute.xlu1 %6066 }
 0x82e   : > { %v6267_v52 = vsel %vm1038_vm2, %v5914_v12, %v6067_v16  ;;  %v5887_v27 = vmul.f32 %v5820_v41, %v5631_v59 }
 0x82f   : > { %6322 = vst [vmem:[%s11893_s23 + $0x170] sm:$0xff] %v6267_v52 }
 0x830   : > { %v5919_v23 = vadd.f32 %v12253_v3, %v5887_v27 }
 0x831   : > { %v6061_v38 = vpop.permute.xlu0 %6060  ;;  %v5822_v34 = vpop.permute.xlu1 %5821 }
 0x832   : > { %v6264_v42 = vsel %vm1038_vm2, %v5911_v39, %v6061_v38  ;;  %v5888_v13 = vmul.f32 %v5822_v34, %v5632_v40 }
 0x833   : > { %6316 = vst [vmem:[%s11893_s23 + $0x140] sm:$0xff] %v6264_v42 }
 0x834   : > { %v5920_v11 = vadd.f32 %v12269_v60, %v5888_v13 }
 0x835   : > { %v6073_v32 = vpop.permute.xlu0 %6072  ;;  %v6063_v17 = vpop.permute.xlu1 %6062 }
 0x836   : > { %v6270_v61 = vsel %vm1038_vm2, %v5917_v7, %v6073_v32  ;;  %v6265_v5 = vsel %vm1038_vm2, %v5912_v50, %v6063_v17 }
 0x837   : > { %6328 = vst [vmem:[%s11893_s23 + $0x1a0] sm:$0xff] %v6270_v61  ;;  %6318 = vst [vmem:[%s11893_s23 + $0x150] sm:$0xff] %v6265_v5 }
 0x839   : > { %v6069_v10 = vpop.permute.xlu0 %6068  ;;  %v6075_v22 = vpop.permute.xlu1 %6074 }
 0x83a   : > { %v6268_v55 = vsel %vm1038_vm2, %v5915_v25, %v6069_v10  ;;  %v6271_v62 = vsel %vm1038_vm2, %v5918_v49, %v6075_v22 }
 0x83b   : > { %6324 = vst [vmem:[%s11893_s23 + $0x180] sm:$0xff] %v6268_v55  ;;  %6330 = vst [vmem:[%s11893_s23 + $0x1b0] sm:$0xff] %v6271_v62 }
 0x83d   : > { %v6081_v31 = vpop.permute.xlu0 %6080  ;;  %v6071_v37 = vpop.permute.xlu1 %6070 }
 0x83e   : > { %v6274_v19 = vsel %vm1038_vm2, %v5921_v30, %v6081_v31  ;;  %v6269_v58 = vsel %vm1038_vm2, %v5916_v54, %v6071_v37 }
 0x83f   : > { %6336 = vst [vmem:[%s11893_s23 + $0x1e0] sm:$0xff] %v6274_v19  ;;  %6326 = vst [vmem:[%s11893_s23 + $0x190] sm:$0xff] %v6269_v58 }
 0x841   : > { %v6077_v9 = vpop.permute.xlu0 %6076  ;;  %v6083_v53 = vpop.permute.xlu1 %6082 }
 0x842   : > { %v6272_v24 = vsel %vm1038_vm2, %v5919_v23, %v6077_v9  ;;  %v6275_v1 = vsel %vm1038_vm2, %v5922_v56, %v6083_v53 }
 0x843   : > { %6332 = vst [vmem:[%s11893_s23 + $0x1c0] sm:$0xff] %v6272_v24  ;;  %6338 = vst [vmem:[%s11893_s23 + $0x1f0] sm:$0xff] %v6275_v1 }
 0x845   : > { %v6209_v6 = vpop.permute.xlu0 %6208  ;;  %v6079_v63 = vpop.permute.xlu1 %6078 }
 0x846   : > { %6337 = vst.msk [vmem:[%s11893_s23 + $0x1e8] sm:$0xff] %vm1038_vm2, %v6209_v6  ;;  %v6273_v3 = vsel %vm1038_vm2, %v5920_v11, %v6079_v63 }
 0x847   : > { %6334 = vst [vmem:[%s11893_s23 + $0x1d0] sm:$0xff] %v6273_v3 }
 0x849   : > { %v6211_v8 = vpop.permute.xlu1 %6210 }
 0x84a   : > { %6339 = vst.msk [vmem:[%s11893_s23 + $0x1f8] sm:$0xff] %vm1038_vm2, %v6211_v8 }
 0x84b PF: > { %s30_s0 = sadd.s32 1, %s8053_s0  }
 0x84c   : > { %p27_p4 = scmp.ge.s32.totalorder %s30_s0, 4  }
 0x84e   :  { %29 = sbr.rel (!%p27_p4) target bundleno = 5 (0x5), region = 143 }

</bundles_post_ra>
